<compile_context>
chip_gen: v7x
topology: tpu7x:2x2x1
jax: 0.10.0
libtpu: 0.0.40
codegen_flags: <defaults>
</compile_context>

<pallas_src>
import jax
import jax.numpy as jnp
from jax.experimental import pallas as pl
from jax.experimental.pallas import tpu as pltpu


# ----------------------------------------------------------------------------- geometry

H1, W1, C1 = 28, 28, 32          # conv1 output spatial / channels
H2, W2, C2 = 14, 14, 64          # conv2
H3, W3, C3 = 7, 7, 128           # conv3
P1, P2, P3 = W1 + 2, W2 + 2, W3 + 3   # row pitch of padded flattened buffers (kept EVEN
                                      # so even/odd flattened rows == even/odd columns)


def _round8(n):
    return ((n + 7) // 8) * 8


XV1_ROWS = _round8((H1 + 2) * P1 + 2)   # 904  padded input buffer of conv1 (built by wrapper)
XV2_ROWS = _round8((H2 + 2) * P2 + 2)   # 264  padded input buffer of conv2 (scratch)
XV3_ROWS = _round8((H3 + 2) * P3 + 2)   # 96   padded input buffer of conv3 (scratch)
Y1_ROWS = H1 * P1                       # 840  conv1 output rows (incl. 2 junk cols/row)
Y2_ROWS = H2 * P2                       # 224
Y3_ROWS = H3 * P3                       # 70
Y3_ROWS_PAD = _round8(Y3_ROWS)          # 72
HID = 256
NCLS_PAD = 128                          # logits padded to a lane-dense 128 wide row

_TAPS = [(dh, dw) for dh in range(3) for dw in range(3)]


# ----------------------------------------------------------------------------- kernel

def _gelu_tanh(x):
    # TODO(synk): nn.GELU defaults to the exact erf form; tanh approximation used here.
    return 0.5 * x * (1.0 + jnp.tanh(0.7978845608028654 * (x + 0.044715 * x * x * x)))


def _cnn_kernel(x_ref, w1_ref, s1_ref, w2_ref, s2_ref, w3_ref, s3_ref,
                wf1_ref, bf1_ref, wf2_ref, bf2_ref, out_ref,
                xv2_ref, xv3_ref, y1_ref, y2_ref, y3_ref):
    f32 = jnp.float32
    bf16 = jnp.bfloat16

    # Padded inputs of conv2 / conv3 must be zero outside the valid region.
    xv2_ref[...] = jnp.zeros_like(xv2_ref)
    xv3_ref[...] = jnp.zeros_like(xv3_ref)

    # ---------------- conv1 (Cin=1): 9 shifted multiply-adds on the VPU ----------------
    x_col = x_ref[0]                                   # (XV1_ROWS, 1) f32
    xb = jnp.broadcast_to(x_col, (XV1_ROWS, C1))       # hoisted lane-broadcast
    acc1 = jnp.zeros((Y1_ROWS, C1), f32)
    for t, (dh, dw) in enumerate(_TAPS):
        off = dh * P1 + dw
        acc1 = acc1 + xb[off:off + Y1_ROWS, :] * w1_ref[t:t + 1, :]
    y1_ref[...] = jnp.maximum(acc1 + s1_ref[...], 0.0)          # BN shift + ReLU

    # ---------------- pool1 (2x2, floor) fused: write into conv2's padded buffer -------
    half = Y1_ROWS // 2
    yw = jnp.maximum(y1_ref[pl.ds(0, half, stride=2), :],       # even columns
                     y1_ref[pl.ds(1, half, stride=2), :])       # odd columns
    g = P1 // 2
    for hp in range(H2):
        lo = yw[(2 * hp) * g:(2 * hp) * g + W2, :]
        hi = yw[(2 * hp + 1) * g:(2 * hp + 1) * g + W2, :]
        row0 = (hp + 1) * P2 + 1
        xv2_ref[row0:row0 + W2, :] = jnp.maximum(lo, hi)

    # ---------------- conv2: 9 shifted (rows,32)@(32,64) bf16 MXU matmuls ---------------
    acc2 = jnp.zeros((Y2_ROWS, C2), f32)
    for t, (dh, dw) in enumerate(_TAPS):
        off = dh * P2 + dw
        tap = xv2_ref[off:off + Y2_ROWS, :].astype(bf16)
        acc2 = acc2 + jnp.dot(tap, w2_ref[t * C1:(t + 1) * C1, :],
                              preferred_element_type=f32)
    y2_ref[...] = jnp.maximum(acc2 + s2_ref[...], 0.0)

    # ---------------- pool2 ----------------
    half = Y2_ROWS // 2
    yw = jnp.maximum(y2_ref[pl.ds(0, half, stride=2), :],
                     y2_ref[pl.ds(1, half, stride=2), :])
    g = P2 // 2
    for hp in range(H3):
        lo = yw[(2 * hp) * g:(2 * hp) * g + W3, :]
        hi = yw[(2 * hp + 1) * g:(2 * hp + 1) * g + W3, :]
        row0 = (hp + 1) * P3 + 1
        xv3_ref[row0:row0 + W3, :] = jnp.maximum(lo, hi)

    # ---------------- conv3: 9 shifted (rows,64)@(64,128) bf16 MXU matmuls --------------
    acc3 = jnp.zeros((Y3_ROWS, C3), f32)
    for t, (dh, dw) in enumerate(_TAPS):
        off = dh * P3 + dw
        tap = xv3_ref[off:off + Y3_ROWS, :].astype(bf16)
        acc3 = acc3 + jnp.dot(tap, w3_ref[t * C2:(t + 1) * C2, :],
                              preferred_element_type=f32)
    y3_ref[0:Y3_ROWS, :] = jnp.maximum(acc3 + s3_ref[...], 0.0)

    # ---------------- pool3 fused directly into the fc1 accumulation --------------------
    half = Y3_ROWS // 2                                   # 35
    yw = jnp.maximum(y3_ref[pl.ds(0, half, stride=2), :],
                     y3_ref[pl.ds(1, half, stride=2), :])
    g = P3 // 2                                           # 5
    hp3, wp3 = H3 // 2, W3 // 2                           # 3, 3
    hacc = bf1_ref[...]                                   # (1, 256) f32
    for hp in range(hp3):
        lo = yw[(2 * hp) * g:(2 * hp) * g + wp3, :]
        hi = yw[(2 * hp + 1) * g:(2 * hp + 1) * g + wp3, :]
        pooled = jnp.maximum(lo, hi)                      # (3, 128) rows=wp, lanes=channel
        for wp in range(wp3):
            s = hp * wp3 + wp
            feat = pooled[wp:wp + 1, :].astype(bf16)      # (1, 128)
            hacc = hacc + jnp.dot(feat, wf1_ref[s * C3:(s + 1) * C3, :],
                                  preferred_element_type=f32)

    # ---------------- fc head: GELU -> Dropout(eval=identity) -> Linear -----------------
    # TODO(synk): Dropout(0.5) is identity in inference mode; training-mode masking not implemented.
    hidden = _gelu_tanh(hacc)
    logits = jnp.dot(hidden.astype(bf16), wf2_ref[...],
                     preferred_element_type=f32) + bf2_ref[...]
    out_ref[0] = logits


# ----------------------------------------------------------------------------- wrappers

def _fold_conv_bn(w_oihw, b, gamma, beta, mean, var, eps=1e-5):
    """Fold BN(eval) into the conv: returns (scaled weight matrix, per-channel shift)."""
    cout, cin = w_oihw.shape[0], w_oihw.shape[1]
    inv = gamma * jax.lax.rsqrt(var + eps)                               # (cout,)
    # (Cout,Cin,kh,kw) -> (kh,kw,Cin,Cout) -> (9*Cin, Cout); row = (dh*3+dw)*Cin + ci.
    w_mat = jnp.transpose(w_oihw, (2, 3, 1, 0)).reshape(9 * cin, cout)
    w_mat = w_mat * inv[None, :]                                         # BN scale folded
    shift = (beta + (b - mean) * inv).reshape(1, cout)                   # bias + BN shift
    return w_mat, shift


@jax.jit
def custom_cnn_forward(x_nchw, params):
    n = x_nchw.shape[0]
    num_classes = params["fc2_w"].shape[1]
    f32, bf16 = jnp.float32, jnp.bfloat16

    # ---- input: zero-pad spatially and flatten with row pitch P1 (tiny; ~3.6 KB/sample)
    x = x_nchw.astype(f32).reshape(n, 28, 28)
    xpad = jnp.pad(x, ((0, 0), (1, 1), (1, 1))).reshape(n, (H1 + 2) * P1)
    xpad = jnp.pad(xpad, ((0, 0), (0, XV1_ROWS - (H1 + 2) * P1)))
    xpad = xpad.reshape(n, XV1_ROWS, 1)

    # ---- fold BN into conv weights; bf16 for the MXU layers (conv1 stays f32 on VPU)
    w1, s1 = _fold_conv_bn(params["conv1_w"], params["conv1_b"], params["bn1_gamma"],
                           params["bn1_beta"], params["bn1_mean"], params["bn1_var"])
    w2, s2 = _fold_conv_bn(params["conv2_w"], params["conv2_b"], params["bn2_gamma"],
                           params["bn2_beta"], params["bn2_mean"], params["bn2_var"])
    w3, s3 = _fold_conv_bn(params["conv3_w"], params["conv3_b"], params["bn3_gamma"],
                           params["bn3_beta"], params["bn3_mean"], params["bn3_var"])
    w2, w3 = w2.astype(bf16), w3.astype(bf16)

    # ---- fc1: PyTorch Flatten is NCHW order (c*9 + hp*3 + wp); permute rows to the
    #      kernel's (hp*3+wp)*128 + c order so no activation transpose is needed.
    wf1 = params["fc1_w"].reshape(C3, 9, HID).transpose(1, 0, 2).reshape(9 * C3, HID)
    wf1 = wf1.astype(bf16)
    bf1 = params["fc1_b"].reshape(1, HID).astype(f32)
    wf2 = jnp.zeros((HID, NCLS_PAD), f32).at[:, :num_classes].set(params["fc2_w"]).astype(bf16)
    bf2 = jnp.zeros((1, NCLS_PAD), f32).at[:, :num_classes].set(params["fc2_b"][None, :])

    in_specs = [
        pl.BlockSpec((1, XV1_ROWS, 1), lambda i: (i, 0, 0)),   # per-sample padded input
        pl.BlockSpec((9, C1), lambda i: (0, 0)),               # conv1 weight (VPU path)
        pl.BlockSpec((1, C1), lambda i: (0, 0)),               # conv1 shift
        pl.BlockSpec((9 * C1, C2), lambda i: (0, 0)),          # conv2 weight (bf16)
        pl.BlockSpec((1, C2), lambda i: (0, 0)),
        pl.BlockSpec((9 * C2, C3), lambda i: (0, 0)),          # conv3 weight (bf16)
        pl.BlockSpec((1, C3), lambda i: (0, 0)),
        pl.BlockSpec((9 * C3, HID), lambda i: (0, 0)),         # fc1 weight (bf16)
        pl.BlockSpec((1, HID), lambda i: (0, 0)),
        pl.BlockSpec((HID, NCLS_PAD), lambda i: (0, 0)),       # fc2 weight (bf16, padded)
        pl.BlockSpec((1, NCLS_PAD), lambda i: (0, 0)),
    ]
    out_spec = pl.BlockSpec((1, 1, NCLS_PAD), lambda i: (i, 0, 0))
    scratch = [
        pltpu.VMEM((XV2_ROWS, C1), f32),      # padded conv2 input
        pltpu.VMEM((XV3_ROWS, C2), f32),      # padded conv3 input
        pltpu.VMEM((Y1_ROWS, C1), f32),       # conv1 output (pre-pool)
        pltpu.VMEM((Y2_ROWS, C2), f32),       # conv2 output
        pltpu.VMEM((Y3_ROWS_PAD, C3), f32),   # conv3 output
    ]

    out = pl.pallas_call(
        _cnn_kernel,
        out_shape=jax.ShapeDtypeStruct((n, 1, NCLS_PAD), f32),
        grid_spec=pltpu.PrefetchScalarGridSpec(
            num_scalar_prefetch=0,
            grid=(n,),
            in_specs=in_specs,
            out_specs=out_spec,
            scratch_shapes=scratch,
        ),
        compiler_params=pltpu.CompilerParams(dimension_semantics=("parallel",)),
    )(xpad, w1, s1, w2, s2, w3, s3, wf1, bf1, wf2, bf2)

    return out[:, 0, :num_classes]


# ----------------------------------------------------------------------------- params

def init_params(key, num_classes=10):
    ks = jax.random.split(key, 10)
    p = {}

    def conv_block(i, cin, cout, kw, kb):
        p[f"conv{i}_w"] = 0.1 * jax.random.normal(kw, (cout, cin, 3, 3), jnp.float32)
        p[f"conv{i}_b"] = 0.05 * jax.random.normal(kb, (cout,), jnp.float32)
        p[f"bn{i}_gamma"] = 1.0 + 0.05 * jax.random.normal(jax.random.fold_in(kb, 1), (cout,), jnp.float32)
        p[f"bn{i}_beta"] = 0.05 * jax.random.normal(jax.random.fold_in(kb, 2), (cout,), jnp.float32)
        p[f"bn{i}_mean"] = 0.01 * jax.random.normal(jax.random.fold_in(kb, 3), (cout,), jnp.float32)
        p[f"bn{i}_var"] = 1.0 + 0.1 * jax.random.uniform(jax.random.fold_in(kb, 4), (cout,), jnp.float32)

    conv_block(1, 1, 32, ks[0], ks[1])
    conv_block(2, 32, 64, ks[2], ks[3])
    conv_block(3, 64, 128, ks[4], ks[5])

    # fc1_w rows follow the PyTorch Flatten order of an NCHW tensor: row = c*9 + h*3 + w.
    p["fc1_w"] = 0.02 * jax.random.normal(ks[6], (128 * 3 * 3, 256), jnp.float32)
    p["fc1_b"] = 0.02 * jax.random.normal(ks[7], (256,), jnp.float32)
    p["fc2_w"] = 0.05 * jax.random.normal(ks[8], (256, num_classes), jnp.float32)
    p["fc2_b"] = 0.02 * jax.random.normal(ks[9], (num_classes,), jnp.float32)
    return p


# ----------------------------------------------------------------------------- main

if __name__ == "__main__":
    key = jax.random.PRNGKey(0)
    k_x, k_p = jax.random.split(key)

    # Spatial size must be 28 so three 2x2 pools give 3x3 (matching Linear(128*3*3, 256)).
    x = jax.random.normal(k_x, (2, 1, 28, 28), jnp.float32)
    params = init_params(k_p, num_classes=10)

    logits = custom_cnn_forward(x, params)
    jax.block_until_ready(logits)
    assert logits.shape == (2, 10)
    print("KERNEL_OK")
</pallas_src>

<mosaic_0001>
module attributes {stable_mosaic.version = 11 : i64} {
  func.func @_cnn_kernel(%arg0: i32, %arg1: memref<1x904x1xf32, #tpu.memory_space<vmem>>, %arg2: memref<9x32xf32, #tpu.memory_space<vmem>>, %arg3: memref<1x32xf32, #tpu.memory_space<vmem>>, %arg4: memref<288x64xbf16, #tpu.memory_space<vmem>>, %arg5: memref<1x64xf32, #tpu.memory_space<vmem>>, %arg6: memref<576x128xbf16, #tpu.memory_space<vmem>>, %arg7: memref<1x128xf32, #tpu.memory_space<vmem>>, %arg8: memref<1152x256xbf16, #tpu.memory_space<vmem>>, %arg9: memref<1x256xf32, #tpu.memory_space<vmem>>, %arg10: memref<256x128xbf16, #tpu.memory_space<vmem>>, %arg11: memref<1x128xf32, #tpu.memory_space<vmem>>, %arg12: memref<1x1x128xf32, #tpu.memory_space<vmem>>, %arg13: memref<264x32xf32, #tpu.memory_space<vmem>>, %arg14: memref<96x64xf32, #tpu.memory_space<vmem>>, %arg15: memref<840x32xf32, #tpu.memory_space<vmem>>, %arg16: memref<224x64xf32, #tpu.memory_space<vmem>>, %arg17: memref<72x128xf32, #tpu.memory_space<vmem>>) attributes {dimension_semantics = [#tpu.dimension_semantics<parallel>], iteration_bounds = array<i64: 2>, scalar_prefetch = 0 : i64, scratch_operands = 5 : i64, tpu.core_type = #tpu.core_type<tc>, window_params = [{transform_indices = @transform_0, window_bounds = array<i64: 1, 904, 1>}, {pipeline_mode = #tpu.pipeline_mode<synchronous>, transform_indices = @transform_1, window_bounds = array<i64: 9, 32>}, {pipeline_mode = #tpu.pipeline_mode<synchronous>, transform_indices = @transform_2, window_bounds = array<i64: 1, 32>}, {pipeline_mode = #tpu.pipeline_mode<synchronous>, transform_indices = @transform_3, window_bounds = array<i64: 288, 64>}, {pipeline_mode = #tpu.pipeline_mode<synchronous>, transform_indices = @transform_4, window_bounds = array<i64: 1, 64>}, {pipeline_mode = #tpu.pipeline_mode<synchronous>, transform_indices = @transform_5, window_bounds = array<i64: 576, 128>}, {pipeline_mode = #tpu.pipeline_mode<synchronous>, transform_indices = @transform_6, window_bounds = array<i64: 1, 128>}, {pipeline_mode = #tpu.pipeline_mode<synchronous>, transform_indices = @transform_7, window_bounds = array<i64: 1152, 256>}, {pipeline_mode = #tpu.pipeline_mode<synchronous>, transform_indices = @transform_8, window_bounds = array<i64: 1, 256>}, {pipeline_mode = #tpu.pipeline_mode<synchronous>, transform_indices = @transform_9, window_bounds = array<i64: 256, 128>}, {pipeline_mode = #tpu.pipeline_mode<synchronous>, transform_indices = @transform_10, window_bounds = array<i64: 1, 128>}, {transform_indices = @transform_11, window_bounds = array<i64: 1, 1, 128>}]} {
    %cst = arith.constant 0.000000e+00 : f32
    %0 = vector.broadcast %cst : f32 to vector<264x32xf32>
    %c0 = arith.constant 0 : index
    %c0_0 = arith.constant 0 : index
    %1 = vector.load %arg13[%c0, %c0_0] : memref<264x32xf32, #tpu.memory_space<vmem>>, vector<264x32xf32>
    tpu.vector_store %arg13[%c0, %c0_0], %0 {strides = array<i32>} : memref<264x32xf32, #tpu.memory_space<vmem>>, vector<264x32xf32>,
    %cst_1 = arith.constant 0.000000e+00 : f32
    %2 = vector.broadcast %cst_1 : f32 to vector<96x64xf32>
    %c0_2 = arith.constant 0 : index
    %c0_3 = arith.constant 0 : index
    %3 = vector.load %arg14[%c0_2, %c0_3] : memref<96x64xf32, #tpu.memory_space<vmem>>, vector<96x64xf32>
    tpu.vector_store %arg14[%c0_2, %c0_3], %2 {strides = array<i32>} : memref<96x64xf32, #tpu.memory_space<vmem>>, vector<96x64xf32>,
    %c0_4 = arith.constant 0 : index
    %c0_5 = arith.constant 0 : index
    %c0_6 = arith.constant 0 : index
    %4 = vector.load %arg1[%c0_4, %c0_5, %c0_6] : memref<1x904x1xf32, #tpu.memory_space<vmem>>, vector<1x904x1xf32>
    %5 = vector.shape_cast %4 : vector<1x904x1xf32> to vector<904x1xf32>
    %6 = vector.shape_cast %5 : vector<904x1xf32> to vector<904x1xf32>
    %7 = vector.broadcast %6 : vector<904x1xf32> to vector<904x32xf32>
    %cst_7 = arith.constant 0.000000e+00 : f32
    %8 = vector.broadcast %cst_7 : f32 to vector<840x32xf32>
    %9 = vector.extract_strided_slice %7 {offsets = [0, 0], sizes = [840, 32], strides = [1, 1]} : vector<904x32xf32> to vector<840x32xf32>
    %c0_8 = arith.constant 0 : index
    %c0_9 = arith.constant 0 : index
    %10 = vector.load %arg2[%c0_8, %c0_9] : memref<9x32xf32, #tpu.memory_space<vmem>>, vector<1x32xf32>
    %11 = vector.broadcast %10 : vector<1x32xf32> to vector<840x32xf32>
    %12 = arith.mulf %9, %11 : vector<840x32xf32>
    %13 = arith.addf %8, %12 : vector<840x32xf32>
    %14 = vector.extract_strided_slice %7 {offsets = [1, 0], sizes = [840, 32], strides = [1, 1]} : vector<904x32xf32> to vector<840x32xf32>
    %c1 = arith.constant 1 : index
    %c0_10 = arith.constant 0 : index
    %15 = vector.load %arg2[%c1, %c0_10] : memref<9x32xf32, #tpu.memory_space<vmem>>, vector<1x32xf32>
    %16 = vector.broadcast %15 : vector<1x32xf32> to vector<840x32xf32>
    %17 = arith.mulf %14, %16 : vector<840x32xf32>
    %18 = arith.addf %13, %17 : vector<840x32xf32>
    %19 = vector.extract_strided_slice %7 {offsets = [2, 0], sizes = [840, 32], strides = [1, 1]} : vector<904x32xf32> to vector<840x32xf32>
    %c2 = arith.constant 2 : index
    %c0_11 = arith.constant 0 : index
    %20 = vector.load %arg2[%c2, %c0_11] : memref<9x32xf32, #tpu.memory_space<vmem>>, vector<1x32xf32>
    %21 = vector.broadcast %20 : vector<1x32xf32> to vector<840x32xf32>
    %22 = arith.mulf %19, %21 : vector<840x32xf32>
    %23 = arith.addf %18, %22 : vector<840x32xf32>
    %24 = vector.extract_strided_slice %7 {offsets = [30, 0], sizes = [840, 32], strides = [1, 1]} : vector<904x32xf32> to vector<840x32xf32>
    %c3 = arith.constant 3 : index
    %c0_12 = arith.constant 0 : index
    %25 = vector.load %arg2[%c3, %c0_12] : memref<9x32xf32, #tpu.memory_space<vmem>>, vector<1x32xf32>
    %26 = vector.broadcast %25 : vector<1x32xf32> to vector<840x32xf32>
    %27 = arith.mulf %24, %26 : vector<840x32xf32>
    %28 = arith.addf %23, %27 : vector<840x32xf32>
    %29 = vector.extract_strided_slice %7 {offsets = [31, 0], sizes = [840, 32], strides = [1, 1]} : vector<904x32xf32> to vector<840x32xf32>
    %c4 = arith.constant 4 : index
    %c0_13 = arith.constant 0 : index
    %30 = vector.load %arg2[%c4, %c0_13] : memref<9x32xf32, #tpu.memory_space<vmem>>, vector<1x32xf32>
    %31 = vector.broadcast %30 : vector<1x32xf32> to vector<840x32xf32>
    %32 = arith.mulf %29, %31 : vector<840x32xf32>
    %33 = arith.addf %28, %32 : vector<840x32xf32>
    %34 = vector.extract_strided_slice %7 {offsets = [32, 0], sizes = [840, 32], strides = [1, 1]} : vector<904x32xf32> to vector<840x32xf32>
    %c5 = arith.constant 5 : index
    %c0_14 = arith.constant 0 : index
    %35 = vector.load %arg2[%c5, %c0_14] : memref<9x32xf32, #tpu.memory_space<vmem>>, vector<1x32xf32>
    %36 = vector.broadcast %35 : vector<1x32xf32> to vector<840x32xf32>
    %37 = arith.mulf %34, %36 : vector<840x32xf32>
    %38 = arith.addf %33, %37 : vector<840x32xf32>
    %39 = vector.extract_strided_slice %7 {offsets = [60, 0], sizes = [840, 32], strides = [1, 1]} : vector<904x32xf32> to vector<840x32xf32>
    %c6 = arith.constant 6 : index
    %c0_15 = arith.constant 0 : index
    %40 = vector.load %arg2[%c6, %c0_15] : memref<9x32xf32, #tpu.memory_space<vmem>>, vector<1x32xf32>
    %41 = vector.broadcast %40 : vector<1x32xf32> to vector<840x32xf32>
    %42 = arith.mulf %39, %41 : vector<840x32xf32>
    %43 = arith.addf %38, %42 : vector<840x32xf32>
    %44 = vector.extract_strided_slice %7 {offsets = [61, 0], sizes = [840, 32], strides = [1, 1]} : vector<904x32xf32> to vector<840x32xf32>
    %c7 = arith.constant 7 : index
    %c0_16 = arith.constant 0 : index
    %45 = vector.load %arg2[%c7, %c0_16] : memref<9x32xf32, #tpu.memory_space<vmem>>, vector<1x32xf32>
    %46 = vector.broadcast %45 : vector<1x32xf32> to vector<840x32xf32>
    %47 = arith.mulf %44, %46 : vector<840x32xf32>
    %48 = arith.addf %43, %47 : vector<840x32xf32>
    %49 = vector.extract_strided_slice %7 {offsets = [62, 0], sizes = [840, 32], strides = [1, 1]} : vector<904x32xf32> to vector<840x32xf32>
    %c8 = arith.constant 8 : index
    %c0_17 = arith.constant 0 : index
    %50 = vector.load %arg2[%c8, %c0_17] : memref<9x32xf32, #tpu.memory_space<vmem>>, vector<1x32xf32>
    %51 = vector.broadcast %50 : vector<1x32xf32> to vector<840x32xf32>
    %52 = arith.mulf %49, %51 : vector<840x32xf32>
    %53 = arith.addf %48, %52 : vector<840x32xf32>
    %c0_18 = arith.constant 0 : index
    %c0_19 = arith.constant 0 : index
    %54 = vector.load %arg3[%c0_18, %c0_19] : memref<1x32xf32, #tpu.memory_space<vmem>>, vector<1x32xf32>
    %55 = vector.broadcast %54 : vector<1x32xf32> to vector<840x32xf32>
    %56 = arith.addf %53, %55 : vector<840x32xf32>
    %cst_20 = arith.constant 0.000000e+00 : f32
    %57 = vector.broadcast %cst_20 : f32 to vector<840x32xf32>
    %58 = arith.maximumf %56, %57 : vector<840x32xf32>
    %c0_21 = arith.constant 0 : index
    %c0_22 = arith.constant 0 : index
    %59 = vector.load %arg15[%c0_21, %c0_22] : memref<840x32xf32, #tpu.memory_space<vmem>>, vector<840x32xf32>
    tpu.vector_store %arg15[%c0_21, %c0_22], %58 {strides = array<i32>} : memref<840x32xf32, #tpu.memory_space<vmem>>, vector<840x32xf32>,
    %c0_23 = arith.constant 0 : index
    %c0_24 = arith.constant 0 : index
    %60 = tpu.strided_load %arg15[%c0_23, %c0_24] {strides = array<i32: 2, 1>} : memref<840x32xf32, #tpu.memory_space<vmem>>, vector<420x32xf32>
    %c1_25 = arith.constant 1 : index
    %c0_26 = arith.constant 0 : index
    %61 = tpu.strided_load %arg15[%c1_25, %c0_26] {strides = array<i32: 2, 1>} : memref<840x32xf32, #tpu.memory_space<vmem>>, vector<420x32xf32>
    %62 = arith.maximumf %60, %61 : vector<420x32xf32>
    %63 = vector.extract_strided_slice %62 {offsets = [0, 0], sizes = [14, 32], strides = [1, 1]} : vector<420x32xf32> to vector<14x32xf32>
    %64 = vector.extract_strided_slice %62 {offsets = [15, 0], sizes = [14, 32], strides = [1, 1]} : vector<420x32xf32> to vector<14x32xf32>
    %65 = arith.maximumf %63, %64 : vector<14x32xf32>
    %c17 = arith.constant 17 : index
    %c0_27 = arith.constant 0 : index
    %66 = vector.load %arg13[%c17, %c0_27] : memref<264x32xf32, #tpu.memory_space<vmem>>, vector<14x32xf32>
    tpu.vector_store %arg13[%c17, %c0_27], %65 {strides = array<i32>} : memref<264x32xf32, #tpu.memory_space<vmem>>, vector<14x32xf32>,
    %67 = vector.extract_strided_slice %62 {offsets = [30, 0], sizes = [14, 32], strides = [1, 1]} : vector<420x32xf32> to vector<14x32xf32>
    %68 = vector.extract_strided_slice %62 {offsets = [45, 0], sizes = [14, 32], strides = [1, 1]} : vector<420x32xf32> to vector<14x32xf32>
    %69 = arith.maximumf %67, %68 : vector<14x32xf32>
    %c33 = arith.constant 33 : index
    %c0_28 = arith.constant 0 : index
    %70 = vector.load %arg13[%c33, %c0_28] : memref<264x32xf32, #tpu.memory_space<vmem>>, vector<14x32xf32>
    tpu.vector_store %arg13[%c33, %c0_28], %69 {strides = array<i32>} : memref<264x32xf32, #tpu.memory_space<vmem>>, vector<14x32xf32>,
    %71 = vector.extract_strided_slice %62 {offsets = [60, 0], sizes = [14, 32], strides = [1, 1]} : vector<420x32xf32> to vector<14x32xf32>
    %72 = vector.extract_strided_slice %62 {offsets = [75, 0], sizes = [14, 32], strides = [1, 1]} : vector<420x32xf32> to vector<14x32xf32>
    %73 = arith.maximumf %71, %72 : vector<14x32xf32>
    %c49 = arith.constant 49 : index
    %c0_29 = arith.constant 0 : index
    %74 = vector.load %arg13[%c49, %c0_29] : memref<264x32xf32, #tpu.memory_space<vmem>>, vector<14x32xf32>
    tpu.vector_store %arg13[%c49, %c0_29], %73 {strides = array<i32>} : memref<264x32xf32, #tpu.memory_space<vmem>>, vector<14x32xf32>,
    %75 = vector.extract_strided_slice %62 {offsets = [90, 0], sizes = [14, 32], strides = [1, 1]} : vector<420x32xf32> to vector<14x32xf32>
    %76 = vector.extract_strided_slice %62 {offsets = [105, 0], sizes = [14, 32], strides = [1, 1]} : vector<420x32xf32> to vector<14x32xf32>
    %77 = arith.maximumf %75, %76 : vector<14x32xf32>
    %c65 = arith.constant 65 : index
    %c0_30 = arith.constant 0 : index
    %78 = vector.load %arg13[%c65, %c0_30] : memref<264x32xf32, #tpu.memory_space<vmem>>, vector<14x32xf32>
    tpu.vector_store %arg13[%c65, %c0_30], %77 {strides = array<i32>} : memref<264x32xf32, #tpu.memory_space<vmem>>, vector<14x32xf32>,
    %79 = vector.extract_strided_slice %62 {offsets = [120, 0], sizes = [14, 32], strides = [1, 1]} : vector<420x32xf32> to vector<14x32xf32>
    %80 = vector.extract_strided_slice %62 {offsets = [135, 0], sizes = [14, 32], strides = [1, 1]} : vector<420x32xf32> to vector<14x32xf32>
    %81 = arith.maximumf %79, %80 : vector<14x32xf32>
    %c81 = arith.constant 81 : index
    %c0_31 = arith.constant 0 : index
    %82 = vector.load %arg13[%c81, %c0_31] : memref<264x32xf32, #tpu.memory_space<vmem>>, vector<14x32xf32>
    tpu.vector_store %arg13[%c81, %c0_31], %81 {strides = array<i32>} : memref<264x32xf32, #tpu.memory_space<vmem>>, vector<14x32xf32>,
    %83 = vector.extract_strided_slice %62 {offsets = [150, 0], sizes = [14, 32], strides = [1, 1]} : vector<420x32xf32> to vector<14x32xf32>
    %84 = vector.extract_strided_slice %62 {offsets = [165, 0], sizes = [14, 32], strides = [1, 1]} : vector<420x32xf32> to vector<14x32xf32>
    %85 = arith.maximumf %83, %84 : vector<14x32xf32>
    %c97 = arith.constant 97 : index
    %c0_32 = arith.constant 0 : index
    %86 = vector.load %arg13[%c97, %c0_32] : memref<264x32xf32, #tpu.memory_space<vmem>>, vector<14x32xf32>
    tpu.vector_store %arg13[%c97, %c0_32], %85 {strides = array<i32>} : memref<264x32xf32, #tpu.memory_space<vmem>>, vector<14x32xf32>,
    %87 = vector.extract_strided_slice %62 {offsets = [180, 0], sizes = [14, 32], strides = [1, 1]} : vector<420x32xf32> to vector<14x32xf32>
    %88 = vector.extract_strided_slice %62 {offsets = [195, 0], sizes = [14, 32], strides = [1, 1]} : vector<420x32xf32> to vector<14x32xf32>
    %89 = arith.maximumf %87, %88 : vector<14x32xf32>
    %c113 = arith.constant 113 : index
    %c0_33 = arith.constant 0 : index
    %90 = vector.load %arg13[%c113, %c0_33] : memref<264x32xf32, #tpu.memory_space<vmem>>, vector<14x32xf32>
    tpu.vector_store %arg13[%c113, %c0_33], %89 {strides = array<i32>} : memref<264x32xf32, #tpu.memory_space<vmem>>, vector<14x32xf32>,
    %91 = vector.extract_strided_slice %62 {offsets = [210, 0], sizes = [14, 32], strides = [1, 1]} : vector<420x32xf32> to vector<14x32xf32>
    %92 = vector.extract_strided_slice %62 {offsets = [225, 0], sizes = [14, 32], strides = [1, 1]} : vector<420x32xf32> to vector<14x32xf32>
    %93 = arith.maximumf %91, %92 : vector<14x32xf32>
    %c129 = arith.constant 129 : index
    %c0_34 = arith.constant 0 : index
    %94 = vector.load %arg13[%c129, %c0_34] : memref<264x32xf32, #tpu.memory_space<vmem>>, vector<14x32xf32>
    tpu.vector_store %arg13[%c129, %c0_34], %93 {strides = array<i32>} : memref<264x32xf32, #tpu.memory_space<vmem>>, vector<14x32xf32>,
    %95 = vector.extract_strided_slice %62 {offsets = [240, 0], sizes = [14, 32], strides = [1, 1]} : vector<420x32xf32> to vector<14x32xf32>
    %96 = vector.extract_strided_slice %62 {offsets = [255, 0], sizes = [14, 32], strides = [1, 1]} : vector<420x32xf32> to vector<14x32xf32>
    %97 = arith.maximumf %95, %96 : vector<14x32xf32>
    %c145 = arith.constant 145 : index
    %c0_35 = arith.constant 0 : index
    %98 = vector.load %arg13[%c145, %c0_35] : memref<264x32xf32, #tpu.memory_space<vmem>>, vector<14x32xf32>
    tpu.vector_store %arg13[%c145, %c0_35], %97 {strides = array<i32>} : memref<264x32xf32, #tpu.memory_space<vmem>>, vector<14x32xf32>,
    %99 = vector.extract_strided_slice %62 {offsets = [270, 0], sizes = [14, 32], strides = [1, 1]} : vector<420x32xf32> to vector<14x32xf32>
    %100 = vector.extract_strided_slice %62 {offsets = [285, 0], sizes = [14, 32], strides = [1, 1]} : vector<420x32xf32> to vector<14x32xf32>
    %101 = arith.maximumf %99, %100 : vector<14x32xf32>
    %c161 = arith.constant 161 : index
    %c0_36 = arith.constant 0 : index
    %102 = vector.load %arg13[%c161, %c0_36] : memref<264x32xf32, #tpu.memory_space<vmem>>, vector<14x32xf32>
    tpu.vector_store %arg13[%c161, %c0_36], %101 {strides = array<i32>} : memref<264x32xf32, #tpu.memory_space<vmem>>, vector<14x32xf32>,
    %103 = vector.extract_strided_slice %62 {offsets = [300, 0], sizes = [14, 32], strides = [1, 1]} : vector<420x32xf32> to vector<14x32xf32>
    %104 = vector.extract_strided_slice %62 {offsets = [315, 0], sizes = [14, 32], strides = [1, 1]} : vector<420x32xf32> to vector<14x32xf32>
    %105 = arith.maximumf %103, %104 : vector<14x32xf32>
    %c177 = arith.constant 177 : index
    %c0_37 = arith.constant 0 : index
    %106 = vector.load %arg13[%c177, %c0_37] : memref<264x32xf32, #tpu.memory_space<vmem>>, vector<14x32xf32>
    tpu.vector_store %arg13[%c177, %c0_37], %105 {strides = array<i32>} : memref<264x32xf32, #tpu.memory_space<vmem>>, vector<14x32xf32>,
    %107 = vector.extract_strided_slice %62 {offsets = [330, 0], sizes = [14, 32], strides = [1, 1]} : vector<420x32xf32> to vector<14x32xf32>
    %108 = vector.extract_strided_slice %62 {offsets = [345, 0], sizes = [14, 32], strides = [1, 1]} : vector<420x32xf32> to vector<14x32xf32>
    %109 = arith.maximumf %107, %108 : vector<14x32xf32>
    %c193 = arith.constant 193 : index
    %c0_38 = arith.constant 0 : index
    %110 = vector.load %arg13[%c193, %c0_38] : memref<264x32xf32, #tpu.memory_space<vmem>>, vector<14x32xf32>
    tpu.vector_store %arg13[%c193, %c0_38], %109 {strides = array<i32>} : memref<264x32xf32, #tpu.memory_space<vmem>>, vector<14x32xf32>,
    %111 = vector.extract_strided_slice %62 {offsets = [360, 0], sizes = [14, 32], strides = [1, 1]} : vector<420x32xf32> to vector<14x32xf32>
    %112 = vector.extract_strided_slice %62 {offsets = [375, 0], sizes = [14, 32], strides = [1, 1]} : vector<420x32xf32> to vector<14x32xf32>
    %113 = arith.maximumf %111, %112 : vector<14x32xf32>
    %c209 = arith.constant 209 : index
    %c0_39 = arith.constant 0 : index
    %114 = vector.load %arg13[%c209, %c0_39] : memref<264x32xf32, #tpu.memory_space<vmem>>, vector<14x32xf32>
    tpu.vector_store %arg13[%c209, %c0_39], %113 {strides = array<i32>} : memref<264x32xf32, #tpu.memory_space<vmem>>, vector<14x32xf32>,
    %115 = vector.extract_strided_slice %62 {offsets = [390, 0], sizes = [14, 32], strides = [1, 1]} : vector<420x32xf32> to vector<14x32xf32>
    %116 = vector.extract_strided_slice %62 {offsets = [405, 0], sizes = [14, 32], strides = [1, 1]} : vector<420x32xf32> to vector<14x32xf32>
    %117 = arith.maximumf %115, %116 : vector<14x32xf32>
    %c225 = arith.constant 225 : index
    %c0_40 = arith.constant 0 : index
    %118 = vector.load %arg13[%c225, %c0_40] : memref<264x32xf32, #tpu.memory_space<vmem>>, vector<14x32xf32>
    tpu.vector_store %arg13[%c225, %c0_40], %117 {strides = array<i32>} : memref<264x32xf32, #tpu.memory_space<vmem>>, vector<14x32xf32>,
    %cst_41 = arith.constant 0.000000e+00 : f32
    %119 = vector.broadcast %cst_41 : f32 to vector<224x64xf32>
    %c0_42 = arith.constant 0 : index
    %c0_43 = arith.constant 0 : index
    %120 = vector.load %arg13[%c0_42, %c0_43] : memref<264x32xf32, #tpu.memory_space<vmem>>, vector<224x32xf32>
    %121 = arith.truncf %120 : vector<224x32xf32> to vector<224x32xbf16>
    %c0_44 = arith.constant 0 : index
    %c0_45 = arith.constant 0 : index
    %122 = vector.load %arg4[%c0_44, %c0_45] : memref<288x64xbf16, #tpu.memory_space<vmem>>, vector<32x64xbf16>
    %cst_46 = arith.constant dense<0.000000e+00> : vector<224x64xf32>
    %123 = tpu.matmul %121, %122, %cst_46 {dimension_numbers = #tpu.dot_dimension_numbers<[1], [0], [0], [1], [0, 0, 1, 1], [], []>} : vector<224x32xbf16>, vector<32x64xbf16>, vector<224x64xf32> -> vector<224x64xf32>
    %124 = arith.addf %119, %123 : vector<224x64xf32>
    %c1_47 = arith.constant 1 : index
    %c0_48 = arith.constant 0 : index
    %125 = vector.load %arg13[%c1_47, %c0_48] : memref<264x32xf32, #tpu.memory_space<vmem>>, vector<224x32xf32>
    %126 = arith.truncf %125 : vector<224x32xf32> to vector<224x32xbf16>
    %c32 = arith.constant 32 : index
    %c0_49 = arith.constant 0 : index
    %127 = vector.load %arg4[%c32, %c0_49] : memref<288x64xbf16, #tpu.memory_space<vmem>>, vector<32x64xbf16>
    %cst_50 = arith.constant dense<0.000000e+00> : vector<224x64xf32>
    %128 = tpu.matmul %126, %127, %cst_50 {dimension_numbers = #tpu.dot_dimension_numbers<[1], [0], [0], [1], [0, 0, 1, 1], [], []>} : vector<224x32xbf16>, vector<32x64xbf16>, vector<224x64xf32> -> vector<224x64xf32>
    %129 = arith.addf %124, %128 : vector<224x64xf32>
    %c2_51 = arith.constant 2 : index
    %c0_52 = arith.constant 0 : index
    %130 = vector.load %arg13[%c2_51, %c0_52] : memref<264x32xf32, #tpu.memory_space<vmem>>, vector<224x32xf32>
    %131 = arith.truncf %130 : vector<224x32xf32> to vector<224x32xbf16>
    %c64 = arith.constant 64 : index
    %c0_53 = arith.constant 0 : index
    %132 = vector.load %arg4[%c64, %c0_53] : memref<288x64xbf16, #tpu.memory_space<vmem>>, vector<32x64xbf16>
    %cst_54 = arith.constant dense<0.000000e+00> : vector<224x64xf32>
    %133 = tpu.matmul %131, %132, %cst_54 {dimension_numbers = #tpu.dot_dimension_numbers<[1], [0], [0], [1], [0, 0, 1, 1], [], []>} : vector<224x32xbf16>, vector<32x64xbf16>, vector<224x64xf32> -> vector<224x64xf32>
    %134 = arith.addf %129, %133 : vector<224x64xf32>
    %c16 = arith.constant 16 : index
    %c0_55 = arith.constant 0 : index
    %135 = vector.load %arg13[%c16, %c0_55] : memref<264x32xf32, #tpu.memory_space<vmem>>, vector<224x32xf32>
    %136 = arith.truncf %135 : vector<224x32xf32> to vector<224x32xbf16>
    %c96 = arith.constant 96 : index
    %c0_56 = arith.constant 0 : index
    %137 = vector.load %arg4[%c96, %c0_56] : memref<288x64xbf16, #tpu.memory_space<vmem>>, vector<32x64xbf16>
    %cst_57 = arith.constant dense<0.000000e+00> : vector<224x64xf32>
    %138 = tpu.matmul %136, %137, %cst_57 {dimension_numbers = #tpu.dot_dimension_numbers<[1], [0], [0], [1], [0, 0, 1, 1], [], []>} : vector<224x32xbf16>, vector<32x64xbf16>, vector<224x64xf32> -> vector<224x64xf32>
    %139 = arith.addf %134, %138 : vector<224x64xf32>
    %c17_58 = arith.constant 17 : index
    %c0_59 = arith.constant 0 : index
    %140 = vector.load %arg13[%c17_58, %c0_59] : memref<264x32xf32, #tpu.memory_space<vmem>>, vector<224x32xf32>
    %141 = arith.truncf %140 : vector<224x32xf32> to vector<224x32xbf16>
    %c128 = arith.constant 128 : index
    %c0_60 = arith.constant 0 : index
    %142 = vector.load %arg4[%c128, %c0_60] : memref<288x64xbf16, #tpu.memory_space<vmem>>, vector<32x64xbf16>
    %cst_61 = arith.constant dense<0.000000e+00> : vector<224x64xf32>
    %143 = tpu.matmul %141, %142, %cst_61 {dimension_numbers = #tpu.dot_dimension_numbers<[1], [0], [0], [1], [0, 0, 1, 1], [], []>} : vector<224x32xbf16>, vector<32x64xbf16>, vector<224x64xf32> -> vector<224x64xf32>
    %144 = arith.addf %139, %143 : vector<224x64xf32>
    %c18 = arith.constant 18 : index
    %c0_62 = arith.constant 0 : index
    %145 = vector.load %arg13[%c18, %c0_62] : memref<264x32xf32, #tpu.memory_space<vmem>>, vector<224x32xf32>
    %146 = arith.truncf %145 : vector<224x32xf32> to vector<224x32xbf16>
    %c160 = arith.constant 160 : index
    %c0_63 = arith.constant 0 : index
    %147 = vector.load %arg4[%c160, %c0_63] : memref<288x64xbf16, #tpu.memory_space<vmem>>, vector<32x64xbf16>
    %cst_64 = arith.constant dense<0.000000e+00> : vector<224x64xf32>
    %148 = tpu.matmul %146, %147, %cst_64 {dimension_numbers = #tpu.dot_dimension_numbers<[1], [0], [0], [1], [0, 0, 1, 1], [], []>} : vector<224x32xbf16>, vector<32x64xbf16>, vector<224x64xf32> -> vector<224x64xf32>
    %149 = arith.addf %144, %148 : vector<224x64xf32>
    %c32_65 = arith.constant 32 : index
    %c0_66 = arith.constant 0 : index
    %150 = vector.load %arg13[%c32_65, %c0_66] : memref<264x32xf32, #tpu.memory_space<vmem>>, vector<224x32xf32>
    %151 = arith.truncf %150 : vector<224x32xf32> to vector<224x32xbf16>
    %c192 = arith.constant 192 : index
    %c0_67 = arith.constant 0 : index
    %152 = vector.load %arg4[%c192, %c0_67] : memref<288x64xbf16, #tpu.memory_space<vmem>>, vector<32x64xbf16>
    %cst_68 = arith.constant dense<0.000000e+00> : vector<224x64xf32>
    %153 = tpu.matmul %151, %152, %cst_68 {dimension_numbers = #tpu.dot_dimension_numbers<[1], [0], [0], [1], [0, 0, 1, 1], [], []>} : vector<224x32xbf16>, vector<32x64xbf16>, vector<224x64xf32> -> vector<224x64xf32>
    %154 = arith.addf %149, %153 : vector<224x64xf32>
    %c33_69 = arith.constant 33 : index
    %c0_70 = arith.constant 0 : index
    %155 = vector.load %arg13[%c33_69, %c0_70] : memref<264x32xf32, #tpu.memory_space<vmem>>, vector<224x32xf32>
    %156 = arith.truncf %155 : vector<224x32xf32> to vector<224x32xbf16>
    %c224 = arith.constant 224 : index
    %c0_71 = arith.constant 0 : index
    %157 = vector.load %arg4[%c224, %c0_71] : memref<288x64xbf16, #tpu.memory_space<vmem>>, vector<32x64xbf16>
    %cst_72 = arith.constant dense<0.000000e+00> : vector<224x64xf32>
    %158 = tpu.matmul %156, %157, %cst_72 {dimension_numbers = #tpu.dot_dimension_numbers<[1], [0], [0], [1], [0, 0, 1, 1], [], []>} : vector<224x32xbf16>, vector<32x64xbf16>, vector<224x64xf32> -> vector<224x64xf32>
    %159 = arith.addf %154, %158 : vector<224x64xf32>
    %c34 = arith.constant 34 : index
    %c0_73 = arith.constant 0 : index
    %160 = vector.load %arg13[%c34, %c0_73] : memref<264x32xf32, #tpu.memory_space<vmem>>, vector<224x32xf32>
    %161 = arith.truncf %160 : vector<224x32xf32> to vector<224x32xbf16>
    %c256 = arith.constant 256 : index
    %c0_74 = arith.constant 0 : index
    %162 = vector.load %arg4[%c256, %c0_74] : memref<288x64xbf16, #tpu.memory_space<vmem>>, vector<32x64xbf16>
    %cst_75 = arith.constant dense<0.000000e+00> : vector<224x64xf32>
    %163 = tpu.matmul %161, %162, %cst_75 {dimension_numbers = #tpu.dot_dimension_numbers<[1], [0], [0], [1], [0, 0, 1, 1], [], []>} : vector<224x32xbf16>, vector<32x64xbf16>, vector<224x64xf32> -> vector<224x64xf32>
    %164 = arith.addf %159, %163 : vector<224x64xf32>
    %c0_76 = arith.constant 0 : index
    %c0_77 = arith.constant 0 : index
    %165 = vector.load %arg5[%c0_76, %c0_77] : memref<1x64xf32, #tpu.memory_space<vmem>>, vector<1x64xf32>
    %166 = vector.broadcast %165 : vector<1x64xf32> to vector<224x64xf32>
    %167 = arith.addf %164, %166 : vector<224x64xf32>
    %cst_78 = arith.constant 0.000000e+00 : f32
    %168 = vector.broadcast %cst_78 : f32 to vector<224x64xf32>
    %169 = arith.maximumf %167, %168 : vector<224x64xf32>
    %c0_79 = arith.constant 0 : index
    %c0_80 = arith.constant 0 : index
    %170 = vector.load %arg16[%c0_79, %c0_80] : memref<224x64xf32, #tpu.memory_space<vmem>>, vector<224x64xf32>
    tpu.vector_store %arg16[%c0_79, %c0_80], %169 {strides = array<i32>} : memref<224x64xf32, #tpu.memory_space<vmem>>, vector<224x64xf32>,
    %c0_81 = arith.constant 0 : index
    %c0_82 = arith.constant 0 : index
    %171 = tpu.strided_load %arg16[%c0_81, %c0_82] {strides = array<i32: 2, 1>} : memref<224x64xf32, #tpu.memory_space<vmem>>, vector<112x64xf32>
    %c1_83 = arith.constant 1 : index
    %c0_84 = arith.constant 0 : index
    %172 = tpu.strided_load %arg16[%c1_83, %c0_84] {strides = array<i32: 2, 1>} : memref<224x64xf32, #tpu.memory_space<vmem>>, vector<112x64xf32>
    %173 = arith.maximumf %171, %172 : vector<112x64xf32>
    %174 = vector.extract_strided_slice %173 {offsets = [0, 0], sizes = [7, 64], strides = [1, 1]} : vector<112x64xf32> to vector<7x64xf32>
    %175 = vector.extract_strided_slice %173 {offsets = [8, 0], sizes = [7, 64], strides = [1, 1]} : vector<112x64xf32> to vector<7x64xf32>
    %176 = arith.maximumf %174, %175 : vector<7x64xf32>
    %c11 = arith.constant 11 : index
    %c0_85 = arith.constant 0 : index
    %177 = vector.load %arg14[%c11, %c0_85] : memref<96x64xf32, #tpu.memory_space<vmem>>, vector<7x64xf32>
    tpu.vector_store %arg14[%c11, %c0_85], %176 {strides = array<i32>} : memref<96x64xf32, #tpu.memory_space<vmem>>, vector<7x64xf32>,
    %178 = vector.extract_strided_slice %173 {offsets = [16, 0], sizes = [7, 64], strides = [1, 1]} : vector<112x64xf32> to vector<7x64xf32>
    %179 = vector.extract_strided_slice %173 {offsets = [24, 0], sizes = [7, 64], strides = [1, 1]} : vector<112x64xf32> to vector<7x64xf32>
    %180 = arith.maximumf %178, %179 : vector<7x64xf32>
    %c21 = arith.constant 21 : index
    %c0_86 = arith.constant 0 : index
    %181 = vector.load %arg14[%c21, %c0_86] : memref<96x64xf32, #tpu.memory_space<vmem>>, vector<7x64xf32>
    tpu.vector_store %arg14[%c21, %c0_86], %180 {strides = array<i32>} : memref<96x64xf32, #tpu.memory_space<vmem>>, vector<7x64xf32>,
    %182 = vector.extract_strided_slice %173 {offsets = [32, 0], sizes = [7, 64], strides = [1, 1]} : vector<112x64xf32> to vector<7x64xf32>
    %183 = vector.extract_strided_slice %173 {offsets = [40, 0], sizes = [7, 64], strides = [1, 1]} : vector<112x64xf32> to vector<7x64xf32>
    %184 = arith.maximumf %182, %183 : vector<7x64xf32>
    %c31 = arith.constant 31 : index
    %c0_87 = arith.constant 0 : index
    %185 = vector.load %arg14[%c31, %c0_87] : memref<96x64xf32, #tpu.memory_space<vmem>>, vector<7x64xf32>
    tpu.vector_store %arg14[%c31, %c0_87], %184 {strides = array<i32>} : memref<96x64xf32, #tpu.memory_space<vmem>>, vector<7x64xf32>,
    %186 = vector.extract_strided_slice %173 {offsets = [48, 0], sizes = [7, 64], strides = [1, 1]} : vector<112x64xf32> to vector<7x64xf32>
    %187 = vector.extract_strided_slice %173 {offsets = [56, 0], sizes = [7, 64], strides = [1, 1]} : vector<112x64xf32> to vector<7x64xf32>
    %188 = arith.maximumf %186, %187 : vector<7x64xf32>
    %c41 = arith.constant 41 : index
    %c0_88 = arith.constant 0 : index
    %189 = vector.load %arg14[%c41, %c0_88] : memref<96x64xf32, #tpu.memory_space<vmem>>, vector<7x64xf32>
    tpu.vector_store %arg14[%c41, %c0_88], %188 {strides = array<i32>} : memref<96x64xf32, #tpu.memory_space<vmem>>, vector<7x64xf32>,
    %190 = vector.extract_strided_slice %173 {offsets = [64, 0], sizes = [7, 64], strides = [1, 1]} : vector<112x64xf32> to vector<7x64xf32>
    %191 = vector.extract_strided_slice %173 {offsets = [72, 0], sizes = [7, 64], strides = [1, 1]} : vector<112x64xf32> to vector<7x64xf32>
    %192 = arith.maximumf %190, %191 : vector<7x64xf32>
    %c51 = arith.constant 51 : index
    %c0_89 = arith.constant 0 : index
    %193 = vector.load %arg14[%c51, %c0_89] : memref<96x64xf32, #tpu.memory_space<vmem>>, vector<7x64xf32>
    tpu.vector_store %arg14[%c51, %c0_89], %192 {strides = array<i32>} : memref<96x64xf32, #tpu.memory_space<vmem>>, vector<7x64xf32>,
    %194 = vector.extract_strided_slice %173 {offsets = [80, 0], sizes = [7, 64], strides = [1, 1]} : vector<112x64xf32> to vector<7x64xf32>
    %195 = vector.extract_strided_slice %173 {offsets = [88, 0], sizes = [7, 64], strides = [1, 1]} : vector<112x64xf32> to vector<7x64xf32>
    %196 = arith.maximumf %194, %195 : vector<7x64xf32>
    %c61 = arith.constant 61 : index
    %c0_90 = arith.constant 0 : index
    %197 = vector.load %arg14[%c61, %c0_90] : memref<96x64xf32, #tpu.memory_space<vmem>>, vector<7x64xf32>
    tpu.vector_store %arg14[%c61, %c0_90], %196 {strides = array<i32>} : memref<96x64xf32, #tpu.memory_space<vmem>>, vector<7x64xf32>,
    %198 = vector.extract_strided_slice %173 {offsets = [96, 0], sizes = [7, 64], strides = [1, 1]} : vector<112x64xf32> to vector<7x64xf32>
    %199 = vector.extract_strided_slice %173 {offsets = [104, 0], sizes = [7, 64], strides = [1, 1]} : vector<112x64xf32> to vector<7x64xf32>
    %200 = arith.maximumf %198, %199 : vector<7x64xf32>
    %c71 = arith.constant 71 : index
    %c0_91 = arith.constant 0 : index
    %201 = vector.load %arg14[%c71, %c0_91] : memref<96x64xf32, #tpu.memory_space<vmem>>, vector<7x64xf32>
    tpu.vector_store %arg14[%c71, %c0_91], %200 {strides = array<i32>} : memref<96x64xf32, #tpu.memory_space<vmem>>, vector<7x64xf32>,
    %cst_92 = arith.constant 0.000000e+00 : f32
    %202 = vector.broadcast %cst_92 : f32 to vector<70x128xf32>
    %c0_93 = arith.constant 0 : index
    %c0_94 = arith.constant 0 : index
    %203 = vector.load %arg14[%c0_93, %c0_94] : memref<96x64xf32, #tpu.memory_space<vmem>>, vector<70x64xf32>
    %204 = arith.truncf %203 : vector<70x64xf32> to vector<70x64xbf16>
    %c0_95 = arith.constant 0 : index
    %c0_96 = arith.constant 0 : index
    %205 = vector.load %arg6[%c0_95, %c0_96] : memref<576x128xbf16, #tpu.memory_space<vmem>>, vector<64x128xbf16>
    %cst_97 = arith.constant dense<0.000000e+00> : vector<70x128xf32>
    %206 = tpu.matmul %204, %205, %cst_97 {dimension_numbers = #tpu.dot_dimension_numbers<[1], [0], [0], [1], [0, 0, 1, 1], [], []>} : vector<70x64xbf16>, vector<64x128xbf16>, vector<70x128xf32> -> vector<70x128xf32>
    %207 = arith.addf %202, %206 : vector<70x128xf32>
    %c1_98 = arith.constant 1 : index
    %c0_99 = arith.constant 0 : index
    %208 = vector.load %arg14[%c1_98, %c0_99] : memref<96x64xf32, #tpu.memory_space<vmem>>, vector<70x64xf32>
    %209 = arith.truncf %208 : vector<70x64xf32> to vector<70x64xbf16>
    %c64_100 = arith.constant 64 : index
    %c0_101 = arith.constant 0 : index
    %210 = vector.load %arg6[%c64_100, %c0_101] : memref<576x128xbf16, #tpu.memory_space<vmem>>, vector<64x128xbf16>
    %cst_102 = arith.constant dense<0.000000e+00> : vector<70x128xf32>
    %211 = tpu.matmul %209, %210, %cst_102 {dimension_numbers = #tpu.dot_dimension_numbers<[1], [0], [0], [1], [0, 0, 1, 1], [], []>} : vector<70x64xbf16>, vector<64x128xbf16>, vector<70x128xf32> -> vector<70x128xf32>
    %212 = arith.addf %207, %211 : vector<70x128xf32>
    %c2_103 = arith.constant 2 : index
    %c0_104 = arith.constant 0 : index
    %213 = vector.load %arg14[%c2_103, %c0_104] : memref<96x64xf32, #tpu.memory_space<vmem>>, vector<70x64xf32>
    %214 = arith.truncf %213 : vector<70x64xf32> to vector<70x64xbf16>
    %c128_105 = arith.constant 128 : index
    %c0_106 = arith.constant 0 : index
    %215 = vector.load %arg6[%c128_105, %c0_106] : memref<576x128xbf16, #tpu.memory_space<vmem>>, vector<64x128xbf16>
    %cst_107 = arith.constant dense<0.000000e+00> : vector<70x128xf32>
    %216 = tpu.matmul %214, %215, %cst_107 {dimension_numbers = #tpu.dot_dimension_numbers<[1], [0], [0], [1], [0, 0, 1, 1], [], []>} : vector<70x64xbf16>, vector<64x128xbf16>, vector<70x128xf32> -> vector<70x128xf32>
    %217 = arith.addf %212, %216 : vector<70x128xf32>
    %c10 = arith.constant 10 : index
    %c0_108 = arith.constant 0 : index
    %218 = vector.load %arg14[%c10, %c0_108] : memref<96x64xf32, #tpu.memory_space<vmem>>, vector<70x64xf32>
    %219 = arith.truncf %218 : vector<70x64xf32> to vector<70x64xbf16>
    %c192_109 = arith.constant 192 : index
    %c0_110 = arith.constant 0 : index
    %220 = vector.load %arg6[%c192_109, %c0_110] : memref<576x128xbf16, #tpu.memory_space<vmem>>, vector<64x128xbf16>
    %cst_111 = arith.constant dense<0.000000e+00> : vector<70x128xf32>
    %221 = tpu.matmul %219, %220, %cst_111 {dimension_numbers = #tpu.dot_dimension_numbers<[1], [0], [0], [1], [0, 0, 1, 1], [], []>} : vector<70x64xbf16>, vector<64x128xbf16>, vector<70x128xf32> -> vector<70x128xf32>
    %222 = arith.addf %217, %221 : vector<70x128xf32>
    %c11_112 = arith.constant 11 : index
    %c0_113 = arith.constant 0 : index
    %223 = vector.load %arg14[%c11_112, %c0_113] : memref<96x64xf32, #tpu.memory_space<vmem>>, vector<70x64xf32>
    %224 = arith.truncf %223 : vector<70x64xf32> to vector<70x64xbf16>
    %c256_114 = arith.constant 256 : index
    %c0_115 = arith.constant 0 : index
    %225 = vector.load %arg6[%c256_114, %c0_115] : memref<576x128xbf16, #tpu.memory_space<vmem>>, vector<64x128xbf16>
    %cst_116 = arith.constant dense<0.000000e+00> : vector<70x128xf32>
    %226 = tpu.matmul %224, %225, %cst_116 {dimension_numbers = #tpu.dot_dimension_numbers<[1], [0], [0], [1], [0, 0, 1, 1], [], []>} : vector<70x64xbf16>, vector<64x128xbf16>, vector<70x128xf32> -> vector<70x128xf32>
    %227 = arith.addf %222, %226 : vector<70x128xf32>
    %c12 = arith.constant 12 : index
    %c0_117 = arith.constant 0 : index
    %228 = vector.load %arg14[%c12, %c0_117] : memref<96x64xf32, #tpu.memory_space<vmem>>, vector<70x64xf32>
    %229 = arith.truncf %228 : vector<70x64xf32> to vector<70x64xbf16>
    %c320 = arith.constant 320 : index
    %c0_118 = arith.constant 0 : index
    %230 = vector.load %arg6[%c320, %c0_118] : memref<576x128xbf16, #tpu.memory_space<vmem>>, vector<64x128xbf16>
    %cst_119 = arith.constant dense<0.000000e+00> : vector<70x128xf32>
    %231 = tpu.matmul %229, %230, %cst_119 {dimension_numbers = #tpu.dot_dimension_numbers<[1], [0], [0], [1], [0, 0, 1, 1], [], []>} : vector<70x64xbf16>, vector<64x128xbf16>, vector<70x128xf32> -> vector<70x128xf32>
    %232 = arith.addf %227, %231 : vector<70x128xf32>
    %c20 = arith.constant 20 : index
    %c0_120 = arith.constant 0 : index
    %233 = vector.load %arg14[%c20, %c0_120] : memref<96x64xf32, #tpu.memory_space<vmem>>, vector<70x64xf32>
    %234 = arith.truncf %233 : vector<70x64xf32> to vector<70x64xbf16>
    %c384 = arith.constant 384 : index
    %c0_121 = arith.constant 0 : index
    %235 = vector.load %arg6[%c384, %c0_121] : memref<576x128xbf16, #tpu.memory_space<vmem>>, vector<64x128xbf16>
    %cst_122 = arith.constant dense<0.000000e+00> : vector<70x128xf32>
    %236 = tpu.matmul %234, %235, %cst_122 {dimension_numbers = #tpu.dot_dimension_numbers<[1], [0], [0], [1], [0, 0, 1, 1], [], []>} : vector<70x64xbf16>, vector<64x128xbf16>, vector<70x128xf32> -> vector<70x128xf32>
    %237 = arith.addf %232, %236 : vector<70x128xf32>
    %c21_123 = arith.constant 21 : index
    %c0_124 = arith.constant 0 : index
    %238 = vector.load %arg14[%c21_123, %c0_124] : memref<96x64xf32, #tpu.memory_space<vmem>>, vector<70x64xf32>
    %239 = arith.truncf %238 : vector<70x64xf32> to vector<70x64xbf16>
    %c448 = arith.constant 448 : index
    %c0_125 = arith.constant 0 : index
    %240 = vector.load %arg6[%c448, %c0_125] : memref<576x128xbf16, #tpu.memory_space<vmem>>, vector<64x128xbf16>
    %cst_126 = arith.constant dense<0.000000e+00> : vector<70x128xf32>
    %241 = tpu.matmul %239, %240, %cst_126 {dimension_numbers = #tpu.dot_dimension_numbers<[1], [0], [0], [1], [0, 0, 1, 1], [], []>} : vector<70x64xbf16>, vector<64x128xbf16>, vector<70x128xf32> -> vector<70x128xf32>
    %242 = arith.addf %237, %241 : vector<70x128xf32>
    %c22 = arith.constant 22 : index
    %c0_127 = arith.constant 0 : index
    %243 = vector.load %arg14[%c22, %c0_127] : memref<96x64xf32, #tpu.memory_space<vmem>>, vector<70x64xf32>
    %244 = arith.truncf %243 : vector<70x64xf32> to vector<70x64xbf16>
    %c512 = arith.constant 512 : index
    %c0_128 = arith.constant 0 : index
    %245 = vector.load %arg6[%c512, %c0_128] : memref<576x128xbf16, #tpu.memory_space<vmem>>, vector<64x128xbf16>
    %cst_129 = arith.constant dense<0.000000e+00> : vector<70x128xf32>
    %246 = tpu.matmul %244, %245, %cst_129 {dimension_numbers = #tpu.dot_dimension_numbers<[1], [0], [0], [1], [0, 0, 1, 1], [], []>} : vector<70x64xbf16>, vector<64x128xbf16>, vector<70x128xf32> -> vector<70x128xf32>
    %247 = arith.addf %242, %246 : vector<70x128xf32>
    %c0_130 = arith.constant 0 : index
    %c0_131 = arith.constant 0 : index
    %248 = vector.load %arg7[%c0_130, %c0_131] : memref<1x128xf32, #tpu.memory_space<vmem>>, vector<1x128xf32>
    %249 = vector.broadcast %248 : vector<1x128xf32> to vector<70x128xf32>
    %250 = arith.addf %247, %249 : vector<70x128xf32>
    %cst_132 = arith.constant 0.000000e+00 : f32
    %251 = vector.broadcast %cst_132 : f32 to vector<70x128xf32>
    %252 = arith.maximumf %250, %251 : vector<70x128xf32>
    %c0_133 = arith.constant 0 : index
    %c0_134 = arith.constant 0 : index
    %253 = vector.load %arg17[%c0_133, %c0_134] : memref<72x128xf32, #tpu.memory_space<vmem>>, vector<70x128xf32>
    tpu.vector_store %arg17[%c0_133, %c0_134], %252 {strides = array<i32>} : memref<72x128xf32, #tpu.memory_space<vmem>>, vector<70x128xf32>,
    %c0_135 = arith.constant 0 : index
    %c0_136 = arith.constant 0 : index
    %254 = tpu.strided_load %arg17[%c0_135, %c0_136] {strides = array<i32: 2, 1>} : memref<72x128xf32, #tpu.memory_space<vmem>>, vector<35x128xf32>
    %c1_137 = arith.constant 1 : index
    %c0_138 = arith.constant 0 : index
    %255 = tpu.strided_load %arg17[%c1_137, %c0_138] {strides = array<i32: 2, 1>} : memref<72x128xf32, #tpu.memory_space<vmem>>, vector<35x128xf32>
    %256 = arith.maximumf %254, %255 : vector<35x128xf32>
    %c0_139 = arith.constant 0 : index
    %c0_140 = arith.constant 0 : index
    %257 = vector.load %arg9[%c0_139, %c0_140] : memref<1x256xf32, #tpu.memory_space<vmem>>, vector<1x256xf32>
    %258 = vector.extract_strided_slice %256 {offsets = [0, 0], sizes = [3, 128], strides = [1, 1]} : vector<35x128xf32> to vector<3x128xf32>
    %259 = vector.extract_strided_slice %256 {offsets = [5, 0], sizes = [3, 128], strides = [1, 1]} : vector<35x128xf32> to vector<3x128xf32>
    %260 = arith.maximumf %258, %259 : vector<3x128xf32>
    %261 = vector.extract_strided_slice %260 {offsets = [0, 0], sizes = [1, 128], strides = [1, 1]} : vector<3x128xf32> to vector<1x128xf32>
    %262 = arith.truncf %261 : vector<1x128xf32> to vector<1x128xbf16>
    %c0_141 = arith.constant 0 : index
    %c0_142 = arith.constant 0 : index
    %263 = vector.load %arg8[%c0_141, %c0_142] : memref<1152x256xbf16, #tpu.memory_space<vmem>>, vector<128x256xbf16>
    %cst_143 = arith.constant dense<0.000000e+00> : vector<1x256xf32>
    %264 = tpu.matmul %262, %263, %cst_143 {dimension_numbers = #tpu.dot_dimension_numbers<[1], [0], [0], [1], [0, 0, 1, 1], [], []>} : vector<1x128xbf16>, vector<128x256xbf16>, vector<1x256xf32> -> vector<1x256xf32>
    %265 = arith.addf %257, %264 : vector<1x256xf32>
    %266 = vector.extract_strided_slice %260 {offsets = [1, 0], sizes = [1, 128], strides = [1, 1]} : vector<3x128xf32> to vector<1x128xf32>
    %267 = arith.truncf %266 : vector<1x128xf32> to vector<1x128xbf16>
    %c128_144 = arith.constant 128 : index
    %c0_145 = arith.constant 0 : index
    %268 = vector.load %arg8[%c128_144, %c0_145] : memref<1152x256xbf16, #tpu.memory_space<vmem>>, vector<128x256xbf16>
    %cst_146 = arith.constant dense<0.000000e+00> : vector<1x256xf32>
    %269 = tpu.matmul %267, %268, %cst_146 {dimension_numbers = #tpu.dot_dimension_numbers<[1], [0], [0], [1], [0, 0, 1, 1], [], []>} : vector<1x128xbf16>, vector<128x256xbf16>, vector<1x256xf32> -> vector<1x256xf32>
    %270 = arith.addf %265, %269 : vector<1x256xf32>
    %271 = vector.extract_strided_slice %260 {offsets = [2, 0], sizes = [1, 128], strides = [1, 1]} : vector<3x128xf32> to vector<1x128xf32>
    %272 = arith.truncf %271 : vector<1x128xf32> to vector<1x128xbf16>
    %c256_147 = arith.constant 256 : index
    %c0_148 = arith.constant 0 : index
    %273 = vector.load %arg8[%c256_147, %c0_148] : memref<1152x256xbf16, #tpu.memory_space<vmem>>, vector<128x256xbf16>
    %cst_149 = arith.constant dense<0.000000e+00> : vector<1x256xf32>
    %274 = tpu.matmul %272, %273, %cst_149 {dimension_numbers = #tpu.dot_dimension_numbers<[1], [0], [0], [1], [0, 0, 1, 1], [], []>} : vector<1x128xbf16>, vector<128x256xbf16>, vector<1x256xf32> -> vector<1x256xf32>
    %275 = arith.addf %270, %274 : vector<1x256xf32>
    %276 = vector.extract_strided_slice %256 {offsets = [10, 0], sizes = [3, 128], strides = [1, 1]} : vector<35x128xf32> to vector<3x128xf32>
    %277 = vector.extract_strided_slice %256 {offsets = [15, 0], sizes = [3, 128], strides = [1, 1]} : vector<35x128xf32> to vector<3x128xf32>
    %278 = arith.maximumf %276, %277 : vector<3x128xf32>
    %279 = vector.extract_strided_slice %278 {offsets = [0, 0], sizes = [1, 128], strides = [1, 1]} : vector<3x128xf32> to vector<1x128xf32>
    %280 = arith.truncf %279 : vector<1x128xf32> to vector<1x128xbf16>
    %c384_150 = arith.constant 384 : index
    %c0_151 = arith.constant 0 : index
    %281 = vector.load %arg8[%c384_150, %c0_151] : memref<1152x256xbf16, #tpu.memory_space<vmem>>, vector<128x256xbf16>
    %cst_152 = arith.constant dense<0.000000e+00> : vector<1x256xf32>
    %282 = tpu.matmul %280, %281, %cst_152 {dimension_numbers = #tpu.dot_dimension_numbers<[1], [0], [0], [1], [0, 0, 1, 1], [], []>} : vector<1x128xbf16>, vector<128x256xbf16>, vector<1x256xf32> -> vector<1x256xf32>
    %283 = arith.addf %275, %282 : vector<1x256xf32>
    %284 = vector.extract_strided_slice %278 {offsets = [1, 0], sizes = [1, 128], strides = [1, 1]} : vector<3x128xf32> to vector<1x128xf32>
    %285 = arith.truncf %284 : vector<1x128xf32> to vector<1x128xbf16>
    %c512_153 = arith.constant 512 : index
    %c0_154 = arith.constant 0 : index
    %286 = vector.load %arg8[%c512_153, %c0_154] : memref<1152x256xbf16, #tpu.memory_space<vmem>>, vector<128x256xbf16>
    %cst_155 = arith.constant dense<0.000000e+00> : vector<1x256xf32>
    %287 = tpu.matmul %285, %286, %cst_155 {dimension_numbers = #tpu.dot_dimension_numbers<[1], [0], [0], [1], [0, 0, 1, 1], [], []>} : vector<1x128xbf16>, vector<128x256xbf16>, vector<1x256xf32> -> vector<1x256xf32>
    %288 = arith.addf %283, %287 : vector<1x256xf32>
    %289 = vector.extract_strided_slice %278 {offsets = [2, 0], sizes = [1, 128], strides = [1, 1]} : vector<3x128xf32> to vector<1x128xf32>
    %290 = arith.truncf %289 : vector<1x128xf32> to vector<1x128xbf16>
    %c640 = arith.constant 640 : index
    %c0_156 = arith.constant 0 : index
    %291 = vector.load %arg8[%c640, %c0_156] : memref<1152x256xbf16, #tpu.memory_space<vmem>>, vector<128x256xbf16>
    %cst_157 = arith.constant dense<0.000000e+00> : vector<1x256xf32>
    %292 = tpu.matmul %290, %291, %cst_157 {dimension_numbers = #tpu.dot_dimension_numbers<[1], [0], [0], [1], [0, 0, 1, 1], [], []>} : vector<1x128xbf16>, vector<128x256xbf16>, vector<1x256xf32> -> vector<1x256xf32>
    %293 = arith.addf %288, %292 : vector<1x256xf32>
    %294 = vector.extract_strided_slice %256 {offsets = [20, 0], sizes = [3, 128], strides = [1, 1]} : vector<35x128xf32> to vector<3x128xf32>
    %295 = vector.extract_strided_slice %256 {offsets = [25, 0], sizes = [3, 128], strides = [1, 1]} : vector<35x128xf32> to vector<3x128xf32>
    %296 = arith.maximumf %294, %295 : vector<3x128xf32>
    %297 = vector.extract_strided_slice %296 {offsets = [0, 0], sizes = [1, 128], strides = [1, 1]} : vector<3x128xf32> to vector<1x128xf32>
    %298 = arith.truncf %297 : vector<1x128xf32> to vector<1x128xbf16>
    %c768 = arith.constant 768 : index
    %c0_158 = arith.constant 0 : index
    %299 = vector.load %arg8[%c768, %c0_158] : memref<1152x256xbf16, #tpu.memory_space<vmem>>, vector<128x256xbf16>
    %cst_159 = arith.constant dense<0.000000e+00> : vector<1x256xf32>
    %300 = tpu.matmul %298, %299, %cst_159 {dimension_numbers = #tpu.dot_dimension_numbers<[1], [0], [0], [1], [0, 0, 1, 1], [], []>} : vector<1x128xbf16>, vector<128x256xbf16>, vector<1x256xf32> -> vector<1x256xf32>
    %301 = arith.addf %293, %300 : vector<1x256xf32>
    %302 = vector.extract_strided_slice %296 {offsets = [1, 0], sizes = [1, 128], strides = [1, 1]} : vector<3x128xf32> to vector<1x128xf32>
    %303 = arith.truncf %302 : vector<1x128xf32> to vector<1x128xbf16>
    %c896 = arith.constant 896 : index
    %c0_160 = arith.constant 0 : index
    %304 = vector.load %arg8[%c896, %c0_160] : memref<1152x256xbf16, #tpu.memory_space<vmem>>, vector<128x256xbf16>
    %cst_161 = arith.constant dense<0.000000e+00> : vector<1x256xf32>
    %305 = tpu.matmul %303, %304, %cst_161 {dimension_numbers = #tpu.dot_dimension_numbers<[1], [0], [0], [1], [0, 0, 1, 1], [], []>} : vector<1x128xbf16>, vector<128x256xbf16>, vector<1x256xf32> -> vector<1x256xf32>
    %306 = arith.addf %301, %305 : vector<1x256xf32>
    %307 = vector.extract_strided_slice %296 {offsets = [2, 0], sizes = [1, 128], strides = [1, 1]} : vector<3x128xf32> to vector<1x128xf32>
    %308 = arith.truncf %307 : vector<1x128xf32> to vector<1x128xbf16>
    %c1024 = arith.constant 1024 : index
    %c0_162 = arith.constant 0 : index
    %309 = vector.load %arg8[%c1024, %c0_162] : memref<1152x256xbf16, #tpu.memory_space<vmem>>, vector<128x256xbf16>
    %cst_163 = arith.constant dense<0.000000e+00> : vector<1x256xf32>
    %310 = tpu.matmul %308, %309, %cst_163 {dimension_numbers = #tpu.dot_dimension_numbers<[1], [0], [0], [1], [0, 0, 1, 1], [], []>} : vector<1x128xbf16>, vector<128x256xbf16>, vector<1x256xf32> -> vector<1x256xf32>
    %311 = arith.addf %306, %310 : vector<1x256xf32>
    %cst_164 = arith.constant 5.000000e-01 : f32
    %312 = vector.broadcast %cst_164 : f32 to vector<1x256xf32>
    %313 = arith.mulf %312, %311 : vector<1x256xf32>
    %cst_165 = arith.constant 4.471500e-02 : f32
    %314 = vector.broadcast %cst_165 : f32 to vector<1x256xf32>
    %315 = arith.mulf %314, %311 : vector<1x256xf32>
    %316 = arith.mulf %315, %311 : vector<1x256xf32>
    %317 = arith.mulf %316, %311 : vector<1x256xf32>
    %318 = arith.addf %311, %317 : vector<1x256xf32>
    %cst_166 = arith.constant 0.797884583 : f32
    %319 = vector.broadcast %cst_166 : f32 to vector<1x256xf32>
    %320 = arith.mulf %319, %318 : vector<1x256xf32>
    %321 = math.tanh %320 : vector<1x256xf32>
    %cst_167 = arith.constant 1.000000e+00 : f32
    %322 = vector.broadcast %cst_167 : f32 to vector<1x256xf32>
    %323 = arith.addf %322, %321 : vector<1x256xf32>
    %324 = arith.mulf %313, %323 : vector<1x256xf32>
    %325 = arith.truncf %324 : vector<1x256xf32> to vector<1x256xbf16>
    %c0_168 = arith.constant 0 : index
    %c0_169 = arith.constant 0 : index
    %326 = vector.load %arg10[%c0_168, %c0_169] : memref<256x128xbf16, #tpu.memory_space<vmem>>, vector<256x128xbf16>
    %cst_170 = arith.constant dense<0.000000e+00> : vector<1x128xf32>
    %327 = tpu.matmul %325, %326, %cst_170 {dimension_numbers = #tpu.dot_dimension_numbers<[1], [0], [0], [1], [0, 0, 1, 1], [], []>} : vector<1x256xbf16>, vector<256x128xbf16>, vector<1x128xf32> -> vector<1x128xf32>
    %c0_171 = arith.constant 0 : index
    %c0_172 = arith.constant 0 : index
    %328 = vector.load %arg11[%c0_171, %c0_172] : memref<1x128xf32, #tpu.memory_space<vmem>>, vector<1x128xf32>
    %329 = arith.addf %327, %328 : vector<1x128xf32>
    %c0_173 = arith.constant 0 : index
    %c0_174 = arith.constant 0 : index
    %c0_175 = arith.constant 0 : index
    %330 = vector.load %arg12[%c0_173, %c0_174, %c0_175] : memref<1x1x128xf32, #tpu.memory_space<vmem>>, vector<1x1x128xf32>
    %331 = vector.shape_cast %330 : vector<1x1x128xf32> to vector<1x128xf32>
    %332 = vector.shape_cast %329 : vector<1x128xf32> to vector<1x1x128xf32>
    tpu.vector_store %arg12[%c0_173, %c0_174, %c0_175], %332 {strides = array<i32>} : memref<1x1x128xf32, #tpu.memory_space<vmem>>, vector<1x1x128xf32>,
    return
  }
  func.func @transform_0(%arg0: i32) -> (i32, i32, i32) {
    %c0_i32 = arith.constant 0 : i32
    %c0_i32_0 = arith.constant 0 : i32
    %c0_i32_1 = arith.constant 0 : i32
    return %arg0, %c0_i32, %c0_i32_0 : i32, i32, i32
  }
  func.func @transform_1(%arg0: i32) -> (i32, i32) {
    %c0_i32 = arith.constant 0 : i32
    %c0_i32_0 = arith.constant 0 : i32
    %c0_i32_1 = arith.constant 0 : i32
    return %c0_i32, %c0_i32_0 : i32, i32
  }
  func.func @transform_2(%arg0: i32) -> (i32, i32) {
    %c0_i32 = arith.constant 0 : i32
    %c0_i32_0 = arith.constant 0 : i32
    %c0_i32_1 = arith.constant 0 : i32
    return %c0_i32, %c0_i32_0 : i32, i32
  }
  func.func @transform_3(%arg0: i32) -> (i32, i32) {
    %c0_i32 = arith.constant 0 : i32
    %c0_i32_0 = arith.constant 0 : i32
    %c0_i32_1 = arith.constant 0 : i32
    return %c0_i32, %c0_i32_0 : i32, i32
  }
  func.func @transform_4(%arg0: i32) -> (i32, i32) {
    %c0_i32 = arith.constant 0 : i32
    %c0_i32_0 = arith.constant 0 : i32
    %c0_i32_1 = arith.constant 0 : i32
    return %c0_i32, %c0_i32_0 : i32, i32
  }
  func.func @transform_5(%arg0: i32) -> (i32, i32) {
    %c0_i32 = arith.constant 0 : i32
    %c0_i32_0 = arith.constant 0 : i32
    %c0_i32_1 = arith.constant 0 : i32
    return %c0_i32, %c0_i32_0 : i32, i32
  }
  func.func @transform_6(%arg0: i32) -> (i32, i32) {
    %c0_i32 = arith.constant 0 : i32
    %c0_i32_0 = arith.constant 0 : i32
    %c0_i32_1 = arith.constant 0 : i32
    return %c0_i32, %c0_i32_0 : i32, i32
  }
  func.func @transform_7(%arg0: i32) -> (i32, i32) {
    %c0_i32 = arith.constant 0 : i32
    %c0_i32_0 = arith.constant 0 : i32
    %c0_i32_1 = arith.constant 0 : i32
    return %c0_i32, %c0_i32_0 : i32, i32
  }
  func.func @transform_8(%arg0: i32) -> (i32, i32) {
    %c0_i32 = arith.constant 0 : i32
    %c0_i32_0 = arith.constant 0 : i32
    %c0_i32_1 = arith.constant 0 : i32
    return %c0_i32, %c0_i32_0 : i32, i32
  }
  func.func @transform_9(%arg0: i32) -> (i32, i32) {
    %c0_i32 = arith.constant 0 : i32
    %c0_i32_0 = arith.constant 0 : i32
    %c0_i32_1 = arith.constant 0 : i32
    return %c0_i32, %c0_i32_0 : i32, i32
  }
  func.func @transform_10(%arg0: i32) -> (i32, i32) {
    %c0_i32 = arith.constant 0 : i32
    %c0_i32_0 = arith.constant 0 : i32
    %c0_i32_1 = arith.constant 0 : i32
    return %c0_i32, %c0_i32_0 : i32, i32
  }
  func.func @transform_11(%arg0: i32) -> (i32, i32, i32) {
    %c0_i32 = arith.constant 0 : i32
    %c0_i32_0 = arith.constant 0 : i32
    %c0_i32_1 = arith.constant 0 : i32
    return %arg0, %c0_i32, %c0_i32_0 : i32, i32, i32
  }
}

</mosaic_0001>

<bundles_post_ra>
// kernel: custom_cnn_forward.1
= control target key start
LH: loop header
LB: loop body
LE: loop exit
PB: predicated region body
PF: predicated region fallthrough
CT: control target
= control target key end

     0   :  { %s21274_s0 = inlined_call_operand.vmem [shape: f32[2,904,1], index: 0, kind: input, shape index: {}]   ;;  %s21275_s1 = inlined_call_operand.vmem [shape: f32[9,32], index: 1, kind: input, shape index: {}]   ;;  %s21276_s2 = inlined_call_operand.vmem [shape: f32[1,32], index: 2, kind: input, shape index: {}]   ;;  %s21277_s3 = inlined_call_operand.vmem [shape: bf16[288,64], index: 3, kind: input, shape index: {}]   ;;  %s21278_s4 = inlined_call_operand.vmem [shape: f32[1,64], index: 4, kind: input, shape index: {}]   ;;  %s21279_s5 = inlined_call_operand.vmem [shape: bf16[576,128], index: 5, kind: input, shape index: {}]   ;;  %s21280_s6 = inlined_call_operand.vmem [shape: f32[1,128], index: 6, kind: input, shape index: {}]   ;;  %s21281_s7 = inlined_call_operand.vmem [shape: bf16[1152,256], index: 7, kind: input, shape index: {}]   ;;  %s21282_s8 = inlined_call_operand.vmem [shape: f32[1,256], index: 8, kind: input, shape index: {}]   ;;  %s21283_s9 = inlined_call_operand.vmem [shape: bf16[256,128], index: 9, kind: input, shape index: {}]   ;;  %s21284_s10 = inlined_call_operand.vmem [shape: f32[1,128], index: 10, kind: input, shape index: {}]   ;;  %s21285_s11 = inlined_call_operand.hbm [shape: f32[2,1,128], index: 11, kind: output, shape index: {}]  }
   0x1   :  { %21479 = sst [smem:[#allocation28_spill]] %s21274_s0 }
   0x2   :  { %16 = vsyncpa [#allocation8], 0 }
   0x3   :  { %18 = vsyncpa [#allocation8 + $0x1], 0  ;;  %s14360_s17 = smov 0   ;;  %s14362_s18 = smov 0  }
   0x4   :  { %s14364_s19 = smov 0   ;;  %s14366_s20 = smov 0  }
   0x5 LB: > { %s14381_s21 = sadd.s32 4294967295, %s14293_s20   ;;  %s12411_s22 = sadd.s32 4294967294, %s14293_s20   ;;  %s14293_s20 = sphi %s14366_s20, %s21922_s20   ;;  %s14289_s19 = sphi %s14364_s19, %s21921_s19   ;;  %s14285_s18 = sphi %s14362_s18, %s21920_s18   ;;  %s14281_s17 = sphi %s14360_s17, %s21919_s17  }
   0x6   : > { %s14385_s23 = sadd.s32 1, %s14293_s20   ;;  %s267_s24 = sadd.s32 1, %s14289_s19 }
   0x7   : > { %s264_s25 = ssub.s32 %s14293_s20, %s14385_s23  ;;  %p277_p0 = scmp.ne.s32.totalorder %s14289_s19, %s14285_s18 }
   0x8   : > { %p265_p1 = scmp.eq.s32.totalorder %s264_s25, 0  ;;  %p278_p2 = scmp.eq.s32.totalorder %s14381_s21, 1 }
   0x9   : > { %p283_p3 = scmp.ne.s32.totalorder %s14285_s18, %s14281_s17  ;;  %p284_p4 = scmp.eq.s32.totalorder %s12411_s22, 1 }
   0xa   : > { %s14396_s26 = scalar_select %p265_p1, %s14289_s19, %s267_s24  }
   0xb   : > { %p14398_p5 = por %p278_p2, %p277_p0  ;;  %p14402_p6 = por %p284_p4, %p283_p3 }
   0xc   : > { %p12414_p7 = scmp.ge.s32.totalorder %s14293_s20, 1  ;;  %p340_p8 = scmp.lt.s32.totalorder %s14293_s20, 3 }
   0xe   : > { %p341_p9 = pnand %p12414_p7, %p340_p8 }
  0x10   : > { %344 = sbr.rel (%p341_p9) target bundleno = 3021 (0xbcd), region = 64 }
  0x17   : > { %p379_p10 = scmp.lt.s32.totalorder %s14381_s21, 1  ;;  %v21286_v0 = vmov 0   ;;  %s21482_s0 = sld [smem:[#allocation28_spill]]  ;;  %vm1507_vm0 = vcmask 1046528   ;;  %vm2146_vm1 = vcmask 1045504   ;;  %vm2800_vm2 = vcmask 1041408  }
  0x18   : > { %13872 = vset.pattern.permute.xlu1 %v21286_v0  ;;  %13871 = vset.pattern.permute.xlu0 %v21286_v0  ;;  %vm3439_vm3 = vcmask 1040384   ;;  %vm4313_vm4 = vcmask 1043456   ;;  %vm4952_vm5 = vcmask 1042432   ;;  %vm385_vm6 = vcmask 261120   ;;  %s377_s15 = sand.u32 1, %s14285_s18   ;;  %s12813_s24 = sshll.u32 %s14381_s21, 4 }
  0x19   : > { %s380_s29 = scalar_select %p379_p10, %s14381_s21, 1  ;;  %vm6611_vm7 = vcmask 259072   ;;  %vm6627_vm8 = vcmask 261126   ;;  %vm6630_vm9 = vcmask 257024   ;;  %vm6646_vm10 = vcmask 261124  }
  0x1a   : > { %vm6649_vm11 = vcmask 254976   ;;  %vm6660_vm12 = vcmask 261122   ;;  %vm419_vm13 = vcmask 523264   ;;  %vm14297_vm14 = vmmov 0   ;;  %s378_s25 = scalar_lea.vmem [#allocation7], %s377_s15  ;;  %s12344_s13 = scalar_lea.sflag [#allocation8], %s377_s15 }
  0x1b   : > { %s13827_s30 = smul.u32 904, %s380_s29  ;;  %vm9374_vm15 = vcmask 522240   ;;  %s12356_s29 = sshll.u32 %s378_s25, 4  ;;  %s21234_s29 = int_to_ptr.vmem [resolvable:$true] %s12356_s29 }
  0x1c   : > { %s14231_s16 = scalar_lea.vmem %s21234_s29, 16  ;;  %s14299_s21 = smov [#allocation7]  }
  0x1d   : > { %s14415_s14 = scalar_lea.vmem %s21482_s0, %s13827_s30  ;;  %p14232_p11 = scmp.ne.s32.totalorder %s21234_s29, %s14231_s16 }
  0x1e   : > { %v436_v1 = vld [vmem:[%s14415_s14 + $0x20] sm:$0xff]  ;;  %v434_v2 = vld [vmem:[%s14415_s14 + $0x10] sm:$0xff]  ;;  %v437_v3 = vld [vmem:[%s14415_s14 + $0x28] sm:$0xff]  ;;  %s14235_s22 = sshll.u32 %s14299_s21, 4  ;;  %s14236_s22 = int_to_ptr.vmem [resolvable:$false] %s14235_s22 }
  0x1f   : > { %567 = vperm.xlu1 %13872, %v436_v1   ;;  %557 = vperm.xlu0 %13871, %v434_v2   ;;  %v435_v4 = vld [vmem:[%s14415_s14 + $0x18] sm:$0xff]  ;;  %v438_v6 = vld [vmem:[%s14415_s14 + $0x30] sm:$0xff]  ;;  %v440_v7 = vld [vmem:[%s14415_s14 + $0x40] sm:$0xff]  ;;  %p14233_p12 = pnand %p14232_p11, %p14398_p5  ;;  %s14237_s0 = scalar_lea.vmem %s14236_s22, 32 }
  0x20   : > { %v439_v5 = vld [vmem:[%s14415_s14 + $0x38] sm:$0xff]  ;;  %v432_v8 = vld [vmem:[%s14415_s14] sm:$0xff]  ;;  %v433_v9 = vld [vmem:[%s14415_s14 + $0x8] sm:$0xff]  ;;  %p14238_p0 = scmp.lt.s32.totalorder %s21234_s29, %s14236_s22  ;;  %p14239_p1 = scmp.lt.s32.totalorder %s14237_s0, %s14231_s16 }
  0x21   : > { %v441_v10 = vld [vmem:[%s14415_s14 + $0x48] sm:$0xff]  ;;  %v442_v11 = vld [vmem:[%s14415_s14 + $0x50] sm:$0xff]  ;;  %v443_v12 = vld [vmem:[%s14415_s14 + $0x58] sm:$0xff]  ;;  %p14234_p13 = pneg %p14233_p12 }
  0x22   : > { %v444_v13 = vld [vmem:[%s14415_s14 + $0x60] sm:$0xff]  ;;  %v445_v14 = vld [vmem:[%s14415_s14 + $0x68] sm:$0xff]  ;;  %v446_v15 = vld [vmem:[%s14415_s14 + $0x70] sm:$0xff]  ;;  %p14240_p2 = por %p14239_p1, %p14238_p0 }
  0x23   : > { %572 = vperm.xlu1 %13872, %v437_v3   ;;  %562 = vperm.xlu0 %13871, %v435_v4   ;;  %v447_v16 = vld [vmem:[%s14415_s14 + $0x78] sm:$0xff]  ;;  %v448_v17 = vld [vmem:[%s14415_s14 + $0x80] sm:$0xff]  ;;  %v450_v18 = vld [vmem:[%s14415_s14 + $0x90] sm:$0xff] }
  0x24   : > { %v451_v19 = vld [vmem:[%s14415_s14 + $0x98] sm:$0xff]  ;;  %v452_v20 = vld [vmem:[%s14415_s14 + $0xa0] sm:$0xff]  ;;  %v453_v21 = vld [vmem:[%s14415_s14 + $0xa8] sm:$0xff]  ;;  %p14241_p3 = pnand %p14240_p2, %p14234_p13 }
  0x25   : > { %v454_v22 = vld [vmem:[%s14415_s14 + $0xb0] sm:$0xff]  ;;  %v455_v23 = vld [vmem:[%s14415_s14 + $0xb8] sm:$0xff]  ;;  %v456_v24 = vld [vmem:[%s14415_s14 + $0xc0] sm:$0xff] }
  0x26   : > { %v449_v25 = vld [vmem:[%s14415_s14 + $0x88] sm:$0xff]  ;;  %v458_v27 = vld [vmem:[%s14415_s14 + $0xd0] sm:$0xff]  ;;  %v459_v28 = vld [vmem:[%s14415_s14 + $0xd8] sm:$0xff] }
  0x27   : > { %582 = vperm.xlu1 %13872, %v439_v5   ;;  %577 = vperm.xlu0 %13871, %v438_v6   ;;  %v457_v26 = vld [vmem:[%s14415_s14 + $0xc8] sm:$0xff]  ;;  %v460_v29 = vld [vmem:[%s14415_s14 + $0xe0] sm:$0xff]  ;;  %v462_v31 = vld [vmem:[%s14415_s14 + $0xf0] sm:$0xff] }
  0x28   : > { %v461_v30 = vld [vmem:[%s14415_s14 + $0xe8] sm:$0xff]  ;;  %v464_v32 = vld [vmem:[%s14415_s14 + $0x100] sm:$0xff]  ;;  %v466_v34 = vld [vmem:[%s14415_s14 + $0x110] sm:$0xff] }
  0x29   : > { %v465_v33 = vld [vmem:[%s14415_s14 + $0x108] sm:$0xff]  ;;  %v467_v35 = vld [vmem:[%s14415_s14 + $0x118] sm:$0xff]  ;;  %v468_v36 = vld [vmem:[%s14415_s14 + $0x120] sm:$0xff] }
  0x2a   : > { %v469_v37 = vld [vmem:[%s14415_s14 + $0x128] sm:$0xff]  ;;  %v470_v38 = vld [vmem:[%s14415_s14 + $0x130] sm:$0xff]  ;;  %v463_v39 = vld [vmem:[%s14415_s14 + $0xf8] sm:$0xff] }
  0x2b   : > { %587 = vperm.xlu0 %13871, %v440_v7   ;;  %547 = vperm.xlu1 %13872, %v432_v8   ;;  %v471_v40 = vld [vmem:[%s14415_s14 + $0x138] sm:$0xff]  ;;  %v472_v41 = vld [vmem:[%s14415_s14 + $0x140] sm:$0xff]  ;;  %v473_v42 = vld [vmem:[%s14415_s14 + $0x148] sm:$0xff] }
  0x2c   : > { %v474_v43 = vld [vmem:[%s14415_s14 + $0x150] sm:$0xff]  ;;  %v475_v44 = vld [vmem:[%s14415_s14 + $0x158] sm:$0xff]  ;;  %v476_v45 = vld [vmem:[%s14415_s14 + $0x160] sm:$0xff] }
  0x2d   : > { %v477_v46 = vld [vmem:[%s14415_s14 + $0x168] sm:$0xff]  ;;  %v478_v47 = vld [vmem:[%s14415_s14 + $0x170] sm:$0xff]  ;;  %v480_v48 = vld [vmem:[%s14415_s14 + $0x180] sm:$0xff] }
  0x2e   : > { %v481_v49 = vld [vmem:[%s14415_s14 + $0x188] sm:$0xff]  ;;  %v482_v50 = vld [vmem:[%s14415_s14 + $0x190] sm:$0xff]  ;;  %v483_v51 = vld [vmem:[%s14415_s14 + $0x198] sm:$0xff] }
  0x2f   : > { %552 = vperm.xlu0 %13871, %v433_v9   ;;  %592 = vperm.xlu1 %13872, %v441_v10   ;;  %v484_v52 = vld [vmem:[%s14415_s14 + $0x1a0] sm:$0xff]  ;;  %v485_v53 = vld [vmem:[%s14415_s14 + $0x1a8] sm:$0xff]  ;;  %v486_v54 = vld [vmem:[%s14415_s14 + $0x1b0] sm:$0xff] }
  0x30   : > { %v479_v55 = vld [vmem:[%s14415_s14 + $0x178] sm:$0xff]  ;;  %v488_v57 = vld [vmem:[%s14415_s14 + $0x1c0] sm:$0xff]  ;;  %v489_v58 = vld [vmem:[%s14415_s14 + $0x1c8] sm:$0xff] }
  0x31   : > { %v487_v56 = vld [vmem:[%s14415_s14 + $0x1b8] sm:$0xff]  ;;  %v490_v59 = vld [vmem:[%s14415_s14 + $0x1d0] sm:$0xff]  ;;  %v492_v61 = vld [vmem:[%s14415_s14 + $0x1e0] sm:$0xff] }
  0x32   : > { %v491_v60 = vld [vmem:[%s14415_s14 + $0x1d8] sm:$0xff]  ;;  %v494_v62 = vld [vmem:[%s14415_s14 + $0x1f0] sm:$0xff]  ;;  %v496_v1 = vld [vmem:[%s14415_s14 + $0x200] sm:$0xff] }
  0x33   : > { %597 = vperm.xlu0 %13871, %v442_v11   ;;  %602 = vperm.xlu1 %13872, %v443_v12   ;;  %v495_v63 = vld [vmem:[%s14415_s14 + $0x1f8] sm:$0xff]  ;;  %v14484_v2 = vld [vmem:[%s21275_s1 + $0x1] ss:$0 sm:$0xff]  ;;  %v14489_v3 = vld [vmem:[%s21275_s1 + $0x2] ss:$0 sm:$0xff] }
  0x34   : > { %v14494_v4 = vld [vmem:[%s21275_s1 + $0x3] ss:$0 sm:$0xff]  ;;  %v497_v5 = vld [vmem:[%s14415_s14 + $0x208] sm:$0xff]  ;;  %v14500_v6 = vld [vmem:[%s21275_s1 + $0x4] ss:$0 sm:$0xff] }
  0x35   : > { %v498_v7 = vld [vmem:[%s14415_s14 + $0x210] sm:$0xff]  ;;  %v14506_v8 = vld [vmem:[%s21275_s1] ss:$0 sm:$0xff]  ;;  %v14511_v9 = vld [vmem:[%s21275_s1 + $0x5] ss:$0 sm:$0xff] }
  0x37   : > { %607 = vperm.xlu0 %13871, %v444_v13   ;;  %612 = vperm.xlu1 %13872, %v445_v14  }
  0x3b   : > { %617 = vperm.xlu0 %13871, %v446_v15   ;;  %622 = vperm.xlu1 %13872, %v447_v16  }
  0x3f   : > { %627 = vperm.xlu0 %13871, %v448_v17   ;;  %637 = vperm.xlu1 %13872, %v450_v18   ;;  %v499_v17 = vld [vmem:[%s14415_s14 + $0x218] sm:$0xff] }
  0x43   : > { %642 = vperm.xlu0 %13871, %v451_v19   ;;  %647 = vperm.xlu1 %13872, %v452_v20  }
  0x47   : > { %652 = vperm.xlu0 %13871, %v453_v21   ;;  %657 = vperm.xlu1 %13872, %v454_v22   ;;  %v500_v22 = vld [vmem:[%s14415_s14 + $0x220] sm:$0xff] }
  0x4b   : > { %662 = vperm.xlu0 %13871, %v455_v23   ;;  %667 = vperm.xlu1 %13872, %v456_v24  }
  0x4f   : > { %632 = vperm.xlu0 %13871, %v449_v25   ;;  %672 = vperm.xlu1 %13872, %v457_v26  }
  0x53   : > { %677 = vperm.xlu0 %13871, %v458_v27   ;;  %682 = vperm.xlu1 %13872, %v459_v28  }
  0x57   : > { %687 = vperm.xlu0 %13871, %v460_v29   ;;  %692 = vperm.xlu1 %13872, %v461_v30  }
  0x5b   : > { %697 = vperm.xlu0 %13871, %v462_v31   ;;  %707 = vperm.xlu1 %13872, %v464_v32  }
  0x5f   : > { %712 = vperm.xlu0 %13871, %v465_v33   ;;  %717 = vperm.xlu1 %13872, %v466_v34  }
  0x63   : > { %722 = vperm.xlu0 %13871, %v467_v35   ;;  %727 = vperm.xlu1 %13872, %v468_v36  }
  0x67   : > { %732 = vperm.xlu0 %13871, %v469_v37   ;;  %737 = vperm.xlu1 %13872, %v470_v38   ;;  %v493_v37 = vld [vmem:[%s14415_s14 + $0x1e8] sm:$0xff] }
  0x6b   : > { %702 = vperm.xlu0 %13871, %v463_v39   ;;  %742 = vperm.xlu1 %13872, %v471_v40  }
  0x6f   : > { %747 = vperm.xlu0 %13871, %v472_v41   ;;  %752 = vperm.xlu1 %13872, %v473_v42   ;;  %v501_v42 = vld [vmem:[%s14415_s14 + $0x228] sm:$0xff] }
  0x73   : > { %757 = vperm.xlu0 %13871, %v474_v43   ;;  %762 = vperm.xlu1 %13872, %v475_v44  }
  0x77   : > { %767 = vperm.xlu0 %13871, %v476_v45   ;;  %772 = vperm.xlu1 %13872, %v477_v46  }
  0x7b   : > { %777 = vperm.xlu0 %13871, %v478_v47   ;;  %787 = vperm.xlu1 %13872, %v480_v48  }
  0x7f   : > { %792 = vperm.xlu0 %13871, %v481_v49   ;;  %797 = vperm.xlu1 %13872, %v482_v50  }
  0x83   : > { %802 = vperm.xlu0 %13871, %v483_v51   ;;  %807 = vperm.xlu1 %13872, %v484_v52  }
  0x87   : > { %812 = vperm.xlu0 %13871, %v485_v53   ;;  %817 = vperm.xlu1 %13872, %v486_v54  }
  0x8b   : > { %782 = vperm.xlu0 %13871, %v479_v55   ;;  %822 = vperm.xlu1 %13872, %v487_v56  }
  0x8f   : > { %827 = vperm.xlu0 %13871, %v488_v57   ;;  %832 = vperm.xlu1 %13872, %v489_v58   ;;  %v502_v57 = vld [vmem:[%s14415_s14 + $0x230] sm:$0xff] }
  0x93   : > { %837 = vperm.xlu0 %13871, %v490_v59   ;;  %842 = vperm.xlu1 %13872, %v491_v60  }
  0x97   : > { %847 = vperm.xlu0 %13871, %v492_v61   ;;  %857 = vperm.xlu1 %13872, %v494_v62   ;;  %v503_v62 = vld [vmem:[%s14415_s14 + $0x238] sm:$0xff] }
  0x9b   : > { %862 = vperm.xlu0 %13871, %v495_v63   ;;  %867 = vperm.xlu1 %13872, %v496_v1  }
  0x9e   : > { %v568_v10 = vpop.permute.xlu1 %567  ;;  %v558_v11 = vpop.permute.xlu0 %557 }
  0x9f   : > { %v1299_v12 = vmul.f32 %v14484_v2, %v568_v10  ;;  %v1938_v13 = vmul.f32 %v14489_v3, %v568_v10  ;;  %v14516_v14 = vmul.f32 %v14494_v4, %v568_v10  ;;  %872 = vperm.xlu0 %13871, %v497_v5   ;;  %v14519_v15 = vmul.f32 %v14500_v6, %v568_v10 }
  0xa0   : > { %v14522_v16 = vmul.f32 %v14484_v2, %v558_v11  ;;  %877 = vperm.xlu1 %13872, %v498_v7   ;;  %v1079_v18 = vmul.f32 %v14506_v8, %v568_v10  ;;  %v14527_v19 = vmul.f32 %v14511_v9, %v568_v10  ;;  %v1077_v20 = vmul.f32 %v14506_v8, %v558_v11 }
  0xa1   : > { %v14531_v21 = vmul.f32 %v14489_v3, %v558_v11  ;;  %v1515_v23 = vrot.slane %v1299_v12, 1  ;;  %v2154_v24 = vrot.slane %v1938_v13, 2  ;;  %v2802_v25 = vrot.slane %v14516_v14, 6 }
  0xa2   : > { %v3441_v26 = vrot.slane %v14519_v15, 7  ;;  %v573_v27 = vpop.permute.xlu1 %572  ;;  %v563_v28 = vpop.permute.xlu0 %562  ;;  %v1511_v29 = vrot.slane %v14522_v16, 1 }
  0xa3   : > { %v2150_v30 = vrot.slane %v14531_v21, 2  ;;  %v14539_v31 = vmul.f32 %v14484_v2, %v573_v27  ;;  %v14542_v32 = vmul.f32 %v14489_v3, %v573_v27  ;;  %882 = vperm.xlu0 %13871, %v499_v17   ;;  %v14545_v33 = vmul.f32 %v14506_v8, %v573_v27 }
  0xa4   : > { %v14548_v34 = vmul.f32 %v14494_v4, %v573_v27  ;;  %v14551_v35 = vmul.f32 %v14500_v6, %v573_v27  ;;  %v14554_v36 = vmul.f32 %v14511_v9, %v573_v27  ;;  %887 = vperm.xlu1 %13872, %v500_v22   ;;  %v1298_v40 = vmul.f32 %v14484_v2, %v563_v28 }
  0xa5   : > { %v1517_v38 = vrot.slane %v14539_v31, 1  ;;  %v2156_v39 = vrot.slane %v14542_v32, 2  ;;  %v1937_v41 = vmul.f32 %v14489_v3, %v563_v28  ;;  %v1078_v44 = vmul.f32 %v14506_v8, %v563_v28 }
  0xa6   : > { %v2804_v43 = vrot.slane %v14548_v34, 6  ;;  %v14565_v45 = vmul.f32 %v14494_v4, %v563_v28  ;;  %v14568_v46 = vmul.f32 %v14500_v6, %v563_v28  ;;  %v14570_v47 = vpop.permute.xlu1 %582  ;;  %v578_v48 = vpop.permute.xlu0 %577  ;;  %v3443_v50 = vrot.slane %v14551_v35, 7 }
  0xa7   : > { %v1518_v49 = vsel %vm1507_vm0, %v1515_v23, %v1517_v38  ;;  %v1513_v51 = vrot.slane %v1298_v40, 1  ;;  %v2152_v52 = vrot.slane %v1937_v41, 2  ;;  %852 = vperm.xlu0 %13871, %v493_v37   ;;  %v2157_v54 = vsel %vm2146_vm1, %v2154_v24, %v2156_v39  ;;  %v505_v41 = vld [vmem:[%s14415_s14 + $0x248] sm:$0xff] }
  0xa8   : > { %v1828_v53 = vadd.f32 %v1518_v49, %v1079_v18  ;;  %v2801_v55 = vrot.slane %v14565_v45, 6  ;;  %v3440_v56 = vrot.slane %v14568_v46, 7  ;;  %892 = vperm.xlu1 %13872, %v501_v42   ;;  %v14591_v61 = vmul.f32 %v14506_v8, %v14570_v47 }
  0xa9   : > { %v1514_v58 = vsel %vm1507_vm0, %v1511_v29, %v1513_v51  ;;  %v1516_v59 = vsel %vm1507_vm0, %v1513_v51, %v1515_v23  ;;  %v2153_v60 = vsel %vm2146_vm1, %v2150_v30, %v2152_v52  ;;  %v2155_v5 = vsel %vm2146_vm1, %v2152_v52, %v2154_v24  ;;  %v504_v24 = vld [vmem:[%s14415_s14 + $0x240] sm:$0xff] }
  0xaa   : > { %v1826_v63 = vadd.f32 %v1514_v58, %v1077_v20  ;;  %v1827_v1 = vadd.f32 %v1516_v59, %v1078_v44  ;;  %v1302_v7 = vmul.f32 %v14484_v2, %v14570_v47  ;;  %v14597_v10 = vadd.f32 %v2157_v54, %v1828_v53  ;;  %v14613_v23 = vpop.permute.xlu0 %587 }
  0xab   : > { %v14601_v11 = vmul.f32 %v14489_v3, %v14570_v47  ;;  %v14605_v12 = vmul.f32 %v14494_v4, %v14570_v47  ;;  %v14609_v13 = vmul.f32 %v14500_v6, %v14570_v47  ;;  %897 = vperm.xlu0 %13871, %v502_v57   ;;  %v3869_v22 = vmul.f32 %v14511_v9, %v14570_v47 }
  0xac   : > { %v2465_v17 = vadd.f32 %v2153_v60, %v1826_v63  ;;  %v2466_v18 = vadd.f32 %v2155_v5, %v1827_v1  ;;  %v1521_v20 = vrot.slane %v1302_v7, 1  ;;  %902 = vperm.xlu1 %13872, %v503_v62   ;;  %v1081_v37 = vmul.f32 %v14506_v8, %v578_v48  ;;  %v506_v63 = vld [vmem:[%s14415_s14 + $0x250] sm:$0xff] }
  0xad   : > { %v2160_v27 = vrot.slane %v14601_v11, 2  ;;  %v2808_v28 = vrot.slane %v14605_v12, 6  ;;  %v1301_v40 = vmul.f32 %v14484_v2, %v578_v48  ;;  %v3447_v42 = vrot.slane %v14609_v13, 7  ;;  %v507_v11 = vld [vmem:[%s14415_s14 + $0x258] sm:$0xff] }
  0xae   : > { %v1940_v44 = vmul.f32 %v14489_v3, %v578_v48  ;;  %v2591_v49 = vmul.f32 %v14494_v4, %v578_v48  ;;  %v3230_v51 = vmul.f32 %v14500_v6, %v578_v48  ;;  %v3868_v53 = vmul.f32 %v14511_v9, %v578_v48 }
  0xaf   : > { %v1519_v52 = vrot.slane %v1301_v40, 1  ;;  %v14628_v54 = vmul.f32 %v14484_v2, %v14613_v23  ;;  %v14632_v57 = vmul.f32 %v14489_v3, %v14613_v23  ;;  %907 = vperm.xlu0 %13871, %v504_v24   ;;  %v14636_v62 = vmul.f32 %v14506_v8, %v14613_v23 }
  0xb0   : > { %v2158_v58 = vrot.slane %v1940_v44, 2  ;;  %v2806_v59 = vrot.slane %v2591_v49, 6  ;;  %v3445_v60 = vrot.slane %v3230_v51, 7  ;;  %912 = vperm.xlu1 %13872, %v505_v41   ;;  %v14646_v7 = vmul.f32 %v14494_v4, %v14613_v23  ;;  %v548_v49 = vpop.permute.xlu1 %547  ;;  %v508_v51 = vld [vmem:[%s14415_s14 + $0x260] sm:$0xff] }
  0xb1   : > { %v1520_v48 = vsel %vm1507_vm0, %v1517_v38, %v1519_v52  ;;  %v1522_v1 = vsel %vm1507_vm0, %v1519_v52, %v1521_v20  ;;  %v1523_v5 = vrot.slane %v14628_v54, 1  ;;  %v2162_v31 = vrot.slane %v14632_v57, 2 }
  0xb2   : > { %v1829_v12 = vadd.f32 %v1520_v48, %v14545_v33  ;;  %v1830_v13 = vadd.f32 %v1522_v1, %v1081_v37  ;;  %v2159_v24 = vsel %vm2146_vm1, %v2156_v39, %v2158_v58  ;;  %v2161_v38 = vsel %vm2146_vm1, %v2158_v58, %v2160_v27 }
  0xb3   : > { %v2807_v40 = vsel %vm2800_vm2, %v2804_v43, %v2806_v59  ;;  %v2809_v41 = vsel %vm2800_vm2, %v2806_v59, %v2808_v28  ;;  %v3446_v33 = vsel %vm3439_vm3, %v3443_v50, %v3445_v60  ;;  %917 = vperm.xlu0 %13871, %v506_v63   ;;  %v3448_v44 = vsel %vm3439_vm3, %v3445_v60, %v3447_v42 }
  0xb4   : > { %v14662_v37 = vadd.f32 %v2159_v24, %v1829_v12  ;;  %v3119_v32 = vadd.f32 %v2807_v40, %v2465_v17  ;;  %v3120_v39 = vadd.f32 %v2809_v41, %v2466_v18  ;;  %922 = vperm.xlu1 %13872, %v507_v11   ;;  %v14666_v52 = vadd.f32 %v2161_v38, %v1830_v13  ;;  %v510_v17 = vld [vmem:[%s14415_s14 + $0x270] sm:$0xff]  ;;  %v14702_v40 = vld [vmem:[%s21275_s1 + $0x7] ss:$0 sm:$0xff]  ;;  %v511_v41 = vld [vmem:[%s14415_s14 + $0x278] sm:$0xff] }
  0xb5   : > { %v1524_v58 = vsel %vm1507_vm0, %v1521_v20, %v1523_v5  ;;  %v2810_v59 = vrot.slane %v14646_v7, 6  ;;  %v14674_v63 = vmul.f32 %v14500_v6, %v14613_v23  ;;  %v2163_v1 = vsel %vm2146_vm1, %v2160_v27, %v2162_v31 }
  0xb6   : > { %v3758_v18 = vadd.f32 %v3446_v33, %v3119_v32  ;;  %v3759_v60 = vadd.f32 %v3448_v44, %v3120_v39  ;;  %v1831_v48 = vadd.f32 %v1524_v58, %v14591_v61  ;;  %v3870_v12 = vmul.f32 %v14511_v9, %v14613_v23  ;;  %v14714_v32 = vld [vmem:[%s21275_s1 + $0x8] ss:$0 sm:$0xff]  ;;  %v512_v39 = vld [vmem:[%s14415_s14 + $0x280] sm:$0xff] }
  0xb7   : > { %v2811_v20 = vsel %vm2800_vm2, %v2808_v28, %v2810_v59  ;;  %v3449_v11 = vrot.slane %v14674_v63, 7  ;;  %v1295_v13 = vmul.f32 %v14484_v2, %v548_v49  ;;  %927 = vperm.xlu0 %13871, %v508_v51   ;;  %v1075_v27 = vmul.f32 %v14506_v8, %v548_v49  ;;  %v14697_v28 = vld [vmem:[%s21275_s1 + $0x6] ss:$0 sm:$0xff] }
  0xb8   : > { %v14688_v24 = vadd.f32 %v3868_v53, %v3758_v18  ;;  %v14690_v61 = vadd.f32 %v3869_v22, %v3759_v60  ;;  %v3121_v38 = vadd.f32 %v2811_v20, %v14597_v10  ;;  %937 = vperm.xlu1 %13872, %v510_v17   ;;  %v14705_v53 = vadd.f32 %v2163_v1, %v1831_v48  ;;  %v514_v60 = vld [vmem:[%s14415_s14 + $0x290] sm:$0xff] }
  0xb9   : > { %v3450_v10 = vsel %vm3439_vm3, %v3447_v42, %v3449_v11  ;;  %v1508_v22 = vrot.slane %v1295_v13, 1  ;;  %v1934_v33 = vmul.f32 %v14489_v3, %v548_v49  ;;  %v14722_v51 = vsel %vm2800_vm2, %v2801_v55, %v2802_v25  ;;  %v513_v55 = vld [vmem:[%s14415_s14 + $0x288] sm:$0xff] }
  0xba   : > { %v3760_v44 = vadd.f32 %v3450_v10, %v3121_v38  ;;  %v14729_v42 = vsel %vm2800_vm2, %v2802_v25, %v2804_v43  ;;  %v14736_v49 = vsel %vm3439_vm3, %v3440_v56, %v3441_v26  ;;  %v14743_v45 = vsel %vm3439_vm3, %v3441_v26, %v3443_v50  ;;  %v553_v43 = vpop.permute.xlu0 %552  ;;  %v593_v50 = vpop.permute.xlu1 %592 }
  0xbb   : > { %v4101_v14 = vmul.f32 %v14697_v28, %v14570_v47  ;;  %v14749_v25 = vmul.f32 %v14697_v28, %v14613_v23  ;;  %v4740_v34 = vmul.f32 %v14702_v40, %v14570_v47  ;;  %942 = vperm.xlu0 %13871, %v511_v41   ;;  %v2147_v46 = vrot.slane %v1934_v33, 2 }
  0xbc   : > { %v14755_v15 = vmul.f32 %v14702_v40, %v14613_v23  ;;  %v5379_v26 = vmul.f32 %v14714_v32, %v14570_v47  ;;  %v14761_v35 = vmul.f32 %v14714_v32, %v14613_v23  ;;  %947 = vperm.xlu1 %13872, %v512_v39   ;;  %v14764_v56 = vadd.f32 %v3870_v12, %v3760_v44  ;;  %v515_v44 = vld [vmem:[%s14415_s14 + $0x298] sm:$0xff] }
  0xbd   : > { %v4314_v58 = vrot.slane %v4101_v14, 4  ;;  %v21289_v17 = vrot.slane %v14749_v25, 4  ;;  %v4953_v18 = vrot.slane %v4740_v34, 5  ;;  %v1076_v47 = vmul.f32 %v14506_v8, %v553_v43 }
  0xbe   : > { %v21288_v48 = vrot.slane %v14755_v15, 5  ;;  %v5592_v1 = vrot.slane %v14761_v35, 6  ;;  %v1296_v23 = vmul.f32 %v14484_v2, %v553_v43  ;;  %v5591_v12 = vrot.slane %v5379_v26, 6 }
  0xbf   : > { %v14775_v20 = vsel %vm4313_vm4, %v4314_v58, %v21289_v17  ;;  %v1935_v13 = vmul.f32 %v14489_v3, %v553_v43  ;;  %v14779_v38 = vmul.f32 %v14484_v2, %v593_v50  ;;  %952 = vperm.xlu0 %13871, %v513_v55   ;;  %v14787_v33 = vmul.f32 %v14506_v8, %v593_v50  ;;  %v516_v55 = vld [vmem:[%s14415_s14 + $0x2a0] sm:$0xff] }
  0xc0   : > { %v14784_v41 = vsel %vm4952_vm5, %v4953_v18, %v21288_v48  ;;  %v1509_v10 = vrot.slane %v1296_v23, 1  ;;  %v14790_v39 = vmul.f32 %v14489_v3, %v593_v50  ;;  %957 = vperm.xlu1 %13872, %v514_v60   ;;  %v14795_v43 = vmul.f32 %v14494_v4, %v593_v50 }
  0xc1   : > { %v2148_v14 = vrot.slane %v1935_v13, 2  ;;  %v1525_v34 = vrot.slane %v14779_v38, 1  ;;  %v14798_v26 = vmul.f32 %v14500_v6, %v593_v50  ;;  %v14804_v58 = vsel %vm2800_vm2, %v5591_v12, %v5592_v1 }
  0xc2   : > { %v1510_v18 = vsel %vm1507_vm0, %v1508_v22, %v1509_v10  ;;  %v1512_v60 = vsel %vm1507_vm0, %v1509_v10, %v1511_v29  ;;  %v2164_v23 = vrot.slane %v14790_v39, 2  ;;  %v3871_v17 = vmul.f32 %v14511_v9, %v593_v50  ;;  %v509_v22 = vld [vmem:[%s14415_s14 + $0x268] sm:$0xff] }
  0xc3   : > { %v1824_v13 = vadd.f32 %v1510_v18, %v1075_v27  ;;  %v1825_v0 = vadd.f32 %v1512_v60, %v1076_v47  ;;  %v2149_v48 = vsel %vm2146_vm1, %v2147_v46, %v2148_v14  ;;  %962 = vperm.xlu0 %13871, %v515_v44   ;;  %v2151_v12 = vsel %vm2146_vm1, %v2148_v14, %v2150_v30  ;;  %v517_v30 = vld [vmem:[%s14415_s14 + $0x2a8] sm:$0xff] }
  0xc4   : > { %v1526_v16 = vsel %vm1507_vm0, %v1523_v5, %v1525_v34  ;;  %v2812_v29 = vrot.slane %v14795_v43, 6  ;;  %v3451_v27 = vrot.slane %v14798_v26, 7  ;;  %967 = vperm.xlu1 %13872, %v516_v55   ;;  %v14826_v21 = vmul.f32 %v14697_v28, %v593_v50 }
  0xc5   : > { %v2463_v46 = vadd.f32 %v2149_v48, %v1824_v13  ;;  %v2464_v47 = vadd.f32 %v2151_v12, %v1825_v0  ;;  %v1832_v10 = vadd.f32 %v1526_v16, %v14636_v62  ;;  %v2165_v54 = vsel %vm2146_vm1, %v2162_v31, %v2164_v23  ;;  %v598_v62 = vpop.permute.xlu0 %597 }
  0xc6   : > { %v2813_v5 = vsel %vm2800_vm2, %v2810_v59, %v2812_v29  ;;  %v14836_v39 = vmul.f32 %v14702_v40, %v593_v50  ;;  %v14839_v0 = vmul.f32 %v14714_v32, %v593_v50  ;;  %v3452_v7 = vsel %vm3439_vm3, %v3449_v11, %v3451_v27  ;;  %v519_v11 = vld [vmem:[%s14415_s14 + $0x2b8] sm:$0xff] }
  0xc7   : > { %v3117_v48 = vadd.f32 %v14722_v51, %v2463_v46  ;;  %v3118_v44 = vadd.f32 %v14729_v42, %v2464_v47  ;;  %v3122_v57 = vadd.f32 %v2813_v5, %v14662_v37  ;;  %932 = vperm.xlu0 %13871, %v509_v22   ;;  %v14849_v31 = vadd.f32 %v2165_v54, %v1832_v10  ;;  %v518_v51 = vld [vmem:[%s14415_s14 + $0x2b0] sm:$0xff] }
  0xc8   : > { %v4317_v59 = vrot.slane %v14826_v21, 4  ;;  %v4956_v50 = vrot.slane %v14836_v39, 5  ;;  %v5594_v14 = vrot.slane %v14839_v0, 6  ;;  %972 = vperm.xlu1 %13872, %v517_v30   ;;  %v14858_v63 = vmul.f32 %v14484_v2, %v598_v62 }
  0xc9   : > { %v3756_v42 = vadd.f32 %v14736_v49, %v3117_v48  ;;  %v3757_v37 = vadd.f32 %v14743_v45, %v3118_v44  ;;  %v3761_v43 = vadd.f32 %v3452_v7, %v3122_v57  ;;  %v21483_v55 = vrot.slane %v14749_v25, 4  ;;  %v603_v7 = vpop.permute.xlu1 %602 }
  0xca   : > { %v21484_v60 = vrot.slane %v14755_v15, 5  ;;  %v14868_v12 = vmul.f32 %v14506_v8, %v598_v62  ;;  %v14871_v49 = vmul.f32 %v14489_v3, %v598_v62  ;;  %v5595_v25 = vsel %vm2800_vm2, %v5592_v1, %v5594_v14 }
  0xcb   : > { %v4318_v18 = vsel %vm4313_vm4, %v21483_v55, %v4317_v59  ;;  %v3971_v45 = vadd.f32 %v14527_v19, %v3756_v42  ;;  %v3972_v16 = vadd.f32 %v14554_v36, %v3757_v37  ;;  %v1527_v15 = vrot.slane %v14858_v63, 1  ;;  %977 = vperm.xlu0 %13871, %v518_v51   ;;  %v520_v19 = vld [vmem:[%s14415_s14 + $0x2c0] sm:$0xff] }
  0xcc   : > { %v4957_v13 = vsel %vm4952_vm5, %v21484_v60, %v4956_v50  ;;  %v14881_v22 = vadd.f32 %v3871_v17, %v3761_v43  ;;  %v2166_v46 = vrot.slane %v14871_v49, 2  ;;  %v2595_v47 = vmul.f32 %v14494_v4, %v598_v62  ;;  %982 = vperm.xlu1 %13872, %v519_v11   ;;  %v521_v17 = vld [vmem:[%s14415_s14 + $0x2c8] sm:$0xff]  ;;  %v14920_v43 = vld [vmem:[%s21276_s2] ss:$0 sm:$0xff] }
  0xcd   : > { %v14886_v10 = vmul.f32 %v14500_v6, %v598_v62  ;;  %v4630_v36 = vadd.f32 %v14775_v20, %v3971_v45  ;;  %v4631_v21 = vadd.f32 %v4318_v18, %v3972_v16  ;;  %v1528_v35 = vsel %vm1507_vm0, %v1525_v34, %v1527_v15 }
  0xce   : > { %v14894_v1 = vmul.f32 %v14697_v28, %v598_v62  ;;  %v1833_v30 = vadd.f32 %v1528_v35, %v14787_v33  ;;  %v2167_v54 = vsel %vm2146_vm1, %v2164_v23, %v2166_v46  ;;  %v2814_v5 = vrot.slane %v2595_v47, 6 }
  0xcf   : > { %v3453_v39 = vrot.slane %v14886_v10, 7  ;;  %v5269_v20 = vadd.f32 %v14784_v41, %v4630_v36  ;;  %v5270_v48 = vadd.f32 %v4957_v13, %v4631_v21  ;;  %v14905_v34 = vmul.f32 %v14702_v40, %v598_v62  ;;  %987 = vperm.xlu0 %13871, %v520_v19  }
  0xd0   : > { %v4319_v38 = vrot.slane %v14894_v1, 4  ;;  %v14907_v44 = vadd.f32 %v2167_v54, %v1833_v30  ;;  %v2815_v33 = vsel %vm2800_vm2, %v2812_v29, %v2814_v5  ;;  %v3872_v57 = vmul.f32 %v14511_v9, %v598_v62  ;;  %992 = vperm.xlu1 %13872, %v521_v17   ;;  %v608_v30 = vpop.permute.xlu0 %607 }
  0xd1   : > { %v14912_v23 = vmul.f32 %v14714_v32, %v598_v62  ;;  %v5907_v41 = vadd.f32 %v14804_v58, %v5269_v20  ;;  %v5908_v51 = vadd.f32 %v5595_v25, %v5270_v48  ;;  %v3123_v42 = vadd.f32 %v2815_v33, %v14666_v52 }
  0xd2   : > { %v4320_v37 = vsel %vm4313_vm4, %v4317_v59, %v4319_v38  ;;  %v3454_v29 = vsel %vm3439_vm3, %v3451_v27, %v3453_v39  ;;  %v4958_v63 = vrot.slane %v14905_v34, 5  ;;  %v14931_v55 = vmul.f32 %v14484_v2, %v603_v7 }
  0xd3   : > { %v4632_v62 = vadd.f32 %v4320_v37, %v14688_v24  ;;  %v5596_v58 = vrot.slane %v14912_v23, 6  ;;  %v6019_v11 = vadd.f32 %v14920_v43, %v5907_v41  ;;  %v6020_v52 = vadd.f32 %v14920_v43, %v5908_v51 }
  0xd4   : > { %v3762_v59 = vadd.f32 %v3454_v29, %v3123_v42  ;;  %v4959_v18 = vsel %vm4952_vm5, %v4956_v50, %v4958_v63  ;;  %v14935_v26 = vmul.f32 %v14506_v8, %v603_v7  ;;  %v14938_v27 = vmul.f32 %v14489_v3, %v603_v7  ;;  %v522_v29 = vld [vmem:[%s14415_s14 + $0x2d0] sm:$0xff] }
  0xd5   : > { %v2596_v24 = vmul.f32 %v14494_v4, %v603_v7  ;;  %v6124_v60 = vmax.f32 %v6019_v11, 0.0  ;;  %v6125_v13 = vmax.f32 %v6020_v52, 0.0  ;;  %v5271_v45 = vadd.f32 %v4959_v18, %v4632_v62  ;;  %v524_v62 = vld [vmem:[%s14415_s14 + $0x2e0] sm:$0xff]  ;;  %997 = vperm.xlu0 %13871, %v522_v29  }
  0xd6   : > { %v5597_v16 = vsel %vm2800_vm2, %v5594_v14, %v5596_v58  ;;  %v1529_v25 = vrot.slane %v14931_v55, 1  ;;  %v2168_v47 = vrot.slane %v14938_v27, 2  ;;  %v3235_v10 = vmul.f32 %v14500_v6, %v603_v7  ;;  %1007 = vperm.xlu1 %13872, %v524_v62  }
  0xd7   : > { %v2816_v50 = vrot.slane %v2596_v24, 6  ;;  %6229 = vst.msk [vmem:[#allocation4] sm:$0xff] %vm385_vm6, %v6124_v60  ;;  %6230 = vst.msk [vmem:[#allocation4 + $0x8] sm:$0xff] %vm385_vm6, %v6125_v13  ;;  %v14949_v19 = vadd.f32 %v3872_v57, %v3762_v59  ;;  %v5909_v36 = vadd.f32 %v5597_v16, %v5271_v45  ;;  %v4105_v21 = vmul.f32 %v14697_v28, %v603_v7 }
  0xd8   : > { %v4744_v0 = vmul.f32 %v14702_v40, %v603_v7  ;;  %v1530_v14 = vsel %vm1507_vm0, %v1527_v15, %v1529_v25  ;;  %v3455_v1 = vrot.slane %v3235_v10, 7  ;;  %v3873_v17 = vmul.f32 %v14511_v9, %v603_v7  ;;  %v613_v10 = vpop.permute.xlu1 %612 }
  0xd9   : > { %v2817_v35 = vsel %vm2800_vm2, %v2814_v5, %v2816_v50  ;;  %v6021_v54 = vadd.f32 %v14920_v43, %v5909_v36  ;;  %v1834_v20 = vadd.f32 %v1530_v14, %v14868_v12  ;;  %v4321_v34 = vrot.slane %v4105_v21, 4 }
  0xda   : > { %v3124_v48 = vadd.f32 %v2817_v35, %v14705_v53  ;;  %v2169_v33 = vsel %vm2146_vm1, %v2166_v46, %v2168_v47  ;;  %v3456_v15 = vsel %vm3439_vm3, %v3453_v39, %v3455_v1  ;;  %v4960_v5 = vrot.slane %v4744_v0, 5 }
  0xdb   : > { %v5383_v57 = vmul.f32 %v14714_v32, %v603_v7  ;;  %v6126_v23 = vmax.f32 %v6021_v54, 0.0  ;;  %v4322_v12 = vsel %vm4313_vm4, %v4319_v38, %v4321_v34  ;;  %v14970_v53 = vmul.f32 %v14506_v8, %v608_v30 }
  0xdc   : > { %v3763_v41 = vadd.f32 %v3456_v15, %v3124_v48  ;;  %v14972_v51 = vadd.f32 %v2169_v33, %v1834_v20  ;;  %v4633_v49 = vadd.f32 %v4322_v12, %v14690_v61  ;;  %v14976_v46 = vmul.f32 %v14484_v2, %v608_v30 }
  0xdd   : > { %v5598_v42 = vrot.slane %v5383_v57, 6  ;;  %6231 = vst.msk [vmem:[#allocation4 + $0x10] sm:$0xff] %vm385_vm6, %v6126_v23  ;;  %v4961_v39 = vsel %vm4952_vm5, %v4958_v63, %v4960_v5  ;;  %v14981_v7 = vmul.f32 %v14489_v3, %v608_v30  ;;  %v2597_v38 = vmul.f32 %v14494_v4, %v608_v30 }
  0xde   : > { %v3236_v37 = vmul.f32 %v14500_v6, %v608_v30  ;;  %v14987_v11 = vadd.f32 %v3873_v17, %v3763_v41  ;;  %v5272_v61 = vadd.f32 %v4961_v39, %v4633_v49  ;;  %v1531_v59 = vrot.slane %v14976_v46, 1  ;;  %v618_v46 = vpop.permute.xlu0 %617 }
  0xdf   : > { %v5599_v52 = vsel %vm2800_vm2, %v5596_v58, %v5598_v42  ;;  %v2818_v18 = vrot.slane %v2597_v38, 6  ;;  %v4106_v24 = vmul.f32 %v14697_v28, %v608_v30  ;;  %v3874_v13 = vmul.f32 %v14511_v9, %v608_v30 }
  0xe0   : > { %v3457_v63 = vrot.slane %v3236_v37, 7  ;;  %v5910_v60 = vadd.f32 %v5599_v52, %v5272_v61  ;;  %v4745_v45 = vmul.f32 %v14702_v40, %v608_v30  ;;  %v5384_v16 = vmul.f32 %v14714_v32, %v608_v30 }
  0xe1   : > { %v2170_v36 = vrot.slane %v14981_v7, 2  ;;  %v2819_v58 = vsel %vm2800_vm2, %v2816_v50, %v2818_v18  ;;  %v4323_v0 = vrot.slane %v4106_v24, 4  ;;  %v1308_v48 = vmul.f32 %v14484_v2, %v613_v10 }
  0xe2   : > { %v3458_v21 = vsel %vm3439_vm3, %v3455_v1, %v3457_v63  ;;  %v6022_v14 = vadd.f32 %v14920_v43, %v5910_v60  ;;  %v3125_v35 = vadd.f32 %v2819_v58, %v14849_v31  ;;  %v4962_v17 = vrot.slane %v4745_v45, 5 }
  0xe3   : > { %v5600_v54 = vrot.slane %v5384_v16, 6  ;;  %v4324_v20 = vsel %vm4313_vm4, %v4321_v34, %v4323_v0  ;;  %v15003_v30 = vmul.f32 %v14489_v3, %v613_v10  ;;  %v15006_v33 = vmul.f32 %v14494_v4, %v613_v10 }
  0xe4   : > { %v6127_v50 = vmax.f32 %v6022_v14, 0.0  ;;  %v1532_v1 = vsel %vm1507_vm0, %v1529_v25, %v1531_v59  ;;  %v3764_v15 = vadd.f32 %v3458_v21, %v3125_v35  ;;  %v4634_v31 = vadd.f32 %v4324_v20, %v14764_v56 }
  0xe5   : > { %v4963_v57 = vsel %vm4952_vm5, %v4960_v5, %v4962_v17  ;;  %v5601_v34 = vsel %vm2800_vm2, %v5598_v42, %v5600_v54  ;;  %v15015_v23 = vmul.f32 %v14506_v8, %v613_v10  ;;  %v2820_v41 = vrot.slane %v15006_v33, 6 }
  0xe6   : > { %6232 = vst.msk [vmem:[#allocation4 + $0x18] sm:$0xff] %vm385_vm6, %v6127_v50  ;;  %v5273_v12 = vadd.f32 %v4963_v57, %v4634_v31  ;;  %v1533_v49 = vrot.slane %v1308_v48, 1  ;;  %v21297_v55 = vrot.slane %v15003_v30, 2  ;;  %v3237_v25 = vmul.f32 %v14500_v6, %v613_v10  ;;  %v526_v57 = vld [vmem:[%s14415_s14 + $0x2f0] sm:$0xff] }
  0xe7   : > { %v15021_v39 = vadd.f32 %v3874_v13, %v3764_v15  ;;  %v2821_v56 = vsel %vm2800_vm2, %v2818_v18, %v2820_v41  ;;  %v4107_v5 = vmul.f32 %v14697_v28, %v613_v10  ;;  %v4746_v42 = vmul.f32 %v14702_v40, %v613_v10  ;;  %1017 = vperm.xlu1 %13872, %v526_v57  }
  0xe8   : > { %v5911_v38 = vadd.f32 %v5601_v34, %v5273_v12  ;;  %v3126_v37 = vadd.f32 %v2821_v56, %v14907_v44  ;;  %v3459_v29 = vrot.slane %v3237_v25, 7  ;;  %v5385_v62 = vmul.f32 %v14714_v32, %v613_v10 }
  0xe9   : > { %v3875_v61 = vmul.f32 %v14511_v9, %v613_v10  ;;  %v4325_v52 = vrot.slane %v4107_v5, 4  ;;  %v4964_v24 = vrot.slane %v4746_v42, 5  ;;  %v15030_v60 = vmul.f32 %v14484_v2, %v618_v46 }
  0xea   : > { %v6023_v13 = vadd.f32 %v14920_v43, %v5911_v38  ;;  %v3460_v18 = vsel %vm3439_vm3, %v3457_v63, %v3459_v29  ;;  %v5602_v45 = vrot.slane %v5385_v62, 6  ;;  %v15035_v16 = vmul.f32 %v14489_v3, %v618_v46 }
  0xeb   : > { %v15038_v44 = vsel %vm1507_vm0, %v1531_v59, %v1533_v49  ;;  %v3765_v58 = vadd.f32 %v3460_v18, %v3126_v37  ;;  %v4326_v10 = vsel %vm4313_vm4, %v4323_v0, %v4325_v52  ;;  %v1089_v21 = vmul.f32 %v14506_v8, %v618_v46  ;;  %v623_v37 = vpop.permute.xlu1 %622 }
  0xec   : > { %v6128_v14 = vmax.f32 %v6023_v13, 0.0  ;;  %v4635_v35 = vadd.f32 %v4326_v10, %v14881_v22  ;;  %v4965_v20 = vsel %vm4952_vm5, %v4962_v17, %v4964_v24  ;;  %v1535_v63 = vrot.slane %v15030_v60, 1  ;;  %v525_v17 = vld [vmem:[%s14415_s14 + $0x2e8] sm:$0xff] }
  0xed   : > { %v5603_v48 = vsel %vm2800_vm2, %v5600_v54, %v5602_v45  ;;  %v21303_v33 = vrot.slane %v15035_v16, 2  ;;  %v2599_v59 = vmul.f32 %v14494_v4, %v618_v46  ;;  %v3238_v50 = vmul.f32 %v14500_v6, %v618_v46  ;;  %1012 = vperm.xlu0 %13871, %v525_v17  }
  0xee   : > { %6233 = vst.msk [vmem:[#allocation4 + $0x20] sm:$0xff] %vm385_vm6, %v6128_v14  ;;  %v15050_v0 = vadd.f32 %v3875_v61, %v3765_v58  ;;  %v5274_v15 = vadd.f32 %v4965_v20, %v4635_v35  ;;  %v4108_v31 = vmul.f32 %v14697_v28, %v618_v46  ;;  %v4747_v22 = vmul.f32 %v14702_v40, %v618_v46 }
  0xef   : > { %v2822_v34 = vrot.slane %v2599_v59, 6  ;;  %v3461_v12 = vrot.slane %v3238_v50, 7  ;;  %v15057_v54 = vmul.f32 %v14714_v32, %v618_v46  ;;  %v1835_v25 = vadd.f32 %v1532_v1, %v14935_v26 }
  0xf0   : > { %21485 = vst [vmem:[#allocation10_spill] sm:$0xff] %v15050_v0  ;;  %v5912_v56 = vadd.f32 %v5603_v48, %v5274_v15  ;;  %v15061_v5 = vsel %vm1507_vm0, %v1533_v49, %v1535_v63  ;;  %v4327_v42 = vrot.slane %v4108_v31, 4  ;;  %v4966_v38 = vrot.slane %v4747_v22, 5 }
  0xf1   : > { %v2823_v62 = vsel %vm2800_vm2, %v2820_v41, %v2822_v34  ;;  %v3876_v61 = vmul.f32 %v14511_v9, %v618_v46  ;;  %v5604_v60 = vrot.slane %v15057_v54, 6  ;;  %v2171_v26 = vsel %vm2146_vm1, %v2168_v47, %v2170_v36 }
  0xf2   : > { %v6024_v1 = vadd.f32 %v14920_v43, %v5912_v56  ;;  %v3127_v49 = vadd.f32 %v2823_v62, %v14972_v51  ;;  %v3462_v13 = vsel %vm3439_vm3, %v3459_v29, %v3461_v12  ;;  %v4328_v18 = vsel %vm4313_vm4, %v4325_v52, %v4327_v42 }
  0xf3   : > { %v4636_v41 = vadd.f32 %v4328_v18, %v14949_v19  ;;  %v4967_v46 = vsel %vm4952_vm5, %v4964_v24, %v4966_v38  ;;  %v2474_v58 = vadd.f32 %v2171_v26, %v1835_v25  ;;  %v1310_v10 = vmul.f32 %v14484_v2, %v623_v37  ;;  %v628_v26 = vpop.permute.xlu0 %627 }
  0xf4   : > { %v6129_v14 = vmax.f32 %v6024_v1, 0.0  ;;  %v3766_v35 = vadd.f32 %v3462_v13, %v3127_v49  ;;  %v15079_v27 = vmul.f32 %v14489_v3, %v623_v37  ;;  %v15082_v47 = vmul.f32 %v14494_v4, %v623_v37 }
  0xf5   : > { %v5275_v51 = vadd.f32 %v4967_v46, %v4636_v41  ;;  %v5605_v29 = vsel %vm2800_vm2, %v5602_v45, %v5604_v60  ;;  %v1537_v20 = vrot.slane %v1310_v10, 1  ;;  %v15086_v52 = vmul.f32 %v14500_v6, %v623_v37  ;;  %v528_v10 = vld [vmem:[%s14415_s14 + $0x300] sm:$0xff] }
  0xf6   : > { %6234 = vst.msk [vmem:[#allocation4 + $0x28] sm:$0xff] %vm385_vm6, %v6129_v14  ;;  %v1090_v19 = vmul.f32 %v14506_v8, %v623_v37  ;;  %v2176_v24 = vrot.slane %v15079_v27, 2  ;;  %v2824_v48 = vrot.slane %v15082_v47, 6  ;;  %v15093_v59 = vmul.f32 %v14697_v28, %v623_v37  ;;  %1027 = vperm.xlu1 %13872, %v528_v10  }
  0xf7   : > { %v5913_v50 = vadd.f32 %v5605_v29, %v5275_v51  ;;  %v1538_v15 = vsel %vm1507_vm0, %v1535_v63, %v1537_v20  ;;  %v3463_v45 = vrot.slane %v15086_v52, 7  ;;  %v15098_v31 = vmul.f32 %v14702_v40, %v623_v37 }
  0xf8   : > { %v15100_v22 = vadd.f32 %v3876_v61, %v3766_v35  ;;  %v2825_v17 = vsel %vm2800_vm2, %v2822_v34, %v2824_v48  ;;  %v3877_v57 = vmul.f32 %v14511_v9, %v623_v37  ;;  %v4329_v54 = vrot.slane %v15093_v59, 4 }
  0xf9   : > { %v6025_v25 = vadd.f32 %v14920_v43, %v5913_v50  ;;  %v1838_v56 = vadd.f32 %v1538_v15, %v1089_v21  ;;  %v3128_v62 = vadd.f32 %v2825_v17, %v2474_v58  ;;  %v4968_v63 = vrot.slane %v15098_v31, 5  ;;  %v13873_v21 = vld [vmem:[%s21277_s3 + $0x10] sm:$0xff]   ;;  %v527_v58 = vld [vmem:[%s14415_s14 + $0x2f8] sm:$0xff] }
  0xfa   : > { %21486 = vst [vmem:[#allocation11_spill] sm:$0xff] %v15100_v22  ;;  %v2177_v61 = vsel %vm2146_vm1, %v21303_v33, %v2176_v24  ;;  %v3464_v34 = vsel %vm3439_vm3, %v3461_v12, %v3463_v45  ;;  %v4330_v1 = vsel %vm4313_vm4, %v4327_v42, %v4329_v54  ;;  %v15115_v49 = vmul.f32 %v14714_v32, %v623_v37 }
  0xfb   : > { %v6130_v13 = vmax.f32 %v6025_v25, 0.0  ;;  %v3767_v18 = vadd.f32 %v3464_v34, %v3128_v62  ;;  %v4637_v41 = vadd.f32 %v4330_v1, %v14987_v11  ;;  %v4969_v46 = vsel %vm4952_vm5, %v4966_v38, %v4968_v63  ;;  %13063 = vmatprep.subr.bf16.mxu0 %v13873_v21  ;;  %1022 = vperm.xlu0 %13871, %v527_v58   ;;  %v15234_v58 = vld [vmem:[%s21275_s1 + $0x4] ss:$0 sm:$0xff] }
  0xfc   : > { %v5606_v12 = vrot.slane %v15115_v49, 6  ;;  %v15128_v42 = vmul.f32 %v14484_v2, %v628_v26  ;;  %v1836_v37 = vadd.f32 %v15038_v44, %v14970_v53  ;;  %v15133_v14 = vmul.f32 %v14489_v3, %v628_v26  ;;  %13064 = vmatpush3.bf16.msra.mxu0 %v13873_v21 }
  0xfd   : > { %6235 = vst.msk [vmem:[#allocation4 + $0x30] sm:$0xff] %vm385_vm6, %v6130_v13  ;;  %v15136_v11 = vadd.f32 %v2177_v61, %v1838_v56  ;;  %v5276_v38 = vadd.f32 %v4969_v46, %v4637_v41  ;;  %v15139_v35 = vmul.f32 %v14506_v8, %v628_v26  ;;  %v15142_v47 = vmul.f32 %v14494_v4, %v628_v26  ;;  %v638_v56 = vpop.permute.xlu1 %637  ;;  %v15228_v41 = vld [vmem:[%s21275_s1] ss:$0 sm:$0xff] }
  0xfe   : > { %v15144_v2 = vadd.f32 %v3877_v57, %v3767_v18  ;;  %v5607_v53 = vsel %vm2800_vm2, %v5604_v60, %v5606_v12  ;;  %v21296_v3 = vrot.slane %v15128_v42, 1  ;;  %v2173_v44 = vsel %vm2146_vm1, %v2170_v36, %v21297_v55 }
  0xff   : > { %v5914_v51 = vadd.f32 %v5607_v53, %v5276_v38  ;;  %v21295_v8 = vrot.slane %v15133_v14, 2  ;;  %v21294_v4 = vrot.slane %v15142_v47, 6  ;;  %v15156_v29 = vmul.f32 %v14500_v6, %v628_v26  ;;  %v15246_v53 = vld [vmem:[%s21275_s1 + $0x5] ss:$0 sm:$0xff] }
 0x100   : > { %v1540_v60 = vsel %vm1507_vm0, %v1537_v20, %v21296_v3  ;;  %v2475_v52 = vadd.f32 %v2173_v44, %v1836_v37  ;;  %v15162_v59 = vmul.f32 %v14697_v28, %v628_v26  ;;  %v15165_v7 = vmul.f32 %v14702_v40, %v628_v26  ;;  %v643_v37 = vpop.permute.xlu0 %642 }
 0x101   : > { %v6026_v36 = vadd.f32 %v14920_v43, %v5914_v51  ;;  %v1839_v50 = vadd.f32 %v1540_v60, %v1090_v19  ;;  %v2827_v15 = vsel %vm2800_vm2, %v2824_v48, %v21294_v4  ;;  %v21293_v6 = vrot.slane %v15156_v29, 7 }
 0x102   : > { %21487 = vst [vmem:[#allocation12_spill] sm:$0xff] %v15165_v7  ;;  %v3129_v17 = vadd.f32 %v2827_v15, %v2475_v52  ;;  %v21292_v57 = vrot.slane %v15162_v59, 4  ;;  %v21291_v20 = vrot.slane %v15165_v7, 5  ;;  %v15175_v25 = vmul.f32 %v14714_v32, %v628_v26 }
 0x103   : > { %v6131_v62 = vmax.f32 %v6026_v36, 0.0  ;;  %v2179_v19 = vsel %vm2146_vm1, %v2176_v24, %v21295_v8  ;;  %v3466_v48 = vsel %vm3439_vm3, %v3463_v45, %v21293_v6  ;;  %v3878_v61 = vmul.f32 %v14511_v9, %v628_v26  ;;  %v15197_v24 = vld [vmem:[%s21275_s1 + $0x1] ss:$0 sm:$0xff]  ;;  %v15205_v45 = vld [vmem:[%s21275_s1 + $0x2] ss:$0 sm:$0xff] }
 0x104   : > { %21488 = vst [vmem:[#allocation13_spill] sm:$0xff] %v15175_v25  ;;  %v15186_v34 = vadd.f32 %v2179_v19, %v1839_v50  ;;  %v3768_v1 = vadd.f32 %v3466_v48, %v3129_v17  ;;  %v4332_v49 = vsel %vm4313_vm4, %v4329_v54, %v21292_v57  ;;  %v21290_v21 = vrot.slane %v15175_v25, 6 }
 0x105   : > { %6236 = vst.msk [vmem:[#allocation4 + $0x38] sm:$0xff] %vm385_vm6, %v6131_v62  ;;  %v4638_v27 = vadd.f32 %v4332_v49, %v15021_v39  ;;  %v15200_v9 = vmul.f32 %v15197_v24, %v638_v56  ;;  %v15208_v54 = vmul.f32 %v15205_v45, %v638_v56  ;;  %v15213_v39 = vld [vmem:[%s21275_s1 + $0x3] ss:$0 sm:$0xff]  ;;  %v4971_v18 = vsel %vm4952_vm5, %v4968_v63, %v21291_v20  ;;  %v13874_v62 = vld [vmem:[%s21277_s3 + $0x18] sm:$0xff]   ;;  %v529_v49 = vld [vmem:[%s14415_s14 + $0x308] sm:$0xff] }
 0x106   : > { %v15216_v26 = vmul.f32 %v15213_v39, %v638_v56  ;;  %v15218_v13 = vadd.f32 %v3878_v61, %v3768_v1  ;;  %v1093_v46 = vmul.f32 %v15228_v41, %v638_v56  ;;  %v15237_v10 = vmul.f32 %v15234_v58, %v638_v56  ;;  %13065 = vmatprep.subr.bf16.mxu0 %v13874_v62 }
 0x107   : > { %v5277_v38 = vadd.f32 %v4971_v18, %v4638_v27  ;;  %v5609_v31 = vsel %vm2800_vm2, %v5606_v12, %v21290_v21  ;;  %v21298_v63 = vrot.slane %v15200_v9, 1  ;;  %v15249_v44 = vmul.f32 %v15246_v53, %v638_v56  ;;  %v530_v27 = vld [vmem:[%s14415_s14 + $0x310] sm:$0xff]  ;;  %1032 = vperm.xlu0 %13871, %v529_v49   ;;  %13066 = vmatpush3.bf16.msra.mxu0 %v13874_v62 }
 0x108   : > { %v21301_v51 = vrot.slane %v15208_v54, 2  ;;  %v21299_v60 = vrot.slane %v15216_v26, 6  ;;  %v15254_v52 = vmul.f32 %v14697_v28, %v638_v56  ;;  %v15257_v12 = vmul.f32 %v14702_v40, %v638_v56  ;;  %1037 = vperm.xlu1 %13872, %v530_v27  }
 0x109   : > { %v5915_v36 = vadd.f32 %v5609_v31, %v5277_v38  ;;  %v15260_v50 = vmul.f32 %v14714_v32, %v638_v56  ;;  %v1314_v15 = vmul.f32 %v15197_v24, %v643_v37  ;;  %v1953_v17 = vmul.f32 %v15205_v45, %v643_v37 }
 0x10a   : > { %21489 = vst [vmem:[#allocation14_spill] sm:$0xff] %v15257_v12  ;;  %v21300_v19 = vrot.slane %v15237_v10, 7  ;;  %v21302_v48 = vrot.slane %v15254_v52, 4  ;;  %v1094_v61 = vmul.f32 %v15228_v41, %v643_v37  ;;  %v2604_v1 = vmul.f32 %v15213_v39, %v643_v37 }
 0x10b   : > { %21490 = vst [vmem:[#allocation15_spill] sm:$0xff] %v15260_v50  ;;  %v6027_v56 = vadd.f32 %v14920_v43, %v5915_v36  ;;  %v1545_v18 = vrot.slane %v1314_v15, 1  ;;  %v2184_v38 = vrot.slane %v1953_v17, 2  ;;  %v3243_v31 = vmul.f32 %v15234_v58, %v643_v37  ;;  %v648_v17 = vpop.permute.xlu1 %647 }
 0x10c   : > { %v21305_v21 = vrot.slane %v15257_v12, 5  ;;  %v2832_v20 = vrot.slane %v2604_v1, 6  ;;  %v4113_v57 = vmul.f32 %v14697_v28, %v643_v37  ;;  %v4752_v6 = vmul.f32 %v14702_v40, %v643_v37 }
 0x10d   : > { %v6132_v4 = vmax.f32 %v6027_v56, 0.0  ;;  %v21307_v8 = vrot.slane %v15260_v50, 6  ;;  %v1546_v36 = vsel %vm1507_vm0, %v21298_v63, %v1545_v18  ;;  %v3471_v15 = vrot.slane %v3243_v31, 7 }
 0x10e   : > { %v2833_v49 = vsel %vm2800_vm2, %v21299_v60, %v2832_v20  ;;  %v3881_v1 = vmul.f32 %v15246_v53, %v643_v37  ;;  %v4337_v3 = vrot.slane %v4113_v57, 4  ;;  %v4976_v55 = vrot.slane %v4752_v6, 5 }
 0x10f   : > { %6237 = vst.msk [vmem:[#allocation4 + $0x40] sm:$0xff] %vm385_vm6, %v6132_v4  ;;  %v1842_v62 = vadd.f32 %v1546_v36, %v1093_v46  ;;  %v2185_v27 = vsel %vm2146_vm1, %v21301_v51, %v2184_v38  ;;  %v3132_v56 = vadd.f32 %v2833_v49, %v15186_v34  ;;  %v5391_v31 = vmul.f32 %v14714_v32, %v643_v37 }
 0x110   : > { %v3472_v63 = vsel %vm3439_vm3, %v21300_v19, %v3471_v15  ;;  %v4338_v57 = vsel %vm4313_vm4, %v21302_v48, %v4337_v3  ;;  %v1095_v6 = vmul.f32 %v15228_v41, %v648_v17  ;;  %v1315_v4 = vmul.f32 %v15197_v24, %v648_v17 }
 0x111   : > { %v4641_v46 = vadd.f32 %v4338_v57, %v15144_v2  ;;  %v4977_v34 = vsel %vm4952_vm5, %v21305_v21, %v4976_v55  ;;  %v5614_v36 = vrot.slane %v5391_v31, 6  ;;  %v1954_v37 = vmul.f32 %v15205_v45, %v648_v17 }
 0x112   : > { %v3771_v49 = vadd.f32 %v3472_v63, %v3132_v56  ;;  %v1547_v60 = vrot.slane %v1315_v4, 1  ;;  %v2605_v19 = vmul.f32 %v15213_v39, %v648_v17  ;;  %v3244_v51 = vmul.f32 %v15234_v58, %v648_v17 }
 0x113   : > { %v15307_v48 = vadd.f32 %v2185_v27, %v1842_v62  ;;  %v5280_v33 = vadd.f32 %v4977_v34, %v4641_v46  ;;  %v5615_v2 = vsel %vm2800_vm2, %v21307_v8, %v5614_v36  ;;  %v2186_v57 = vrot.slane %v1954_v37, 2  ;;  %v653_v27 = vpop.permute.xlu0 %652 }
 0x114   : > { %v1548_v25 = vsel %vm1507_vm0, %v1545_v18, %v1547_v60  ;;  %v2834_v21 = vrot.slane %v2605_v19, 6  ;;  %v3473_v31 = vrot.slane %v3244_v51, 7  ;;  %v15314_v12 = vmul.f32 %v14697_v28, %v648_v17 }
 0x115   : > { %v5918_v63 = vadd.f32 %v5615_v2, %v5280_v33  ;;  %v1843_v56 = vadd.f32 %v1548_v25, %v1094_v61  ;;  %v15317_v4 = vmul.f32 %v15246_v53, %v648_v17  ;;  %v4753_v62 = vmul.f32 %v14702_v40, %v648_v17 }
 0x116   : > { %21491 = vst [vmem:[#allocation16_spill] sm:$0xff] %v15314_v12  ;;  %v15320_v46 = vadd.f32 %v3881_v1, %v3771_v49  ;;  %v2187_v34 = vsel %vm2146_vm1, %v2184_v38, %v2186_v57  ;;  %v21308_v37 = vrot.slane %v15314_v12, 4  ;;  %v15325_v19 = vmul.f32 %v14714_v32, %v648_v17 }
 0x117   : > { %21492 = vst [vmem:[#allocation17_spill] sm:$0xff] %v15317_v4  ;;  %v6030_v51 = vadd.f32 %v14920_v43, %v5918_v63  ;;  %v15329_v33 = vsel %vm2800_vm2, %v2832_v20, %v2834_v21  ;;  %v15332_v25 = vsel %vm3439_vm3, %v3471_v15, %v3473_v31  ;;  %v4978_v61 = vrot.slane %v4753_v62, 5 }
 0x118   : > { %v4340_v18 = vsel %vm4313_vm4, %v4337_v3, %v21308_v37  ;;  %v5616_v38 = vrot.slane %v15325_v19, 6  ;;  %v1316_v1 = vmul.f32 %v15197_v24, %v653_v27  ;;  %v1955_v17 = vmul.f32 %v15205_v45, %v653_v27 }
 0x119   : > { %v6135_v49 = vmax.f32 %v6030_v51, 0.0  ;;  %v15340_v2 = vadd.f32 %v2187_v34, %v1843_v56  ;;  %v4642_v20 = vadd.f32 %v4340_v18, %v15218_v13  ;;  %v2606_v15 = vmul.f32 %v15213_v39, %v653_v27  ;;  %v523_v56 = vld [vmem:[%s14415_s14 + $0x2d8] sm:$0xff] }
 0x11a   : > { %v4979_v63 = vsel %vm4952_vm5, %v4976_v55, %v4978_v61  ;;  %v1549_v62 = vrot.slane %v1316_v1, 1  ;;  %v2188_v8 = vrot.slane %v1955_v17, 2  ;;  %v3245_v3 = vmul.f32 %v15234_v58, %v653_v27  ;;  %v531_v34 = vld [vmem:[%s14415_s14 + $0x318] sm:$0xff]  ;;  %v658_v17 = vpop.permute.xlu1 %657  ;;  %1002 = vperm.xlu0 %13871, %v523_v56  }
 0x11b   : > { %6240 = vst.msk [vmem:[#allocation4 + $0x58] sm:$0xff] %vm385_vm6, %v6135_v49  ;;  %v5281_v19 = vadd.f32 %v4979_v63, %v4642_v20  ;;  %v1096_v37 = vmul.f32 %v15228_v41, %v653_v27  ;;  %v2836_v50 = vrot.slane %v2606_v15, 6  ;;  %v15349_v51 = vmul.f32 %v14697_v28, %v653_v27  ;;  %1042 = vperm.xlu1 %13872, %v531_v34  }
 0x11c   : > { %v5617_v13 = vsel %vm2800_vm2, %v5614_v36, %v5616_v38  ;;  %v1550_v18 = vsel %vm1507_vm0, %v1547_v60, %v1549_v62  ;;  %v3475_v55 = vrot.slane %v3245_v3, 7  ;;  %v4754_v1 = vmul.f32 %v14702_v40, %v653_v27 }
 0x11d   : > { %21493 = vst [vmem:[#allocation18_spill] sm:$0xff] %v15349_v51  ;;  %v5919_v49 = vadd.f32 %v5617_v13, %v5281_v19  ;;  %v1844_v20 = vadd.f32 %v1550_v18, %v1095_v6  ;;  %v2189_v63 = vsel %vm2146_vm1, %v2186_v57, %v2188_v8  ;;  %v15358_v15 = vmul.f32 %v15246_v53, %v653_v27 }
 0x11e   : > { %v15361_v7 = vsel %vm2800_vm2, %v2834_v21, %v2836_v50  ;;  %v4980_v4 = vrot.slane %v4754_v1, 5  ;;  %v5393_v60 = vmul.f32 %v14714_v32, %v653_v27  ;;  %v15367_v56 = vsel %vm3439_vm3, %v3473_v31, %v3475_v55 }
 0x11f   : > { %21494 = vst [vmem:[#allocation19_spill] sm:$0xff] %v15358_v15  ;;  %v6031_v3 = vadd.f32 %v14920_v43, %v5919_v49  ;;  %21495 = vst [vmem:[#allocation20_spill] sm:$0xff] %v15367_v56  ;;  %v1317_v6 = vmul.f32 %v15197_v24, %v658_v17  ;;  %v1956_v57 = vmul.f32 %v15205_v45, %v658_v17 }
 0x120   : > { %v5618_v19 = vrot.slane %v5393_v60, 6  ;;  %v1097_v34 = vmul.f32 %v15228_v41, %v658_v17  ;;  %v2607_v21 = vmul.f32 %v15213_v39, %v658_v17  ;;  %v3246_v13 = vmul.f32 %v15234_v58, %v658_v17 }
 0x121   : > { %v6136_v18 = vmax.f32 %v6031_v3, 0.0  ;;  %v15374_v1 = vadd.f32 %v2189_v63, %v1844_v20  ;;  %v1551_v27 = vrot.slane %v1317_v6, 1  ;;  %v2190_v36 = vrot.slane %v1956_v57, 2  ;;  %v663_v63 = vpop.permute.xlu0 %662 }
 0x122   : > { %v15377_v49 = vsel %vm4952_vm5, %v4978_v61, %v4980_v4  ;;  %v2838_v31 = vrot.slane %v2607_v21, 6  ;;  %v3477_v15 = vrot.slane %v3246_v13, 7  ;;  %v4116_v56 = vmul.f32 %v14697_v28, %v658_v17 }
 0x123   : > { %21496 = vst [vmem:[#allocation21_spill] sm:$0xff] %v15377_v49  ;;  %6241 = vst.msk [vmem:[#allocation4 + $0x60] sm:$0xff] %vm385_vm6, %v6136_v18  ;;  %v1552_v60 = vsel %vm1507_vm0, %v1549_v62, %v1551_v27  ;;  %v3884_v22 = vmul.f32 %v15246_v53, %v658_v17  ;;  %v4755_v0 = vmul.f32 %v14702_v40, %v658_v17 }
 0x124   : > { %v5394_v20 = vmul.f32 %v14714_v32, %v658_v17  ;;  %v15386_v3 = vsel %vm2800_vm2, %v5616_v38, %v5618_v19  ;;  %v1845_v61 = vadd.f32 %v1552_v60, %v1096_v37  ;;  %v2839_v6 = vsel %vm2800_vm2, %v2836_v50, %v2838_v31 }
 0x125   : > { %21497 = vst [vmem:[#allocation22_spill] sm:$0xff] %v15386_v3  ;;  %v4343_v57 = vrot.slane %v4116_v56, 4  ;;  %v2191_v28 = vsel %vm2146_vm1, %v2188_v8, %v2190_v36  ;;  %v3135_v21 = vadd.f32 %v2839_v6, %v15307_v48  ;;  %v4982_v13 = vrot.slane %v4755_v0, 5  ;;  %v15413_v6 = vld [vmem:[%s21275_s1 + $0x6] ss:$0 sm:$0xff] }
 0x126   : > { %v5620_v62 = vrot.slane %v5394_v20, 6  ;;  %v3478_v18 = vsel %vm3439_vm3, %v3475_v55, %v3477_v15  ;;  %v1098_v40 = vmul.f32 %v15228_v41, %v663_v63  ;;  %v1318_v32 = vmul.f32 %v15197_v24, %v663_v63 }
 0x127   : > { %v1957_v17 = vmul.f32 %v15205_v45, %v663_v63  ;;  %v15395_v38 = vadd.f32 %v2191_v28, %v1845_v61  ;;  %v3774_v37 = vadd.f32 %v3478_v18, %v3135_v21  ;;  %v21499_v50 = vrot.slane %v15349_v51, 4 }
 0x128   : > { %v2608_v8 = vmul.f32 %v15213_v39, %v663_v63  ;;  %v15404_v0 = vsel %vm4952_vm5, %v4980_v4, %v4982_v13  ;;  %v1553_v48 = vrot.slane %v1318_v32, 1  ;;  %v3247_v60 = vmul.f32 %v15234_v58, %v663_v63  ;;  %v15419_v4 = vld [vmem:[%s21275_s1 + $0x7] ss:$0 sm:$0xff] }
 0x129   : > { %21498 = vst [vmem:[#allocation23_spill] sm:$0xff] %v15395_v38  ;;  %v15400_v56 = vsel %vm4313_vm4, %v21499_v50, %v4343_v57  ;;  %21501 = vst [vmem:[#allocation25_spill] sm:$0xff] %v15404_v0  ;;  %v2192_v55 = vrot.slane %v1957_v17, 2  ;;  %v15408_v20 = vsel %vm2800_vm2, %v5618_v19, %v5620_v62  ;;  %v4117_v28 = vmul.f32 %v15413_v6, %v663_v63  ;;  %v15427_v17 = vld [vmem:[%s21275_s1 + $0x8] ss:$0 sm:$0xff] }
 0x12a   : > { %21500 = vst [vmem:[#allocation24_spill] sm:$0xff] %v15400_v56  ;;  %21502 = vst [vmem:[#allocation26_spill] sm:$0xff] %v15408_v20  ;;  %v2840_v61 = vrot.slane %v2608_v8, 6  ;;  %v4756_v21 = vmul.f32 %v15419_v4, %v663_v63  ;;  %v1554_v18 = vsel %vm1507_vm0, %v1551_v27, %v1553_v48  ;;  %v3479_v32 = vrot.slane %v3247_v60, 7  ;;  %v668_v8 = vpop.permute.xlu1 %667 }
 0x12b   : > { %v3885_v19 = vmul.f32 %v15246_v53, %v663_v63  ;;  %v5395_v50 = vmul.f32 %v15427_v17, %v663_v63  ;;  %v1846_v38 = vadd.f32 %v1554_v18, %v1097_v34  ;;  %v4345_v3 = vrot.slane %v4117_v28, 4 }
 0x12c   : > { %v2841_v20 = vsel %vm2800_vm2, %v2838_v31, %v2840_v61  ;;  %v4984_v0 = vrot.slane %v4756_v21, 5  ;;  %v15431_v49 = vadd.f32 %v3884_v22, %v3774_v37  ;;  %v2193_v27 = vsel %vm2146_vm1, %v2190_v36, %v2192_v55  ;;  %v633_v21 = vpop.permute.xlu0 %632 }
 0x12d   : > { %v3136_v60 = vadd.f32 %v2841_v20, %v15340_v2  ;;  %v5622_v56 = vrot.slane %v5395_v50, 6  ;;  %v3480_v12 = vsel %vm3439_vm3, %v3477_v15, %v3479_v32  ;;  %v4346_v51 = vsel %vm4313_vm4, %v4343_v57, %v4345_v3 }
 0x12e   : > { %21503 = vst [vmem:[#allocation27_spill] sm:$0xff] %v15431_v49  ;;  %v15438_v63 = vmul.f32 %v15228_v41, %v668_v8  ;;  %v15441_v34 = vmul.f32 %v15197_v24, %v668_v8  ;;  %v15443_v31 = vadd.f32 %v2193_v27, %v1846_v38  ;;  %v4645_v22 = vadd.f32 %v4346_v51, %v15320_v46  ;;  %v532_v51 = vld [vmem:[%s14415_s14 + $0x320] sm:$0xff] }
 0x12f   : > { %v4985_v36 = vsel %vm4952_vm5, %v4982_v13, %v4984_v0  ;;  %v15448_v2 = vmul.f32 %v15205_v45, %v668_v8  ;;  %v3775_v15 = vadd.f32 %v3480_v12, %v3136_v60  ;;  %v15452_v57 = vmul.f32 %v15213_v39, %v668_v8  ;;  %v533_v13 = vld [vmem:[%s14415_s14 + $0x328] sm:$0xff]  ;;  %1047 = vperm.xlu0 %13871, %v532_v51  }
 0x130   : > { %v21313_v37 = vrot.slane %v15441_v34, 1  ;;  %v15455_v20 = vmul.f32 %v15234_v58, %v668_v8  ;;  %v5284_v28 = vadd.f32 %v4985_v36, %v4645_v22  ;;  %v5623_v38 = vsel %vm2800_vm2, %v5620_v62, %v5622_v56  ;;  %1052 = vperm.xlu1 %13872, %v533_v13  }
 0x131   : > { %v15460_v46 = vmul.f32 %v15413_v6, %v668_v8  ;;  %v2842_v18 = vrot.slane %v15452_v57, 6  ;;  %v15470_v27 = vmul.f32 %v15419_v4, %v668_v8  ;;  %v15473_v22 = vmul.f32 %v15246_v53, %v668_v8 }
 0x132   : > { %v1556_v12 = vsel %vm1507_vm0, %v1553_v48, %v21313_v37  ;;  %v5922_v62 = vadd.f32 %v5623_v38, %v5284_v28  ;;  %v21504_v49 = vrot.slane %v15448_v2, 2  ;;  %v15484_v51 = vmul.f32 %v15427_v17, %v668_v8 }
 0x133   : > { %v1847_v60 = vadd.f32 %v1556_v12, %v1098_v40  ;;  %v4347_v36 = vrot.slane %v15460_v46, 4  ;;  %v2843_v37 = vsel %vm2800_vm2, %v2840_v61, %v2842_v18  ;;  %v4986_v50 = vrot.slane %v15470_v27, 5 }
 0x134   : > { %v2195_v48 = vsel %vm2146_vm1, %v2192_v55, %v21504_v49  ;;  %v15486_v40 = vadd.f32 %v3885_v19, %v3775_v15  ;;  %v6034_v28 = vadd.f32 %v14920_v43, %v5922_v62  ;;  %v3137_v13 = vadd.f32 %v2843_v37, %v15374_v1 }
 0x135   : > { %v15489_v38 = vadd.f32 %v2195_v48, %v1847_v60  ;;  %v21505_v12 = vrot.slane %v15455_v20, 7  ;;  %v4348_v55 = vsel %vm4313_vm4, %v4345_v3, %v4347_v36  ;;  %v21314_v61 = vrot.slane %v15484_v51, 6 }
 0x136   : > { %v1312_v8 = vmul.f32 %v15197_v24, %v633_v21  ;;  %v6139_v19 = vmax.f32 %v6034_v28, 0.0  ;;  %v15503_v43 = vsel %vm4952_vm5, %v4984_v0, %v4986_v50  ;;  %v1837_v1 = vadd.f32 %v15061_v5, %v15015_v23 }
 0x137   : > { %v3482_v49 = vsel %vm3439_vm3, %v3479_v32, %v21505_v12  ;;  %v1951_v15 = vmul.f32 %v15205_v45, %v633_v21  ;;  %v1092_v37 = vmul.f32 %v15228_v41, %v633_v21  ;;  %v2602_v3 = vmul.f32 %v15213_v39, %v633_v21 }
 0x138   : > { %v3776_v32 = vadd.f32 %v3482_v49, %v3137_v13  ;;  %v1541_v62 = vrot.slane %v1312_v8, 1  ;;  %6244 = vst.msk [vmem:[#allocation4 + $0x78] sm:$0xff] %vm385_vm6, %v6139_v19  ;;  %v15514_v60 = vsel %vm2800_vm2, %v5622_v56, %v21314_v61  ;;  %v21506_v0 = vrot.slane %v15035_v16, 2 }
 0x139   : > { %v21507_v48 = vrot.slane %v15003_v30, 2  ;;  %v2180_v5 = vrot.slane %v1951_v15, 2  ;;  %v3241_v28 = vmul.f32 %v15234_v58, %v633_v21  ;;  %v21508_v13 = vrot.slane %v15128_v42, 1 }
 0x13a   : > { %v21509_v49 = vrot.slane %v15200_v9, 1  ;;  %v2828_v56 = vrot.slane %v2602_v3, 6  ;;  %v21510_v30 = vrot.slane %v15133_v14, 2  ;;  %v21511_v15 = vrot.slane %v15208_v54, 2 }
 0x13b   : > { %v2175_v23 = vsel %vm2146_vm1, %v21507_v48, %v21506_v0  ;;  %v1542_v12 = vsel %vm1507_vm0, %v21508_v13, %v1541_v62  ;;  %v21512_v42 = vrot.slane %v15142_v47, 6  ;;  %v21513_v9 = vrot.slane %v15216_v26, 6 }
 0x13c   : > { %v1544_v8 = vsel %vm1507_vm0, %v1541_v62, %v21509_v49  ;;  %v2476_v19 = vadd.f32 %v2175_v23, %v1837_v1  ;;  %v1840_v61 = vadd.f32 %v1542_v12, %v15139_v35  ;;  %v2181_v0 = vsel %vm2146_vm1, %v21510_v30, %v2180_v5 }
 0x13d   : > { %v1841_v16 = vadd.f32 %v1544_v8, %v1092_v37  ;;  %v2183_v48 = vsel %vm2146_vm1, %v2180_v5, %v21511_v15  ;;  %v2829_v13 = vsel %vm2800_vm2, %v21512_v42, %v2828_v56  ;;  %v2831_v1 = vsel %vm2800_vm2, %v2828_v56, %v21513_v9  ;;  %v21520_v42 = vld [vmem:[#allocation16_spill] sm:$0xff]  ;;  %v21522_v9 = vld [vmem:[#allocation10_spill] sm:$0xff] }
 0x13e   : > { %v3467_v62 = vrot.slane %v3241_v28, 7  ;;  %v4111_v35 = vmul.f32 %v15413_v6, %v633_v21  ;;  %v2479_v37 = vadd.f32 %v2181_v0, %v1840_v61  ;;  %v3130_v14 = vadd.f32 %v2829_v13, %v2476_v19 }
 0x13f   : > { %v2480_v3 = vadd.f32 %v2183_v48, %v1841_v16  ;;  %v3131_v23 = vadd.f32 %v2831_v1, %v15136_v11  ;;  %v21514_v54 = vrot.slane %v15156_v29, 7  ;;  %v21515_v47 = vrot.slane %v15237_v10, 7 }
 0x140   : > { %v3879_v26 = vmul.f32 %v15246_v53, %v633_v21  ;;  %v4333_v49 = vrot.slane %v4111_v35, 4  ;;  %v3133_v28 = vadd.f32 %v15329_v33, %v2479_v37  ;;  %v21516_v19 = vrot.slane %v15162_v59, 4 }
 0x141   : > { %v3468_v5 = vsel %vm3439_vm3, %v21514_v54, %v3467_v62  ;;  %v3470_v12 = vsel %vm3439_vm3, %v3467_v62, %v21515_v47  ;;  %v3134_v8 = vadd.f32 %v15361_v7, %v2480_v3  ;;  %v21517_v29 = vrot.slane %v15254_v52, 4  ;;  %v21518_v7 = vld [vmem:[#allocation18_spill] sm:$0xff]  ;;  %v21523_v52 = vld [vmem:[#allocation11_spill] sm:$0xff]  ;;  %v673_v54 = vpop.permute.xlu1 %672 }
 0x142   : > { %v3769_v61 = vadd.f32 %v3468_v5, %v3130_v14  ;;  %v3770_v56 = vadd.f32 %v3470_v12, %v3131_v23  ;;  %v4334_v11 = vsel %vm4313_vm4, %v21516_v19, %v4333_v49  ;;  %v4750_v10 = vmul.f32 %v15419_v4, %v633_v21  ;;  %v21525_v14 = vld [vmem:[#allocation24_spill] sm:$0xff]  ;;  %v21531_v19 = vld [vmem:[#allocation13_spill] sm:$0xff] }
 0x143   : > { %v4336_v16 = vsel %vm4313_vm4, %v4333_v49, %v21517_v29  ;;  %v5389_v30 = vmul.f32 %v15427_v17, %v633_v21  ;;  %v3772_v0 = vadd.f32 %v15332_v25, %v3133_v28  ;;  %v21519_v48 = vrot.slane %v21518_v7, 4  ;;  %v21524_v25 = vld [vmem:[#allocation17_spill] sm:$0xff]  ;;  %v21526_v5 = vld [vmem:[#allocation20_spill] sm:$0xff]  ;;  %v21529_v28 = vld [vmem:[#allocation14_spill] sm:$0xff] }
 0x144   : > { %v3984_v15 = vadd.f32 %v3879_v26, %v3769_v61  ;;  %v3985_v33 = vadd.f32 %v15249_v44, %v3770_v56  ;;  %v21521_v13 = vrot.slane %v21520_v42, 4  ;;  %v4639_v1 = vadd.f32 %v4334_v11, %v21522_v9  ;;  %v21527_v12 = vld [vmem:[#allocation12_spill] sm:$0xff]  ;;  %v21535_v7 = vld [vmem:[#allocation15_spill] sm:$0xff] }
 0x145   : > { %v4640_v62 = vadd.f32 %v4336_v16, %v21523_v52  ;;  %v4972_v35 = vrot.slane %v4750_v10, 5  ;;  %v5610_v37 = vrot.slane %v5389_v30, 6  ;;  %v15570_v21 = vadd.f32 %v15473_v22, %v3776_v32  ;;  %v21533_v10 = vld [vmem:[#allocation21_spill] sm:$0xff]  ;;  %v21537_v52 = vld [vmem:[#allocation22_spill] sm:$0xff] }
 0x146   : > { %v4342_v59 = vsel %vm4313_vm4, %v21521_v13, %v21519_v48  ;;  %v3987_v3 = vadd.f32 %v21524_v25, %v3772_v0  ;;  %v4644_v23 = vadd.f32 %v21525_v14, %v3985_v33  ;;  %v3773_v47 = vadd.f32 %v21526_v5, %v3134_v8  ;;  %v534_v0 = vld [vmem:[%s14415_s14 + $0x330] sm:$0xff]  ;;  %v15607_v5 = vld [vmem:[%s21276_s2] ss:$0 sm:$0xff] }
 0x147   : > { %v4643_v44 = vadd.f32 %v4342_v59, %v3984_v15  ;;  %v21528_v26 = vrot.slane %v21527_v12, 5  ;;  %v21530_v61 = vrot.slane %v21529_v28, 5  ;;  %v21532_v11 = vrot.slane %v21531_v19, 6  ;;  %v535_v15 = vld [vmem:[%s14415_s14 + $0x338] sm:$0xff]  ;;  %1057 = vperm.xlu0 %13871, %v534_v0  }
 0x148   : > { %v4646_v32 = vadd.f32 %v4348_v55, %v3987_v3  ;;  %v21534_v8 = vld [vmem:[#allocation25_spill] sm:$0xff]  ;;  %v21536_v48 = vrot.slane %v21535_v7, 6  ;;  %v15592_v13 = vmul.f32 %v15197_v24, %v673_v54  ;;  %v15595_v59 = vmul.f32 %v15205_v45, %v673_v54  ;;  %1062 = vperm.xlu1 %13872, %v535_v15   ;;  %v21539_v3 = vld [vmem:[#allocation19_spill] sm:$0xff] }
 0x149   : > { %v4973_v49 = vsel %vm4952_vm5, %v21528_v26, %v4972_v35  ;;  %v4975_v56 = vsel %vm4952_vm5, %v4972_v35, %v21530_v61  ;;  %v5611_v22 = vsel %vm2800_vm2, %v21532_v11, %v5610_v37  ;;  %v5282_v30 = vadd.f32 %v21533_v10, %v4643_v44  ;;  %v21538_v35 = vld [vmem:[#allocation26_spill] sm:$0xff]  ;;  %v21541_v15 = vld [vmem:[#allocation23_spill] sm:$0xff] }
 0x14a   : > { %v5278_v29 = vadd.f32 %v4973_v49, %v4639_v1  ;;  %v5279_v16 = vadd.f32 %v4975_v56, %v4640_v62  ;;  %v5283_v33 = vadd.f32 %v21534_v8, %v4644_v23  ;;  %v5613_v42 = vsel %vm2800_vm2, %v5610_v37, %v21536_v48 }
 0x14b   : > { %v5285_v55 = vadd.f32 %v15503_v43, %v4646_v32  ;;  %v5920_v62 = vadd.f32 %v21537_v52, %v5282_v30  ;;  %v3988_v44 = vadd.f32 %v21539_v3, %v3773_v47  ;;  %v1557_v37 = vrot.slane %v15592_v13, 1 }
 0x14c   : > { %v5916_v9 = vadd.f32 %v5611_v22, %v5278_v29  ;;  %v5917_v1 = vadd.f32 %v5613_v42, %v5279_v16  ;;  %v5921_v25 = vadd.f32 %v21538_v35, %v5283_v33  ;;  %v2610_v14 = vmul.f32 %v15213_v39, %v673_v54 }
 0x14d   : > { %v5923_v23 = vadd.f32 %v15514_v60, %v5285_v55  ;;  %v6032_v26 = vadd.f32 %v15607_v5, %v5920_v62  ;;  %v21540_v47 = vrot.slane %v15441_v34, 1  ;;  %v2196_v61 = vrot.slane %v15595_v59, 2  ;;  %v678_v34 = vpop.permute.xlu0 %677 }
 0x14e   : > { %v6028_v43 = vadd.f32 %v15607_v5, %v5916_v9  ;;  %v6029_v12 = vadd.f32 %v15607_v5, %v5917_v1  ;;  %v6033_v49 = vadd.f32 %v15607_v5, %v5921_v25  ;;  %v2844_v60 = vrot.slane %v2610_v14, 6 }
 0x14f   : > { %v1558_v28 = vsel %vm1507_vm0, %v21540_v47, %v1557_v37  ;;  %v6035_v56 = vadd.f32 %v15607_v5, %v5923_v23  ;;  %v6137_v22 = vmax.f32 %v6032_v26, 0.0  ;;  %v1100_v29 = vmul.f32 %v15228_v41, %v673_v54 }
 0x150   : > { %v6133_v19 = vmax.f32 %v6028_v43, 0.0  ;;  %v6134_v11 = vmax.f32 %v6029_v12, 0.0  ;;  %v6138_v32 = vmax.f32 %v6033_v49, 0.0  ;;  %v2845_v16 = vsel %vm2800_vm2, %v2842_v18, %v2844_v60 }
 0x151   : > { %v3249_v10 = vmul.f32 %v15234_v58, %v673_v54  ;;  %v6140_v30 = vmax.f32 %v6035_v56, 0.0  ;;  %6242 = vst.msk [vmem:[#allocation4 + $0x68] sm:$0xff] %vm385_vm6, %v6137_v22  ;;  %v1848_v0 = vadd.f32 %v1558_v28, %v15438_v63  ;;  %v3138_v8 = vadd.f32 %v2845_v16, %v21541_v15  ;;  %v536_v22 = vld [vmem:[%s14415_s14 + $0x340] sm:$0xff] }
 0x152   : > { %6238 = vst.msk [vmem:[#allocation4 + $0x48] sm:$0xff] %vm385_vm6, %v6133_v19  ;;  %6239 = vst.msk [vmem:[#allocation4 + $0x50] sm:$0xff] %vm385_vm6, %v6134_v11  ;;  %v4119_v33 = vmul.f32 %v15413_v6, %v673_v54  ;;  %v21542_v57 = vrot.slane %v15448_v2, 2  ;;  %v4758_v48 = vmul.f32 %v15419_v4, %v673_v54  ;;  %v15635_v42 = vmul.f32 %v15427_v17, %v673_v54  ;;  %v683_v19 = vpop.permute.xlu1 %682 }
 0x153   : > { %6243 = vst.msk [vmem:[#allocation4 + $0x70] sm:$0xff] %vm385_vm6, %v6138_v32  ;;  %v3483_v7 = vrot.slane %v3249_v10, 7  ;;  %6245 = vst.msk [vmem:[#allocation4 + $0x80] sm:$0xff] %vm385_vm6, %v6140_v30  ;;  %v3887_v63 = vmul.f32 %v15246_v53, %v673_v54  ;;  %v1321_v59 = vmul.f32 %v15197_v24, %v678_v34  ;;  %v15641_v55 = vmul.f32 %v15205_v45, %v678_v34  ;;  %v537_v32 = vld [vmem:[%s14415_s14 + $0x348] sm:$0xff] }
 0x154   : > { %v2197_v18 = vsel %vm2146_vm1, %v21542_v57, %v2196_v61  ;;  %v4349_v13 = vrot.slane %v4119_v33, 4  ;;  %v21543_v2 = vrot.slane %v15455_v20, 7  ;;  %v4988_v1 = vrot.slane %v4758_v48, 5  ;;  %1067 = vperm.xlu0 %13871, %v536_v22   ;;  %1287 = vperm.xlu1 %13872, %v537_v32  }
 0x155   : > { %v5626_v52 = vrot.slane %v15635_v42, 6  ;;  %v2611_v62 = vmul.f32 %v15213_v39, %v678_v34  ;;  %v15648_v35 = vadd.f32 %v2197_v18, %v1848_v0  ;;  %v1559_v3 = vrot.slane %v1321_v59, 1  ;;  %v21545_v42 = vld [vmem:[#allocation27_spill] sm:$0xff] }
 0x156   : > { %v3484_v9 = vsel %vm3439_vm3, %v21543_v2, %v3483_v7  ;;  %v4350_v54 = vsel %vm4313_vm4, %v4347_v36, %v4349_v13  ;;  %v1101_v23 = vmul.f32 %v15228_v41, %v678_v34  ;;  %v2198_v20 = vrot.slane %v15641_v55, 2 }
 0x157   : > { %v3777_v25 = vadd.f32 %v3484_v9, %v3138_v8  ;;  %v4647_v14 = vadd.f32 %v4350_v54, %v3988_v44  ;;  %v2846_v43 = vrot.slane %v2611_v62, 6  ;;  %v4989_v12 = vsel %vm4952_vm5, %v4986_v50, %v4988_v1 }
 0x158   : > { %v21544_v26 = vrot.slane %v15484_v51, 6  ;;  %v1560_v46 = vsel %vm1507_vm0, %v1557_v37, %v1559_v3  ;;  %v3250_v36 = vmul.f32 %v15234_v58, %v678_v34  ;;  %v4120_v50 = vmul.f32 %v15413_v6, %v678_v34 }
 0x159   : > { %v15663_v44 = vadd.f32 %v3887_v63, %v3777_v25  ;;  %v5286_v47 = vadd.f32 %v4989_v12, %v4647_v14  ;;  %v1849_v28 = vadd.f32 %v1560_v46, %v1100_v29  ;;  %v2847_v56 = vsel %vm2800_vm2, %v2844_v60, %v2846_v43  ;;  %v688_v46 = vpop.permute.xlu0 %687 }
 0x15a   : > { %v5627_v49 = vsel %vm2800_vm2, %v21544_v26, %v5626_v52  ;;  %v3139_v11 = vadd.f32 %v2847_v56, %v15443_v31  ;;  %v3485_v27 = vrot.slane %v3250_v36, 7  ;;  %v4759_v51 = vmul.f32 %v15419_v4, %v678_v34 }
 0x15b   : > { %v5924_v16 = vadd.f32 %v5627_v49, %v5286_v47  ;;  %v2199_v37 = vsel %vm2146_vm1, %v2196_v61, %v2198_v20  ;;  %v3888_v10 = vmul.f32 %v15246_v53, %v678_v34  ;;  %v5398_v30 = vmul.f32 %v15427_v17, %v678_v34 }
 0x15c   : > { %v3486_v60 = vsel %vm3439_vm3, %v3483_v7, %v3485_v27  ;;  %v4351_v29 = vrot.slane %v4120_v50, 4  ;;  %v4990_v0 = vrot.slane %v4759_v51, 5  ;;  %v1322_v31 = vmul.f32 %v15197_v24, %v683_v19 }
 0x15d   : > { %v6036_v15 = vadd.f32 %v15607_v5, %v5924_v16  ;;  %v3778_v8 = vadd.f32 %v3486_v60, %v3139_v11  ;;  %v5628_v33 = vrot.slane %v5398_v30, 6  ;;  %v15678_v57 = vmul.f32 %v15205_v45, %v683_v19 }
 0x15e   : > { %v15680_v61 = vadd.f32 %v2199_v37, %v1849_v28  ;;  %v4352_v18 = vsel %vm4313_vm4, %v4349_v13, %v4351_v29  ;;  %v1561_v34 = vrot.slane %v1322_v31, 1  ;;  %v2612_v48 = vmul.f32 %v15213_v39, %v683_v19 }
 0x15f   : > { %v6141_v7 = vmax.f32 %v6036_v15, 0.0  ;;  %v4648_v63 = vadd.f32 %v4352_v18, %v21545_v42  ;;  %v4991_v59 = vsel %vm4952_vm5, %v4988_v1, %v4990_v0  ;;  %v1102_v55 = vmul.f32 %v15228_v41, %v683_v19 }
 0x160   : > { %v1562_v2 = vsel %vm1507_vm0, %v1559_v3, %v1561_v34  ;;  %v2200_v9 = vrot.slane %v15678_v57, 2  ;;  %v2848_v62 = vrot.slane %v2612_v48, 6  ;;  %v15690_v25 = vmul.f32 %v15234_v58, %v683_v19  ;;  %v540_v48 = vld [vmem:[%s14415_s14 + $0x360] sm:$0xff] }
 0x161   : > { %6246 = vst.msk [vmem:[#allocation4 + $0x88] sm:$0xff] %vm385_vm6, %v6141_v7  ;;  %v15693_v13 = vadd.f32 %v3888_v10, %v3778_v8  ;;  %v5287_v54 = vadd.f32 %v4991_v59, %v4648_v63  ;;  %v5629_v14 = vsel %vm2800_vm2, %v5626_v52, %v5628_v33  ;;  %v4121_v12 = vmul.f32 %v15413_v6, %v683_v19 }
 0x162   : > { %v1850_v1 = vadd.f32 %v1562_v2, %v1101_v23  ;;  %v2849_v26 = vsel %vm2800_vm2, %v2846_v43, %v2848_v62  ;;  %v3487_v3 = vrot.slane %v15690_v25, 7  ;;  %v4760_v49 = vmul.f32 %v15419_v4, %v683_v19  ;;  %2580 = vperm.xlu1 %13872, %v540_v48  }
 0x163   : > { %v5925_v36 = vadd.f32 %v5629_v14, %v5287_v54  ;;  %v3140_v47 = vadd.f32 %v2849_v26, %v15489_v38  ;;  %v3889_v28 = vmul.f32 %v15246_v53, %v683_v19  ;;  %v4353_v56 = vrot.slane %v4121_v12, 4 }
 0x164   : > { %v2201_v11 = vsel %vm2146_vm1, %v2198_v20, %v2200_v9  ;;  %v3488_v52 = vsel %vm3439_vm3, %v3485_v27, %v3487_v3  ;;  %v4992_v50 = vrot.slane %v4760_v49, 5  ;;  %v5399_v23 = vmul.f32 %v15427_v17, %v683_v19 }
 0x165   : > { %v6037_v43 = vadd.f32 %v15607_v5, %v5925_v36  ;;  %v3779_v51 = vadd.f32 %v3488_v52, %v3140_v47  ;;  %v4354_v22 = vsel %vm4313_vm4, %v4351_v29, %v4353_v56  ;;  %v1323_v32 = vmul.f32 %v15197_v24, %v688_v46 }
 0x166   : > { %v15708_v16 = vadd.f32 %v2201_v11, %v1850_v1  ;;  %v4649_v38 = vadd.f32 %v4354_v22, %v15486_v40  ;;  %v5630_v37 = vrot.slane %v5399_v23, 6  ;;  %v15712_v20 = vmul.f32 %v15205_v45, %v688_v46 }
 0x167   : > { %v6142_v27 = vmax.f32 %v6037_v43, 0.0  ;;  %v4993_v19 = vsel %vm4952_vm5, %v4990_v0, %v4992_v50  ;;  %v1563_v10 = vrot.slane %v1323_v32, 1  ;;  %v2613_v30 = vmul.f32 %v15213_v39, %v688_v46  ;;  %v539_v0 = vld [vmem:[%s14415_s14 + $0x358] sm:$0xff] }
 0x168   : > { %v5288_v60 = vadd.f32 %v4993_v19, %v4649_v38  ;;  %v1103_v29 = vmul.f32 %v15228_v41, %v688_v46  ;;  %v2202_v31 = vrot.slane %v15712_v20, 2  ;;  %v3252_v15 = vmul.f32 %v15234_v58, %v688_v46  ;;  %2575 = vperm.xlu0 %13871, %v539_v0  }
 0x169   : > { %6247 = vst.msk [vmem:[#allocation4 + $0x90] sm:$0xff] %vm385_vm6, %v6142_v27  ;;  %v5631_v40 = vsel %vm2800_vm2, %v5628_v33, %v5630_v37  ;;  %v1564_v8 = vsel %vm1507_vm0, %v1561_v34, %v1563_v10  ;;  %v2850_v57 = vrot.slane %v2613_v30, 6  ;;  %v4122_v18 = vmul.f32 %v15413_v6, %v688_v46  ;;  %v693_v34 = vpop.permute.xlu1 %692 }
 0x16a   : > { %v15725_v7 = vadd.f32 %v3889_v28, %v3779_v51  ;;  %v5926_v42 = vadd.f32 %v5631_v40, %v5288_v60  ;;  %v1851_v63 = vadd.f32 %v1564_v8, %v1102_v55  ;;  %v3489_v59 = vrot.slane %v3252_v15, 7 }
 0x16b   : > { %v2851_v2 = vsel %vm2800_vm2, %v2848_v62, %v2850_v57  ;;  %v4355_v25 = vrot.slane %v4122_v18, 4  ;;  %v4761_v54 = vmul.f32 %v15419_v4, %v688_v46  ;;  %v5400_v33 = vmul.f32 %v15427_v17, %v688_v46 }
 0x16c   : > { %21546 = vst [vmem:[#allocation18_spill] sm:$0xff] %v15725_v7  ;;  %v6038_v14 = vadd.f32 %v15607_v5, %v5926_v42  ;;  %v2203_v12 = vsel %vm2146_vm1, %v2200_v9, %v2202_v31  ;;  %v3141_v1 = vadd.f32 %v2851_v2, %v15648_v35  ;;  %v3890_v26 = vmul.f32 %v15246_v53, %v688_v46 }
 0x16d   : > { %v15734_v55 = vadd.f32 %v2203_v12, %v1851_v63  ;;  %v4356_v49 = vsel %vm4313_vm4, %v4353_v56, %v4355_v25  ;;  %v4994_v36 = vrot.slane %v4761_v54, 5  ;;  %v5632_v62 = vrot.slane %v5400_v33, 6 }
 0x16e   : > { %v6143_v47 = vmax.f32 %v6038_v14, 0.0  ;;  %v3490_v28 = vsel %vm3439_vm3, %v3487_v3, %v3489_v59  ;;  %v4650_v11 = vadd.f32 %v4356_v49, %v15570_v21  ;;  %v1324_v52 = vmul.f32 %v15197_v24, %v693_v34 }
 0x16f   : > { %v3780_v23 = vadd.f32 %v3490_v28, %v3141_v1  ;;  %v4995_v9 = vsel %vm4952_vm5, %v4992_v50, %v4994_v36  ;;  %v15742_v35 = vmul.f32 %v15205_v45, %v693_v34  ;;  %v2614_v46 = vmul.f32 %v15213_v39, %v693_v34 }
 0x170   : > { %6248 = vst.msk [vmem:[#allocation4 + $0x98] sm:$0xff] %vm385_vm6, %v6143_v47  ;;  %v5289_v56 = vadd.f32 %v4995_v9, %v4650_v11  ;;  %v1104_v43 = vmul.f32 %v15228_v41, %v693_v34  ;;  %v1565_v51 = vrot.slane %v1324_v52, 1  ;;  %v3253_v3 = vmul.f32 %v15234_v58, %v693_v34  ;;  %v708_v11 = vpop.permute.xlu1 %707  ;;  %v541_v52 = vld [vmem:[%s14415_s14 + $0x368] sm:$0xff] }
 0x171   : > { %v5633_v21 = vsel %vm2800_vm2, %v5630_v37, %v5632_v62  ;;  %v2204_v22 = vrot.slane %v15742_v35, 2  ;;  %v2852_v32 = vrot.slane %v2614_v46, 6  ;;  %v15751_v50 = vmul.f32 %v15413_v6, %v693_v34  ;;  %4078 = vperm.xlu0 %13871, %v541_v52  }
 0x172   : > { %v5927_v38 = vadd.f32 %v5633_v21, %v5289_v56  ;;  %v1566_v20 = vsel %vm1507_vm0, %v1563_v10, %v1565_v51  ;;  %v3491_v27 = vrot.slane %v3253_v3, 7  ;;  %v15755_v19 = vmul.f32 %v15419_v4, %v693_v34  ;;  %v698_v10 = vpop.permute.xlu0 %697 }
 0x173   : > { %v15757_v30 = vadd.f32 %v3890_v26, %v3780_v23  ;;  %v2853_v60 = vsel %vm2800_vm2, %v2850_v57, %v2852_v32  ;;  %v3891_v15 = vmul.f32 %v15246_v53, %v693_v34  ;;  %v4357_v37 = vrot.slane %v15751_v50, 4  ;;  %v538_v23 = vld [vmem:[%s14415_s14 + $0x350] sm:$0xff] }
 0x174   : > { %v6039_v40 = vadd.f32 %v15607_v5, %v5927_v38  ;;  %v1852_v8 = vadd.f32 %v1566_v20, %v1103_v29  ;;  %v3142_v18 = vadd.f32 %v2853_v60, %v15680_v61  ;;  %v4996_v0 = vrot.slane %v15755_v19, 5  ;;  %2570 = vperm.xlu1 %13872, %v538_v23   ;;  %v15839_v19 = vld [vmem:[%s21275_s1] ss:$0 sm:$0xff]  ;;  %v15845_v60 = vld [vmem:[%s21275_s1 + $0x2] ss:$0 sm:$0xff] }
 0x175   : > { %21547 = vst [vmem:[#allocation16_spill] sm:$0xff] %v15757_v30  ;;  %v2205_v48 = vsel %vm2146_vm1, %v2202_v31, %v2204_v22  ;;  %v3492_v42 = vsel %vm3439_vm3, %v3489_v59, %v3491_v27  ;;  %v4358_v63 = vsel %vm4313_vm4, %v4355_v25, %v4357_v37  ;;  %v5401_v57 = vmul.f32 %v15427_v17, %v693_v34  ;;  %v6340_v30 = vld [vmem:[#allocation4 + $0x30] ss:$2 sm:$0xff] }
 0x176   : > { %v6144_v2 = vmax.f32 %v6039_v40, 0.0  ;;  %v3781_v54 = vadd.f32 %v3492_v42, %v3142_v18  ;;  %v4651_v33 = vadd.f32 %v4358_v63, %v15663_v44  ;;  %v4997_v14 = vsel %vm4952_vm5, %v4994_v36, %v4996_v0  ;;  %v15861_v18 = vld [vmem:[%s21275_s1 + $0x3] ss:$0 sm:$0xff] }
 0x177   : > { %v5634_v29 = vrot.slane %v5401_v57, 6  ;;  %v15772_v61 = vmul.f32 %v15197_v24, %v698_v10  ;;  %v15775_v12 = vmul.f32 %v15205_v45, %v698_v10  ;;  %v15778_v31 = vmul.f32 %v15213_v39, %v698_v10 }
 0x178   : > { %6249 = vst.msk [vmem:[#allocation4 + $0xa0] sm:$0xff] %vm385_vm6, %v6144_v2  ;;  %v15781_v59 = vadd.f32 %v2205_v48, %v1852_v8  ;;  %v5290_v25 = vadd.f32 %v4997_v14, %v4651_v33  ;;  %v15784_v44 = vmul.f32 %v15228_v41, %v698_v10  ;;  %v15787_v34 = vmul.f32 %v15234_v58, %v698_v10  ;;  %v713_v48 = vpop.permute.xlu0 %712  ;;  %v15884_v33 = vld [vmem:[%s21275_s1 + $0x5] ss:$0 sm:$0xff] }
 0x179   : > { %v5635_v24 = vsel %vm2800_vm2, %v5632_v62, %v5634_v29  ;;  %v21328_v45 = vrot.slane %v15772_v61, 1  ;;  %v21325_v39 = vrot.slane %v15775_v12, 2  ;;  %v21319_v1 = vrot.slane %v15778_v31, 6 }
 0x17a   : > { %v5928_v26 = vadd.f32 %v5635_v24, %v5290_v25  ;;  %v21318_v49 = vrot.slane %v15787_v34, 7  ;;  %v15795_v36 = vmul.f32 %v15413_v6, %v698_v10  ;;  %v15798_v41 = vmul.f32 %v15419_v4, %v698_v10 }
 0x17b   : > { %v15800_v47 = vadd.f32 %v3891_v15, %v3781_v54  ;;  %v1568_v58 = vsel %vm1507_vm0, %v1565_v51, %v21328_v45  ;;  %v2855_v62 = vsel %vm2800_vm2, %v2852_v32, %v21319_v1  ;;  %v15809_v28 = vmul.f32 %v15427_v17, %v698_v10  ;;  %v543_v1 = vld [vmem:[%s14415_s14 + $0x378] sm:$0xff] }
 0x17c   : > { %21548 = vst [vmem:[#allocation10_spill] sm:$0xff] %v15795_v36  ;;  %21549 = vst [vmem:[#allocation11_spill] sm:$0xff] %v15798_v41  ;;  %v6040_v9 = vadd.f32 %v15607_v5, %v5928_v26  ;;  %v1853_v35 = vadd.f32 %v1568_v58, %v1104_v43  ;;  %v3143_v46 = vadd.f32 %v2855_v62, %v15708_v16  ;;  %v21317_v3 = vrot.slane %v15795_v36, 4 }
 0x17d   : > { %21550 = vst [vmem:[#allocation17_spill] sm:$0xff] %v15809_v28  ;;  %v3892_v56 = vmul.f32 %v15246_v53, %v698_v10  ;;  %v3494_v51 = vsel %vm3439_vm3, %v3491_v27, %v21318_v49  ;;  %v21316_v21 = vrot.slane %v15798_v41, 5  ;;  %v21315_v32 = vrot.slane %v15809_v28, 6  ;;  %v15828_v53 = vld [vmem:[%s21275_s1 + $0x1] ss:$0 sm:$0xff]  ;;  %v542_v49 = vld [vmem:[%s14415_s14 + $0x370] sm:$0xff]  ;;  %4088 = vperm.xlu1 %13872, %v543_v1  }
 0x17e   : > { %v6145_v50 = vmax.f32 %v6040_v9, 0.0  ;;  %v2207_v43 = vsel %vm2146_vm1, %v2204_v22, %v21325_v39  ;;  %v3782_v16 = vadd.f32 %v3494_v51, %v3143_v46  ;;  %v15831_v38 = vmul.f32 %v15828_v53, %v708_v11  ;;  %4083 = vperm.xlu0 %13871, %v542_v49   ;;  %v6334_v41 = vld [vmem:[#allocation4] ss:$2 sm:$0xff] }
 0x17f   : > { %v2492_v20 = vadd.f32 %v2207_v43, %v1853_v35  ;;  %v4360_v27 = vsel %vm4313_vm4, %v4357_v37, %v21317_v3  ;;  %v1107_v22 = vmul.f32 %v15839_v19, %v708_v11  ;;  %v15848_v15 = vmul.f32 %v15845_v60, %v708_v11 }
 0x180   : > { %6250 = vst.msk [vmem:[#allocation4 + $0xa8] sm:$0xff] %vm385_vm6, %v6145_v50  ;;  %v4652_v40 = vadd.f32 %v4360_v27, %v15693_v13  ;;  %v4999_v37 = vsel %vm4952_vm5, %v4996_v0, %v21316_v21  ;;  %v5637_v8 = vsel %vm2800_vm2, %v5634_v29, %v21315_v32  ;;  %v15864_v10 = vmul.f32 %v15861_v18, %v708_v11  ;;  %v15872_v0 = vld [vmem:[%s21275_s1 + $0x4] ss:$0 sm:$0xff]  ;;  %v718_v32 = vpop.permute.xlu1 %717 }
 0x181   : > { %v15866_v42 = vadd.f32 %v3892_v56, %v3782_v16  ;;  %v21326_v13 = vrot.slane %v15831_v38, 1  ;;  %v15875_v63 = vmul.f32 %v15872_v0, %v708_v11  ;;  %v15878_v57 = vmul.f32 %v15413_v6, %v708_v11 }
 0x182   : > { %v5291_v2 = vadd.f32 %v4999_v37, %v4652_v40  ;;  %v21324_v54 = vrot.slane %v15848_v15, 2  ;;  %v15887_v14 = vmul.f32 %v15884_v33, %v708_v11  ;;  %v15890_v29 = vmul.f32 %v15419_v4, %v708_v11 }
 0x183   : > { %21551 = vst [vmem:[#allocation24_spill] sm:$0xff] %v15878_v57  ;;  %v21320_v25 = vrot.slane %v15864_v10, 6  ;;  %v21323_v24 = vrot.slane %v15875_v63, 7  ;;  %v15895_v26 = vmul.f32 %v15427_v17, %v708_v11  ;;  %v1328_v58 = vmul.f32 %v15828_v53, %v713_v48 }
 0x184   : > { %21552 = vst [vmem:[#allocation20_spill] sm:$0xff] %v15887_v14  ;;  %21553 = vst [vmem:[#allocation12_spill] sm:$0xff] %v15890_v29  ;;  %v5929_v62 = vadd.f32 %v5637_v8, %v5291_v2  ;;  %v21321_v52 = vrot.slane %v15878_v57, 4  ;;  %v1108_v23 = vmul.f32 %v15839_v19, %v713_v48  ;;  %v1967_v9 = vmul.f32 %v15845_v60, %v713_v48 }
 0x185   : > { %21554 = vst [vmem:[#allocation14_spill] sm:$0xff] %v15895_v26  ;;  %v21322_v35 = vrot.slane %v15890_v29, 5  ;;  %v1573_v46 = vrot.slane %v1328_v58, 1  ;;  %v2618_v56 = vmul.f32 %v15861_v18, %v713_v48  ;;  %v3257_v51 = vmul.f32 %v15872_v0, %v713_v48 }
 0x186   : > { %v6041_v50 = vadd.f32 %v15607_v5, %v5929_v62  ;;  %v2212_v11 = vrot.slane %v1967_v9, 2  ;;  %v4127_v43 = vmul.f32 %v15413_v6, %v713_v48  ;;  %v4766_v16 = vmul.f32 %v15419_v4, %v713_v48 }
 0x187   : > { %v1574_v27 = vsel %vm1507_vm0, %v21326_v13, %v1573_v46  ;;  %v2860_v40 = vrot.slane %v2618_v56, 6  ;;  %v3499_v37 = vrot.slane %v3257_v51, 7  ;;  %v15911_v8 = vmul.f32 %v15427_v17, %v713_v48 }
 0x188   : > { %v6146_v2 = vmax.f32 %v6041_v50, 0.0  ;;  %v21327_v58 = vrot.slane %v15895_v26, 6  ;;  %v1856_v62 = vadd.f32 %v1574_v27, %v1107_v22  ;;  %v4365_v9 = vrot.slane %v4127_v43, 4 }
 0x189   : > { %v2213_v21 = vsel %vm2146_vm1, %v21324_v54, %v2212_v11  ;;  %v2861_v3 = vsel %vm2800_vm2, %v21320_v25, %v2860_v40  ;;  %v3895_v56 = vmul.f32 %v15884_v33, %v713_v48  ;;  %v5004_v51 = vrot.slane %v4766_v16, 5 }
 0x18a   : > { %6251 = vst.msk [vmem:[#allocation4 + $0xb0] sm:$0xff] %vm385_vm6, %v6146_v2  ;;  %v3146_v50 = vadd.f32 %v2861_v3, %v2492_v20  ;;  %v3500_v22 = vsel %vm3439_vm3, %v21323_v24, %v3499_v37  ;;  %v4366_v43 = vsel %vm4313_vm4, %v21321_v52, %v4365_v9  ;;  %v5642_v27 = vrot.slane %v15911_v8, 6 }
 0x18b   : > { %v15931_v25 = vadd.f32 %v2213_v21, %v1856_v62  ;;  %v4655_v48 = vadd.f32 %v4366_v43, %v15800_v47  ;;  %v5005_v16 = vsel %vm4952_vm5, %v21322_v35, %v5004_v51  ;;  %v15938_v3 = vmul.f32 %v15828_v53, %v718_v32 }
 0x18c   : > { %v3785_v20 = vadd.f32 %v3500_v22, %v3146_v50  ;;  %v15941_v2 = vmul.f32 %v15845_v60, %v718_v32  ;;  %v15944_v52 = vmul.f32 %v15861_v18, %v718_v32  ;;  %v15947_v49 = vmul.f32 %v15872_v0, %v718_v32 }
 0x18d   : > { %v5294_v21 = vadd.f32 %v5005_v16, %v4655_v48  ;;  %v15950_v47 = vmul.f32 %v15839_v19, %v718_v32  ;;  %v21329_v62 = vrot.slane %v15938_v3, 1  ;;  %v15954_v43 = vmul.f32 %v15413_v6, %v718_v32 }
 0x18e   : > { %v5643_v1 = vsel %vm2800_vm2, %v21327_v58, %v5642_v27  ;;  %v2214_v50 = vrot.slane %v15941_v2, 2  ;;  %v21335_v22 = vrot.slane %v15944_v52, 6  ;;  %v21334_v48 = vrot.slane %v15947_v49, 7 }
 0x18f   : > { %21555 = vst [vmem:[#allocation13_spill] sm:$0xff] %v15954_v43  ;;  %v5932_v16 = vadd.f32 %v5643_v1, %v5294_v21  ;;  %v1576_v35 = vsel %vm1507_vm0, %v1573_v46, %v21329_v62  ;;  %v21332_v24 = vrot.slane %v15954_v43, 4  ;;  %v15969_v54 = vmul.f32 %v15419_v4, %v718_v32  ;;  %v15979_v21 = vpop.permute.xlu0 %722 }
 0x190   : > { %v15971_v39 = vadd.f32 %v3895_v56, %v3785_v20  ;;  %v1857_v13 = vadd.f32 %v1576_v35, %v1108_v23  ;;  %v2215_v58 = vsel %vm2146_vm1, %v2212_v11, %v2214_v50  ;;  %v15977_v45 = vmul.f32 %v15884_v33, %v718_v32 }
 0x191   : > { %v6044_v1 = vadd.f32 %v15607_v5, %v5932_v16  ;;  %v4368_v46 = vsel %vm4313_vm4, %v4365_v9, %v21332_v24  ;;  %v21333_v62 = vrot.slane %v15969_v54, 5  ;;  %v15987_v56 = vmul.f32 %v15427_v17, %v718_v32 }
 0x192   : > { %21556 = vst [vmem:[#allocation21_spill] sm:$0xff] %v15977_v45  ;;  %v15992_v23 = vsel %vm2800_vm2, %v2860_v40, %v21335_v22  ;;  %v15997_v35 = vsel %vm3439_vm3, %v3499_v37, %v21334_v48  ;;  %v4656_v11 = vadd.f32 %v4368_v46, %v15866_v42  ;;  %v21330_v16 = vmov 0.0   ;;  %v6440_v45 = vld [vmem:[#allocation4 + $0x1] ss:$2 sm:$0xff] }
 0x193   : > { %21557 = vst [vmem:[#allocation25_spill] sm:$0xff] %v15997_v35  ;;  %v6149_v20 = vmax.f32 %v6044_v1, 0.0  ;;  %v5007_v9 = vsel %vm4952_vm5, %v5004_v51, %v21333_v62  ;;  %v21336_v32 = vrot.slane %v15987_v56, 6  ;;  %386 = vst.msk [vmem:[#allocation2] sm:$0xff] %vm385_vm6, %v21330_v16  ;;  %v1330_v42 = vmul.f32 %v15828_v53, %v15979_v21  ;;  %13351 = vmatprep.subr.bf16.mxu1 %v21330_v16  ;;  %v733_v7 = vpop.permute.xlu0 %732 }
 0x194   : > { %387 = vst.msk [vmem:[#allocation2 + $0x8] sm:$0xff] %vm385_vm6, %v21330_v16  ;;  %388 = vst.msk [vmem:[#allocation2 + $0x10] sm:$0xff] %vm385_vm6, %v21330_v16  ;;  %v5295_v40 = vadd.f32 %v5007_v9, %v4656_v11  ;;  %v16075_v37 = vmul.f32 %v15845_v60, %v15979_v21  ;;  %v2620_v51 = vmul.f32 %v15861_v18, %v15979_v21 }
 0x195   : > { %389 = vst.msk [vmem:[#allocation2 + $0x18] sm:$0xff] %vm385_vm6, %v21330_v16  ;;  %390 = vst.msk [vmem:[#allocation2 + $0x20] sm:$0xff] %vm385_vm6, %v21330_v16  ;;  %v16081_v1 = vmul.f32 %v15872_v0, %v15979_v21  ;;  %v16084_v46 = vadd.f32 %v2215_v58, %v1857_v13  ;;  %v5645_v11 = vsel %vm2800_vm2, %v5642_v27, %v21336_v32  ;;  %v1577_v9 = vrot.slane %v1330_v42, 1  ;;  %v6444_v32 = vld [vmem:[#allocation4 + $0x21] ss:$2 sm:$0xff] }
 0x196   : > { %391 = vst.msk [vmem:[#allocation2 + $0x28] sm:$0xff] %vm385_vm6, %v21330_v16  ;;  %392 = vst.msk [vmem:[#allocation2 + $0x30] sm:$0xff] %vm385_vm6, %v21330_v16  ;;  %v5933_v24 = vadd.f32 %v5645_v11, %v5295_v40  ;;  %v2216_v62 = vrot.slane %v16075_v37, 2  ;;  %v2864_v48 = vrot.slane %v2620_v51, 6  ;;  %v1110_v13 = vmul.f32 %v15839_v19, %v15979_v21 }
 0x197   : > { %393 = vst.msk [vmem:[#allocation2 + $0x38] sm:$0xff] %vm385_vm6, %v21330_v16  ;;  %394 = vst.msk [vmem:[#allocation2 + $0x40] sm:$0xff] %vm385_vm6, %v21330_v16  ;;  %v3503_v22 = vrot.slane %v16081_v1, 7  ;;  %v21558_v58 = vrot.slane %v15938_v3, 1  ;;  %v16104_v27 = vmul.f32 %v15419_v4, %v15979_v21  ;;  %v16114_v37 = vmul.f32 %v15884_v33, %v15979_v21  ;;  %v6338_v3 = vld [vmem:[#allocation4 + $0x20] ss:$2 sm:$0xff] }
 0x198   : > { %395 = vst.msk [vmem:[#allocation2 + $0x48] sm:$0xff] %vm385_vm6, %v21330_v16  ;;  %396 = vst.msk [vmem:[#allocation2 + $0x50] sm:$0xff] %vm385_vm6, %v21330_v16  ;;  %v6045_v42 = vadd.f32 %v15607_v5, %v5933_v24  ;;  %v2217_v4 = vsel %vm2146_vm1, %v2214_v50, %v2216_v62  ;;  %v21560_v51 = vrot.slane %v15944_v52, 6  ;;  %v21561_v1 = vrot.slane %v15947_v49, 7 }
 0x199   : > { %397 = vst.msk [vmem:[#allocation2 + $0x58] sm:$0xff] %vm385_vm6, %v21330_v16  ;;  %398 = vst.msk [vmem:[#allocation2 + $0x60] sm:$0xff] %vm385_vm6, %v21330_v16  ;;  %v1578_v8 = vsel %vm1507_vm0, %v21558_v58, %v1577_v9 }
 0x19a   : > { %399 = vst.msk [vmem:[#allocation2 + $0x68] sm:$0xff] %vm385_vm6, %v21330_v16  ;;  %400 = vst.msk [vmem:[#allocation2 + $0x70] sm:$0xff] %vm385_vm6, %v21330_v16  ;;  %v1858_v40 = vadd.f32 %v1578_v8, %v15950_v47  ;;  %v16128_v24 = vsel %vm3439_vm3, %v21561_v1, %v3503_v22  ;;  %v5008_v47 = vrot.slane %v16104_v27, 5  ;;  %v21563_v27 = vrot.slane %v15969_v54, 5  ;;  %v16162_v54 = vld [vmem:[%s21275_s1 + $0x6] ss:$0 sm:$0xff] }
 0x19b   : > { %401 = vst.msk [vmem:[#allocation2 + $0x78] sm:$0xff] %vm385_vm6, %v21330_v16  ;;  %402 = vst.msk [vmem:[#allocation2 + $0x80] sm:$0xff] %vm385_vm6, %v21330_v16  ;;  %v6858_v11 = vld [vmem:[#allocation2 + $0x1] sm:$0xff]  ;;  %v6859_v58 = vld [vmem:[#allocation2 + $0x9] sm:$0xff] }
 0x19c   : > { %403 = vst.msk [vmem:[#allocation2 + $0x88] sm:$0xff] %vm385_vm6, %v21330_v16  ;;  %404 = vst.msk [vmem:[#allocation2 + $0x90] sm:$0xff] %vm385_vm6, %v21330_v16  ;;  %v6886_v50 = vpack.c.bf16 %v6859_v58, %v6858_v11  ;;  %v6442_v11 = vld [vmem:[#allocation4 + $0x11] ss:$2 sm:$0xff] }
 0x19d   : > { %405 = vst.msk [vmem:[#allocation2 + $0x98] sm:$0xff] %vm385_vm6, %v21330_v16  ;;  %406 = vst.msk [vmem:[#allocation2 + $0xa0] sm:$0xff] %vm385_vm6, %v21330_v16 }
 0x19e   : > { %407 = vst.msk [vmem:[#allocation2 + $0xa8] sm:$0xff] %vm385_vm6, %v21330_v16  ;;  %408 = vst.msk [vmem:[#allocation2 + $0xb0] sm:$0xff] %vm385_vm6, %v21330_v16  ;;  %13067 = vmatprep.mubr.msk.bf16.mxu0 %vm385_vm6, %v6886_v50  ;;  %v16178_v50 = vld [vmem:[%s21275_s1 + $0x8] ss:$0 sm:$0xff] }
 0x19f   : > { %409 = vst.msk [vmem:[#allocation2 + $0xb8] sm:$0xff] %vm385_vm6, %v21330_v16  ;;  %410 = vst.msk [vmem:[#allocation2 + $0xc0] sm:$0xff] %vm385_vm6, %v21330_v16 }
 0x1a0   : > { %411 = vst.msk [vmem:[#allocation2 + $0xc8] sm:$0xff] %vm385_vm6, %v21330_v16  ;;  %412 = vst.msk [vmem:[#allocation2 + $0xd0] sm:$0xff] %vm385_vm6, %v21330_v16 }
 0x1a1   : > { %413 = vst.msk [vmem:[#allocation2 + $0xd8] sm:$0xff] %vm385_vm6, %v21330_v16  ;;  %414 = vst.msk [vmem:[#allocation2 + $0xe0] sm:$0xff] %vm385_vm6, %v21330_v16 }
 0x1a2   : > { %415 = vst.msk [vmem:[#allocation2 + $0xe8] sm:$0xff] %vm385_vm6, %v21330_v16  ;;  %416 = vst.msk [vmem:[#allocation2 + $0xf0] sm:$0xff] %vm385_vm6, %v21330_v16 }
 0x1a3   : > { %417 = vst.msk [vmem:[#allocation2 + $0xf8] sm:$0xff] %vm385_vm6, %v21330_v16  ;;  %418 = vst.msk [vmem:[#allocation2 + $0x100] sm:$0xff] %vm385_vm6, %v21330_v16  ;;  %v16093_v16 = vmul.f32 %v15413_v6, %v15979_v21  ;;  %v16108_v6 = vmul.f32 %v15427_v17, %v15979_v21  ;;  %v16123_v17 = vsel %vm2800_vm2, %v21560_v51, %v2864_v48  ;;  %v6150_v21 = vmax.f32 %v6045_v42, 0.0 }
 0x1a4   : > { %6254 = vst.msk [vmem:[#allocation4 + $0xc8] sm:$0xff] %vm385_vm6, %v6149_v20  ;;  %v728_v20 = vpop.permute.xlu1 %727  ;;  %21559 = vst [vmem:[#allocation15_spill] sm:$0xff] %v16114_v37  ;;  %v16138_v51 = vadd.f32 %v2217_v4, %v1858_v40  ;;  %v6336_v4 = vld [vmem:[#allocation4 + $0x10] ss:$2 sm:$0xff]  ;;  %v21565_v37 = vrot.slane %v15987_v56, 6 }
 0x1a5   : > { %21562 = vst [vmem:[#allocation22_spill] sm:$0xff] %v16128_v24  ;;  %v5646_v8 = vrot.slane %v16108_v6, 6  ;;  %v16133_v2 = vmul.f32 %v15828_v53, %v728_v20  ;;  %v16136_v52 = vmul.f32 %v15845_v60, %v728_v20  ;;  %v16141_v49 = vmul.f32 %v15839_v19, %v728_v20  ;;  %6255 = vst.msk [vmem:[#allocation4 + $0xd0] sm:$0xff] %vm385_vm6, %v6150_v21  ;;  %v6446_v56 = vld [vmem:[#allocation4 + $0x31] ss:$2 sm:$0xff] }
 0x1a6   : > { %v16144_v1 = vmul.f32 %v15861_v18, %v728_v20  ;;  %v16150_v6 = vsel %vm4952_vm5, %v21563_v27, %v5008_v47  ;;  %v16155_v40 = vmul.f32 %v15872_v0, %v728_v20  ;;  %v16165_v21 = vmul.f32 %v16162_v54, %v728_v20 }
 0x1a7   : > { %21564 = vst [vmem:[#allocation26_spill] sm:$0xff] %v16150_v6  ;;  %v1579_v42 = vrot.slane %v16133_v2, 1  ;;  %v16170_v2 = vld [vmem:[%s21275_s1 + $0x7] ss:$0 sm:$0xff]  ;;  %v16186_v6 = vsel %vm2800_vm2, %v21565_v37, %v5646_v8  ;;  %v3898_v29 = vmul.f32 %v15884_v33, %v728_v20  ;;  %v21567_v37 = vrot.slane %v16136_v52, 2 }
 0x1a8   : > { %v2866_v58 = vrot.slane %v16144_v1, 6  ;;  %v16173_v27 = vmul.f32 %v16170_v2, %v728_v20  ;;  %v16181_v1 = vmul.f32 %v16178_v50, %v728_v20  ;;  %21566 = vst [vmem:[#allocation19_spill] sm:$0xff] %v16186_v6  ;;  %v3505_v28 = vrot.slane %v16155_v40, 7 }
 0x1a9   : > { %v1580_v26 = vsel %vm1507_vm0, %v1577_v9, %v1579_v42  ;;  %v4371_v43 = vrot.slane %v16165_v21, 4  ;;  %v2219_v6 = vsel %vm2146_vm1, %v2216_v62, %v21567_v37  ;;  %v6546_v20 = vmax.f32 %v6336_v4, %v6442_v11 }
 0x1aa   : > { %v1859_v14 = vadd.f32 %v1580_v26, %v1110_v13  ;;  %v2867_v24 = vsel %vm2800_vm2, %v2864_v48, %v2866_v58  ;;  %v5648_v40 = vrot.slane %v16181_v1, 6  ;;  %v3506_v26 = vsel %vm3439_vm3, %v3503_v22, %v3505_v28 }
 0x1ab   : > { %v3149_v9 = vadd.f32 %v2867_v24, %v15931_v25  ;;  %v6545_v48 = vmax.f32 %v6334_v41, %v6440_v45  ;;  %v6547_v13 = vmax.f32 %v6338_v3, %v6444_v32  ;;  %v21568_v35 = vrot.slane %v16093_v16, 4  ;;  %v544_v3 = vld [vmem:[%s14415_s14 + $0x380] sm:$0xff]  ;;  %s21232_s14 = scalar_lea.hbm %s21285_s11, %s12813_s24 }
 0x1ac   : > { %v16199_v57 = vadd.f32 %v2219_v6, %v1859_v14  ;;  %v21569_v62 = vrot.slane %v16173_v27, 5  ;;  %v16212_v24 = vmax.f32 %v6340_v30, %v6446_v56  ;;  %v16215_v14 = vsel %vm2800_vm2, %v5646_v8, %v5648_v40  ;;  %4093 = vperm.xlu0 %13871, %v544_v3  }
 0x1ad   : > { %v3788_v21 = vadd.f32 %v3506_v26, %v3149_v9  ;;  %v16205_v36 = vsel %vm4313_vm4, %v21568_v35, %v4371_v43  ;;  %v6601_v6 = vrot.slane %v6546_v20, 7  ;;  %v6602_v22 = vrot.slane %v6547_v13, 7 }
 0x1ae   : > { %v16210_v25 = vsel %vm4952_vm5, %v5008_v47, %v21569_v62  ;;  %21570 = vst [vmem:[#allocation23_spill] sm:$0xff] %v16212_v24  ;;  %v1332_v45 = vmul.f32 %v15828_v53, %v733_v7  ;;  %v6604_v41 = vrot.slane %v16212_v24, 7  ;;  %v16220_v35 = vmul.f32 %v15845_v60, %v733_v7  ;;  %v738_v24 = vpop.permute.xlu1 %737 }
 0x1af   : > { %v2622_v32 = vmul.f32 %v15861_v18, %v733_v7  ;;  %v6603_v47 = vsel %vm3439_vm3, %v6601_v6, %v6602_v22  ;;  %v1112_v30 = vmul.f32 %v15839_v19, %v733_v7  ;;  %v3261_v8 = vmul.f32 %v15872_v0, %v733_v7 }
 0x1b0   : > { %v1581_v4 = vrot.slane %v1332_v45, 1  ;;  %v6605_v11 = vsel %vm3439_vm3, %v6602_v22, %v6604_v41  ;;  %v6608_v1 = vmax.f32 %v6545_v48, %v6603_v47  ;;  %v2220_v56 = vrot.slane %v16220_v35, 2 }
 0x1b1   : > { %v2868_v37 = vrot.slane %v2622_v32, 6  ;;  %v6609_v9 = vmax.f32 %v6546_v20, %v6605_v11  ;;  %v3507_v13 = vrot.slane %v3261_v8, 7  ;;  %v4131_v62 = vmul.f32 %v16162_v54, %v733_v7 }
 0x1b2   : > { %v1582_v26 = vsel %vm1507_vm0, %v1579_v42, %v1581_v4  ;;  %v16231_v6 = vadd.f32 %v3898_v29, %v3788_v21  ;;  %6610 = vst.msk [vmem:[#allocation2 + $0x11] sm:$0xff] %vm385_vm6, %v6608_v1  ;;  %v4770_v48 = vmul.f32 %v16170_v2, %v733_v7  ;;  %v3899_v42 = vmul.f32 %v15884_v33, %v733_v7 }
 0x1b3   : > { %v1860_v45 = vadd.f32 %v1582_v26, %v16141_v49  ;;  %v2869_v3 = vsel %vm2800_vm2, %v2866_v58, %v2868_v37  ;;  %6612 = vst.msk [vmem:[#allocation2 + $0x19] sm:$0x3f] %vm6611_vm7, %v6609_v9  ;;  %v4373_v22 = vrot.slane %v4131_v62, 4  ;;  %v5409_v41 = vmul.f32 %v16178_v50, %v733_v7 }
 0x1b4   : > { %v3150_v20 = vadd.f32 %v2869_v3, %v16084_v46  ;;  %v21571_v29 = vrot.slane %v16136_v52, 2  ;;  %v3508_v35 = vsel %vm3439_vm3, %v3505_v28, %v3507_v13  ;;  %v5012_v49 = vrot.slane %v4770_v48, 5 }
 0x1b5   : > { %v16246_v58 = vmul.f32 %v15828_v53, %v738_v24  ;;  %v4374_v47 = vsel %vm4313_vm4, %v4371_v43, %v4373_v22  ;;  %v5650_v8 = vrot.slane %v5409_v41, 6  ;;  %v16250_v46 = vmul.f32 %v15845_v60, %v738_v24 }
 0x1b6   : > { %v2221_v21 = vsel %vm2146_vm1, %v21571_v29, %v2220_v56  ;;  %v3789_v32 = vadd.f32 %v3508_v35, %v3150_v20  ;;  %v4659_v7 = vadd.f32 %v4374_v47, %v15971_v39  ;;  %v16257_v1 = vmul.f32 %v15861_v18, %v738_v24 }
 0x1b7   : > { %v16252_v11 = vadd.f32 %v2221_v21, %v1860_v45  ;;  %v1583_v52 = vrot.slane %v16246_v58, 1  ;;  %v21572_v9 = vrot.slane %v16173_v27, 5  ;;  %v16265_v43 = vmul.f32 %v15839_v19, %v738_v24 }
 0x1b8   : > { %v16259_v28 = vadd.f32 %v3899_v42, %v3789_v32  ;;  %v16268_v62 = vmul.f32 %v15872_v0, %v738_v24  ;;  %v5651_v39 = vsel %vm2800_vm2, %v5648_v40, %v5650_v8  ;;  %v21350_v48 = vrot.slane %v16257_v1, 6 }
 0x1b9   : > { %v5013_v26 = vsel %vm4952_vm5, %v21572_v9, %v5012_v49  ;;  %v1584_v3 = vsel %vm1507_vm0, %v1581_v4, %v1583_v52  ;;  %v21349_v27 = vrot.slane %v16250_v46, 2  ;;  %v16278_v41 = vmul.f32 %v16162_v54, %v738_v24  ;;  %v6860_v29 = vld [vmem:[#allocation2 + $0x11] sm:$0xff] }
 0x1ba   : > { %v5298_v45 = vadd.f32 %v5013_v26, %v4659_v7  ;;  %v1861_v20 = vadd.f32 %v1584_v3, %v1112_v30  ;;  %v21345_v42 = vrot.slane %v16268_v62, 7  ;;  %v6861_v21 = vld [vmem:[#allocation2 + $0x19] sm:$0xff]  ;;  %v2871_v40 = vsel %vm2800_vm2, %v2868_v37, %v21350_v48  ;;  %v703_v30 = vpop.permute.xlu0 %702 }
 0x1bb   : > { %v16284_v32 = vmul.f32 %v16170_v2, %v738_v24  ;;  %v16287_v4 = vmul.f32 %v16178_v50, %v738_v24  ;;  %v6887_v47 = vpack.c.bf16 %v6861_v21, %v6860_v29  ;;  %v3151_v7 = vadd.f32 %v2871_v40, %v16138_v51 }
 0x1bc   : > { %v5936_v35 = vadd.f32 %v5651_v39, %v5298_v45  ;;  %v3510_v9 = vsel %vm3439_vm3, %v3507_v13, %v21345_v42  ;;  %v3900_v26 = vmul.f32 %v15884_v33, %v738_v24  ;;  %v21348_v37 = vrot.slane %v16278_v41, 4 }
 0x1bd   : > { %v21347_v39 = vrot.slane %v16284_v32, 5  ;;  %v21346_v3 = vrot.slane %v16287_v4, 6  ;;  %13068 = vmatmul.mubr.msk.bf16.vlgmr.msra.gmra.mrb[0].mxu0 %vm385_vm6, %v6887_v47  ;;  %v2223_v51 = vsel %vm2146_vm1, %v2220_v56, %v21349_v27  ;;  %v3790_v29 = vadd.f32 %v3510_v9, %v3151_v7 }
 0x1be   : > { %v6048_v45 = vadd.f32 %v15607_v5, %v5936_v35  ;;  %v1326_v21 = vmul.f32 %v15828_v53, %v703_v30  ;;  %v1965_v13 = vmul.f32 %v15845_v60, %v703_v30  ;;  %v16304_v40 = vadd.f32 %v2223_v51, %v1861_v20 }
 0x1bf   : > { %v4376_v5 = vsel %vm4313_vm4, %v4373_v22, %v21348_v37  ;;  %v1106_v35 = vmul.f32 %v15839_v19, %v703_v30  ;;  %v5015_v47 = vsel %vm4952_vm5, %v5012_v49, %v21347_v39  ;;  %v2616_v7 = vmul.f32 %v15861_v18, %v703_v30 }
 0x1c0   : > { %v6153_v24 = vmax.f32 %v6048_v45, 0.0  ;;  %v1569_v42 = vrot.slane %v1326_v21, 1  ;;  %v2208_v56 = vrot.slane %v1965_v13, 2  ;;  %v16315_v9 = vadd.f32 %v3900_v26, %v3790_v29 }
 0x1c1   : > { %v16320_v20 = vsel %vm2800_vm2, %v5650_v8, %v21346_v3  ;;  %v3255_v22 = vmul.f32 %v15872_v0, %v703_v30  ;;  %v4125_v45 = vmul.f32 %v16162_v54, %v703_v30  ;;  %v21573_v51 = vrot.slane %v15772_v61, 1 }
 0x1c2   : > { %6258 = vst.msk [vmem:[#allocation4 + $0xe8] sm:$0xff] %vm385_vm6, %v6153_v24  ;;  %v21574_v21 = vrot.slane %v15831_v38, 1  ;;  %v21575_v26 = vrot.slane %v15775_v12, 2  ;;  %v3893_v24 = vmul.f32 %v15884_v33, %v703_v30  ;;  %v2856_v39 = vrot.slane %v2616_v7, 6 }
 0x1c3   : > { %v1570_v49 = vsel %vm1507_vm0, %v21573_v51, %v1569_v42  ;;  %v3495_v37 = vrot.slane %v3255_v22, 7  ;;  %v21576_v27 = vrot.slane %v15848_v15, 2  ;;  %v4361_v51 = vrot.slane %v4125_v45, 4  ;;  %v21581_v45 = vld [vmem:[#allocation10_spill] sm:$0xff] }
 0x1c4   : > { %v1572_v13 = vsel %vm1507_vm0, %v1569_v42, %v21574_v21  ;;  %v2209_v29 = vsel %vm2146_vm1, %v21575_v26, %v2208_v56  ;;  %v1854_v8 = vadd.f32 %v1570_v49, %v15784_v44  ;;  %v4764_v38 = vmul.f32 %v16170_v2, %v703_v30  ;;  %v21583_v49 = vld [vmem:[#allocation24_spill] sm:$0xff] }
 0x1c5   : > { %v1855_v3 = vadd.f32 %v1572_v13, %v1106_v35  ;;  %v2211_v61 = vsel %vm2146_vm1, %v2208_v56, %v21576_v27  ;;  %v5403_v42 = vmul.f32 %v16178_v50, %v703_v30  ;;  %v21577_v26 = vrot.slane %v15778_v31, 6 }
 0x1c6   : > { %v2493_v21 = vadd.f32 %v2209_v29, %v1854_v8  ;;  %v21578_v44 = vrot.slane %v15864_v10, 6  ;;  %v21579_v27 = vrot.slane %v15787_v34, 7  ;;  %v21580_v30 = vrot.slane %v15875_v63, 7  ;;  %v21585_v29 = vld [vmem:[#allocation18_spill] sm:$0xff]  ;;  %v21586_v8 = vld [vmem:[#allocation16_spill] sm:$0xff] }
 0x1c7   : > { %v2494_v12 = vadd.f32 %v2211_v61, %v1855_v3  ;;  %v2857_v48 = vsel %vm2800_vm2, %v21577_v26, %v2856_v39  ;;  %v21582_v10 = vrot.slane %v21581_v45, 4  ;;  %v21587_v61 = vld [vmem:[#allocation25_spill] sm:$0xff]  ;;  %v21592_v45 = vld [vmem:[#allocation20_spill] sm:$0xff] }
 0x1c8   : > { %v2859_v35 = vsel %vm2800_vm2, %v2856_v39, %v21578_v44  ;;  %v3144_v7 = vadd.f32 %v2857_v48, %v15734_v55  ;;  %v3496_v56 = vsel %vm3439_vm3, %v21579_v27, %v3495_v37  ;;  %v3498_v3 = vsel %vm3439_vm3, %v3495_v37, %v21580_v30  ;;  %v16362_v48 = vpop.permute.xlu1 %742  ;;  %v21591_v27 = vld [vmem:[#allocation22_spill] sm:$0xff] }
 0x1c9   : > { %v3145_v15 = vadd.f32 %v2859_v35, %v15781_v59  ;;  %v3147_v31 = vadd.f32 %v15992_v23, %v2493_v21  ;;  %v3148_v22 = vadd.f32 %v16123_v17, %v2494_v12  ;;  %v4362_v39 = vsel %vm4313_vm4, %v21582_v10, %v4361_v51  ;;  %v21589_v21 = vld [vmem:[#allocation13_spill] sm:$0xff] }
 0x1ca   : > { %v21584_v55 = vrot.slane %v21583_v49, 4  ;;  %v3783_v34 = vadd.f32 %v3496_v56, %v3144_v7  ;;  %v4653_v63 = vadd.f32 %v4362_v39, %v21585_v29  ;;  %v21588_v17 = vrot.slane %v16093_v16, 4  ;;  %v21593_v56 = vld [vmem:[#allocation21_spill] sm:$0xff]  ;;  %v21596_v39 = vld [vmem:[#allocation12_spill] sm:$0xff] }
 0x1cb   : > { %v3784_v13 = vadd.f32 %v3498_v3, %v3145_v15  ;;  %v3786_v23 = vadd.f32 %v21587_v61, %v3147_v31  ;;  %v21590_v12 = vrot.slane %v21589_v21, 4  ;;  %v5000_v44 = vrot.slane %v4764_v38, 5  ;;  %v21594_v31 = vld [vmem:[#allocation11_spill] sm:$0xff]  ;;  %v21600_v61 = vld [vmem:[#allocation14_spill] sm:$0xff] }
 0x1cc   : > { %v4364_v59 = vsel %vm4313_vm4, %v4361_v51, %v21584_v55  ;;  %v5638_v35 = vrot.slane %v5403_v42, 6  ;;  %v3787_v51 = vadd.f32 %v21591_v27, %v3148_v22  ;;  %v3998_v30 = vadd.f32 %v3893_v24, %v3783_v34 }
 0x1cd   : > { %v4654_v37 = vadd.f32 %v4364_v59, %v21586_v8  ;;  %v4370_v26 = vsel %vm4313_vm4, %v21590_v12, %v21588_v17  ;;  %v3999_v7 = vadd.f32 %v21592_v45, %v3784_v13  ;;  %v16376_v15 = vmul.f32 %v15828_v53, %v16362_v48  ;;  %v21598_v13 = vld [vmem:[#allocation17_spill] sm:$0xff]  ;;  %v21602_v12 = vld [vmem:[#allocation26_spill] sm:$0xff]  ;;  %v21603_v45 = vld [vmem:[#allocation19_spill] sm:$0xff] }
 0x1ce   : > { %v4001_v3 = vadd.f32 %v21593_v56, %v3786_v23  ;;  %v21595_v10 = vrot.slane %v21594_v31, 5  ;;  %v21597_v49 = vrot.slane %v21596_v39, 5  ;;  %v16387_v42 = vmul.f32 %v15845_v60, %v16362_v48 }
 0x1cf   : > { %v4657_v24 = vadd.f32 %v4370_v26, %v3998_v30  ;;  %v4658_v22 = vadd.f32 %v16205_v36, %v3999_v7  ;;  %v21599_v29 = vrot.slane %v21598_v13, 6  ;;  %v21601_v23 = vrot.slane %v21600_v61, 6 }
 0x1d0   : > { %v5001_v16 = vsel %vm4952_vm5, %v21595_v10, %v5000_v44  ;;  %v5003_v38 = vsel %vm4952_vm5, %v5000_v44, %v21597_v49  ;;  %v4660_v34 = vadd.f32 %v4376_v5, %v4001_v3  ;;  %v1585_v21 = vrot.slane %v16376_v15, 1  ;;  %v21604_v49 = vld [vmem:[#allocation15_spill] sm:$0xff] }
 0x1d1   : > { %v5292_v55 = vadd.f32 %v5001_v16, %v4653_v63  ;;  %v5293_v59 = vadd.f32 %v5003_v38, %v4654_v37  ;;  %v5639_v8 = vsel %vm2800_vm2, %v21599_v29, %v5638_v35  ;;  %v5641_v17 = vsel %vm2800_vm2, %v5638_v35, %v21601_v23 }
 0x1d2   : > { %v5296_v44 = vadd.f32 %v21602_v12, %v4657_v24  ;;  %v5297_v27 = vadd.f32 %v16210_v25, %v4658_v22  ;;  %v5299_v36 = vadd.f32 %v5015_v47, %v4660_v34  ;;  %v1586_v5 = vsel %vm1507_vm0, %v1583_v52, %v1585_v21  ;;  %v16410_v25 = vld [vmem:[%s21276_s2] ss:$0 sm:$0xff]  ;;  %v748_v22 = vpop.permute.xlu0 %747 }
 0x1d3   : > { %v5930_v26 = vadd.f32 %v5639_v8, %v5292_v55  ;;  %v5931_v30 = vadd.f32 %v5641_v17, %v5293_v59  ;;  %v2224_v63 = vrot.slane %v16387_v42, 2  ;;  %v2624_v37 = vmul.f32 %v15861_v18, %v16362_v48 }
 0x1d4   : > { %v5934_v35 = vadd.f32 %v21603_v45, %v5296_v44  ;;  %v5935_v7 = vadd.f32 %v16215_v14, %v5297_v27  ;;  %v5937_v52 = vadd.f32 %v16320_v20, %v5299_v36  ;;  %v1114_v15 = vmul.f32 %v15839_v19, %v16362_v48 }
 0x1d5   : > { %v6042_v47 = vadd.f32 %v16410_v25, %v5930_v26  ;;  %v6043_v58 = vadd.f32 %v16410_v25, %v5931_v30  ;;  %v1862_v56 = vadd.f32 %v1586_v5, %v16265_v43  ;;  %v2872_v3 = vrot.slane %v2624_v37, 6 }
 0x1d6   : > { %v6046_v31 = vadd.f32 %v16410_v25, %v5934_v35  ;;  %v6047_v14 = vadd.f32 %v16410_v25, %v5935_v7  ;;  %v6049_v39 = vadd.f32 %v16410_v25, %v5937_v52  ;;  %v4002_v38 = vadd.f32 %v21604_v49, %v3787_v51 }
 0x1d7   : > { %v6147_v10 = vmax.f32 %v6042_v47, 0.0  ;;  %v6148_v16 = vmax.f32 %v6043_v58, 0.0  ;;  %v21605_v42 = vrot.slane %v16257_v1, 6  ;;  %v3263_v24 = vmul.f32 %v15872_v0, %v16362_v48 }
 0x1d8   : > { %v6151_v43 = vmax.f32 %v6046_v31, 0.0  ;;  %v6152_v55 = vmax.f32 %v6047_v14, 0.0  ;;  %v21606_v59 = vrot.slane %v16250_v46, 2  ;;  %v6154_v13 = vmax.f32 %v6049_v39, 0.0 }
 0x1d9   : > { %v2873_v20 = vsel %vm2800_vm2, %v21605_v42, %v2872_v3  ;;  %6252 = vst.msk [vmem:[#allocation4 + $0xb8] sm:$0xff] %vm385_vm6, %v6147_v10  ;;  %6253 = vst.msk [vmem:[#allocation4 + $0xc0] sm:$0xff] %vm385_vm6, %v6148_v16  ;;  %v3511_v1 = vrot.slane %v3263_v24, 7  ;;  %v4133_v29 = vmul.f32 %v16162_v54, %v16362_v48  ;;  %v4772_v8 = vmul.f32 %v16170_v2, %v16362_v48 }
 0x1da   : > { %v2225_v34 = vsel %vm2146_vm1, %v21606_v59, %v2224_v63  ;;  %v3152_v51 = vadd.f32 %v2873_v20, %v16199_v57  ;;  %6256 = vst.msk [vmem:[#allocation4 + $0xd8] sm:$0xff] %vm385_vm6, %v6151_v43  ;;  %6257 = vst.msk [vmem:[#allocation4 + $0xe0] sm:$0xff] %vm385_vm6, %v6152_v55  ;;  %v5411_v46 = vmul.f32 %v16178_v50, %v16362_v48  ;;  %v21607_v17 = vrot.slane %v16268_v62, 7 }
 0x1db   : > { %v16439_v61 = vadd.f32 %v2225_v34, %v1862_v56  ;;  %v1335_v23 = vmul.f32 %v15828_v53, %v748_v22  ;;  %v16445_v57 = vmul.f32 %v15845_v60, %v748_v22  ;;  %6259 = vst.msk [vmem:[#allocation4 + $0xf0] sm:$0xff] %vm385_vm6, %v6154_v13  ;;  %v4377_v44 = vrot.slane %v4133_v29, 4 }
 0x1dc   : > { %v3512_v12 = vsel %vm3439_vm3, %v21607_v17, %v3511_v1  ;;  %v5016_v27 = vrot.slane %v4772_v8, 5  ;;  %v2625_v26 = vmul.f32 %v15861_v18, %v748_v22  ;;  %v3901_v36 = vmul.f32 %v15884_v33, %v16362_v48 }
 0x1dd   : > { %v3791_v30 = vadd.f32 %v3512_v12, %v3152_v51  ;;  %v1587_v5 = vrot.slane %v1335_v23, 1  ;;  %v2226_v37 = vrot.slane %v16445_v57, 2  ;;  %v21608_v45 = vrot.slane %v16278_v41, 4 }
 0x1de   : > { %v5654_v7 = vrot.slane %v5411_v46, 6  ;;  %v2874_v47 = vrot.slane %v2625_v26, 6  ;;  %v3264_v62 = vmul.f32 %v15872_v0, %v748_v22  ;;  %v21609_v52 = vrot.slane %v16284_v32, 5  ;;  %v753_v32 = vpop.permute.xlu1 %752 }
 0x1df   : > { %v4378_v35 = vsel %vm4313_vm4, %v21608_v45, %v4377_v44  ;;  %v1115_v31 = vmul.f32 %v15839_v19, %v748_v22  ;;  %v1588_v48 = vsel %vm1507_vm0, %v1585_v21, %v1587_v5  ;;  %v16464_v14 = vadd.f32 %v3901_v36, %v3791_v30 }
 0x1e0   : > { %v4661_v58 = vadd.f32 %v4378_v35, %v4002_v38  ;;  %v5017_v56 = vsel %vm4952_vm5, %v21609_v52, %v5016_v27  ;;  %v1863_v10 = vadd.f32 %v1588_v48, %v1114_v15  ;;  %v2875_v41 = vsel %vm2800_vm2, %v2872_v3, %v2874_v47 }
 0x1e1   : > { %v3513_v16 = vrot.slane %v3264_v62, 7  ;;  %v2227_v49 = vsel %vm2146_vm1, %v2224_v63, %v2226_v37  ;;  %v3153_v42 = vadd.f32 %v2875_v41, %v16252_v11  ;;  %v4134_v38 = vmul.f32 %v16162_v54, %v748_v22  ;;  %v758_v41 = vpop.permute.xlu0 %757 }
 0x1e2   : > { %v5300_v39 = vadd.f32 %v5017_v56, %v4661_v58  ;;  %v21610_v20 = vrot.slane %v16287_v4, 6  ;;  %v16473_v43 = vadd.f32 %v2227_v49, %v1863_v10  ;;  %v4773_v21 = vmul.f32 %v16170_v2, %v748_v22 }
 0x1e3   : > { %v5412_v15 = vmul.f32 %v16178_v50, %v748_v22  ;;  %v3514_v55 = vsel %vm3439_vm3, %v3511_v1, %v3513_v16  ;;  %v3902_v63 = vmul.f32 %v15884_v33, %v748_v22  ;;  %v4379_v59 = vrot.slane %v4134_v38, 4 }
 0x1e4   : > { %v5655_v24 = vsel %vm2800_vm2, %v21610_v20, %v5654_v7  ;;  %v3792_v11 = vadd.f32 %v3514_v55, %v3153_v42  ;;  %v5018_v34 = vrot.slane %v4773_v21, 5  ;;  %v1336_v51 = vmul.f32 %v15828_v53, %v753_v32 }
 0x1e5   : > { %v5938_v3 = vadd.f32 %v5655_v24, %v5300_v39  ;;  %v16481_v4 = vmul.f32 %v15845_v60, %v753_v32  ;;  %v4380_v29 = vsel %vm4313_vm4, %v4377_v44, %v4379_v59  ;;  %v5656_v8 = vrot.slane %v5412_v15, 6 }
 0x1e6   : > { %v2626_v46 = vmul.f32 %v15861_v18, %v753_v32  ;;  %v4662_v23 = vadd.f32 %v4380_v29, %v16231_v6  ;;  %v5019_v1 = vsel %vm4952_vm5, %v5016_v27, %v5018_v34  ;;  %v1116_v22 = vmul.f32 %v15839_v19, %v753_v32 }
 0x1e7   : > { %v6050_v13 = vadd.f32 %v16410_v25, %v5938_v3  ;;  %v1589_v57 = vrot.slane %v1336_v51, 1  ;;  %v2228_v12 = vrot.slane %v16481_v4, 2  ;;  %v3265_v30 = vmul.f32 %v15872_v0, %v753_v32 }
 0x1e8   : > { %v2876_v26 = vrot.slane %v2626_v46, 6  ;;  %v16491_v36 = vadd.f32 %v3902_v63, %v3792_v11  ;;  %v5301_v45 = vadd.f32 %v5019_v1, %v4662_v23  ;;  %v4135_v35 = vmul.f32 %v16162_v54, %v753_v32 }
 0x1e9   : > { %v6155_v17 = vmax.f32 %v6050_v13, 0.0  ;;  %v1590_v44 = vsel %vm1507_vm0, %v1587_v5, %v1589_v57  ;;  %v5657_v6 = vsel %vm2800_vm2, %v5654_v7, %v5656_v8  ;;  %v3515_v58 = vrot.slane %v3265_v30, 7 }
 0x1ea   : > { %v1864_v27 = vadd.f32 %v1590_v44, %v1115_v31  ;;  %v2877_v62 = vsel %vm2800_vm2, %v2874_v47, %v2876_v26  ;;  %v5939_v52 = vadd.f32 %v5657_v6, %v5301_v45  ;;  %v4381_v48 = vrot.slane %v4135_v35, 4  ;;  %v763_v6 = vpop.permute.xlu1 %762 }
 0x1eb   : > { %6260 = vst.msk [vmem:[#allocation4 + $0xf8] sm:$0xff] %vm385_vm6, %v6155_v17  ;;  %v3154_v56 = vadd.f32 %v2877_v62, %v16304_v40  ;;  %v4774_v10 = vmul.f32 %v16170_v2, %v753_v32  ;;  %v2229_v39 = vsel %vm2146_vm1, %v2226_v37, %v2228_v12  ;;  %v3516_v5 = vsel %vm3439_vm3, %v3513_v16, %v3515_v58 }
 0x1ec   : > { %v3903_v49 = vmul.f32 %v15884_v33, %v753_v32  ;;  %v5413_v42 = vmul.f32 %v16178_v50, %v753_v32  ;;  %v6051_v7 = vadd.f32 %v16410_v25, %v5939_v52  ;;  %v4382_v47 = vsel %vm4313_vm4, %v4379_v59, %v4381_v48 }
 0x1ed   : > { %v3793_v31 = vadd.f32 %v3516_v5, %v3154_v56  ;;  %v5020_v38 = vrot.slane %v4774_v10, 5  ;;  %v4663_v40 = vadd.f32 %v4382_v47, %v16259_v28  ;;  %v1337_v24 = vmul.f32 %v15828_v53, %v758_v41 }
 0x1ee   : > { %v5658_v20 = vrot.slane %v5413_v42, 6  ;;  %v16509_v21 = vmul.f32 %v15845_v60, %v758_v41  ;;  %v6156_v37 = vmax.f32 %v6051_v7, 0.0  ;;  %v16511_v16 = vadd.f32 %v2229_v39, %v1864_v27 }
 0x1ef   : > { %v5021_v15 = vsel %vm4952_vm5, %v5018_v34, %v5020_v38  ;;  %v2627_v32 = vmul.f32 %v15861_v18, %v758_v41  ;;  %v1117_v63 = vmul.f32 %v15839_v19, %v758_v41  ;;  %v1591_v59 = vrot.slane %v1337_v24, 1 }
 0x1f0   : > { %v5302_v3 = vadd.f32 %v5021_v15, %v4663_v40  ;;  %v5659_v55 = vsel %vm2800_vm2, %v5656_v8, %v5658_v20  ;;  %6261 = vst.msk [vmem:[#allocation4 + $0x100] sm:$0xff] %vm385_vm6, %v6156_v37  ;;  %v2230_v28 = vrot.slane %v16509_v21, 2  ;;  %v3266_v51 = vmul.f32 %v15872_v0, %v758_v41 }
 0x1f1   : > { %v2878_v11 = vrot.slane %v2627_v32, 6  ;;  %v4136_v4 = vmul.f32 %v16162_v54, %v758_v41  ;;  %v16521_v13 = vadd.f32 %v3903_v49, %v3793_v31  ;;  %v1592_v29 = vsel %vm1507_vm0, %v1589_v57, %v1591_v59 }
 0x1f2   : > { %v5940_v34 = vadd.f32 %v5659_v55, %v5302_v3  ;;  %v16525_v46 = vmul.f32 %v16170_v2, %v758_v41  ;;  %v1865_v8 = vadd.f32 %v1592_v29, %v1116_v22  ;;  %v3517_v1 = vrot.slane %v3266_v51, 7  ;;  %v16580_v29 = vld [vmem:[%s21275_s1] ss:$0 sm:$0xff] }
 0x1f3   : > { %v2879_v23 = vsel %vm2800_vm2, %v2876_v26, %v2878_v11  ;;  %v4383_v17 = vrot.slane %v4136_v4, 4  ;;  %v5414_v35 = vmul.f32 %v16178_v50, %v758_v41  ;;  %v2231_v27 = vsel %vm2146_vm1, %v2228_v12, %v2230_v28 }
 0x1f4   : > { %v6052_v30 = vadd.f32 %v16410_v25, %v5940_v34  ;;  %v3155_v45 = vadd.f32 %v2879_v23, %v16439_v61  ;;  %v5022_v44 = vrot.slane %v16525_v46, 5  ;;  %v3518_v57 = vsel %vm3439_vm3, %v3515_v58, %v3517_v1  ;;  %v16571_v34 = vld [vmem:[%s21275_s1 + $0x1] ss:$0 sm:$0xff] }
 0x1f5   : > { %v3904_v62 = vmul.f32 %v15884_v33, %v758_v41  ;;  %v4384_v22 = vsel %vm4313_vm4, %v4381_v48, %v4383_v17  ;;  %v5660_v61 = vrot.slane %v5414_v35, 6  ;;  %v1338_v39 = vmul.f32 %v15828_v53, %v763_v6 }
 0x1f6   : > { %v6157_v26 = vmax.f32 %v6052_v30, 0.0  ;;  %v3794_v52 = vadd.f32 %v3518_v57, %v3155_v45  ;;  %v4664_v56 = vadd.f32 %v4384_v22, %v16315_v9  ;;  %v5023_v10 = vsel %vm4952_vm5, %v5020_v38, %v5022_v44  ;;  %v16597_v30 = vld [vmem:[%s21275_s1 + $0x3] ss:$0 sm:$0xff] }
 0x1f7   : > { %v16540_v5 = vmul.f32 %v15845_v60, %v763_v6  ;;  %v2628_v12 = vmul.f32 %v15861_v18, %v763_v6  ;;  %v16544_v58 = vadd.f32 %v2231_v27, %v1865_v8  ;;  %v1118_v48 = vmul.f32 %v15839_v19, %v763_v6  ;;  %v16605_v27 = vld [vmem:[%s21275_s1 + $0x4] ss:$0 sm:$0xff] }
 0x1f8   : > { %6262 = vst.msk [vmem:[#allocation4 + $0x108] sm:$0xff] %vm385_vm6, %v6157_v26  ;;  %v5303_v41 = vadd.f32 %v5023_v10, %v4664_v56  ;;  %v16548_v49 = vmul.f32 %v15872_v0, %v763_v6  ;;  %v5661_v9 = vsel %vm2800_vm2, %v5658_v20, %v5660_v61  ;;  %v1593_v42 = vrot.slane %v1338_v39, 1  ;;  %v768_v20 = vpop.permute.xlu0 %767 }
 0x1f9   : > { %v2232_v53 = vrot.slane %v16540_v5, 2  ;;  %v2880_v7 = vrot.slane %v2628_v12, 6  ;;  %v4137_v18 = vmul.f32 %v16162_v54, %v763_v6  ;;  %v4776_v47 = vmul.f32 %v16170_v2, %v763_v6 }
 0x1fa   : > { %v5941_v60 = vadd.f32 %v5661_v9, %v5303_v41  ;;  %v3519_v31 = vrot.slane %v16548_v49, 7  ;;  %v16555_v38 = vadd.f32 %v3904_v62, %v3794_v52  ;;  %v1594_v19 = vsel %vm1507_vm0, %v1591_v59, %v1593_v42  ;;  %v773_v49 = vpop.permute.xlu1 %772 }
 0x1fb   : > { %v2881_v0 = vsel %vm2800_vm2, %v2878_v11, %v2880_v7  ;;  %v16560_v40 = vmul.f32 %v16178_v50, %v763_v6  ;;  %v1866_v21 = vadd.f32 %v1594_v19, %v1117_v63  ;;  %v3905_v15 = vmul.f32 %v15884_v33, %v763_v6 }
 0x1fc   : > { %v6053_v24 = vadd.f32 %v16410_v25, %v5941_v60  ;;  %v3156_v37 = vadd.f32 %v2881_v0, %v16473_v43  ;;  %v3520_v32 = vsel %vm3439_vm3, %v3517_v1, %v3519_v31  ;;  %v4385_v3 = vrot.slane %v4137_v18, 4 }
 0x1fd   : > { %v5024_v55 = vrot.slane %v4776_v47, 5  ;;  %v5662_v51 = vrot.slane %v16560_v40, 6  ;;  %v2233_v11 = vsel %vm2146_vm1, %v2230_v28, %v2232_v53  ;;  %v1339_v63 = vmul.f32 %v16571_v34, %v768_v20  ;;  %v16586_v28 = vld [vmem:[%s21275_s1 + $0x2] ss:$0 sm:$0xff] }
 0x1fe   : > { %v6158_v59 = vmax.f32 %v6053_v24, 0.0  ;;  %v3795_v4 = vadd.f32 %v3520_v32, %v3156_v37  ;;  %v16574_v43 = vadd.f32 %v2233_v11, %v1866_v21  ;;  %v4386_v33 = vsel %vm4313_vm4, %v4383_v17, %v4385_v3 }
 0x1ff   : > { %v1119_v46 = vmul.f32 %v16580_v29, %v768_v20  ;;  %v16589_v8 = vmul.f32 %v16586_v28, %v768_v20  ;;  %v4665_v23 = vadd.f32 %v4386_v33, %v16464_v14  ;;  %v5025_v1 = vsel %vm4952_vm5, %v5022_v44, %v5024_v55 }
 0x200   : > { %6263 = vst.msk [vmem:[#allocation4 + $0x110] sm:$0xff] %vm385_vm6, %v6158_v59  ;;  %v1595_v17 = vrot.slane %v1339_v63, 1  ;;  %v2629_v45 = vmul.f32 %v16597_v30, %v768_v20  ;;  %v5663_v35 = vsel %vm2800_vm2, %v5660_v61, %v5662_v51  ;;  %v3268_v14 = vmul.f32 %v16605_v27, %v768_v20 }
 0x201   : > { %v2234_v6 = vrot.slane %v16589_v8, 2  ;;  %v4138_v44 = vmul.f32 %v16162_v54, %v768_v20  ;;  %v5304_v57 = vadd.f32 %v5025_v1, %v4665_v23  ;;  %v4777_v26 = vmul.f32 %v16170_v2, %v768_v20 }
 0x202   : > { %v1596_v62 = vsel %vm1507_vm0, %v1593_v42, %v1595_v17  ;;  %v2882_v22 = vrot.slane %v2629_v45, 6  ;;  %v16611_v52 = vadd.f32 %v3905_v15, %v3795_v4  ;;  %v3521_v10 = vrot.slane %v3268_v14, 7  ;;  %v16620_v42 = vld [vmem:[%s21275_s1 + $0x5] ss:$0 sm:$0xff] }
 0x203   : > { %v1867_v56 = vadd.f32 %v1596_v62, %v1118_v48  ;;  %v4387_v61 = vrot.slane %v4138_v44, 4  ;;  %v5942_v39 = vadd.f32 %v5663_v35, %v5304_v57  ;;  %v5026_v12 = vrot.slane %v4777_v26, 5  ;;  %v778_v26 = vpop.permute.xlu0 %777 }
 0x204   : > { %v2883_v5 = vsel %vm2800_vm2, %v2880_v7, %v2882_v22  ;;  %v5416_v41 = vmul.f32 %v16178_v50, %v768_v20  ;;  %v2235_v9 = vsel %vm2146_vm1, %v2232_v53, %v2234_v6  ;;  %v3906_v48 = vmul.f32 %v16620_v42, %v768_v20 }
 0x205   : > { %v3157_v60 = vadd.f32 %v2883_v5, %v16511_v16  ;;  %v4388_v18 = vsel %vm4313_vm4, %v4385_v3, %v4387_v61  ;;  %v6054_v47 = vadd.f32 %v16410_v25, %v5942_v39  ;;  %v3522_v7 = vsel %vm3439_vm3, %v3519_v31, %v3521_v10 }
 0x206   : > { %v4666_v19 = vadd.f32 %v4388_v18, %v16491_v36  ;;  %v5664_v0 = vrot.slane %v5416_v41, 6  ;;  %v5027_v53 = vsel %vm4952_vm5, %v5024_v55, %v5026_v12  ;;  %v1340_v16 = vmul.f32 %v16571_v34, %v773_v49 }
 0x207   : > { %v3796_v40 = vadd.f32 %v3522_v7, %v3157_v60  ;;  %v16630_v24 = vmul.f32 %v16586_v28, %v773_v49  ;;  %v6159_v21 = vmax.f32 %v6054_v47, 0.0  ;;  %v16632_v37 = vadd.f32 %v2235_v9, %v1867_v56 }
 0x208   : > { %v5305_v20 = vadd.f32 %v5027_v53, %v4666_v19  ;;  %v2630_v15 = vmul.f32 %v16597_v30, %v773_v49  ;;  %v5665_v32 = vsel %vm2800_vm2, %v5662_v51, %v5664_v0  ;;  %v1120_v31 = vmul.f32 %v16580_v29, %v773_v49 }
 0x209   : > { %v1597_v36 = vrot.slane %v1340_v16, 1  ;;  %v3269_v3 = vmul.f32 %v16605_v27, %v773_v49  ;;  %6264 = vst.msk [vmem:[#allocation4 + $0x118] sm:$0xff] %vm385_vm6, %v6159_v21  ;;  %v2236_v59 = vrot.slane %v16630_v24, 2  ;;  %v4139_v4 = vmul.f32 %v16162_v54, %v773_v49  ;;  %v788_v16 = vpop.permute.xlu1 %787 }
 0x20a   : > { %v5943_v55 = vadd.f32 %v5665_v32, %v5305_v20  ;;  %v2884_v11 = vrot.slane %v2630_v15, 6  ;;  %v16641_v63 = vadd.f32 %v3906_v48, %v3796_v40  ;;  %v4778_v51 = vmul.f32 %v16170_v2, %v773_v49 }
 0x20b   : > { %v1598_v33 = vsel %vm1507_vm0, %v1595_v17, %v1597_v36  ;;  %v3523_v8 = vrot.slane %v3269_v3, 7  ;;  %v3907_v45 = vmul.f32 %v16620_v42, %v773_v49  ;;  %v4389_v35 = vrot.slane %v4139_v4, 4 }
 0x20c   : > { %v6055_v23 = vadd.f32 %v16410_v25, %v5943_v55  ;;  %v2885_v1 = vsel %vm2800_vm2, %v2882_v22, %v2884_v11  ;;  %v1868_v14 = vadd.f32 %v1598_v33, %v1119_v46  ;;  %v5028_v57 = vrot.slane %v4778_v51, 5 }
 0x20d   : > { %v3158_v44 = vadd.f32 %v2885_v1, %v16544_v58  ;;  %v5417_v62 = vmul.f32 %v16178_v50, %v773_v49  ;;  %v2237_v17 = vsel %vm2146_vm1, %v2234_v6, %v2236_v59  ;;  %v3524_v39 = vsel %vm3439_vm3, %v3521_v10, %v3523_v8 }
 0x20e   : > { %v6160_v56 = vmax.f32 %v6055_v23, 0.0  ;;  %v4390_v5 = vsel %vm4313_vm4, %v4387_v61, %v4389_v35  ;;  %v5029_v9 = vsel %vm4952_vm5, %v5026_v12, %v5028_v57  ;;  %v16657_v58 = vmul.f32 %v16571_v34, %v778_v26 }
 0x20f   : > { %v3797_v41 = vadd.f32 %v3524_v39, %v3158_v44  ;;  %v4667_v22 = vadd.f32 %v4390_v5, %v16521_v13  ;;  %v5666_v60 = vrot.slane %v5417_v62, 6  ;;  %v16660_v46 = vmul.f32 %v16586_v28, %v778_v26  ;;  %v6344_v62 = vld [vmem:[#allocation4 + $0x50] ss:$2 sm:$0xff] }
 0x210   : > { %6265 = vst.msk [vmem:[#allocation4 + $0x120] sm:$0xff] %vm385_vm6, %v6160_v56  ;;  %v16663_v6 = vmul.f32 %v16597_v30, %v778_v26  ;;  %v16666_v10 = vmul.f32 %v16605_v27, %v778_v26  ;;  %v16668_v61 = vadd.f32 %v2237_v17, %v1868_v14  ;;  %v16672_v49 = vmul.f32 %v16580_v29, %v778_v26  ;;  %v6346_v56 = vld [vmem:[#allocation4 + $0x60] ss:$2 sm:$0xff]  ;;  %v6450_v17 = vld [vmem:[#allocation4 + $0x51] ss:$2 sm:$0xff] }
 0x211   : > { %v5306_v13 = vadd.f32 %v5029_v9, %v4667_v22  ;;  %v5667_v12 = vsel %vm2800_vm2, %v5664_v0, %v5666_v60  ;;  %v21364_v48 = vrot.slane %v16657_v58, 1  ;;  %v21360_v18 = vrot.slane %v16660_v46, 2  ;;  %v6452_v9 = vld [vmem:[#allocation4 + $0x61] ss:$2 sm:$0xff] }
 0x212   : > { %v21357_v47 = vrot.slane %v16663_v6, 6  ;;  %v21354_v7 = vrot.slane %v16666_v10, 7  ;;  %v16679_v40 = vmul.f32 %v16162_v54, %v778_v26  ;;  %v16682_v53 = vmul.f32 %v16170_v2, %v778_v26 }
 0x213   : > { %v5944_v19 = vadd.f32 %v5667_v12, %v5306_v13  ;;  %v16685_v0 = vmul.f32 %v16178_v50, %v778_v26  ;;  %v16687_v24 = vadd.f32 %v3907_v45, %v3797_v41  ;;  %v1600_v21 = vsel %vm1507_vm0, %v1597_v36, %v21364_v48 }
 0x214   : > { %21611 = vst [vmem:[#allocation27_spill] sm:$0xff] %v16682_v53  ;;  %v2887_v20 = vsel %vm2800_vm2, %v2884_v11, %v21357_v47  ;;  %v3908_v15 = vmul.f32 %v16620_v42, %v778_v26  ;;  %v1869_v3 = vadd.f32 %v1600_v21, %v1120_v31  ;;  %v21353_v4 = vrot.slane %v16679_v40, 4 }
 0x215   : > { %21612 = vst [vmem:[#allocation10_spill] sm:$0xff] %v16685_v0  ;;  %v6056_v32 = vadd.f32 %v16410_v25, %v5944_v19  ;;  %v3159_v55 = vadd.f32 %v2887_v20, %v16574_v43  ;;  %v3526_v33 = vsel %vm3439_vm3, %v3523_v8, %v21354_v7  ;;  %v21352_v51 = vrot.slane %v16682_v53, 5  ;;  %v6342_v20 = vld [vmem:[#allocation4 + $0x40] ss:$2 sm:$0xff] }
 0x216   : > { %v21351_v36 = vrot.slane %v16685_v0, 6  ;;  %v16705_v23 = vmul.f32 %v16571_v34, %v788_v16  ;;  %v2239_v31 = vsel %vm2146_vm1, %v2236_v59, %v21360_v18  ;;  %v4392_v43 = vsel %vm4313_vm4, %v4389_v35, %v21353_v4 }
 0x217   : > { %v6161_v11 = vmax.f32 %v6056_v32, 0.0  ;;  %v3798_v1 = vadd.f32 %v3526_v33, %v3159_v55  ;;  %v16713_v45 = vadd.f32 %v2239_v31, %v1869_v3  ;;  %v4668_v8 = vadd.f32 %v4392_v43, %v16555_v38  ;;  %v6448_v32 = vld [vmem:[#allocation4 + $0x41] ss:$2 sm:$0xff]  ;;  %v793_v33 = vpop.permute.xlu0 %792 }
 0x218   : > { %v5031_v14 = vsel %vm4952_vm5, %v5028_v57, %v21352_v51  ;;  %v1123_v44 = vmul.f32 %v16580_v29, %v788_v16  ;;  %v5669_v59 = vsel %vm2800_vm2, %v5666_v60, %v21351_v36  ;;  %v16725_v26 = vmul.f32 %v16586_v28, %v788_v16  ;;  %v6348_v57 = vld [vmem:[#allocation4 + $0x70] ss:$2 sm:$0xff]  ;;  %v6454_v60 = vld [vmem:[#allocation4 + $0x71] ss:$2 sm:$0xff] }
 0x219   : > { %6266 = vst.msk [vmem:[#allocation4 + $0x128] sm:$0xff] %vm385_vm6, %v6161_v11  ;;  %v16728_v35 = vmul.f32 %v16597_v30, %v788_v16  ;;  %v16731_v38 = vmul.f32 %v16605_v27, %v788_v16  ;;  %v5307_v39 = vadd.f32 %v5031_v14, %v4668_v8  ;;  %v21362_v5 = vrot.slane %v16705_v23, 1 }
 0x21a   : > { %v16735_v41 = vmul.f32 %v16162_v54, %v788_v16  ;;  %v16738_v22 = vmul.f32 %v16170_v2, %v788_v16  ;;  %v16740_v13 = vadd.f32 %v3908_v15, %v3798_v1  ;;  %v21356_v12 = vrot.slane %v16725_v26, 2 }
 0x21b   : > { %v21355_v19 = vrot.slane %v16728_v35, 6  ;;  %v16745_v21 = vmul.f32 %v16620_v42, %v788_v16  ;;  %v5945_v3 = vadd.f32 %v5669_v59, %v5307_v39  ;;  %v21358_v54 = vrot.slane %v16731_v38, 7 }
 0x21c   : > { %21613 = vst [vmem:[#allocation24_spill] sm:$0xff] %v16738_v22  ;;  %v21359_v55 = vrot.slane %v16735_v41, 4  ;;  %v16750_v2 = vmul.f32 %v16178_v50, %v788_v16  ;;  %v21361_v15 = vrot.slane %v16738_v22, 5  ;;  %v6550_v11 = vmax.f32 %v6344_v62, %v6450_v17 }
 0x21d   : > { %v6551_v31 = vmax.f32 %v6346_v56, %v6452_v9  ;;  %v16753_v1 = vmax.f32 %v6348_v57, %v6454_v60  ;;  %v6057_v43 = vadd.f32 %v16410_v25, %v5945_v3  ;;  %v6549_v8 = vmax.f32 %v6342_v20, %v6448_v32  ;;  %v21616_v9 = vld [vmem:[#allocation23_spill] sm:$0xff] }
 0x21e   : > { %21614 = vst [vmem:[#allocation18_spill] sm:$0xff] %v16750_v2  ;;  %v6616_v14 = vrot.slane %v6550_v11, 7  ;;  %v1344_v36 = vmul.f32 %v16571_v34, %v793_v33  ;;  %v16759_v16 = vmul.f32 %v16586_v28, %v793_v33  ;;  %v16762_v62 = vmul.f32 %v16597_v30, %v793_v33 }
 0x21f   : > { %21615 = vst [vmem:[#allocation16_spill] sm:$0xff] %v16753_v1  ;;  %v6617_v59 = vrot.slane %v6551_v31, 7  ;;  %v6619_v39 = vrot.slane %v16753_v1, 7  ;;  %v6162_v50 = vmax.f32 %v6057_v43, 0.0  ;;  %v16765_v56 = vmul.f32 %v16605_v27, %v793_v33 }
 0x220   : > { %v6624_v60 = vmax.f32 %v21616_v9, %v6616_v14  ;;  %v1605_v20 = vrot.slane %v1344_v36, 1  ;;  %v2244_v31 = vrot.slane %v16759_v16, 2  ;;  %v2892_v43 = vrot.slane %v16762_v62, 6  ;;  %v16782_v36 = vld [vmem:[%s21275_s1 + $0x6] ss:$0 sm:$0xff] }
 0x221   : > { %v6618_v57 = vsel %vm3439_vm3, %v6616_v14, %v6617_v59  ;;  %v6620_v17 = vsel %vm3439_vm3, %v6617_v59, %v6619_v39  ;;  %6267 = vst.msk [vmem:[#allocation4 + $0x130] sm:$0xff] %vm385_vm6, %v6162_v50  ;;  %v21363_v51 = vrot.slane %v16750_v2, 6  ;;  %v3531_v59 = vrot.slane %v16765_v56, 7  ;;  %v16794_v16 = vld [vmem:[%s21275_s1 + $0x7] ss:$0 sm:$0xff] }
 0x222   : > { %v6625_v32 = vmax.f32 %v6549_v8, %v6618_v57  ;;  %v6626_v3 = vmax.f32 %v6550_v11, %v6620_v17  ;;  %6628 = vst.msk [vmem:[#allocation2 + $0x1b] sm:$0xc0] %vm6627_vm8, %v6624_v60  ;;  %v1606_v4 = vsel %vm1507_vm0, %v21362_v5, %v1605_v20  ;;  %v4143_v11 = vmul.f32 %v16782_v36, %v793_v33  ;;  %v798_v8 = vpop.permute.xlu1 %797  ;;  %v803_v5 = vpop.permute.xlu0 %802 }
 0x223   : > { %v1124_v14 = vmul.f32 %v16580_v29, %v793_v33  ;;  %v1872_v39 = vadd.f32 %v1606_v4, %v1123_v44  ;;  %v2893_v50 = vsel %vm2800_vm2, %v21355_v19, %v2892_v43  ;;  %v4782_v62 = vmul.f32 %v16794_v16, %v793_v33  ;;  %v16802_v4 = vld [vmem:[%s21275_s1 + $0x8] ss:$0 sm:$0xff] }
 0x224   : > { %6629 = vst.msk [vmem:[#allocation2 + $0x23] sm:$0xff] %vm385_vm6, %v6625_v32  ;;  %v3162_v56 = vadd.f32 %v2893_v50, %v16713_v45  ;;  %v3911_v57 = vmul.f32 %v16620_v42, %v793_v33  ;;  %v4397_v17 = vrot.slane %v4143_v11, 4  ;;  %v5421_v44 = vmul.f32 %v16802_v4, %v793_v33 }
 0x225   : > { %6631 = vst.msk [vmem:[#allocation2 + $0x2b] sm:$0xf] %vm6630_vm9, %v6626_v3  ;;  %v2245_v9 = vsel %vm2146_vm1, %v21356_v12, %v2244_v31  ;;  %v3532_v60 = vsel %vm3439_vm3, %v21358_v54, %v3531_v59  ;;  %v5036_v32 = vrot.slane %v4782_v62, 5  ;;  %v1345_v45 = vmul.f32 %v16571_v34, %v798_v8 }
 0x226   : > { %v3801_v3 = vadd.f32 %v3532_v60, %v3162_v56  ;;  %v4398_v11 = vsel %vm4313_vm4, %v21359_v55, %v4397_v17  ;;  %v5674_v50 = vrot.slane %v5421_v44, 6  ;;  %v1984_v7 = vmul.f32 %v16586_v28, %v798_v8  ;;  %v813_v53 = vpop.permute.xlu0 %812 }
 0x227   : > { %v16816_v33 = vadd.f32 %v2245_v9, %v1872_v39  ;;  %v4671_v19 = vadd.f32 %v4398_v11, %v16687_v24  ;;  %v1607_v12 = vrot.slane %v1345_v45, 1  ;;  %v2635_v47 = vmul.f32 %v16597_v30, %v798_v8 }
 0x228   : > { %v5037_v62 = vsel %vm4952_vm5, %v21361_v15, %v5036_v32  ;;  %v1125_v56 = vmul.f32 %v16580_v29, %v798_v8  ;;  %v2246_v60 = vrot.slane %v1984_v7, 2  ;;  %v3274_v54 = vmul.f32 %v16605_v27, %v798_v8 }
 0x229   : > { %v16825_v55 = vadd.f32 %v3911_v57, %v3801_v3  ;;  %v5310_v44 = vadd.f32 %v5037_v62, %v4671_v19  ;;  %v1608_v39 = vsel %vm1507_vm0, %v1605_v20, %v1607_v12  ;;  %v2894_v9 = vrot.slane %v2635_v47, 6 }
 0x22a   : > { %v5675_v45 = vsel %vm2800_vm2, %v21363_v51, %v5674_v50  ;;  %v1873_v11 = vadd.f32 %v1608_v39, %v1124_v14  ;;  %v16832_v15 = vmul.f32 %v16620_v42, %v798_v8  ;;  %v16835_v7 = vmul.f32 %v16782_v36, %v798_v8 }
 0x22b   : > { %v6862_v18 = vld [vmem:[#allocation2 + $0x21] sm:$0xff]  ;;  %v5948_v3 = vadd.f32 %v5675_v45, %v5310_v44  ;;  %v3533_v19 = vrot.slane %v3274_v54, 7  ;;  %v4783_v20 = vmul.f32 %v16794_v16, %v798_v8  ;;  %v2247_v47 = vsel %vm2146_vm1, %v2244_v31, %v2246_v60 }
 0x22c   : > { %v6863_v24 = vld [vmem:[#allocation2 + $0x29] sm:$0xff]  ;;  %21617 = vst [vmem:[#allocation25_spill] sm:$0xff] %v16832_v15  ;;  %21618 = vst [vmem:[#allocation13_spill] sm:$0xff] %v16835_v7  ;;  %v16840_v62 = vsel %vm2800_vm2, %v2892_v43, %v2894_v9  ;;  %v21366_v51 = vrot.slane %v16835_v7, 4  ;;  %v5422_v14 = vmul.f32 %v16802_v4, %v798_v8  ;;  %v16846_v48 = vadd.f32 %v2247_v47, %v1873_v11 }
 0x22d   : > { %v6888_v57 = vpack.c.bf16 %v6863_v24, %v6862_v18  ;;  %v6060_v39 = vadd.f32 %v16410_v25, %v5948_v3  ;;  %v5038_v18 = vrot.slane %v4783_v20, 5  ;;  %v1346_v54 = vmul.f32 %v16571_v34, %v803_v5 }
 0x22e   : > { %v4400_v31 = vsel %vm4313_vm4, %v4397_v17, %v21366_v51  ;;  %v5676_v44 = vrot.slane %v5422_v14, 6  ;;  %v1985_v43 = vmul.f32 %v16586_v28, %v803_v5  ;;  %v2636_v24 = vmul.f32 %v16597_v30, %v803_v5 }
 0x22f   : > { %13071 = vmatprep.mubr.msk.bf16.mxu0 %vm385_vm6, %v6888_v57  ;;  %v6165_v45 = vmax.f32 %v6060_v39, 0.0  ;;  %v16855_v8 = vsel %vm3439_vm3, %v3531_v59, %v3533_v19  ;;  %v4672_v57 = vadd.f32 %v4400_v31, %v16740_v13  ;;  %v1609_v11 = vrot.slane %v1346_v54, 1  ;;  %v808_v59 = vpop.permute.xlu1 %807 }
 0x230   : > { %v5039_v3 = vsel %vm4952_vm5, %v5036_v32, %v5038_v18  ;;  %v2248_v20 = vrot.slane %v1985_v43, 2  ;;  %v2896_v47 = vrot.slane %v2636_v24, 6  ;;  %v3275_v1 = vmul.f32 %v16605_v27, %v803_v5 }
 0x231   : > { %6270 = vst.msk [vmem:[#allocation4 + $0x148] sm:$0xff] %vm385_vm6, %v6165_v45  ;;  %v5311_v17 = vadd.f32 %v5039_v3, %v4672_v57  ;;  %v1126_v14 = vmul.f32 %v16580_v29, %v803_v5  ;;  %v1610_v51 = vsel %vm1507_vm0, %v1607_v12, %v1609_v11  ;;  %v16864_v39 = vmul.f32 %v16782_v36, %v803_v5 }
 0x232   : > { %v5677_v13 = vsel %vm2800_vm2, %v5674_v50, %v5676_v44  ;;  %v1874_v54 = vadd.f32 %v1610_v51, %v1125_v56  ;;  %v3535_v31 = vrot.slane %v3275_v1, 7  ;;  %v16868_v32 = vmul.f32 %v16620_v42, %v803_v5 }
 0x233   : > { %21619 = vst [vmem:[#allocation22_spill] sm:$0xff] %v16864_v39  ;;  %v5949_v43 = vadd.f32 %v5677_v13, %v5311_v17  ;;  %v2249_v24 = vsel %vm2146_vm1, %v2246_v60, %v2248_v20  ;;  %v4784_v45 = vmul.f32 %v16794_v16, %v803_v5  ;;  %v5423_v57 = vmul.f32 %v16802_v4, %v803_v5 }
 0x234   : > { %21620 = vst [vmem:[#allocation20_spill] sm:$0xff] %v16868_v32  ;;  %v16873_v3 = vadd.f32 %v2249_v24, %v1874_v54  ;;  %v16876_v12 = vsel %vm2800_vm2, %v2894_v9, %v2896_v47  ;;  %v1347_v51 = vmul.f32 %v16571_v34, %v808_v59  ;;  %v16882_v50 = vsel %vm3439_vm3, %v3533_v19, %v3535_v31 }
 0x235   : > { %v6061_v1 = vadd.f32 %v16410_v25, %v5949_v43  ;;  %21621 = vst [vmem:[#allocation21_spill] sm:$0xff] %v16882_v50  ;;  %v5040_v56 = vrot.slane %v4784_v45, 5  ;;  %v1986_v60 = vmul.f32 %v16586_v28, %v808_v59  ;;  %v5678_v17 = vrot.slane %v5423_v57, 6 }
 0x236   : > { %v1611_v13 = vrot.slane %v1347_v51, 1  ;;  %v2637_v5 = vmul.f32 %v16597_v30, %v808_v59  ;;  %v3276_v54 = vmul.f32 %v16605_v27, %v808_v59  ;;  %v1127_v24 = vmul.f32 %v16580_v29, %v808_v59 }
 0x237   : > { %v6166_v9 = vmax.f32 %v6061_v1, 0.0  ;;  %v2250_v2 = vrot.slane %v1986_v60, 2  ;;  %v3914_v32 = vmul.f32 %v16620_v42, %v808_v59  ;;  %v4146_v45 = vmul.f32 %v16782_v36, %v808_v59 }
 0x238   : > { %v1612_v43 = vsel %vm1507_vm0, %v1609_v11, %v1611_v13  ;;  %v2898_v0 = vrot.slane %v2637_v5, 6  ;;  %v3537_v19 = vrot.slane %v3276_v54, 7  ;;  %v16893_v57 = vsel %vm4952_vm5, %v5038_v18, %v5040_v56 }
 0x239   : > { %6271 = vst.msk [vmem:[#allocation4 + $0x150] sm:$0xff] %vm385_vm6, %v6166_v9  ;;  %21622 = vst [vmem:[#allocation11_spill] sm:$0xff] %v16893_v57  ;;  %v1875_v51 = vadd.f32 %v1612_v43, %v1126_v14  ;;  %v4785_v22 = vmul.f32 %v16794_v16, %v808_v59  ;;  %v5424_v1 = vmul.f32 %v16802_v4, %v808_v59  ;;  %v4403_v54 = vrot.slane %v4146_v45, 4 }
 0x23a   : > { %v16898_v60 = vsel %vm2800_vm2, %v5676_v44, %v5678_v17  ;;  %v2251_v11 = vsel %vm2146_vm1, %v2248_v20, %v2250_v2  ;;  %v2899_v5 = vsel %vm2800_vm2, %v2896_v47, %v2898_v0  ;;  %v3538_v9 = vsel %vm3439_vm3, %v3535_v31, %v3537_v19 }
 0x23b   : > { %21623 = vst [vmem:[#allocation12_spill] sm:$0xff] %v16898_v60  ;;  %v3165_v15 = vadd.f32 %v2899_v5, %v16816_v33  ;;  %v5042_v18 = vrot.slane %v4785_v22, 5  ;;  %v5680_v57 = vrot.slane %v5424_v1, 6  ;;  %v1128_v14 = vmul.f32 %v16580_v29, %v813_v53 }
 0x23c   : > { %v1348_v43 = vmul.f32 %v16571_v34, %v813_v53  ;;  %v1987_v59 = vmul.f32 %v16586_v28, %v813_v53  ;;  %v2638_v44 = vmul.f32 %v16597_v30, %v813_v53  ;;  %v16908_v60 = vadd.f32 %v2251_v11, %v1875_v51  ;;  %v818_v11 = vpop.permute.xlu1 %817 }
 0x23d   : > { %v3804_v20 = vadd.f32 %v3538_v9, %v3165_v15  ;;  %v21625_v47 = vrot.slane %v16864_v39, 4  ;;  %v3277_v33 = vmul.f32 %v16605_v27, %v813_v53  ;;  %v16917_v22 = vsel %vm4952_vm5, %v5040_v56, %v5042_v18 }
 0x23e   : > { %21624 = vst [vmem:[#allocation17_spill] sm:$0xff] %v16908_v60  ;;  %21627 = vst [vmem:[#allocation26_spill] sm:$0xff] %v16917_v22  ;;  %v1613_v31 = vrot.slane %v1348_v43, 1  ;;  %v2252_v1 = vrot.slane %v1987_v59, 2  ;;  %v2900_v5 = vrot.slane %v2638_v44, 6  ;;  %v16920_v50 = vsel %vm2800_vm2, %v5678_v17, %v5680_v57 }
 0x23f   : > { %v16913_v45 = vsel %vm4313_vm4, %v21625_v47, %v4403_v54  ;;  %21628 = vst [vmem:[#allocation19_spill] sm:$0xff] %v16920_v50  ;;  %v3539_v7 = vrot.slane %v3277_v33, 7  ;;  %v4147_v51 = vmul.f32 %v16782_v36, %v813_v53  ;;  %v4786_v15 = vmul.f32 %v16794_v16, %v813_v53 }
 0x240   : > { %21626 = vst [vmem:[#allocation14_spill] sm:$0xff] %v16913_v45  ;;  %v1614_v9 = vsel %vm1507_vm0, %v1611_v13, %v1613_v31  ;;  %v2901_v47 = vsel %vm2800_vm2, %v2898_v0, %v2900_v5  ;;  %v3915_v60 = vmul.f32 %v16620_v42, %v813_v53  ;;  %v5425_v56 = vmul.f32 %v16802_v4, %v813_v53 }
 0x241   : > { %v16928_v43 = vadd.f32 %v3914_v32, %v3804_v20  ;;  %v1876_v59 = vadd.f32 %v1614_v9, %v1127_v24  ;;  %v3166_v17 = vadd.f32 %v2901_v47, %v16846_v48  ;;  %v4405_v44 = vrot.slane %v4147_v51, 4 }
 0x242   : > { %v2253_v33 = vsel %vm2146_vm1, %v2250_v2, %v2252_v1  ;;  %v5044_v50 = vrot.slane %v4786_v15, 5  ;;  %v5682_v22 = vrot.slane %v5425_v56, 6  ;;  %v16933_v45 = vmul.f32 %v16571_v34, %v818_v11 }
 0x243   : > { %v3540_v13 = vsel %vm3439_vm3, %v3537_v19, %v3539_v7  ;;  %v4406_v0 = vsel %vm4313_vm4, %v4403_v54, %v4405_v44  ;;  %v16938_v39 = vmul.f32 %v16580_v29, %v818_v11  ;;  %v16941_v53 = vmul.f32 %v16586_v28, %v818_v11 }
 0x244   : > { %v16943_v32 = vadd.f32 %v2253_v33, %v1876_v59  ;;  %v3805_v48 = vadd.f32 %v3540_v13, %v3166_v17  ;;  %v4675_v2 = vadd.f32 %v4406_v0, %v16825_v55  ;;  %v21377_v24 = vrot.slane %v16933_v45, 1  ;;  %v783_v0 = vpop.permute.xlu0 %782 }
 0x245   : > { %v5045_v20 = vsel %vm4952_vm5, %v5042_v18, %v5044_v50  ;;  %v21373_v51 = vrot.slane %v16941_v53, 2  ;;  %v16950_v19 = vmul.f32 %v16597_v30, %v818_v11  ;;  %v16953_v54 = vmul.f32 %v16605_v27, %v818_v11 }
 0x246   : > { %v5314_v15 = vadd.f32 %v5045_v20, %v4675_v2  ;;  %v5683_v9 = vsel %vm2800_vm2, %v5680_v57, %v5682_v22  ;;  %v1616_v47 = vsel %vm1507_vm0, %v1613_v31, %v21377_v24  ;;  %v16960_v55 = vmul.f32 %v16782_v36, %v818_v11 }
 0x247   : > { %v1877_v56 = vadd.f32 %v1616_v47, %v1128_v14  ;;  %v2255_v18 = vsel %vm2146_vm1, %v2252_v1, %v21373_v51  ;;  %v21375_v59 = vrot.slane %v16950_v19, 6  ;;  %v21374_v17 = vrot.slane %v16953_v54, 7 }
 0x248   : > { %v5952_v33 = vadd.f32 %v5683_v9, %v5314_v15  ;;  %v21376_v13 = vrot.slane %v16960_v55, 4  ;;  %v16969_v57 = vmul.f32 %v16794_v16, %v818_v11  ;;  %v16972_v31 = vmul.f32 %v16802_v4, %v818_v11 }
 0x249   : > { %v16974_v2 = vadd.f32 %v3915_v60, %v3805_v48  ;;  %v16976_v14 = vadd.f32 %v2255_v18, %v1877_v56  ;;  %v2903_v1 = vsel %vm2800_vm2, %v2900_v5, %v21375_v59  ;;  %v3916_v20 = vmul.f32 %v16620_v42, %v818_v11 }
 0x24a   : > { %v6064_v15 = vadd.f32 %v16410_v25, %v5952_v33  ;;  %v3167_v9 = vadd.f32 %v2903_v1, %v16873_v3  ;;  %v3542_v47 = vsel %vm3439_vm3, %v3539_v7, %v21374_v17  ;;  %v5046_v51 = vrot.slane %v16969_v57, 5 }
 0x24b   : > { %v21378_v60 = vrot.slane %v16972_v31, 6  ;;  %v1342_v48 = vmul.f32 %v16571_v34, %v783_v0  ;;  %v1981_v56 = vmul.f32 %v16586_v28, %v783_v0  ;;  %v2632_v5 = vmul.f32 %v16597_v30, %v783_v0 }
 0x24c   : > { %v6169_v18 = vmax.f32 %v6064_v15, 0.0  ;;  %v4408_v25 = vsel %vm4313_vm4, %v4405_v44, %v21376_v13  ;;  %v1122_v3 = vmul.f32 %v16580_v29, %v783_v0  ;;  %v3271_v11 = vmul.f32 %v16605_v27, %v783_v0 }
 0x24d   : > { %v3806_v7 = vadd.f32 %v3542_v47, %v3167_v9  ;;  %v1601_v33 = vrot.slane %v1342_v48, 1  ;;  %v2240_v1 = vrot.slane %v1981_v56, 2  ;;  %v2888_v17 = vrot.slane %v2632_v5, 6 }
 0x24e   : > { %6274 = vst.msk [vmem:[#allocation4 + $0x168] sm:$0xff] %vm385_vm6, %v6169_v18  ;;  %v5047_v59 = vsel %vm4952_vm5, %v5044_v50, %v5046_v51  ;;  %v17004_v15 = vsel %vm2800_vm2, %v5682_v22, %v21378_v60  ;;  %v3527_v44 = vrot.slane %v3271_v11, 7  ;;  %v4141_v13 = vmul.f32 %v16782_v36, %v783_v0 }
 0x24f   : > { %v21629_v24 = vrot.slane %v16657_v58, 1  ;;  %v21630_v47 = vrot.slane %v16705_v23, 1  ;;  %v21631_v56 = vrot.slane %v16660_v46, 2  ;;  %v3909_v5 = vmul.f32 %v16620_v42, %v783_v0 }
 0x250   : > { %v21632_v11 = vrot.slane %v16663_v6, 6  ;;  %v21633_v58 = vrot.slane %v16728_v35, 6  ;;  %v21634_v23 = vrot.slane %v16725_v26, 2  ;;  %v4780_v26 = vmul.f32 %v16794_v16, %v783_v0 }
 0x251   : > { %v1602_v9 = vsel %vm1507_vm0, %v21629_v24, %v1601_v33  ;;  %v1604_v48 = vsel %vm1507_vm0, %v1601_v33, %v21630_v47  ;;  %v2241_v50 = vsel %vm2146_vm1, %v21631_v56, %v2240_v1  ;;  %v21635_v56 = vrot.slane %v16666_v10, 7 }
 0x252   : > { %v1870_v22 = vadd.f32 %v1602_v9, %v16672_v49  ;;  %v1871_v18 = vadd.f32 %v1604_v48, %v1122_v3  ;;  %v2889_v60 = vsel %vm2800_vm2, %v21632_v11, %v2888_v17  ;;  %v2891_v24 = vsel %vm2800_vm2, %v2888_v17, %v21633_v58 }
 0x253   : > { %v2243_v33 = vsel %vm2146_vm1, %v2240_v1, %v21634_v23  ;;  %v3160_v46 = vadd.f32 %v2889_v60, %v16632_v37  ;;  %v3161_v47 = vadd.f32 %v2891_v24, %v16668_v61  ;;  %v3528_v49 = vsel %vm3439_vm3, %v21635_v56, %v3527_v44 }
 0x254   : > { %v2509_v3 = vadd.f32 %v2241_v50, %v1870_v22  ;;  %v2510_v6 = vadd.f32 %v2243_v33, %v1871_v18  ;;  %v21636_v9 = vrot.slane %v16731_v38, 7  ;;  %v4393_v48 = vrot.slane %v4141_v13, 4 }
 0x255   : > { %v3799_v17 = vadd.f32 %v3528_v49, %v3160_v46  ;;  %v5419_v1 = vmul.f32 %v16802_v4, %v783_v0  ;;  %v21637_v10 = vrot.slane %v16679_v40, 4  ;;  %v21638_v50 = vrot.slane %v16735_v41, 4  ;;  %v21641_v40 = vld [vmem:[#allocation13_spill] sm:$0xff] }
 0x256   : > { %v3530_v35 = vsel %vm3439_vm3, %v3527_v44, %v21636_v9  ;;  %v3163_v37 = vadd.f32 %v16840_v62, %v2509_v3  ;;  %v3164_v61 = vadd.f32 %v16876_v12, %v2510_v6  ;;  %v17045_v44 = vpop.permute.xlu1 %822  ;;  %v21639_v12 = vld [vmem:[#allocation22_spill] sm:$0xff]  ;;  %v21642_v24 = vrot.slane %v21641_v40, 4  ;;  %v21646_v3 = vld [vmem:[#allocation27_spill] sm:$0xff]  ;;  %v21656_v40 = vld [vmem:[#allocation12_spill] sm:$0xff] }
 0x257   : > { %v3800_v11 = vadd.f32 %v3530_v35, %v3161_v47  ;;  %v4394_v60 = vsel %vm4313_vm4, %v21637_v10, %v4393_v48  ;;  %v4396_v38 = vsel %vm4313_vm4, %v4393_v48, %v21638_v50  ;;  %v4014_v13 = vadd.f32 %v3909_v5, %v3799_v17  ;;  %v21643_v5 = vld [vmem:[#allocation14_spill] sm:$0xff]  ;;  %v21648_v35 = vld [vmem:[#allocation24_spill] sm:$0xff] }
 0x258   : > { %v4669_v18 = vadd.f32 %v4394_v60, %v16611_v52  ;;  %v4670_v0 = vadd.f32 %v4396_v38, %v16641_v63  ;;  %v3802_v62 = vadd.f32 %v16855_v8, %v3163_v37  ;;  %v21640_v58 = vrot.slane %v21639_v12, 4  ;;  %v21644_v63 = vld [vmem:[#allocation21_spill] sm:$0xff]  ;;  %v21652_v60 = vld [vmem:[#allocation10_spill] sm:$0xff] }
 0x259   : > { %v4015_v22 = vadd.f32 %v16745_v21, %v3800_v11  ;;  %v5032_v41 = vrot.slane %v4780_v26, 5  ;;  %v5670_v33 = vrot.slane %v5419_v1, 6  ;;  %v17056_v46 = vadd.f32 %v3916_v20, %v3806_v7  ;;  %v21645_v8 = vld [vmem:[#allocation25_spill] sm:$0xff]  ;;  %v21650_v11 = vld [vmem:[#allocation11_spill] sm:$0xff]  ;;  %v21651_v1 = vld [vmem:[#allocation26_spill] sm:$0xff] }
 0x25a   : > { %v4402_v23 = vsel %vm4313_vm4, %v21642_v24, %v21640_v58  ;;  %v17061_v52 = vmul.f32 %v16571_v34, %v17045_v44  ;;  %v3803_v21 = vadd.f32 %v21644_v63, %v3164_v61  ;;  %v4017_v49 = vadd.f32 %v21645_v8, %v3802_v62  ;;  %v21654_v38 = vld [vmem:[#allocation18_spill] sm:$0xff] }
 0x25b   : > { %v4673_v47 = vadd.f32 %v4402_v23, %v4014_v13  ;;  %v4674_v56 = vadd.f32 %v21643_v5, %v4015_v22  ;;  %v21647_v6 = vrot.slane %v21646_v3, 5  ;;  %v21649_v48 = vrot.slane %v21648_v35, 5  ;;  %v17094_v5 = vld [vmem:[%s21276_s2] ss:$0 sm:$0xff] }
 0x25c   : > { %v4676_v10 = vadd.f32 %v4408_v25, %v4017_v49  ;;  %v21653_v50 = vrot.slane %v21652_v60, 6  ;;  %v21655_v13 = vrot.slane %v21654_v38, 6  ;;  %v1617_v62 = vrot.slane %v17061_v52, 1 }
 0x25d   : > { %v5033_v9 = vsel %vm4952_vm5, %v21647_v6, %v5032_v41  ;;  %v5035_v20 = vsel %vm4952_vm5, %v5032_v41, %v21649_v48  ;;  %v5312_v26 = vadd.f32 %v21650_v11, %v4673_v47  ;;  %v5313_v37 = vadd.f32 %v21651_v1, %v4674_v56 }
 0x25e   : > { %v5308_v7 = vadd.f32 %v5033_v9, %v4669_v18  ;;  %v5309_v17 = vadd.f32 %v5035_v20, %v4670_v0  ;;  %v5671_v61 = vsel %vm2800_vm2, %v21653_v50, %v5670_v33  ;;  %v5673_v22 = vsel %vm2800_vm2, %v5670_v33, %v21655_v13  ;;  %v21657_v0 = vld [vmem:[#allocation19_spill] sm:$0xff] }
 0x25f   : > { %v5950_v18 = vadd.f32 %v21656_v40, %v5312_v26  ;;  %v5951_v24 = vadd.f32 %v21657_v0, %v5313_v37  ;;  %v5315_v23 = vadd.f32 %v5047_v59, %v4676_v10  ;;  %v21658_v41 = vrot.slane %v16933_v45, 1  ;;  %v21660_v26 = vld [vmem:[#allocation20_spill] sm:$0xff]  ;;  %v21662_v10 = vld [vmem:[#allocation17_spill] sm:$0xff] }
 0x260   : > { %v5946_v12 = vadd.f32 %v5671_v61, %v5308_v7  ;;  %v5947_v58 = vadd.f32 %v5673_v22, %v5309_v17  ;;  %v17087_v47 = vmul.f32 %v16586_v28, %v17045_v44  ;;  %v2640_v33 = vmul.f32 %v16597_v30, %v17045_v44 }
 0x261   : > { %v1618_v25 = vsel %vm1507_vm0, %v21658_v41, %v1617_v62  ;;  %v6062_v45 = vadd.f32 %v17094_v5, %v5950_v18  ;;  %v6063_v52 = vadd.f32 %v17094_v5, %v5951_v24  ;;  %v5953_v63 = vadd.f32 %v17004_v15, %v5315_v23 }
 0x262   : > { %v6058_v56 = vadd.f32 %v17094_v5, %v5946_v12  ;;  %v6059_v59 = vadd.f32 %v17094_v5, %v5947_v58  ;;  %v1878_v8 = vadd.f32 %v1618_v25, %v16938_v39  ;;  %v2256_v49 = vrot.slane %v17087_v47, 2  ;;  %v828_v39 = vpop.permute.xlu0 %827 }
 0x263   : > { %v2904_v3 = vrot.slane %v2640_v33, 6  ;;  %v6167_v35 = vmax.f32 %v6062_v45, 0.0  ;;  %v6168_v48 = vmax.f32 %v6063_v52, 0.0  ;;  %v6065_v20 = vadd.f32 %v17094_v5, %v5953_v63 }
 0x264   : > { %v6163_v6 = vmax.f32 %v6058_v56, 0.0  ;;  %v6164_v9 = vmax.f32 %v6059_v59, 0.0  ;;  %v1130_v7 = vmul.f32 %v16580_v29, %v17045_v44  ;;  %v21659_v17 = vrot.slane %v16950_v19, 6 }
 0x265   : > { %v3279_v15 = vmul.f32 %v16605_v27, %v17045_v44  ;;  %6272 = vst.msk [vmem:[#allocation4 + $0x158] sm:$0xff] %vm385_vm6, %v6167_v35  ;;  %6273 = vst.msk [vmem:[#allocation4 + $0x160] sm:$0xff] %vm385_vm6, %v6168_v48  ;;  %v4018_v1 = vadd.f32 %v21660_v26, %v3803_v21  ;;  %v21661_v37 = vrot.slane %v16941_v53, 2  ;;  %v4149_v50 = vmul.f32 %v16782_v36, %v17045_v44 }
 0x266   : > { %v2905_v11 = vsel %vm2800_vm2, %v21659_v17, %v2904_v3  ;;  %6268 = vst.msk [vmem:[#allocation4 + $0x138] sm:$0xff] %vm385_vm6, %v6163_v6  ;;  %6269 = vst.msk [vmem:[#allocation4 + $0x140] sm:$0xff] %vm385_vm6, %v6164_v9  ;;  %v6170_v61 = vmax.f32 %v6065_v20, 0.0  ;;  %v4788_v13 = vmul.f32 %v16794_v16, %v17045_v44  ;;  %v5427_v22 = vmul.f32 %v16802_v4, %v17045_v44  ;;  %v833_v17 = vpop.permute.xlu1 %832 }
 0x267   : > { %v2257_v19 = vsel %vm2146_vm1, %v21661_v37, %v2256_v49  ;;  %v3168_v60 = vadd.f32 %v2905_v11, %v21662_v10  ;;  %v3543_v38 = vrot.slane %v3279_v15, 7  ;;  %v4409_v21 = vrot.slane %v4149_v50, 4 }
 0x268   : > { %v17126_v12 = vadd.f32 %v2257_v19, %v1878_v8  ;;  %v1351_v53 = vmul.f32 %v16571_v34, %v828_v39  ;;  %v17130_v58 = vmul.f32 %v16586_v28, %v828_v39  ;;  %6275 = vst.msk [vmem:[#allocation4 + $0x170] sm:$0xff] %vm385_vm6, %v6170_v61  ;;  %v21663_v40 = vrot.slane %v16953_v54, 7 }
 0x269   : > { %v5048_v0 = vrot.slane %v4788_v13, 5  ;;  %v5686_v24 = vrot.slane %v5427_v22, 6  ;;  %v2641_v23 = vmul.f32 %v16597_v30, %v828_v39  ;;  %v3917_v25 = vmul.f32 %v16620_v42, %v17045_v44 }
 0x26a   : > { %v3544_v18 = vsel %vm3439_vm3, %v21663_v40, %v3543_v38  ;;  %v21664_v47 = vrot.slane %v16960_v55, 4  ;;  %v1619_v56 = vrot.slane %v1351_v53, 1  ;;  %v1131_v45 = vmul.f32 %v16580_v29, %v828_v39 }
 0x26b   : > { %v3807_v41 = vadd.f32 %v3544_v18, %v3168_v60  ;;  %v2258_v54 = vrot.slane %v17130_v58, 2  ;;  %v2906_v52 = vrot.slane %v2641_v23, 6  ;;  %v5049_v63 = vsel %vm4952_vm5, %v5046_v51, %v5048_v0 }
 0x26c   : > { %v4410_v33 = vsel %vm4313_vm4, %v21664_v47, %v4409_v21  ;;  %v21665_v8 = vrot.slane %v16972_v31, 6  ;;  %v1620_v44 = vsel %vm1507_vm0, %v1617_v62, %v1619_v56  ;;  %v3280_v55 = vmul.f32 %v16605_v27, %v828_v39  ;;  %v838_v47 = vpop.permute.xlu0 %837 }
 0x26d   : > { %v4677_v59 = vadd.f32 %v4410_v33, %v4018_v1  ;;  %v17152_v9 = vadd.f32 %v3917_v25, %v3807_v41  ;;  %v1879_v48 = vadd.f32 %v1620_v44, %v1130_v7  ;;  %v2907_v20 = vsel %vm2800_vm2, %v2904_v3, %v2906_v52 }
 0x26e   : > { %v5687_v6 = vsel %vm2800_vm2, %v21665_v8, %v5686_v24  ;;  %v3169_v11 = vadd.f32 %v2907_v20, %v16943_v32  ;;  %v3545_v57 = vrot.slane %v3280_v55, 7  ;;  %v4150_v51 = vmul.f32 %v16782_v36, %v828_v39  ;;  %v17200_v55 = vld [vmem:[%s21275_s1 + $0x1] ss:$0 sm:$0xff] }
 0x26f   : > { %v5316_v35 = vadd.f32 %v5049_v63, %v4677_v59  ;;  %v4789_v31 = vmul.f32 %v16794_v16, %v828_v39  ;;  %v2259_v26 = vsel %vm2146_vm1, %v2256_v49, %v2258_v54  ;;  %v3918_v62 = vmul.f32 %v16620_v42, %v828_v39 }
 0x270   : > { %v17161_v1 = vmul.f32 %v16802_v4, %v828_v39  ;;  %v3546_v7 = vsel %vm3439_vm3, %v3543_v38, %v3545_v57  ;;  %v4411_v37 = vrot.slane %v4150_v51, 4  ;;  %v1352_v19 = vmul.f32 %v16571_v34, %v833_v17  ;;  %v17218_v51 = vld [vmem:[%s21275_s1 + $0x3] ss:$0 sm:$0xff] }
 0x271   : > { %v5954_v15 = vadd.f32 %v5687_v6, %v5316_v35  ;;  %v5050_v3 = vrot.slane %v4789_v31, 5  ;;  %v3808_v10 = vadd.f32 %v3546_v7, %v3169_v11  ;;  %v17168_v50 = vmul.f32 %v16586_v28, %v833_v17 }
 0x272   : > { %v5688_v60 = vrot.slane %v17161_v1, 6  ;;  %v17170_v49 = vadd.f32 %v2259_v26, %v1879_v48  ;;  %v4412_v61 = vsel %vm4313_vm4, %v4409_v21, %v4411_v37  ;;  %v1621_v39 = vrot.slane %v1352_v19, 1  ;;  %v17209_v48 = vld [vmem:[%s21275_s1 + $0x2] ss:$0 sm:$0xff]  ;;  %v17231_v1 = vld [vmem:[%s21275_s1 + $0x4] ss:$0 sm:$0xff] }
 0x273   : > { %v6066_v32 = vadd.f32 %v17094_v5, %v5954_v15  ;;  %v2642_v13 = vmul.f32 %v16597_v30, %v833_v17  ;;  %v4678_v22 = vadd.f32 %v4412_v61, %v16928_v43  ;;  %v5051_v34 = vsel %vm4952_vm5, %v5048_v0, %v5050_v3  ;;  %v17224_v15 = vld [vmem:[%s21275_s1] ss:$0 sm:$0xff] }
 0x274   : > { %v1132_v53 = vmul.f32 %v16580_v29, %v833_v17  ;;  %v1622_v58 = vsel %vm1507_vm0, %v1619_v56, %v1621_v39  ;;  %v2260_v40 = vrot.slane %v17168_v50, 2  ;;  %v17180_v18 = vmul.f32 %v16605_v27, %v833_v17 }
 0x275   : > { %v6171_v38 = vmax.f32 %v6066_v32, 0.0  ;;  %v2908_v28 = vrot.slane %v2642_v13, 6  ;;  %v17183_v21 = vadd.f32 %v3918_v62, %v3808_v10  ;;  %v5317_v30 = vadd.f32 %v5051_v34, %v4678_v22 }
 0x276   : > { %v5689_v23 = vsel %vm2800_vm2, %v5686_v24, %v5688_v60  ;;  %v4151_v43 = vmul.f32 %v16782_v36, %v833_v17  ;;  %v1880_v0 = vadd.f32 %v1622_v58, %v1131_v45  ;;  %v3547_v41 = vrot.slane %v17180_v18, 7  ;;  %v843_v18 = vpop.permute.xlu1 %842 }
 0x277   : > { %6276 = vst.msk [vmem:[#allocation4 + $0x178] sm:$0xff] %vm385_vm6, %v6171_v38  ;;  %v2909_v29 = vsel %vm2800_vm2, %v2906_v52, %v2908_v28  ;;  %v4790_v25 = vmul.f32 %v16794_v16, %v833_v17  ;;  %v5955_v33 = vadd.f32 %v5689_v23, %v5317_v30  ;;  %v3919_v56 = vmul.f32 %v16620_v42, %v833_v17 }
 0x278   : > { %v3170_v27 = vadd.f32 %v2909_v29, %v16976_v14  ;;  %v4413_v59 = vrot.slane %v4151_v43, 4  ;;  %v2261_v63 = vsel %vm2146_vm1, %v2258_v54, %v2260_v40  ;;  %v3548_v24 = vsel %vm3439_vm3, %v3545_v57, %v3547_v41 }
 0x279   : > { %v5052_v8 = vrot.slane %v4790_v25, 5  ;;  %v5429_v45 = vmul.f32 %v16802_v4, %v833_v17  ;;  %v6067_v52 = vadd.f32 %v17094_v5, %v5955_v33  ;;  %v1353_v42 = vmul.f32 %v17200_v55, %v838_v47 }
 0x27a   : > { %v3809_v6 = vadd.f32 %v3548_v24, %v3170_v27  ;;  %v4414_v44 = vsel %vm4313_vm4, %v4411_v37, %v4413_v59  ;;  %v17203_v14 = vadd.f32 %v2261_v63, %v1880_v0  ;;  %v17212_v20 = vmul.f32 %v17209_v48, %v838_v47 }
 0x27b   : > { %v4679_v54 = vadd.f32 %v4414_v44, %v16974_v2  ;;  %v5690_v35 = vrot.slane %v5429_v45, 6  ;;  %v6172_v17 = vmax.f32 %v6067_v52, 0.0  ;;  %v5053_v11 = vsel %vm4952_vm5, %v5050_v3, %v5052_v8 }
 0x27c   : > { %v1623_v57 = vrot.slane %v1353_v42, 1  ;;  %v2643_v2 = vmul.f32 %v17218_v51, %v838_v47  ;;  %v1133_v26 = vmul.f32 %v17224_v15, %v838_v47  ;;  %v2262_v62 = vrot.slane %v17212_v20, 2 }
 0x27d   : > { %v5318_v31 = vadd.f32 %v5053_v11, %v4679_v54  ;;  %v3282_v7 = vmul.f32 %v17231_v1, %v838_v47  ;;  %6277 = vst.msk [vmem:[#allocation4 + $0x180] sm:$0xff] %vm385_vm6, %v6172_v17  ;;  %v5691_v37 = vsel %vm2800_vm2, %v5688_v60, %v5690_v35  ;;  %v4152_v32 = vmul.f32 %v16782_v36, %v838_v47  ;;  %v6352_v17 = vld [vmem:[#allocation4 + $0x90] ss:$2 sm:$0xff]  ;;  %v6458_v11 = vld [vmem:[#allocation4 + $0x91] ss:$2 sm:$0xff] }
 0x27e   : > { %v1624_v3 = vsel %vm1507_vm0, %v1621_v39, %v1623_v57  ;;  %v2910_v19 = vrot.slane %v2643_v2, 6  ;;  %v17238_v10 = vadd.f32 %v3919_v56, %v3809_v6  ;;  %v4791_v34 = vmul.f32 %v16794_v16, %v838_v47 }
 0x27f   : > { %v5956_v50 = vadd.f32 %v5691_v37, %v5318_v31  ;;  %v1881_v61 = vadd.f32 %v1624_v3, %v1132_v53  ;;  %v3549_v13 = vrot.slane %v3282_v7, 7  ;;  %v4415_v22 = vrot.slane %v4152_v32, 4  ;;  %v17251_v53 = vld [vmem:[%s21275_s1 + $0x5] ss:$0 sm:$0xff]  ;;  %v6354_v37 = vld [vmem:[#allocation4 + $0xa0] ss:$2 sm:$0xff] }
 0x280   : > { %21666 = vst [vmem:[#allocation15_spill] sm:$0xff] %v17238_v10  ;;  %v2911_v38 = vsel %vm2800_vm2, %v2908_v28, %v2910_v19  ;;  %v17243_v58 = vmul.f32 %v16802_v4, %v838_v47  ;;  %v2263_v39 = vsel %vm2146_vm1, %v2260_v40, %v2262_v62  ;;  %v3920_v28 = vmul.f32 %v17251_v53, %v838_v47  ;;  %v6460_v3 = vld [vmem:[#allocation4 + $0xa1] ss:$2 sm:$0xff] }
 0x281   : > { %v6068_v60 = vadd.f32 %v17094_v5, %v5956_v50  ;;  %v3171_v30 = vadd.f32 %v2911_v38, %v17126_v12  ;;  %v17254_v23 = vadd.f32 %v2263_v39, %v1881_v61  ;;  %v4416_v43 = vsel %vm4313_vm4, %v4413_v59, %v4415_v22  ;;  %v6356_v38 = vld [vmem:[#allocation4 + $0xb0] ss:$2 sm:$0xff]  ;;  %v6456_v39 = vld [vmem:[#allocation4 + $0x81] ss:$2 sm:$0xff] }
 0x282   : > { %v5054_v0 = vrot.slane %v4791_v34, 5  ;;  %v5692_v29 = vrot.slane %v17243_v58, 6  ;;  %v3550_v33 = vsel %vm3439_vm3, %v3547_v41, %v3549_v13  ;;  %v4680_v40 = vadd.f32 %v4416_v43, %v17056_v46  ;;  %v6462_v34 = vld [vmem:[#allocation4 + $0xb1] ss:$2 sm:$0xff] }
 0x283   : > { %v6173_v25 = vmax.f32 %v6068_v60, 0.0  ;;  %v17261_v12 = vmul.f32 %v17200_v55, %v843_v18  ;;  %v3810_v27 = vadd.f32 %v3550_v33, %v3171_v30  ;;  %v17265_v47 = vmul.f32 %v17209_v48, %v843_v18  ;;  %v6350_v60 = vld [vmem:[#allocation4 + $0x80] ss:$2 sm:$0xff] }
 0x284   : > { %v5055_v56 = vsel %vm4952_vm5, %v5052_v8, %v5054_v0  ;;  %v17268_v63 = vmul.f32 %v17218_v51, %v843_v18  ;;  %v17272_v24 = vmul.f32 %v17224_v15, %v843_v18  ;;  %v17276_v41 = vmul.f32 %v17231_v1, %v843_v18 }
 0x285   : > { %6278 = vst.msk [vmem:[#allocation4 + $0x188] sm:$0xff] %vm385_vm6, %v6173_v25  ;;  %v5319_v59 = vadd.f32 %v5055_v56, %v4680_v40  ;;  %v1625_v46 = vrot.slane %v17261_v12, 1  ;;  %v5693_v45 = vsel %vm2800_vm2, %v5690_v35, %v5692_v29  ;;  %v2264_v8 = vrot.slane %v17265_v47, 2 }
 0x286   : > { %v2912_v52 = vrot.slane %v17268_v63, 6  ;;  %v17282_v6 = vmul.f32 %v16782_v36, %v843_v18  ;;  %v3551_v54 = vrot.slane %v17276_v41, 7  ;;  %v17289_v20 = vmul.f32 %v16794_v16, %v843_v18 }
 0x287   : > { %v5957_v44 = vadd.f32 %v5693_v45, %v5319_v59  ;;  %v1626_v42 = vsel %vm1507_vm0, %v1623_v57, %v1625_v46  ;;  %v17291_v35 = vadd.f32 %v3920_v28, %v3810_v27  ;;  %v3921_v50 = vmul.f32 %v17251_v53, %v843_v18 }
 0x288   : > { %v1882_v2 = vadd.f32 %v1626_v42, %v1133_v26  ;;  %v2913_v31 = vsel %vm2800_vm2, %v2910_v19, %v2912_v52  ;;  %v4417_v7 = vrot.slane %v17282_v6, 4  ;;  %v5056_v61 = vrot.slane %v17289_v20, 5 }
 0x289   : > { %21667 = vst [vmem:[#allocation23_spill] sm:$0xff] %v17291_v35  ;;  %v6069_v57 = vadd.f32 %v17094_v5, %v5957_v44  ;;  %v3172_v32 = vadd.f32 %v2913_v31, %v17170_v49  ;;  %v2265_v26 = vsel %vm2146_vm1, %v2262_v62, %v2264_v8  ;;  %v3552_v19 = vsel %vm3439_vm3, %v3549_v13, %v3551_v54  ;;  %v21668_v31 = vld [vmem:[#allocation16_spill] sm:$0xff] }
 0x28a   : > { %v4418_v58 = vsel %vm4313_vm4, %v4415_v22, %v4417_v7  ;;  %v17311_v49 = vmul.f32 %v16802_v4, %v843_v18  ;;  %v17313_v28 = vadd.f32 %v2265_v26, %v1882_v2  ;;  %v5057_v62 = vsel %vm4952_vm5, %v5054_v0, %v5056_v61  ;;  %v848_v22 = vpop.permute.xlu0 %847 }
 0x28b   : > { %v6174_v30 = vmax.f32 %v6069_v57, 0.0  ;;  %v4681_v43 = vadd.f32 %v4418_v58, %v17152_v9  ;;  %v6554_v25 = vmax.f32 %v6352_v17, %v6458_v11  ;;  %v6555_v33 = vmax.f32 %v6354_v37, %v6460_v3 }
 0x28c   : > { %v5694_v13 = vrot.slane %v17311_v49, 6  ;;  %v17320_v40 = vmax.f32 %v6356_v38, %v6462_v34  ;;  %v3811_v18 = vadd.f32 %v3552_v19, %v3172_v32  ;;  %v6553_v56 = vmax.f32 %v6350_v60, %v6456_v39 }
 0x28d   : > { %6279 = vst.msk [vmem:[#allocation4 + $0x190] sm:$0xff] %vm385_vm6, %v6174_v30  ;;  %v5320_v27 = vadd.f32 %v5057_v62, %v4681_v43  ;;  %v6635_v59 = vrot.slane %v6554_v25, 7  ;;  %v6636_v45 = vrot.slane %v6555_v33, 7  ;;  %v17328_v42 = vmul.f32 %v17200_v55, %v848_v22  ;;  %v858_v43 = vpop.permute.xlu1 %857 }
 0x28e   : > { %v5695_v9 = vsel %vm2800_vm2, %v5692_v29, %v5694_v13  ;;  %v6638_v0 = vrot.slane %v17320_v40, 7  ;;  %v17331_v17 = vmul.f32 %v17209_v48, %v848_v22  ;;  %v17337_v29 = vmul.f32 %v17218_v51, %v848_v22 }
 0x28f   : > { %v5958_v44 = vadd.f32 %v5695_v9, %v5320_v27  ;;  %v6637_v11 = vsel %vm3439_vm3, %v6635_v59, %v6636_v45  ;;  %v6643_v37 = vmax.f32 %v21668_v31, %v6635_v59  ;;  %v21392_v38 = vrot.slane %v17328_v42, 1  ;;  %v6464_v31 = vld [vmem:[#allocation4 + $0xc1] ss:$2 sm:$0xff] }
 0x290   : > { %v6639_v2 = vsel %vm3439_vm3, %v6636_v45, %v6638_v0  ;;  %v6644_v57 = vmax.f32 %v6553_v56, %v6637_v11  ;;  %v17341_v34 = vadd.f32 %v3921_v50, %v3811_v18  ;;  %v21386_v26 = vrot.slane %v17331_v17, 2  ;;  %v6358_v0 = vld [vmem:[#allocation4 + $0xc0] ss:$2 sm:$0xff] }
 0x291   : > { %v6070_v3 = vadd.f32 %v17094_v5, %v5958_v44  ;;  %v6645_v32 = vmax.f32 %v6554_v25, %v6639_v2  ;;  %6647 = vst.msk [vmem:[#allocation2 + $0x2d] sm:$0xf0] %vm6646_vm10, %v6643_v37  ;;  %v21384_v19 = vrot.slane %v17337_v29, 6  ;;  %v17347_v58 = vmul.f32 %v17231_v1, %v848_v22  ;;  %v6360_v44 = vld [vmem:[#allocation4 + $0xd0] ss:$2 sm:$0xff] }
 0x292   : > { %6648 = vst.msk [vmem:[#allocation2 + $0x35] sm:$0xff] %vm385_vm6, %v6644_v57  ;;  %v1628_v50 = vsel %vm1507_vm0, %v1625_v46, %v21392_v38  ;;  %v17357_v39 = vmul.f32 %v16782_v36, %v848_v22  ;;  %v17360_v30 = vmul.f32 %v16794_v16, %v848_v22  ;;  %v17363_v62 = vmul.f32 %v17224_v15, %v848_v22  ;;  %v6362_v11 = vld [vmem:[#allocation4 + $0xe0] ss:$2 sm:$0xff]  ;;  %v6466_v37 = vld [vmem:[#allocation4 + $0xd1] ss:$2 sm:$0xff] }
 0x293   : > { %v6175_v60 = vmax.f32 %v6070_v3, 0.0  ;;  %6650 = vst.msk [vmem:[#allocation2 + $0x3d] sm:$0x3] %vm6649_vm11, %v6645_v32  ;;  %v1883_v25 = vadd.f32 %v1628_v50, %v17272_v24  ;;  %v2915_v12 = vsel %vm2800_vm2, %v2912_v52, %v21384_v19  ;;  %v21382_v46 = vrot.slane %v17347_v58, 7  ;;  %v6468_v50 = vld [vmem:[#allocation4 + $0xe1] ss:$2 sm:$0xff] }
 0x294   : > { %21669 = vst [vmem:[#allocation22_spill] sm:$0xff] %v17360_v30  ;;  %v3173_v33 = vadd.f32 %v2915_v12, %v17203_v14  ;;  %v21381_v18 = vrot.slane %v17357_v39, 4  ;;  %v21380_v27 = vrot.slane %v17360_v30, 5  ;;  %v17377_v56 = vmul.f32 %v16802_v4, %v848_v22  ;;  %v6368_v30 = vld [vmem:[#allocation4 + $0x110] ss:$2 sm:$0xff] }
 0x295   : > { %6280 = vst.msk [vmem:[#allocation4 + $0x198] sm:$0xff] %vm385_vm6, %v6175_v60  ;;  %v2267_v63 = vsel %vm2146_vm1, %v2264_v8, %v21386_v26  ;;  %v3554_v24 = vsel %vm3439_vm3, %v3551_v54, %v21382_v46  ;;  %v3922_v14 = vmul.f32 %v17251_v53, %v848_v22  ;;  %v17391_v52 = vmul.f32 %v17200_v55, %v858_v43 }
 0x296   : > { %21670 = vst [vmem:[#allocation13_spill] sm:$0xff] %v17377_v56  ;;  %v17393_v9 = vadd.f32 %v2267_v63, %v1883_v25  ;;  %v3812_v59 = vadd.f32 %v3554_v24, %v3173_v33  ;;  %v4420_v47 = vsel %vm4313_vm4, %v4417_v7, %v21381_v18  ;;  %v21379_v8 = vrot.slane %v17377_v56, 6  ;;  %v863_v24 = vpop.permute.xlu0 %862 }
 0x297   : > { %v4682_v41 = vadd.f32 %v4420_v47, %v17183_v21  ;;  %v1137_v54 = vmul.f32 %v17224_v15, %v858_v43  ;;  %v17404_v22 = vmul.f32 %v17209_v48, %v858_v43  ;;  %v17407_v45 = vmul.f32 %v17218_v51, %v858_v43 }
 0x298   : > { %v17409_v2 = vadd.f32 %v3922_v14, %v3812_v59  ;;  %v5059_v6 = vsel %vm4952_vm5, %v5056_v61, %v21380_v27  ;;  %v21391_v21 = vrot.slane %v17391_v52, 1  ;;  %v17418_v7 = vmul.f32 %v17231_v1, %v858_v43  ;;  %v17484_v27 = vld [vmem:[%s21275_s1 + $0x8] ss:$0 sm:$0xff] }
 0x299   : > { %v6864_v3 = vld [vmem:[#allocation2 + $0x31] sm:$0xff]  ;;  %v5321_v32 = vadd.f32 %v5059_v6, %v4682_v41  ;;  %v5697_v60 = vsel %vm2800_vm2, %v5694_v13, %v21379_v8  ;;  %v17426_v20 = vmul.f32 %v17251_v53, %v858_v43  ;;  %v17429_v61 = vmul.f32 %v16782_v36, %v858_v43 }
 0x29a   : > { %v6865_v57 = vld [vmem:[#allocation2 + $0x39] sm:$0xff]  ;;  %v21385_v12 = vrot.slane %v17404_v22, 2  ;;  %v21383_v33 = vrot.slane %v17407_v45, 6  ;;  %v17434_v63 = vmul.f32 %v16794_v16, %v858_v43  ;;  %v21387_v49 = vrot.slane %v17418_v7, 7 }
 0x29b   : > { %21671 = vst [vmem:[#allocation14_spill] sm:$0xff] %v17426_v20  ;;  %v6889_v25 = vpack.c.bf16 %v6865_v57, %v6864_v3  ;;  %v5959_v14 = vadd.f32 %v5697_v60, %v5321_v32  ;;  %v17438_v13 = vmul.f32 %v16802_v4, %v858_v43  ;;  %v6558_v59 = vmax.f32 %v6360_v44, %v6466_v37 }
 0x29c   : > { %21672 = vst [vmem:[#allocation21_spill] sm:$0xff] %v17434_v63  ;;  %v21389_v36 = vrot.slane %v17429_v61, 4  ;;  %v21388_v47 = vrot.slane %v17434_v63, 5  ;;  %v6557_v41 = vmax.f32 %v6358_v0, %v6464_v31  ;;  %v6559_v6 = vmax.f32 %v6362_v11, %v6468_v50 }
 0x29d   : > { %21673 = vst [vmem:[#allocation25_spill] sm:$0xff] %v17438_v13  ;;  %13072 = vmatmul.mubr.msk.bf16.gmra.mrb[4].mxu0 %vm385_vm6, %v6889_v25  ;;  %v6071_v3 = vadd.f32 %v17094_v5, %v5959_v14  ;;  %v6653_v16 = vrot.slane %v6558_v59, 7  ;;  %v1358_v57 = vmul.f32 %v17200_v55, %v863_v24  ;;  %v1997_v60 = vmul.f32 %v17209_v48, %v863_v24 }
 0x29e   : > { %v6654_v32 = vrot.slane %v6559_v6, 7  ;;  %v17447_v4 = vmul.f32 %v17218_v51, %v863_v24  ;;  %v17450_v43 = vmul.f32 %v17231_v1, %v863_v24  ;;  %v21390_v37 = vrot.slane %v17438_v13, 6 }
 0x29f   : > { %v6176_v44 = vmax.f32 %v6071_v3, 0.0  ;;  %v6658_v0 = vmax.f32 %v17320_v40, %v6653_v16  ;;  %v1633_v11 = vrot.slane %v1358_v57, 1  ;;  %v2272_v50 = vrot.slane %v1997_v60, 2  ;;  %v17465_v40 = vld [vmem:[%s21275_s1 + $0x6] ss:$0 sm:$0xff]  ;;  %v868_v57 = vpop.permute.xlu1 %867 }
 0x2a0   : > { %v6655_v31 = vsel %vm3439_vm3, %v6653_v16, %v6654_v32  ;;  %v2920_v25 = vrot.slane %v17447_v4, 6  ;;  %v21393_v14 = vrot.slane %v17450_v43, 7  ;;  %v4157_v3 = vmul.f32 %v17465_v40, %v863_v24  ;;  %v17471_v16 = vld [vmem:[%s21275_s1 + $0x7] ss:$0 sm:$0xff] }
 0x2a1   : > { %6281 = vst.msk [vmem:[#allocation4 + $0x1a0] sm:$0xff] %vm385_vm6, %v6176_v44  ;;  %v6659_v59 = vmax.f32 %v6557_v41, %v6655_v31  ;;  %v1634_v6 = vsel %vm1507_vm0, %v21391_v21, %v1633_v11  ;;  %v4796_v41 = vmul.f32 %v17471_v16, %v863_v24  ;;  %v1138_v32 = vmul.f32 %v17224_v15, %v863_v24 }
 0x2a2   : > { %6661 = vst.msk [vmem:[#allocation2 + $0x3f] sm:$0xfc] %vm6660_vm12, %v6658_v0  ;;  %v1886_v60 = vadd.f32 %v1634_v6, %v1137_v54  ;;  %v2921_v4 = vsel %vm2800_vm2, %v21383_v33, %v2920_v25  ;;  %v3925_v44 = vmul.f32 %v17251_v53, %v863_v24  ;;  %v4425_v31 = vrot.slane %v4157_v3, 4 }
 0x2a3   : > { %6662 = vst.msk [vmem:[#allocation2 + $0x47] sm:$0xff] %vm385_vm6, %v6659_v59  ;;  %v3176_v0 = vadd.f32 %v2921_v4, %v17393_v9  ;;  %v5064_v8 = vrot.slane %v4796_v41, 5  ;;  %v5435_v18 = vmul.f32 %v17484_v27, %v863_v24  ;;  %v2273_v54 = vsel %vm2146_vm1, %v21385_v12, %v2272_v50 }
 0x2a4   : > { %v3560_v59 = vsel %vm3439_vm3, %v21387_v49, %v21393_v14  ;;  %v1359_v9 = vmul.f32 %v17200_v55, %v868_v57  ;;  %v1998_v6 = vmul.f32 %v17209_v48, %v868_v57  ;;  %v17497_v3 = vadd.f32 %v2273_v54, %v1886_v60 }
 0x2a5   : > { %v3815_v41 = vadd.f32 %v3560_v59, %v3176_v0  ;;  %v4426_v24 = vsel %vm4313_vm4, %v21389_v36, %v4425_v31  ;;  %v5702_v4 = vrot.slane %v5435_v18, 6  ;;  %v2649_v12 = vmul.f32 %v17218_v51, %v868_v57 }
 0x2a6   : > { %v4685_v46 = vadd.f32 %v4426_v24, %v17341_v34  ;;  %v1635_v33 = vrot.slane %v1359_v9, 1  ;;  %v2274_v19 = vrot.slane %v1998_v6, 2  ;;  %v5065_v49 = vsel %vm4952_vm5, %v21388_v47, %v5064_v8  ;;  %v873_v9 = vpop.permute.xlu0 %872 }
 0x2a7   : > { %v17504_v26 = vadd.f32 %v3925_v44, %v3815_v41  ;;  %v1139_v60 = vmul.f32 %v17224_v15, %v868_v57  ;;  %v3288_v0 = vmul.f32 %v17231_v1, %v868_v57  ;;  %v5703_v18 = vsel %vm2800_vm2, %v21390_v37, %v5702_v4 }
 0x2a8   : > { %v5324_v54 = vadd.f32 %v5065_v49, %v4685_v46  ;;  %v1636_v34 = vsel %vm1507_vm0, %v1633_v11, %v1635_v33  ;;  %v2922_v59 = vrot.slane %v2649_v12, 6  ;;  %v2275_v44 = vsel %vm2146_vm1, %v2272_v50, %v2274_v19 }
 0x2a9   : > { %v17517_v6 = vmul.f32 %v17251_v53, %v868_v57  ;;  %v17520_v41 = vmul.f32 %v17465_v40, %v868_v57  ;;  %v17523_v24 = vmul.f32 %v17471_v16, %v868_v57  ;;  %v1887_v36 = vadd.f32 %v1636_v34, %v1138_v32 }
 0x2aa   : > { %v6866_v46 = vld [vmem:[#allocation2 + $0x41] sm:$0xff]  ;;  %v6867_v49 = vld [vmem:[#allocation2 + $0x49] sm:$0xff]  ;;  %v5962_v47 = vadd.f32 %v5703_v18, %v5324_v54  ;;  %v3561_v37 = vrot.slane %v3288_v0, 7  ;;  %v17526_v11 = vmul.f32 %v17484_v27, %v868_v57  ;;  %v17529_v50 = vsel %vm2800_vm2, %v2920_v25, %v2922_v59 }
 0x2ab   : > { %21674 = vst [vmem:[#allocation27_spill] sm:$0xff] %v17517_v6  ;;  %21675 = vst [vmem:[#allocation24_spill] sm:$0xff] %v17520_v41  ;;  %v6890_v12 = vpack.c.bf16 %v6867_v49, %v6866_v46  ;;  %v21396_v21 = vrot.slane %v17520_v41, 4  ;;  %v1140_v38 = vmul.f32 %v17224_v15, %v873_v9  ;;  %v5066_v13 = vrot.slane %v17523_v24, 5  ;;  %v6474_v6 = vld [vmem:[#allocation4 + $0x111] ss:$2 sm:$0xff] }
 0x2ac   : > { %21676 = vst [vmem:[#allocation11_spill] sm:$0xff] %v17529_v50  ;;  %v6074_v14 = vadd.f32 %v17094_v5, %v5962_v47  ;;  %v1360_v32 = vmul.f32 %v17200_v55, %v873_v9  ;;  %v1999_v25 = vmul.f32 %v17209_v48, %v873_v9  ;;  %v2650_v0 = vmul.f32 %v17218_v51, %v873_v9  ;;  %v6364_v41 = vld [vmem:[#allocation4 + $0xf0] ss:$2 sm:$0xff] }
 0x2ad   : > { %13075 = vmatprep.mubr.msk.bf16.mxu0 %vm385_vm6, %v6890_v12  ;;  %v4428_v57 = vsel %vm4313_vm4, %v4425_v31, %v21396_v21  ;;  %v17544_v54 = vmul.f32 %v17231_v1, %v873_v9  ;;  %v17546_v18 = vadd.f32 %v2275_v44, %v1887_v36  ;;  %v5067_v24 = vsel %vm4952_vm5, %v5064_v8, %v5066_v13 }
 0x2ae   : > { %v6179_v47 = vmax.f32 %v6074_v14, 0.0  ;;  %v4686_v34 = vadd.f32 %v4428_v57, %v17409_v2  ;;  %v1637_v46 = vrot.slane %v1360_v32, 1  ;;  %v2276_v49 = vrot.slane %v1999_v25, 2  ;;  %v878_v14 = vpop.permute.xlu1 %877 }
 0x2af   : > { %v2924_v12 = vrot.slane %v2650_v0, 6  ;;  %v3563_v56 = vrot.slane %v17544_v54, 7  ;;  %v21677_v31 = vrot.slane %v17450_v43, 7  ;;  %v17558_v36 = vmul.f32 %v17465_v40, %v873_v9 }
 0x2b0   : > { %6284 = vst.msk [vmem:[#allocation4 + $0x1b8] sm:$0xff] %vm385_vm6, %v6179_v47  ;;  %v5325_v63 = vadd.f32 %v5067_v24, %v4686_v34  ;;  %v4798_v2 = vmul.f32 %v17471_v16, %v873_v9  ;;  %v21679_v8 = vrot.slane %v17526_v11, 6  ;;  %v1638_v32 = vsel %vm1507_vm0, %v1635_v33, %v1637_v46 }
 0x2b1   : > { %v17555_v21 = vsel %vm3439_vm3, %v21677_v31, %v3561_v37  ;;  %v2277_v57 = vsel %vm2146_vm1, %v2274_v19, %v2276_v49  ;;  %v17567_v43 = vmul.f32 %v17251_v53, %v873_v9  ;;  %v1888_v0 = vadd.f32 %v1638_v32, %v1139_v60 }
 0x2b2   : > { %21678 = vst [vmem:[#allocation26_spill] sm:$0xff] %v17555_v21  ;;  %v5705_v44 = vsel %vm2800_vm2, %v5702_v4, %v21679_v8  ;;  %v17570_v54 = vsel %vm2800_vm2, %v2922_v59, %v2924_v12  ;;  %v17573_v47 = vsel %vm3439_vm3, %v3561_v37, %v3563_v56  ;;  %v5068_v34 = vrot.slane %v4798_v2, 5  ;;  %v6366_v8 = vld [vmem:[#allocation4 + $0x100] ss:$2 sm:$0xff] }
 0x2b3   : > { %21680 = vst [vmem:[#allocation10_spill] sm:$0xff] %v17567_v43  ;;  %v5963_v25 = vadd.f32 %v5705_v44, %v5325_v63  ;;  %21681 = vst [vmem:[#allocation18_spill] sm:$0xff] %v17570_v54  ;;  %v17576_v24 = vmul.f32 %v17484_v27, %v873_v9  ;;  %v17579_v4 = vmul.f32 %v17200_v55, %v878_v14  ;;  %v6472_v44 = vld [vmem:[#allocation4 + $0x101] ss:$2 sm:$0xff] }
 0x2b4   : > { %21682 = vst [vmem:[#allocation12_spill] sm:$0xff] %v17573_v47  ;;  %v17582_v19 = vmul.f32 %v17209_v48, %v878_v14  ;;  %v17587_v60 = vmul.f32 %v17224_v15, %v878_v14  ;;  %v17590_v37 = vmul.f32 %v17218_v51, %v878_v14  ;;  %v17596_v2 = vmul.f32 %v17231_v1, %v878_v14 }
 0x2b5   : > { %v6075_v33 = vadd.f32 %v17094_v5, %v5963_v25  ;;  %v5706_v59 = vrot.slane %v17576_v24, 6  ;;  %v1639_v9 = vrot.slane %v17579_v4, 1  ;;  %v17598_v25 = vadd.f32 %v2277_v57, %v1888_v0 }
 0x2b6   : > { %v21400_v63 = vrot.slane %v17590_v37, 6  ;;  %v17602_v43 = vmul.f32 %v17465_v40, %v878_v14  ;;  %v17605_v24 = vsel %vm4952_vm5, %v5066_v13, %v5068_v34  ;;  %v3565_v31 = vrot.slane %v17596_v2, 7 }
 0x2b7   : > { %v6180_v32 = vmax.f32 %v6075_v33, 0.0  ;;  %21683 = vst [vmem:[#allocation19_spill] sm:$0xff] %v17605_v24  ;;  %v1640_v4 = vsel %vm1507_vm0, %v1637_v46, %v1639_v9  ;;  %v3928_v47 = vmul.f32 %v17251_v53, %v878_v14  ;;  %v6470_v33 = vld [vmem:[#allocation4 + $0xf1] ss:$2 sm:$0xff]  ;;  %v17616_v13 = vmul.f32 %v17471_v16, %v878_v14  ;;  %v6370_v24 = vld [vmem:[#allocation4 + $0x120] ss:$2 sm:$0xff] }
 0x2b8   : > { %v1889_v57 = vadd.f32 %v1640_v4, %v1140_v38  ;;  %v2927_v0 = vsel %vm2800_vm2, %v2924_v12, %v21400_v63  ;;  %v4431_v35 = vrot.slane %v17602_v43, 4  ;;  %v6476_v46 = vld [vmem:[#allocation4 + $0x121] ss:$2 sm:$0xff]  ;;  %v21684_v2 = vrot.slane %v17526_v11, 6  ;;  %v883_v43 = vpop.permute.xlu0 %882 }
 0x2b9   : > { %6285 = vst.msk [vmem:[#allocation4 + $0x1c0] sm:$0xff] %vm385_vm6, %v6180_v32  ;;  %v21686_v21 = vrot.slane %v17582_v19, 2  ;;  %v3179_v32 = vadd.f32 %v2927_v0, %v17497_v3  ;;  %v17628_v12 = vmul.f32 %v17484_v27, %v878_v14  ;;  %v3566_v4 = vsel %vm3439_vm3, %v3563_v56, %v3565_v31 }
 0x2ba   : > { %v17621_v20 = vsel %vm2800_vm2, %v21684_v2, %v5706_v59  ;;  %v5070_v63 = vrot.slane %v17616_v13, 5  ;;  %v6560_v10 = vmax.f32 %v6364_v41, %v6470_v33  ;;  %v6561_v54 = vmax.f32 %v6366_v8, %v6472_v44 }
 0x2bb   : > { %21685 = vst [vmem:[#allocation20_spill] sm:$0xff] %v17621_v20  ;;  %v2279_v38 = vsel %vm2146_vm1, %v2276_v49, %v21686_v21  ;;  %v3818_v2 = vadd.f32 %v3566_v4, %v3179_v32  ;;  %v6562_v20 = vmax.f32 %v6368_v30, %v6474_v6  ;;  %v17634_v50 = vmax.f32 %v6370_v24, %v6476_v46 }
 0x2bc   : > { %v17632_v11 = vadd.f32 %v2279_v38, %v1889_v57  ;;  %v21688_v21 = vrot.slane %v17558_v36, 4  ;;  %v17642_v49 = vsel %vm4952_vm5, %v5068_v34, %v5070_v63  ;;  %v5708_v56 = vrot.slane %v17628_v12, 6 }
 0x2bd   : > { %21687 = vst [vmem:[#allocation17_spill] sm:$0xff] %v17634_v50  ;;  %v1362_v14 = vmul.f32 %v17200_v55, %v883_v43  ;;  %v6666_v41 = vrot.slane %v6561_v54, 7  ;;  %v6667_v8 = vrot.slane %v6562_v20, 7  ;;  %v6669_v44 = vrot.slane %v17634_v50, 7 }
 0x2be   : > { %v17639_v3 = vsel %vm4313_vm4, %v21688_v21, %v4431_v35  ;;  %v1142_v30 = vmul.f32 %v17224_v15, %v883_v43  ;;  %v2001_v24 = vmul.f32 %v17209_v48, %v883_v43  ;;  %v2652_v33 = vmul.f32 %v17218_v51, %v883_v43 }
 0x2bf   : > { %v1641_v6 = vrot.slane %v1362_v14, 1  ;;  %v17651_v57 = vmul.f32 %v17231_v1, %v883_v43  ;;  %v17653_v34 = vadd.f32 %v3928_v47, %v3818_v2  ;;  %v6668_v0 = vsel %vm3439_vm3, %v6666_v41, %v6667_v8 }
 0x2c0   : > { %v6670_v13 = vsel %vm3439_vm3, %v6667_v8, %v6669_v44  ;;  %v17658_v20 = vmul.f32 %v17465_v40, %v883_v43  ;;  %v6673_v46 = vmax.f32 %v6560_v10, %v6668_v0  ;;  %v2280_v12 = vrot.slane %v2001_v24, 2 }
 0x2c1   : > { %21689 = vst [vmem:[#allocation16_spill] sm:$0xff] %v17653_v34  ;;  %v6674_v38 = vmax.f32 %v6561_v54, %v6670_v13  ;;  %v1642_v32 = vsel %vm1507_vm0, %v1639_v9, %v1641_v6  ;;  %v17662_v4 = vsel %vm2800_vm2, %v5706_v59, %v5708_v56  ;;  %v2928_v21 = vrot.slane %v2652_v33, 6  ;;  %v888_v59 = vpop.permute.xlu1 %887 }
 0x2c2   : > { %v3567_v14 = vrot.slane %v17651_v57, 7  ;;  %v4433_v47 = vrot.slane %v17658_v20, 4  ;;  %6675 = vst.msk [vmem:[#allocation2 + $0x51] sm:$0xff] %vm385_vm6, %v6673_v46  ;;  %v1890_v2 = vadd.f32 %v1642_v32, %v17587_v60  ;;  %v3929_v10 = vmul.f32 %v17251_v53, %v883_v43 }
 0x2c3   : > { %6676 = vst.msk [vmem:[#allocation2 + $0x59] sm:$0x3f] %vm6611_vm7, %v6674_v38  ;;  %v4800_v54 = vmul.f32 %v17471_v16, %v883_v43  ;;  %v17672_v9 = vmul.f32 %v17484_v27, %v883_v43  ;;  %v21690_v41 = vrot.slane %v17582_v19, 2  ;;  %v21691_v44 = vrot.slane %v17590_v37, 6 }
 0x2c4   : > { %v3568_v33 = vsel %vm3439_vm3, %v3565_v31, %v3567_v14  ;;  %v4434_v60 = vsel %vm4313_vm4, %v4431_v35, %v4433_v47  ;;  %v17686_v20 = vmul.f32 %v17200_v55, %v888_v59  ;;  %v17689_v19 = vmul.f32 %v17209_v48, %v888_v59 }
 0x2c5   : > { %v2281_v8 = vsel %vm2146_vm1, %v21690_v41, %v2280_v12  ;;  %v2929_v24 = vsel %vm2800_vm2, %v21691_v44, %v2928_v21  ;;  %v4689_v0 = vadd.f32 %v4434_v60, %v17504_v26  ;;  %v5072_v13 = vrot.slane %v4800_v54, 5 }
 0x2c6   : > { %v3180_v57 = vadd.f32 %v2929_v24, %v17546_v18  ;;  %v21401_v43 = vrot.slane %v17672_v9, 6  ;;  %v17692_v37 = vmul.f32 %v17218_v51, %v888_v59  ;;  %v17695_v31 = vmul.f32 %v17231_v1, %v888_v59 }
 0x2c7   : > { %v17697_v35 = vadd.f32 %v2281_v8, %v1890_v2  ;;  %v5073_v26 = vsel %vm4952_vm5, %v5070_v63, %v5072_v13  ;;  %v17701_v46 = vmul.f32 %v17224_v15, %v888_v59  ;;  %v21403_v32 = vrot.slane %v17686_v20, 1 }
 0x2c8   : > { %v3819_v18 = vadd.f32 %v3568_v33, %v3180_v57  ;;  %v5328_v38 = vadd.f32 %v5073_v26, %v4689_v0  ;;  %v21406_v54 = vrot.slane %v17689_v19, 2  ;;  %v21407_v41 = vrot.slane %v17692_v37, 6  ;;  %v853_v26 = vpop.permute.xlu0 %852 }
 0x2c9   : > { %v5711_v44 = vsel %vm2800_vm2, %v5708_v56, %v21401_v43  ;;  %v17711_v8 = vmul.f32 %v17465_v40, %v888_v59  ;;  %v17714_v63 = vmul.f32 %v17471_v16, %v888_v59  ;;  %v6868_v24 = vld [vmem:[#allocation2 + $0x51] sm:$0xff]  ;;  %v1644_v57 = vsel %vm1507_vm0, %v1641_v6, %v21403_v32 }
 0x2ca   : > { %v6869_v33 = vld [vmem:[#allocation2 + $0x59] sm:$0xff]  ;;  %v5966_v60 = vadd.f32 %v5711_v44, %v5328_v38  ;;  %v2931_v0 = vsel %vm2800_vm2, %v2928_v21, %v21407_v41  ;;  %v3930_v56 = vmul.f32 %v17251_v53, %v888_v59  ;;  %v1891_v2 = vadd.f32 %v1644_v57, %v1142_v30 }
 0x2cb   : > { %v6891_v43 = vpack.c.bf16 %v6869_v33, %v6868_v24  ;;  %v2283_v50 = vsel %vm2146_vm1, %v2280_v12, %v21406_v54  ;;  %v3181_v34 = vadd.f32 %v2931_v0, %v17598_v25  ;;  %v21405_v44 = vrot.slane %v17711_v8, 4 }
 0x2cc   : > { %v6078_v38 = vadd.f32 %v17094_v5, %v5966_v60  ;;  %v21404_v6 = vrot.slane %v17714_v63, 5  ;;  %v17731_v32 = vmul.f32 %v17484_v27, %v888_v59  ;;  %v17734_v21 = vadd.f32 %v3929_v10, %v3819_v18 }
 0x2cd   : > { %13076 = vmatmul.mubr.msk.bf16.gmra.mrb[8].mxu0 %vm385_vm6, %v6891_v43  ;;  %v17736_v30 = vadd.f32 %v2283_v50, %v1891_v2  ;;  %v21692_v24 = vrot.slane %v17695_v31, 7  ;;  %v1356_v25 = vmul.f32 %v17200_v55, %v853_v26  ;;  %v4436_v60 = vsel %vm4313_vm4, %v4433_v47, %v21405_v44 }
 0x2ce   : > { %v6183_v5 = vmax.f32 %v6078_v38, 0.0  ;;  %v1136_v59 = vmul.f32 %v17224_v15, %v853_v26  ;;  %v17749_v10 = vsel %vm4952_vm5, %v5072_v13, %v21404_v6  ;;  %v1995_v43 = vmul.f32 %v17209_v48, %v853_v26 }
 0x2cf   : > { %v3570_v12 = vsel %vm3439_vm3, %v3567_v14, %v21692_v24  ;;  %v1629_v50 = vrot.slane %v1356_v25, 1  ;;  %v2646_v14 = vmul.f32 %v17218_v51, %v853_v26  ;;  %v3285_v18 = vmul.f32 %v17231_v1, %v853_v26 }
 0x2d0   : > { %v3820_v33 = vadd.f32 %v3570_v12, %v3181_v34  ;;  %6288 = vst.msk [vmem:[#allocation4 + $0x1d8] sm:$0xff] %vm385_vm6, %v6183_v5  ;;  %v3923_v47 = vmul.f32 %v17251_v53, %v853_v26  ;;  %v4155_v2 = vmul.f32 %v17465_v40, %v853_v26  ;;  %v21693_v57 = vrot.slane %v17328_v42, 1 }
 0x2d1   : > { %v21694_v0 = vrot.slane %v17391_v52, 1  ;;  %v2268_v24 = vrot.slane %v1995_v43, 2  ;;  %v2916_v12 = vrot.slane %v2646_v14, 6  ;;  %v3555_v6 = vrot.slane %v3285_v18, 7 }
 0x2d2   : > { %v1630_v13 = vsel %vm1507_vm0, %v21693_v57, %v1629_v50  ;;  %v4421_v44 = vrot.slane %v4155_v2, 4  ;;  %v21695_v54 = vrot.slane %v17331_v17, 2  ;;  %v21696_v34 = vrot.slane %v17404_v22, 2 }
 0x2d3   : > { %v1632_v38 = vsel %vm1507_vm0, %v1629_v50, %v21694_v0  ;;  %v1884_v25 = vadd.f32 %v1630_v13, %v17363_v62  ;;  %v21697_v57 = vrot.slane %v17337_v29, 6  ;;  %v21698_v50 = vrot.slane %v17407_v45, 6  ;;  %v21703_v13 = vld [vmem:[#allocation11_spill] sm:$0xff]  ;;  %v21704_v0 = vld [vmem:[#allocation18_spill] sm:$0xff] }
 0x2d4   : > { %v1885_v5 = vadd.f32 %v1632_v38, %v1136_v59  ;;  %v2269_v41 = vsel %vm2146_vm1, %v21695_v54, %v2268_v24  ;;  %v2271_v42 = vsel %vm2146_vm1, %v2268_v24, %v21696_v34  ;;  %v21699_v54 = vrot.slane %v17347_v58, 7  ;;  %v17793_v24 = vpop.permute.xlu1 %892 }
 0x2d5   : > { %v2917_v52 = vsel %vm2800_vm2, %v21697_v57, %v2916_v12  ;;  %v2919_v43 = vsel %vm2800_vm2, %v2916_v12, %v21698_v50  ;;  %v2523_v62 = vadd.f32 %v2269_v41, %v1884_v25  ;;  %v21700_v34 = vrot.slane %v17418_v7, 7  ;;  %v21707_v25 = vld [vmem:[#allocation15_spill] sm:$0xff] }
 0x2d6   : > { %v2524_v59 = vadd.f32 %v2271_v42, %v1885_v5  ;;  %v3174_v14 = vadd.f32 %v2917_v52, %v17254_v23  ;;  %v3175_v17 = vadd.f32 %v2919_v43, %v17313_v28  ;;  %v3556_v22 = vsel %vm3439_vm3, %v21699_v54, %v3555_v6  ;;  %v21708_v5 = vld [vmem:[#allocation26_spill] sm:$0xff]  ;;  %v21710_v43 = vld [vmem:[#allocation23_spill] sm:$0xff] }
 0x2d7   : > { %v3558_v29 = vsel %vm3439_vm3, %v3555_v6, %v21700_v34  ;;  %v21701_v18 = vrot.slane %v17357_v39, 4  ;;  %v21702_v2 = vrot.slane %v17429_v61, 4  ;;  %v3177_v23 = vadd.f32 %v21703_v13, %v2523_v62  ;;  %v21709_v52 = vld [vmem:[#allocation14_spill] sm:$0xff]  ;;  %v21718_v13 = vld [vmem:[#allocation21_spill] sm:$0xff] }
 0x2d8   : > { %v3178_v28 = vadd.f32 %v21704_v0, %v2524_v59  ;;  %v3813_v38 = vadd.f32 %v3556_v22, %v3174_v14  ;;  %v3814_v58 = vadd.f32 %v3558_v29, %v3175_v17  ;;  %v17795_v12 = vadd.f32 %v3930_v56, %v3820_v33  ;;  %v21712_v33 = vld [vmem:[#allocation24_spill] sm:$0xff] }
 0x2d9   : > { %v4422_v45 = vsel %vm4313_vm4, %v21701_v18, %v4421_v44  ;;  %v4424_v41 = vsel %vm4313_vm4, %v4421_v44, %v21702_v2  ;;  %v21705_v7 = vrot.slane %v17731_v32, 6  ;;  %v21706_v39 = vrot.slane %v17672_v9, 6  ;;  %v21714_v22 = vld [vmem:[#allocation12_spill] sm:$0xff]  ;;  %v21716_v2 = vld [vmem:[#allocation22_spill] sm:$0xff] }
 0x2da   : > { %v4683_v61 = vadd.f32 %v4422_v45, %v21707_v25  ;;  %v4794_v44 = vmul.f32 %v17471_v16, %v853_v26  ;;  %v3816_v42 = vadd.f32 %v21708_v5, %v3177_v23  ;;  %v4028_v57 = vadd.f32 %v3923_v47, %v3813_v38  ;;  %v21715_v47 = vld [vmem:[#allocation27_spill] sm:$0xff]  ;;  %v21721_v5 = vld [vmem:[#allocation13_spill] sm:$0xff] }
 0x2db   : > { %v5713_v6 = vsel %vm2800_vm2, %v21706_v39, %v21705_v7  ;;  %v4029_v50 = vadd.f32 %v21709_v52, %v3814_v58  ;;  %v4684_v62 = vadd.f32 %v4424_v41, %v21710_v43  ;;  %v21711_v56 = vrot.slane %v17558_v36, 4 }
 0x2dc   : > { %v21713_v59 = vrot.slane %v21712_v33, 4  ;;  %v5060_v9 = vrot.slane %v4794_v44, 5  ;;  %v5433_v17 = vmul.f32 %v17484_v27, %v853_v26  ;;  %v17815_v54 = vmul.f32 %v17200_v55, %v17793_v24  ;;  %v21726_v33 = vld [vmem:[#allocation20_spill] sm:$0xff] }
 0x2dd   : > { %v3817_v34 = vadd.f32 %v21714_v22, %v3178_v28  ;;  %v4031_v29 = vadd.f32 %v21715_v47, %v3816_v42  ;;  %v4688_v45 = vadd.f32 %v17639_v3, %v4029_v50  ;;  %v21717_v36 = vrot.slane %v21716_v2, 5  ;;  %v21720_v28 = vld [vmem:[#allocation19_spill] sm:$0xff] }
 0x2de   : > { %v4430_v14 = vsel %vm4313_vm4, %v21713_v59, %v21711_v56  ;;  %v21719_v23 = vrot.slane %v21718_v13, 5  ;;  %v5698_v26 = vrot.slane %v5433_v17, 6  ;;  %v1645_v38 = vrot.slane %v17815_v54, 1 }
 0x2df   : > { %v4687_v18 = vadd.f32 %v4430_v14, %v4028_v57  ;;  %v5061_v41 = vsel %vm4952_vm5, %v21717_v36, %v5060_v9  ;;  %v4690_v58 = vadd.f32 %v4436_v60, %v4031_v29  ;;  %v5327_v44 = vadd.f32 %v17642_v49, %v4688_v45  ;;  %v21723_v57 = vld [vmem:[#allocation25_spill] sm:$0xff] }
 0x2e0   : > { %v5063_v0 = vsel %vm4952_vm5, %v5060_v9, %v21719_v23  ;;  %v5322_v7 = vadd.f32 %v5061_v41, %v4683_v61  ;;  %v21722_v3 = vrot.slane %v21721_v5, 6  ;;  %v21724_v52 = vrot.slane %v21723_v57, 6 }
 0x2e1   : > { %v5323_v39 = vadd.f32 %v5063_v0, %v4684_v62  ;;  %v5326_v25 = vadd.f32 %v21720_v28, %v4687_v18  ;;  %v21725_v43 = vrot.slane %v17686_v20, 1  ;;  %v5329_v61 = vadd.f32 %v17749_v10, %v4690_v58  ;;  %v17851_v20 = vld [vmem:[%s21276_s2] ss:$0 sm:$0xff] }
 0x2e2   : > { %v5699_v42 = vsel %vm2800_vm2, %v21722_v3, %v5698_v26  ;;  %v5701_v50 = vsel %vm2800_vm2, %v5698_v26, %v21724_v52  ;;  %v5965_v59 = vadd.f32 %v17662_v4, %v5327_v44  ;;  %v2003_v9 = vmul.f32 %v17209_v48, %v17793_v24  ;;  %v21728_v28 = vld [vmem:[#allocation10_spill] sm:$0xff] }
 0x2e3   : > { %v1646_v60 = vsel %vm1507_vm0, %v21725_v43, %v1645_v38  ;;  %v5960_v62 = vadd.f32 %v5699_v42, %v5322_v7  ;;  %v5961_v56 = vadd.f32 %v5701_v50, %v5323_v39  ;;  %v5964_v49 = vadd.f32 %v21726_v33, %v5326_v25  ;;  %v898_v7 = vpop.permute.xlu0 %897 }
 0x2e4   : > { %v1892_v14 = vadd.f32 %v1646_v60, %v17701_v46  ;;  %v2654_v17 = vmul.f32 %v17218_v51, %v17793_v24  ;;  %v5967_v22 = vadd.f32 %v5713_v6, %v5329_v61  ;;  %v6077_v46 = vadd.f32 %v17851_v20, %v5965_v59 }
 0x2e5   : > { %v6072_v10 = vadd.f32 %v17851_v20, %v5960_v62  ;;  %v6073_v47 = vadd.f32 %v17851_v20, %v5961_v56  ;;  %v6076_v4 = vadd.f32 %v17851_v20, %v5964_v49  ;;  %v2284_v29 = vrot.slane %v2003_v9, 2 }
 0x2e6   : > { %v2932_v18 = vrot.slane %v2654_v17, 6  ;;  %v3293_v45 = vmul.f32 %v17231_v1, %v17793_v24  ;;  %v6079_v6 = vadd.f32 %v17851_v20, %v5967_v22  ;;  %v6182_v13 = vmax.f32 %v6077_v46, 0.0  ;;  %v903_v46 = vpop.permute.xlu1 %902 }
 0x2e7   : > { %v6177_v2 = vmax.f32 %v6072_v10, 0.0  ;;  %v6178_v36 = vmax.f32 %v6073_v47, 0.0  ;;  %v6181_v41 = vmax.f32 %v6076_v4, 0.0  ;;  %v1144_v23 = vmul.f32 %v17224_v15, %v17793_v24 }
 0x2e8   : > { %v21727_v0 = vrot.slane %v17692_v37, 6  ;;  %v3571_v58 = vrot.slane %v3293_v45, 7  ;;  %v6184_v39 = vmax.f32 %v6079_v6, 0.0  ;;  %v4032_v25 = vadd.f32 %v21728_v28, %v3817_v34  ;;  %6287 = vst.msk [vmem:[#allocation4 + $0x1d0] sm:$0xff] %vm385_vm6, %v6182_v13 }
 0x2e9   : > { %6282 = vst.msk [vmem:[#allocation4 + $0x1a8] sm:$0xff] %vm385_vm6, %v6177_v2  ;;  %6283 = vst.msk [vmem:[#allocation4 + $0x1b0] sm:$0xff] %vm385_vm6, %v6178_v36  ;;  %v21729_v44 = vrot.slane %v17689_v19, 2  ;;  %v4163_v42 = vmul.f32 %v17465_v40, %v17793_v24  ;;  %v4802_v57 = vmul.f32 %v17471_v16, %v17793_v24  ;;  %v5441_v52 = vmul.f32 %v17484_v27, %v17793_v24 }
 0x2ea   : > { %v2933_v26 = vsel %vm2800_vm2, %v21727_v0, %v2932_v18  ;;  %6286 = vst.msk [vmem:[#allocation4 + $0x1c8] sm:$0xff] %vm385_vm6, %v6181_v41  ;;  %6289 = vst.msk [vmem:[#allocation4 + $0x1e0] sm:$0xff] %vm385_vm6, %v6184_v39  ;;  %v21730_v19 = vrot.slane %v17695_v31, 7  ;;  %v1365_v50 = vmul.f32 %v17200_v55, %v898_v7  ;;  %v17890_v43 = vmul.f32 %v17209_v48, %v898_v7 }
 0x2eb   : > { %v2285_v5 = vsel %vm2146_vm1, %v21729_v44, %v2284_v29  ;;  %v3182_v3 = vadd.f32 %v2933_v26, %v17632_v11  ;;  %v3931_v11 = vmul.f32 %v17251_v53, %v17793_v24  ;;  %v4437_v60 = vrot.slane %v4163_v42, 4  ;;  %v17936_v26 = vld [vmem:[%s21275_s1 + $0x2] ss:$0 sm:$0xff]  ;;  %v21734_v44 = vld [vmem:[#allocation16_spill] sm:$0xff] }
 0x2ec   : > { %v17874_v37 = vadd.f32 %v2285_v5, %v1892_v14  ;;  %v3572_v34 = vsel %vm3439_vm3, %v21730_v19, %v3571_v58  ;;  %v5076_v61 = vrot.slane %v4802_v57, 5  ;;  %v5714_v62 = vrot.slane %v5441_v52, 6 }
 0x2ed   : > { %v2655_v56 = vmul.f32 %v17218_v51, %v898_v7  ;;  %v3821_v33 = vadd.f32 %v3572_v34, %v3182_v3  ;;  %v1647_v49 = vrot.slane %v1365_v50, 1  ;;  %v2286_v59 = vrot.slane %v17890_v43, 2  ;;  %v17954_v3 = vld [vmem:[%s21275_s1] ss:$0 sm:$0xff] }
 0x2ee   : > { %v17895_v31 = vmul.f32 %v17231_v1, %v898_v7  ;;  %v21731_v14 = vrot.slane %v17711_v8, 4  ;;  %v21732_v55 = vrot.slane %v17714_v63, 5  ;;  %v1145_v9 = vmul.f32 %v17224_v15, %v898_v7 }
 0x2ef   : > { %v2934_v17 = vrot.slane %v2655_v56, 6  ;;  %v21733_v51 = vrot.slane %v17731_v32, 6  ;;  %v1648_v1 = vsel %vm1507_vm0, %v1645_v38, %v1647_v49  ;;  %v2287_v63 = vsel %vm2146_vm1, %v2284_v29, %v2286_v59  ;;  %v17964_v56 = vld [vmem:[%s21275_s1 + $0x4] ss:$0 sm:$0xff] }
 0x2f0   : > { %v4438_v24 = vsel %vm4313_vm4, %v21731_v14, %v4437_v60  ;;  %v5077_v48 = vsel %vm4952_vm5, %v21732_v55, %v5076_v61  ;;  %v3573_v8 = vrot.slane %v17895_v31, 7  ;;  %v1893_v47 = vadd.f32 %v1648_v1, %v1144_v23  ;;  %v17928_v23 = vld [vmem:[%s21275_s1 + $0x1] ss:$0 sm:$0xff]  ;;  %v908_v55 = vpop.permute.xlu0 %907 }
 0x2f1   : > { %v4691_v22 = vadd.f32 %v4438_v24, %v4032_v25  ;;  %v5715_v10 = vsel %vm2800_vm2, %v21733_v51, %v5714_v62  ;;  %v2935_v4 = vsel %vm2800_vm2, %v2932_v18, %v2934_v17  ;;  %v4164_v15 = vmul.f32 %v17465_v40, %v898_v7 }
 0x2f2   : > { %v3183_v32 = vadd.f32 %v2935_v4, %v17697_v35  ;;  %v3932_v6 = vmul.f32 %v17251_v53, %v898_v7  ;;  %v4803_v54 = vmul.f32 %v17471_v16, %v898_v7  ;;  %v17919_v38 = vadd.f32 %v2287_v63, %v1893_v47 }
 0x2f3   : > { %v5330_v45 = vadd.f32 %v5077_v48, %v4691_v22  ;;  %v3574_v2 = vsel %vm3439_vm3, %v3571_v58, %v3573_v8  ;;  %v4439_v36 = vrot.slane %v4164_v15, 4  ;;  %v17923_v41 = vmul.f32 %v17484_v27, %v898_v7  ;;  %v17944_v7 = vld [vmem:[%s21275_s1 + $0x3] ss:$0 sm:$0xff] }
 0x2f4   : > { %v3822_v18 = vadd.f32 %v3574_v2, %v3183_v32  ;;  %v5078_v13 = vrot.slane %v4803_v54, 5  ;;  %v1366_v53 = vmul.f32 %v17928_v23, %v903_v46  ;;  %v17939_v58 = vmul.f32 %v17936_v26, %v903_v46 }
 0x2f5   : > { %v5968_v29 = vadd.f32 %v5715_v10, %v5330_v45  ;;  %v4440_v35 = vsel %vm4313_vm4, %v4437_v60, %v4439_v36  ;;  %v5716_v0 = vrot.slane %v17923_v41, 6  ;;  %v2656_v39 = vmul.f32 %v17944_v7, %v903_v46  ;;  %v17976_v10 = vld [vmem:[%s21275_s1 + $0x5] ss:$0 sm:$0xff] }
 0x2f6   : > { %v17947_v28 = vadd.f32 %v3931_v11, %v3821_v33  ;;  %v4692_v5 = vadd.f32 %v4440_v35, %v21734_v44  ;;  %v1146_v42 = vmul.f32 %v17954_v3, %v903_v46  ;;  %v17957_v57 = vadd.f32 %v3932_v6, %v3822_v18 }
 0x2f7   : > { %v6080_v25 = vadd.f32 %v17851_v20, %v5968_v29  ;;  %v5079_v52 = vsel %vm4952_vm5, %v5076_v61, %v5078_v13  ;;  %v1649_v19 = vrot.slane %v1366_v53, 1  ;;  %v2936_v34 = vrot.slane %v2656_v39, 6 }
 0x2f8   : > { %v5331_v11 = vadd.f32 %v5079_v52, %v4692_v5  ;;  %v2288_v60 = vrot.slane %v17939_v58, 2  ;;  %v3295_v33 = vmul.f32 %v17964_v56, %v903_v46  ;;  %v5717_v31 = vsel %vm2800_vm2, %v5714_v62, %v5716_v0 }
 0x2f9   : > { %v6185_v50 = vmax.f32 %v6080_v25, 0.0  ;;  %v1650_v14 = vsel %vm1507_vm0, %v1647_v49, %v1649_v19  ;;  %v2937_v24 = vsel %vm2800_vm2, %v2934_v17, %v2936_v34  ;;  %v4165_v61 = vmul.f32 %v17465_v40, %v903_v46 }
 0x2fa   : > { %v5969_v48 = vadd.f32 %v5717_v31, %v5331_v11  ;;  %v3184_v22 = vadd.f32 %v2937_v24, %v17736_v30  ;;  %v3575_v51 = vrot.slane %v3295_v33, 7  ;;  %v3933_v62 = vmul.f32 %v17976_v10, %v903_v46 }
 0x2fb   : > { %6290 = vst.msk [vmem:[#allocation4 + $0x1e8] sm:$0xff] %vm385_vm6, %v6185_v50  ;;  %v1894_v1 = vadd.f32 %v1650_v14, %v1145_v9  ;;  %v4441_v49 = vrot.slane %v4165_v61, 4  ;;  %v4804_v17 = vmul.f32 %v17471_v16, %v903_v46  ;;  %v5443_v47 = vmul.f32 %v17484_v27, %v903_v46  ;;  %v913_v50 = vpop.permute.xlu1 %912 }
 0x2fc   : > { %v6081_v63 = vadd.f32 %v17851_v20, %v5969_v48  ;;  %v2289_v30 = vsel %vm2146_vm1, %v2286_v59, %v2288_v60  ;;  %v3576_v4 = vsel %vm3439_vm3, %v3573_v8, %v3575_v51  ;;  %v1367_v15 = vmul.f32 %v17928_v23, %v908_v55 }
 0x2fd   : > { %v3823_v45 = vadd.f32 %v3576_v4, %v3184_v22  ;;  %v4442_v32 = vsel %vm4313_vm4, %v4439_v36, %v4441_v49  ;;  %v5080_v6 = vrot.slane %v4804_v17, 5  ;;  %v5718_v9 = vrot.slane %v5443_v47, 6 }
 0x2fe   : > { %v6186_v54 = vmax.f32 %v6081_v63, 0.0  ;;  %v4693_v2 = vadd.f32 %v4442_v32, %v17734_v21  ;;  %v1651_v41 = vrot.slane %v1367_v15, 1  ;;  %v2006_v46 = vmul.f32 %v17936_v26, %v908_v55 }
 0x2ff   : > { %v17990_v29 = vadd.f32 %v2289_v30, %v1894_v1  ;;  %v5081_v43 = vsel %vm4952_vm5, %v5078_v13, %v5080_v6  ;;  %v1147_v59 = vmul.f32 %v17954_v3, %v908_v55  ;;  %v2657_v8 = vmul.f32 %v17944_v7, %v908_v55 }
 0x300   : > { %6291 = vst.msk [vmem:[#allocation4 + $0x1f0] sm:$0xff] %vm385_vm6, %v6186_v54  ;;  %v5332_v18 = vadd.f32 %v5081_v43, %v4693_v2  ;;  %v1652_v36 = vsel %vm1507_vm0, %v1649_v19, %v1651_v41  ;;  %v2290_v53 = vrot.slane %v2006_v46, 2  ;;  %v3296_v35 = vmul.f32 %v17964_v56, %v908_v55 }
 0x301   : > { %v17998_v21 = vadd.f32 %v3933_v62, %v3823_v45  ;;  %v5719_v58 = vsel %vm2800_vm2, %v5716_v0, %v5718_v9  ;;  %v2938_v39 = vrot.slane %v2657_v8, 6  ;;  %v4166_v25 = vmul.f32 %v17465_v40, %v908_v55 }
 0x302   : > { %v5970_v13 = vadd.f32 %v5719_v58, %v5332_v18  ;;  %v1895_v44 = vadd.f32 %v1652_v36, %v1146_v42  ;;  %v3577_v5 = vrot.slane %v3296_v35, 7  ;;  %v4805_v52 = vmul.f32 %v17471_v16, %v908_v55  ;;  %v918_v36 = vpop.permute.xlu0 %917 }
 0x303   : > { %v2939_v11 = vsel %vm2800_vm2, %v2936_v34, %v2938_v39  ;;  %v3934_v19 = vmul.f32 %v17976_v10, %v908_v55  ;;  %v4443_v33 = vrot.slane %v4166_v25, 4  ;;  %v5444_v31 = vmul.f32 %v17484_v27, %v908_v55 }
 0x304   : > { %v6082_v14 = vadd.f32 %v17851_v20, %v5970_v13  ;;  %v2291_v0 = vsel %vm2146_vm1, %v2288_v60, %v2290_v53  ;;  %v3185_v24 = vadd.f32 %v2939_v11, %v17874_v37  ;;  %v5082_v61 = vrot.slane %v4805_v52, 5 }
 0x305   : > { %v3578_v42 = vsel %vm3439_vm3, %v3575_v51, %v3577_v5  ;;  %v4444_v48 = vsel %vm4313_vm4, %v4441_v49, %v4443_v33  ;;  %v5720_v22 = vrot.slane %v5444_v31, 6  ;;  %v1368_v62 = vmul.f32 %v17928_v23, %v913_v50 }
 0x306   : > { %v6187_v34 = vmax.f32 %v6082_v14, 0.0  ;;  %v18012_v1 = vadd.f32 %v2291_v0, %v1895_v44  ;;  %v3824_v17 = vadd.f32 %v3578_v42, %v3185_v24  ;;  %v4694_v55 = vadd.f32 %v4444_v48, %v17795_v12 }
 0x307   : > { %v5083_v47 = vsel %vm4952_vm5, %v5080_v6, %v5082_v61  ;;  %v1653_v63 = vrot.slane %v1368_v62, 1  ;;  %v2007_v60 = vmul.f32 %v17936_v26, %v913_v50  ;;  %v2658_v37 = vmul.f32 %v17944_v7, %v913_v50 }
 0x308   : > { %6292 = vst.msk [vmem:[#allocation4 + $0x1f8] sm:$0xff] %vm385_vm6, %v6187_v34  ;;  %v5333_v51 = vadd.f32 %v5083_v47, %v4694_v55  ;;  %v5721_v49 = vsel %vm2800_vm2, %v5718_v9, %v5720_v22  ;;  %v1148_v30 = vmul.f32 %v17954_v3, %v913_v50  ;;  %v3297_v4 = vmul.f32 %v17964_v56, %v913_v50 }
 0x309   : > { %v1654_v15 = vsel %vm1507_vm0, %v1651_v41, %v1653_v63  ;;  %v2292_v45 = vrot.slane %v2007_v60, 2  ;;  %v2940_v12 = vrot.slane %v2658_v37, 6  ;;  %v4167_v32 = vmul.f32 %v17465_v40, %v913_v50 }
 0x30a   : > { %v18024_v6 = vadd.f32 %v3934_v19, %v3824_v17  ;;  %v5971_v54 = vadd.f32 %v5721_v49, %v5333_v51  ;;  %v3579_v2 = vrot.slane %v3297_v4, 7  ;;  %v4806_v46 = vmul.f32 %v17471_v16, %v913_v50 }
 0x30b   : > { %v1896_v43 = vadd.f32 %v1654_v15, %v1147_v59  ;;  %v2941_v8 = vsel %vm2800_vm2, %v2938_v39, %v2940_v12  ;;  %v4445_v9 = vrot.slane %v4167_v32, 4  ;;  %v5445_v18 = vmul.f32 %v17484_v27, %v913_v50  ;;  %v923_v32 = vpop.permute.xlu1 %922 }
 0x30c   : > { %v6083_v35 = vadd.f32 %v17851_v20, %v5971_v54  ;;  %v2293_v41 = vsel %vm2146_vm1, %v2290_v53, %v2292_v45  ;;  %v3186_v58 = vadd.f32 %v2941_v8, %v17919_v38  ;;  %v3935_v25 = vmul.f32 %v17976_v10, %v913_v50 }
 0x30d   : > { %v3580_v13 = vsel %vm3439_vm3, %v3577_v5, %v3579_v2  ;;  %v4446_v44 = vsel %vm4313_vm4, %v4443_v33, %v4445_v9  ;;  %v5084_v52 = vrot.slane %v4806_v46, 5  ;;  %v5722_v59 = vrot.slane %v5445_v18, 6 }
 0x30e   : > { %v6188_v11 = vmax.f32 %v6083_v35, 0.0  ;;  %v3825_v39 = vadd.f32 %v3580_v13, %v3186_v58  ;;  %v4695_v19 = vadd.f32 %v4446_v44, %v17947_v28  ;;  %v1369_v31 = vmul.f32 %v17928_v23, %v918_v36 }
 0x30f   : > { %v18037_v14 = vadd.f32 %v2293_v41, %v1896_v43  ;;  %v5085_v53 = vsel %vm4952_vm5, %v5082_v61, %v5084_v52  ;;  %v2008_v38 = vmul.f32 %v17936_v26, %v918_v36  ;;  %v2659_v50 = vmul.f32 %v17944_v7, %v918_v36 }
 0x310   : > { %6293 = vst.msk [vmem:[#allocation4 + $0x200] sm:$0xff] %vm385_vm6, %v6188_v11  ;;  %v5334_v5 = vadd.f32 %v5085_v53, %v4695_v19  ;;  %v1149_v33 = vmul.f32 %v17954_v3, %v918_v36  ;;  %v1655_v0 = vrot.slane %v1369_v31, 1  ;;  %v3298_v24 = vmul.f32 %v17964_v56, %v918_v36 }
 0x311   : > { %v5723_v28 = vsel %vm2800_vm2, %v5720_v22, %v5722_v59  ;;  %v2294_v42 = vrot.slane %v2008_v38, 2  ;;  %v2942_v48 = vrot.slane %v2659_v50, 6  ;;  %v4168_v62 = vmul.f32 %v17465_v40, %v918_v36 }
 0x312   : > { %v5972_v34 = vadd.f32 %v5723_v28, %v5334_v5  ;;  %v1656_v61 = vsel %vm1507_vm0, %v1653_v63, %v1655_v0  ;;  %v3581_v17 = vrot.slane %v3298_v24, 7  ;;  %v4807_v55 = vmul.f32 %v17471_v16, %v918_v36 }
 0x313   : > { %v18049_v47 = vadd.f32 %v3935_v25, %v3825_v39  ;;  %v2943_v60 = vsel %vm2800_vm2, %v2940_v12, %v2942_v48  ;;  %v3936_v37 = vmul.f32 %v17976_v10, %v918_v36  ;;  %v4447_v51 = vrot.slane %v4168_v62, 4 }
 0x314   : > { %v6084_v49 = vadd.f32 %v17851_v20, %v5972_v34  ;;  %v1897_v22 = vadd.f32 %v1656_v61, %v1148_v30  ;;  %v3187_v4 = vadd.f32 %v2943_v60, %v17990_v29  ;;  %v5086_v15 = vrot.slane %v4807_v55, 5 }
 0x315   : > { %v2295_v54 = vsel %vm2146_vm1, %v2292_v45, %v2294_v42  ;;  %v3582_v63 = vsel %vm3439_vm3, %v3579_v2, %v3581_v17  ;;  %v4448_v46 = vsel %vm4313_vm4, %v4445_v9, %v4447_v51  ;;  %v5446_v43 = vmul.f32 %v17484_v27, %v918_v36 }
 0x316   : > { %v6189_v8 = vmax.f32 %v6084_v49, 0.0  ;;  %v3826_v12 = vadd.f32 %v3582_v63, %v3187_v4  ;;  %v4696_v18 = vadd.f32 %v4448_v46, %v17957_v57  ;;  %v5087_v35 = vsel %vm4952_vm5, %v5084_v52, %v5086_v15 }
 0x317   : > { %v5724_v41 = vrot.slane %v5446_v43, 6  ;;  %v1370_v30 = vmul.f32 %v17928_v23, %v923_v32  ;;  %v18063_v29 = vmul.f32 %v17936_v26, %v923_v32  ;;  %v2660_v45 = vmul.f32 %v17944_v7, %v923_v32  ;;  %v18127_v43 = vld [vmem:[%s21275_s1 + $0x7] ss:$0 sm:$0xff] }
 0x318   : > { %6294 = vst.msk [vmem:[#allocation4 + $0x208] sm:$0xff] %vm385_vm6, %v6189_v8  ;;  %v18067_v2 = vadd.f32 %v2295_v54, %v1897_v22  ;;  %v5335_v9 = vadd.f32 %v5087_v35, %v4696_v18  ;;  %v1150_v36 = vmul.f32 %v17954_v3, %v923_v32  ;;  %v3299_v58 = vmul.f32 %v17964_v56, %v923_v32  ;;  %v18115_v54 = vld [vmem:[%s21275_s1 + $0x6] ss:$0 sm:$0xff] }
 0x319   : > { %v5725_v57 = vsel %vm2800_vm2, %v5722_v59, %v5724_v41  ;;  %v1657_v25 = vrot.slane %v1370_v30, 1  ;;  %v2296_v13 = vrot.slane %v18063_v29, 2  ;;  %v2944_v44 = vrot.slane %v2660_v45, 6  ;;  %v928_v59 = vpop.permute.xlu0 %927 }
 0x31a   : > { %v5973_v52 = vadd.f32 %v5725_v57, %v5335_v9  ;;  %v3583_v11 = vrot.slane %v3299_v58, 7  ;;  %v4169_v39 = vmul.f32 %v17465_v40, %v923_v32  ;;  %v4808_v19 = vmul.f32 %v17471_v16, %v923_v32  ;;  %v18143_v9 = vld [vmem:[%s21275_s1 + $0x8] ss:$0 sm:$0xff] }
 0x31b   : > { %v18075_v31 = vadd.f32 %v3936_v37, %v3826_v12  ;;  %v1658_v53 = vsel %vm1507_vm0, %v1655_v0, %v1657_v25  ;;  %v2945_v38 = vsel %vm2800_vm2, %v2942_v48, %v2944_v44  ;;  %v18080_v50 = vmul.f32 %v17484_v27, %v923_v32 }
 0x31c   : > { %v6085_v5 = vadd.f32 %v17851_v20, %v5973_v52  ;;  %v1898_v24 = vadd.f32 %v1658_v53, %v1149_v33  ;;  %v3188_v28 = vadd.f32 %v2945_v38, %v18012_v1  ;;  %v3937_v62 = vmul.f32 %v17976_v10, %v923_v32 }
 0x31d   : > { %v2297_v40 = vsel %vm2146_vm1, %v2294_v42, %v2296_v13  ;;  %v4449_v16 = vrot.slane %v4169_v39, 4  ;;  %v5088_v34 = vrot.slane %v4808_v19, 5  ;;  %v5726_v61 = vrot.slane %v18080_v50, 6 }
 0x31e   : > { %v6190_v0 = vmax.f32 %v6085_v5, 0.0  ;;  %v3584_v48 = vsel %vm3439_vm3, %v3581_v17, %v3583_v11  ;;  %v18089_v27 = vmul.f32 %v17954_v3, %v928_v59  ;;  %v18092_v55 = vmul.f32 %v17928_v23, %v928_v59 }
 0x31f   : > { %v18094_v33 = vadd.f32 %v2297_v40, %v1898_v24  ;;  %v3827_v1 = vadd.f32 %v3584_v48, %v3188_v28  ;;  %v4450_v60 = vsel %vm4313_vm4, %v4447_v51, %v4449_v16  ;;  %v18098_v42 = vmul.f32 %v17936_v26, %v928_v59  ;;  %v6478_v40 = vld [vmem:[#allocation4 + $0x131] ss:$2 sm:$0xff] }
 0x320   : > { %6295 = vst.msk [vmem:[#allocation4 + $0x210] sm:$0xff] %vm385_vm6, %v6190_v0  ;;  %v4697_v37 = vadd.f32 %v4450_v60, %v17998_v21  ;;  %v5089_v17 = vsel %vm4952_vm5, %v5086_v15, %v5088_v34  ;;  %v21414_v49 = vrot.slane %v18092_v55, 1  ;;  %v18105_v22 = vmul.f32 %v17944_v7, %v928_v59  ;;  %v6480_v60 = vld [vmem:[#allocation4 + $0x141] ss:$2 sm:$0xff] }
 0x321   : > { %v5727_v4 = vsel %vm2800_vm2, %v5724_v41, %v5726_v61  ;;  %v21413_v32 = vrot.slane %v18098_v42, 2  ;;  %v18110_v51 = vmul.f32 %v17964_v56, %v928_v59  ;;  %v18118_v21 = vmul.f32 %v18115_v54, %v928_v59 }
 0x322   : > { %v5336_v15 = vadd.f32 %v5089_v17, %v4697_v37  ;;  %v1660_v63 = vsel %vm1507_vm0, %v1657_v25, %v21414_v49  ;;  %v21412_v46 = vrot.slane %v18105_v22, 6  ;;  %v18130_v8 = vmul.f32 %v18127_v43, %v928_v59  ;;  %v6482_v37 = vld [vmem:[#allocation4 + $0x151] ss:$2 sm:$0xff] }
 0x323   : > { %v18132_v12 = vadd.f32 %v3937_v62, %v3827_v1  ;;  %v1899_v18 = vadd.f32 %v1660_v63, %v1150_v36  ;;  %v21411_v35 = vrot.slane %v18110_v51, 7  ;;  %v21410_v41 = vrot.slane %v18118_v21, 4  ;;  %v938_v36 = vpop.permute.xlu1 %937  ;;  %v6374_v62 = vld [vmem:[#allocation4 + $0x140] ss:$2 sm:$0xff]  ;;  %v6376_v1 = vld [vmem:[#allocation4 + $0x150] ss:$2 sm:$0xff] }
 0x324   : > { %21735 = vst [vmem:[#allocation11_spill] sm:$0xff] %v18130_v8  ;;  %v5974_v30 = vadd.f32 %v5727_v4, %v5336_v15  ;;  %v2947_v29 = vsel %vm2800_vm2, %v2944_v44, %v21412_v46  ;;  %v21409_v45 = vrot.slane %v18130_v8, 5  ;;  %v18146_v58 = vmul.f32 %v18143_v9, %v928_v59 }
 0x325   : > { %v2299_v57 = vsel %vm2146_vm1, %v2296_v13, %v21413_v32  ;;  %v3189_v25 = vadd.f32 %v2947_v29, %v18037_v14  ;;  %v3938_v52 = vmul.f32 %v17976_v10, %v928_v59  ;;  %v4452_v44 = vsel %vm4313_vm4, %v4449_v16, %v21410_v41 }
 0x326   : > { %21736 = vst [vmem:[#allocation18_spill] sm:$0xff] %v18146_v58  ;;  %v6086_v39 = vadd.f32 %v17851_v20, %v5974_v30  ;;  %v3586_v19 = vsel %vm3439_vm3, %v3583_v11, %v21411_v35  ;;  %v4698_v53 = vadd.f32 %v4452_v44, %v18024_v6  ;;  %v21408_v38 = vrot.slane %v18146_v58, 6  ;;  %v6372_v6 = vld [vmem:[#allocation4 + $0x130] ss:$2 sm:$0xff] }
 0x327   : > { %v3828_v50 = vadd.f32 %v3586_v19, %v3189_v25  ;;  %v5091_v14 = vsel %vm4952_vm5, %v5088_v34, %v21409_v45  ;;  %v18166_v13 = vmul.f32 %v17928_v23, %v938_v36  ;;  %v18169_v59 = vmul.f32 %v17936_v26, %v938_v36 }
 0x328   : > { %v6191_v5 = vmax.f32 %v6086_v39, 0.0  ;;  %v2538_v24 = vadd.f32 %v2299_v57, %v1899_v18  ;;  %v5337_v28 = vadd.f32 %v5091_v14, %v4698_v53  ;;  %v18172_v11 = vmul.f32 %v17944_v7, %v938_v36  ;;  %v6378_v18 = vld [vmem:[#allocation4 + $0x160] ss:$2 sm:$0xff] }
 0x329   : > { %v18174_v16 = vadd.f32 %v3938_v52, %v3828_v50  ;;  %v5729_v34 = vsel %vm2800_vm2, %v5726_v61, %v21408_v38  ;;  %v1153_v0 = vmul.f32 %v17954_v3, %v938_v36  ;;  %v18181_v48 = vmul.f32 %v17964_v56, %v938_v36  ;;  %v6484_v61 = vld [vmem:[#allocation4 + $0x161] ss:$2 sm:$0xff]  ;;  %v943_v52 = vpop.permute.xlu0 %942 }
 0x32a   : > { %6296 = vst.msk [vmem:[#allocation4 + $0x218] sm:$0xff] %vm385_vm6, %v6191_v5  ;;  %v5975_v17 = vadd.f32 %v5729_v34, %v5337_v28  ;;  %v21420_v4 = vrot.slane %v18166_v13, 1  ;;  %v21417_v15 = vrot.slane %v18169_v59, 2  ;;  %v18187_v63 = vmul.f32 %v18115_v54, %v938_v36 }
 0x32b   : > { %v21419_v30 = vrot.slane %v18172_v11, 6  ;;  %v21416_v29 = vrot.slane %v18181_v48, 7  ;;  %v18192_v57 = vmul.f32 %v17976_v10, %v938_v36  ;;  %v18195_v25 = vmul.f32 %v18127_v43, %v938_v36 }
 0x32c   : > { %v6087_v44 = vadd.f32 %v17851_v20, %v5975_v17  ;;  %v18199_v39 = vmul.f32 %v18143_v9, %v938_v36  ;;  %v6565_v19 = vmax.f32 %v6374_v62, %v6480_v60  ;;  %v6566_v53 = vmax.f32 %v6376_v1, %v6482_v37  ;;  %v21740_v1 = vld [vmem:[#allocation17_spill] sm:$0xff] }
 0x32d   : > { %21737 = vst [vmem:[#allocation15_spill] sm:$0xff] %v18195_v25  ;;  %v21415_v50 = vrot.slane %v18187_v63, 4  ;;  %v21418_v14 = vrot.slane %v18195_v25, 5  ;;  %v6564_v5 = vmax.f32 %v6372_v6, %v6478_v40  ;;  %v18203_v28 = vmax.f32 %v6378_v18, %v6484_v61  ;;  %v948_v6 = vpop.permute.xlu1 %947 }
 0x32e   : > { %21738 = vst [vmem:[#allocation26_spill] sm:$0xff] %v18199_v39  ;;  %v6192_v34 = vmax.f32 %v6087_v44, 0.0  ;;  %v6680_v38 = vrot.slane %v6565_v19, 7  ;;  %v6681_v45 = vrot.slane %v6566_v53, 7  ;;  %v1374_v41 = vmul.f32 %v17928_v23, %v943_v52 }
 0x32f   : > { %21739 = vst [vmem:[#allocation14_spill] sm:$0xff] %v18203_v28  ;;  %v6683_v35 = vrot.slane %v18203_v28, 7  ;;  %v2013_v17 = vmul.f32 %v17936_v26, %v943_v52  ;;  %v2664_v36 = vmul.f32 %v17944_v7, %v943_v52  ;;  %v18210_v62 = vmul.f32 %v17964_v56, %v943_v52 }
 0x330   : > { %6297 = vst.msk [vmem:[#allocation4 + $0x220] sm:$0xff] %vm385_vm6, %v6192_v34  ;;  %v6682_v40 = vsel %vm3439_vm3, %v6680_v38, %v6681_v45  ;;  %v6688_v60 = vmax.f32 %v21740_v1, %v6680_v38  ;;  %v1665_v37 = vrot.slane %v1374_v41, 1  ;;  %v4173_v49 = vmul.f32 %v18115_v54, %v943_v52 }
 0x331   : > { %v6684_v18 = vsel %vm3439_vm3, %v6681_v45, %v6683_v35  ;;  %v6689_v61 = vmax.f32 %v6564_v5, %v6682_v40  ;;  %v2304_v44 = vrot.slane %v2013_v17, 2  ;;  %v2952_v53 = vrot.slane %v2664_v36, 6 }
 0x332   : > { %v6690_v46 = vmax.f32 %v6565_v19, %v6684_v18  ;;  %6691 = vst.msk [vmem:[#allocation2 + $0x5b] sm:$0xc0] %vm6627_vm8, %v6688_v60  ;;  %v1666_v32 = vsel %vm1507_vm0, %v21420_v4, %v1665_v37  ;;  %v3591_v34 = vrot.slane %v18210_v62, 7  ;;  %v1154_v41 = vmul.f32 %v17954_v3, %v943_v52 }
 0x333   : > { %6692 = vst.msk [vmem:[#allocation2 + $0x63] sm:$0xff] %vm385_vm6, %v6689_v61  ;;  %v1902_v35 = vadd.f32 %v1666_v32, %v1153_v0  ;;  %v2953_v45 = vsel %vm2800_vm2, %v21419_v30, %v2952_v53  ;;  %v4812_v38 = vmul.f32 %v18127_v43, %v943_v52  ;;  %v3941_v5 = vmul.f32 %v17976_v10, %v943_v52 }
 0x334   : > { %6693 = vst.msk [vmem:[#allocation2 + $0x6b] sm:$0xf] %vm6630_vm9, %v6690_v46  ;;  %v3192_v19 = vadd.f32 %v2953_v45, %v2538_v24  ;;  %v4457_v17 = vrot.slane %v4173_v49, 4  ;;  %v5451_v36 = vmul.f32 %v18143_v9, %v943_v52  ;;  %v2305_v62 = vsel %vm2146_vm1, %v21417_v15, %v2304_v44 }
 0x335   : > { %v3592_v32 = vsel %vm3439_vm3, %v21416_v29, %v3591_v34  ;;  %v5096_v0 = vrot.slane %v4812_v38, 5  ;;  %v1375_v40 = vmul.f32 %v17928_v23, %v948_v6  ;;  %v2014_v49 = vmul.f32 %v17936_v26, %v948_v6 }
 0x336   : > { %v3831_v1 = vadd.f32 %v3592_v32, %v3192_v19  ;;  %v4458_v46 = vsel %vm4313_vm4, %v21415_v50, %v4457_v17  ;;  %v5734_v24 = vrot.slane %v5451_v36, 6  ;;  %v18243_v52 = vadd.f32 %v2305_v62, %v1902_v35 }
 0x337   : > { %v4701_v60 = vadd.f32 %v4458_v46, %v18132_v12  ;;  %v1667_v18 = vrot.slane %v1375_v40, 1  ;;  %v2665_v61 = vmul.f32 %v17944_v7, %v948_v6  ;;  %v5097_v45 = vsel %vm4952_vm5, %v21418_v14, %v5096_v0 }
 0x338   : > { %v1155_v38 = vmul.f32 %v17954_v3, %v948_v6  ;;  %v2306_v19 = vrot.slane %v2014_v49, 2  ;;  %v3304_v32 = vmul.f32 %v17964_v56, %v948_v6  ;;  %v18252_v50 = vadd.f32 %v3941_v5, %v3831_v1 }
 0x339   : > { %v5340_v36 = vadd.f32 %v5097_v45, %v4701_v60  ;;  %v1668_v35 = vsel %vm1507_vm0, %v1665_v37, %v1667_v18  ;;  %v2954_v62 = vrot.slane %v2665_v61, 6  ;;  %v21741_v12 = vrot.slane %v18199_v39, 6  ;;  %v953_v60 = vpop.permute.xlu0 %952 }
 0x33a   : > { %v6870_v29 = vld [vmem:[#allocation2 + $0x61] sm:$0xff]  ;;  %v1903_v46 = vadd.f32 %v1668_v35, %v1154_v41  ;;  %v18259_v15 = vmul.f32 %v17976_v10, %v948_v6  ;;  %v18262_v14 = vmul.f32 %v18115_v54, %v948_v6  ;;  %v3593_v5 = vrot.slane %v3304_v32, 7 }
 0x33b   : > { %v5735_v40 = vsel %vm2800_vm2, %v21741_v12, %v5734_v24  ;;  %v6871_v49 = vld [vmem:[#allocation2 + $0x69] sm:$0xff]  ;;  %v4813_v1 = vmul.f32 %v18127_v43, %v948_v6  ;;  %v18266_v37 = vmul.f32 %v18143_v9, %v948_v6  ;;  %v2307_v45 = vsel %vm2146_vm1, %v2304_v44, %v2306_v19 }
 0x33c   : > { %21742 = vst [vmem:[#allocation23_spill] sm:$0xff] %v18259_v15  ;;  %21743 = vst [vmem:[#allocation24_spill] sm:$0xff] %v18262_v14  ;;  %v5978_v30 = vadd.f32 %v5735_v40, %v5340_v36  ;;  %v6892_v61 = vpack.c.bf16 %v6871_v49, %v6870_v29  ;;  %v18270_v41 = vsel %vm2800_vm2, %v2952_v53, %v2954_v62  ;;  %v21421_v35 = vrot.slane %v18262_v14, 4 }
 0x33d   : > { %v18274_v4 = vadd.f32 %v2307_v45, %v1903_v46  ;;  %v5098_v36 = vrot.slane %v4813_v1, 5  ;;  %v5736_v32 = vrot.slane %v18266_v37, 6  ;;  %v1376_v6 = vmul.f32 %v17928_v23, %v953_v60  ;;  %v963_v15 = vpop.permute.xlu0 %962 }
 0x33e   : > { %v6090_v12 = vadd.f32 %v17851_v20, %v5978_v30  ;;  %13079 = vmatprep.mubr.msk.bf16.mxu0 %vm385_vm6, %v6892_v61  ;;  %v4460_v29 = vsel %vm4313_vm4, %v4457_v17, %v21421_v35  ;;  %v2015_v44 = vmul.f32 %v17936_v26, %v953_v60  ;;  %v2666_v53 = vmul.f32 %v17944_v7, %v953_v60 }
 0x33f   : > { %v18285_v30 = vsel %vm3439_vm3, %v3591_v34, %v3593_v5  ;;  %v4702_v46 = vadd.f32 %v4460_v29, %v18174_v16  ;;  %v5099_v49 = vsel %vm4952_vm5, %v5096_v0, %v5098_v36  ;;  %v1669_v1 = vrot.slane %v1376_v6, 1 }
 0x340   : > { %v6195_v40 = vmax.f32 %v6090_v12, 0.0  ;;  %21744 = vst [vmem:[#allocation12_spill] sm:$0xff] %v18285_v30  ;;  %v2308_v37 = vrot.slane %v2015_v44, 2  ;;  %v2956_v61 = vrot.slane %v2666_v53, 6  ;;  %v3305_v45 = vmul.f32 %v17964_v56, %v953_v60  ;;  %v958_v12 = vpop.permute.xlu1 %957 }
 0x341   : > { %v5341_v17 = vadd.f32 %v5099_v49, %v4702_v46  ;;  %v1156_v35 = vmul.f32 %v17954_v3, %v953_v60  ;;  %v18293_v28 = vmul.f32 %v18115_v54, %v953_v60  ;;  %v4814_v34 = vmul.f32 %v18127_v43, %v953_v60 }
 0x342   : > { %6300 = vst.msk [vmem:[#allocation4 + $0x238] sm:$0xff] %vm385_vm6, %v6195_v40  ;;  %v5737_v16 = vsel %vm2800_vm2, %v5734_v24, %v5736_v32  ;;  %v1670_v0 = vsel %vm1507_vm0, %v1667_v18, %v1669_v1  ;;  %v3595_v29 = vrot.slane %v3305_v45, 7  ;;  %v18299_v6 = vmul.f32 %v17976_v10, %v953_v60 }
 0x343   : > { %21745 = vst [vmem:[#allocation27_spill] sm:$0xff] %v18293_v28  ;;  %v5979_v44 = vadd.f32 %v5737_v16, %v5341_v17  ;;  %v1904_v53 = vadd.f32 %v1670_v0, %v1155_v38  ;;  %v2309_v40 = vsel %vm2146_vm1, %v2306_v19, %v2308_v37  ;;  %v18303_v46 = vsel %vm2800_vm2, %v2954_v62, %v2956_v61 }
 0x344   : > { %21746 = vst [vmem:[#allocation22_spill] sm:$0xff] %v18299_v6  ;;  %v5100_v39 = vrot.slane %v4814_v34, 5  ;;  %v5453_v58 = vmul.f32 %v18143_v9, %v953_v60  ;;  %v1377_v24 = vmul.f32 %v17928_v23, %v958_v12  ;;  %v18310_v45 = vsel %vm3439_vm3, %v3593_v5, %v3595_v29 }
 0x345   : > { %v6091_v18 = vadd.f32 %v17851_v20, %v5979_v44  ;;  %21747 = vst [vmem:[#allocation21_spill] sm:$0xff] %v18310_v45  ;;  %v1157_v17 = vmul.f32 %v17954_v3, %v958_v12  ;;  %v2016_v38 = vmul.f32 %v17936_v26, %v958_v12  ;;  %v2667_v62 = vmul.f32 %v17944_v7, %v958_v12 }
 0x346   : > { %v5738_v19 = vrot.slane %v5453_v58, 6  ;;  %v1671_v16 = vrot.slane %v1377_v24, 1  ;;  %v3306_v0 = vmul.f32 %v17964_v56, %v958_v12  ;;  %v18316_v49 = vadd.f32 %v2309_v40, %v1904_v53 }
 0x347   : > { %v6196_v34 = vmax.f32 %v6091_v18, 0.0  ;;  %v2310_v60 = vrot.slane %v2016_v38, 2  ;;  %v4176_v6 = vmul.f32 %v18115_v54, %v958_v12  ;;  %v18320_v44 = vsel %vm4952_vm5, %v5098_v36, %v5100_v39 }
 0x348   : > { %21748 = vst [vmem:[#allocation19_spill] sm:$0xff] %v18320_v44  ;;  %v1672_v5 = vsel %vm1507_vm0, %v1669_v1, %v1671_v16  ;;  %v2958_v25 = vrot.slane %v2667_v62, 6  ;;  %v3597_v8 = vrot.slane %v3306_v0, 7  ;;  %v3944_v24 = vmul.f32 %v17976_v10, %v958_v12 }
 0x349   : > { %6301 = vst.msk [vmem:[#allocation4 + $0x240] sm:$0xff] %vm385_vm6, %v6196_v34  ;;  %v1905_v58 = vadd.f32 %v1672_v5, %v1156_v35  ;;  %v4463_v45 = vrot.slane %v4176_v6, 4  ;;  %v4815_v53 = vmul.f32 %v18127_v43, %v958_v12  ;;  %v18327_v40 = vsel %vm2800_vm2, %v5736_v32, %v5738_v19 }
 0x34a   : > { %21749 = vst [vmem:[#allocation13_spill] sm:$0xff] %v18327_v40  ;;  %v2311_v18 = vsel %vm2146_vm1, %v2308_v37, %v2310_v60  ;;  %v2959_v36 = vsel %vm2800_vm2, %v2956_v61, %v2958_v25  ;;  %v5454_v1 = vmul.f32 %v18143_v9, %v958_v12  ;;  %v3598_v62 = vsel %vm3439_vm3, %v3595_v29, %v3597_v8 }
 0x34b   : > { %v3195_v38 = vadd.f32 %v2959_v36, %v18243_v52  ;;  %v5102_v0 = vrot.slane %v4815_v53, 5  ;;  %v1158_v35 = vmul.f32 %v17954_v3, %v963_v15  ;;  %v1378_v6 = vmul.f32 %v17928_v23, %v963_v15 }
 0x34c   : > { %v5740_v34 = vrot.slane %v5454_v1, 6  ;;  %v2017_v5 = vmul.f32 %v17936_v26, %v963_v15  ;;  %v2668_v32 = vmul.f32 %v17944_v7, %v963_v15  ;;  %v18338_v40 = vadd.f32 %v2311_v18, %v1905_v58 }
 0x34d   : > { %v3834_v37 = vadd.f32 %v3598_v62, %v3195_v38  ;;  %v21751_v61 = vrot.slane %v18293_v28, 4  ;;  %v3307_v52 = vmul.f32 %v17964_v56, %v963_v15  ;;  %v18347_v29 = vsel %vm4952_vm5, %v5100_v39, %v5102_v0  ;;  %v968_v38 = vpop.permute.xlu1 %967 }
 0x34e   : > { %21750 = vst [vmem:[#allocation25_spill] sm:$0xff] %v18338_v40  ;;  %21753 = vst [vmem:[#allocation10_spill] sm:$0xff] %v18347_v29  ;;  %v1673_v53 = vrot.slane %v1378_v6, 1  ;;  %v2312_v36 = vrot.slane %v2017_v5, 2  ;;  %v2960_v1 = vrot.slane %v2668_v32, 6  ;;  %v3945_v14 = vmul.f32 %v17976_v10, %v963_v15 }
 0x34f   : > { %v18343_v12 = vsel %vm4313_vm4, %v21751_v61, %v4463_v45  ;;  %v3599_v44 = vrot.slane %v3307_v52, 7  ;;  %v4177_v58 = vmul.f32 %v18115_v54, %v963_v15  ;;  %v4816_v18 = vmul.f32 %v18127_v43, %v963_v15 }
 0x350   : > { %21752 = vst [vmem:[#allocation20_spill] sm:$0xff] %v18343_v12  ;;  %v18353_v62 = vsel %vm2800_vm2, %v5738_v19, %v5740_v34  ;;  %v1674_v61 = vsel %vm1507_vm0, %v1671_v16, %v1673_v53  ;;  %v2961_v40 = vsel %vm2800_vm2, %v2958_v25, %v2960_v1  ;;  %v5455_v39 = vmul.f32 %v18143_v9, %v963_v15 }
 0x351   : > { %v18358_v6 = vadd.f32 %v3944_v24, %v3834_v37  ;;  %v1906_v5 = vadd.f32 %v1674_v61, %v1157_v17  ;;  %v3196_v32 = vadd.f32 %v2961_v40, %v18274_v4  ;;  %v4465_v52 = vrot.slane %v4177_v58, 4 }
 0x352   : > { %v2313_v29 = vsel %vm2146_vm1, %v2310_v60, %v2312_v36  ;;  %v5104_v12 = vrot.slane %v4816_v18, 5  ;;  %v5742_v28 = vrot.slane %v5455_v39, 6  ;;  %v18363_v30 = vmul.f32 %v17928_v23, %v968_v38 }
 0x353   : > { %v3600_v19 = vsel %vm3439_vm3, %v3597_v8, %v3599_v44  ;;  %v4466_v16 = vsel %vm4313_vm4, %v4463_v45, %v4465_v52  ;;  %v18368_v25 = vmul.f32 %v17954_v3, %v968_v38  ;;  %v18371_v15 = vmul.f32 %v17936_v26, %v968_v38 }
 0x354   : > { %v18373_v17 = vadd.f32 %v2313_v29, %v1906_v5  ;;  %v3835_v4 = vadd.f32 %v3600_v19, %v3196_v32  ;;  %v4705_v60 = vadd.f32 %v4466_v16, %v18252_v50  ;;  %v1675_v24 = vrot.slane %v18363_v30, 1  ;;  %v933_v16 = vpop.permute.xlu0 %932  ;;  %v18536_v30 = vld [vmem:[%s21276_s2] ss:$0 sm:$0xff] }
 0x355   : > { %v5105_v40 = vsel %vm4952_vm5, %v5102_v0, %v5104_v12  ;;  %v21429_v37 = vrot.slane %v18371_v15, 2  ;;  %v18380_v8 = vmul.f32 %v17944_v7, %v968_v38  ;;  %v18383_v45 = vmul.f32 %v17964_v56, %v968_v38 }
 0x356   : > { %v5344_v58 = vadd.f32 %v5105_v40, %v4705_v60  ;;  %v5743_v18 = vsel %vm2800_vm2, %v5740_v34, %v5742_v28  ;;  %v1676_v29 = vsel %vm1507_vm0, %v1673_v53, %v1675_v24  ;;  %v18390_v50 = vmul.f32 %v18115_v54, %v968_v38 }
 0x357   : > { %v1907_v61 = vadd.f32 %v1676_v29, %v1158_v35  ;;  %v2315_v0 = vsel %vm2146_vm1, %v2312_v36, %v21429_v37  ;;  %v2962_v39 = vrot.slane %v18380_v8, 6  ;;  %v21430_v5 = vrot.slane %v18383_v45, 7  ;;  %v21783_v8 = vld [vmem:[#allocation22_spill] sm:$0xff] }
 0x358   : > { %v5982_v32 = vadd.f32 %v5743_v18, %v5344_v58  ;;  %v4467_v19 = vrot.slane %v18390_v50, 4  ;;  %v18399_v34 = vmul.f32 %v18127_v43, %v968_v38  ;;  %v18402_v53 = vmul.f32 %v18143_v9, %v968_v38 }
 0x359   : > { %v18404_v60 = vadd.f32 %v3945_v14, %v3835_v4  ;;  %v18406_v35 = vadd.f32 %v2315_v0, %v1907_v61  ;;  %v2963_v36 = vsel %vm2800_vm2, %v2960_v1, %v2962_v39  ;;  %v3946_v40 = vmul.f32 %v17976_v10, %v968_v38 }
 0x35a   : > { %v6094_v58 = vadd.f32 %v17851_v20, %v5982_v32  ;;  %v3197_v18 = vadd.f32 %v2963_v36, %v18316_v49  ;;  %v3602_v29 = vsel %vm3439_vm3, %v3599_v44, %v21430_v5  ;;  %v5106_v37 = vrot.slane %v18399_v34, 5 }
 0x35b   : > { %v5744_v14 = vrot.slane %v18402_v53, 6  ;;  %v1372_v4 = vmul.f32 %v17928_v23, %v933_v16  ;;  %v2011_v61 = vmul.f32 %v17936_v26, %v933_v16  ;;  %v2662_v1 = vmul.f32 %v17944_v7, %v933_v16 }
 0x35c   : > { %v6199_v0 = vmax.f32 %v6094_v58, 0.0  ;;  %v4468_v20 = vsel %vm4313_vm4, %v4465_v52, %v4467_v19  ;;  %v1152_v49 = vmul.f32 %v17954_v3, %v933_v16  ;;  %v3301_v38 = vmul.f32 %v17964_v56, %v933_v16 }
 0x35d   : > { %v3836_v44 = vadd.f32 %v3602_v29, %v3197_v18  ;;  %v1661_v32 = vrot.slane %v1372_v4, 1  ;;  %v2300_v36 = vrot.slane %v2011_v61, 2  ;;  %v2948_v5 = vrot.slane %v2662_v1, 6 }
 0x35e   : > { %6304 = vst.msk [vmem:[#allocation4 + $0x258] sm:$0xff] %vm385_vm6, %v6199_v0  ;;  %v5107_v26 = vsel %vm4952_vm5, %v5104_v12, %v5106_v37  ;;  %v18434_v7 = vsel %vm2800_vm2, %v5742_v28, %v5744_v14  ;;  %v3587_v52 = vrot.slane %v3301_v38, 7  ;;  %v4171_v3 = vmul.f32 %v18115_v54, %v933_v16 }
 0x35f   : > { %v21754_v56 = vrot.slane %v18092_v55, 1  ;;  %v21755_v18 = vrot.slane %v18166_v13, 1  ;;  %v21756_v4 = vrot.slane %v18098_v42, 2  ;;  %v3939_v61 = vmul.f32 %v17976_v10, %v933_v16 }
 0x360   : > { %v21757_v0 = vrot.slane %v18105_v22, 6  ;;  %v21758_v55 = vrot.slane %v18172_v11, 6  ;;  %v21759_v13 = vrot.slane %v18169_v59, 2  ;;  %v21760_v10 = vrot.slane %v18110_v51, 7 }
 0x361   : > { %v1662_v58 = vsel %vm1507_vm0, %v21754_v56, %v1661_v32  ;;  %v1664_v29 = vsel %vm1507_vm0, %v1661_v32, %v21755_v18  ;;  %v2301_v12 = vsel %vm2146_vm1, %v21756_v4, %v2300_v36  ;;  %v4810_v59 = vmul.f32 %v18127_v43, %v933_v16 }
 0x362   : > { %v1900_v28 = vadd.f32 %v1662_v58, %v18089_v27  ;;  %v1901_v1 = vadd.f32 %v1664_v29, %v1152_v49  ;;  %v2949_v38 = vsel %vm2800_vm2, %v21757_v0, %v2948_v5  ;;  %v2951_v56 = vsel %vm2800_vm2, %v2948_v5, %v21758_v55 }
 0x363   : > { %v2303_v32 = vsel %vm2146_vm1, %v2300_v36, %v21759_v13  ;;  %v3190_v42 = vadd.f32 %v2949_v38, %v18067_v2  ;;  %v3191_v18 = vadd.f32 %v2951_v56, %v18094_v33  ;;  %v3588_v27 = vsel %vm3439_vm3, %v21760_v10, %v3587_v52 }
 0x364   : > { %v2539_v49 = vadd.f32 %v2301_v12, %v1900_v28  ;;  %v2540_v22 = vadd.f32 %v2303_v32, %v1901_v1  ;;  %v21761_v58 = vrot.slane %v18181_v48, 7  ;;  %v4453_v29 = vrot.slane %v4171_v3, 4 }
 0x365   : > { %v3829_v5 = vadd.f32 %v3588_v27, %v3190_v42  ;;  %v5449_v36 = vmul.f32 %v18143_v9, %v933_v16  ;;  %v21762_v51 = vrot.slane %v18118_v21, 4  ;;  %v21763_v28 = vrot.slane %v18187_v63, 4  ;;  %v21767_v21 = vld [vmem:[#allocation24_spill] sm:$0xff]  ;;  %v21771_v27 = vld [vmem:[#allocation23_spill] sm:$0xff] }
 0x366   : > { %v3590_v11 = vsel %vm3439_vm3, %v3587_v52, %v21761_v58  ;;  %v3193_v2 = vadd.f32 %v18270_v41, %v2539_v49  ;;  %v3194_v33 = vadd.f32 %v18303_v46, %v2540_v22  ;;  %v18475_v52 = vpop.permute.xlu1 %972  ;;  %v21764_v41 = vld [vmem:[#allocation12_spill] sm:$0xff]  ;;  %v21765_v46 = vld [vmem:[#allocation27_spill] sm:$0xff]  ;;  %v21768_v56 = vrot.slane %v21767_v21, 4 }
 0x367   : > { %v3830_v4 = vadd.f32 %v3590_v11, %v3191_v18  ;;  %v4454_v12 = vsel %vm4313_vm4, %v21762_v51, %v4453_v29  ;;  %v4456_v48 = vsel %vm4313_vm4, %v4453_v29, %v21763_v28  ;;  %v4044_v3 = vadd.f32 %v3939_v61, %v3829_v5  ;;  %v21769_v61 = vld [vmem:[#allocation20_spill] sm:$0xff]  ;;  %v21772_v22 = vld [vmem:[#allocation11_spill] sm:$0xff] }
 0x368   : > { %v4699_v0 = vadd.f32 %v4454_v12, %v18049_v47  ;;  %v4700_v16 = vadd.f32 %v4456_v48, %v18075_v31  ;;  %v3832_v38 = vadd.f32 %v21764_v41, %v3193_v2  ;;  %v21766_v55 = vrot.slane %v21765_v46, 4  ;;  %v21770_v31 = vld [vmem:[#allocation21_spill] sm:$0xff]  ;;  %v21774_v29 = vld [vmem:[#allocation15_spill] sm:$0xff]  ;;  %v21777_v2 = vld [vmem:[#allocation10_spill] sm:$0xff] }
 0x369   : > { %v4045_v1 = vadd.f32 %v18192_v57, %v3830_v4  ;;  %v5092_v63 = vrot.slane %v4810_v59, 5  ;;  %v5730_v32 = vrot.slane %v5449_v36, 6  ;;  %v18486_v42 = vadd.f32 %v3946_v40, %v3836_v44  ;;  %v21776_v59 = vld [vmem:[#allocation19_spill] sm:$0xff]  ;;  %v21778_v12 = vld [vmem:[#allocation18_spill] sm:$0xff] }
 0x36a   : > { %v4462_v13 = vsel %vm4313_vm4, %v21768_v56, %v21766_v55  ;;  %v18491_v47 = vmul.f32 %v17928_v23, %v18475_v52  ;;  %v3833_v57 = vadd.f32 %v21770_v31, %v3194_v33  ;;  %v4047_v49 = vadd.f32 %v21771_v27, %v3832_v38  ;;  %v21780_v48 = vld [vmem:[#allocation26_spill] sm:$0xff]  ;;  %v21782_v55 = vld [vmem:[#allocation13_spill] sm:$0xff]  ;;  %v18520_v56 = vld [vmem:[%s21275_s1 + $0x2] ss:$0 sm:$0xff] }
 0x36b   : > { %v4703_v18 = vadd.f32 %v4462_v13, %v4044_v3  ;;  %v4704_v10 = vadd.f32 %v21769_v61, %v4045_v1  ;;  %v21773_v58 = vrot.slane %v21772_v22, 5  ;;  %v21775_v5 = vrot.slane %v21774_v29, 5 }
 0x36c   : > { %v4706_v23 = vadd.f32 %v4468_v20, %v4047_v49  ;;  %v21779_v28 = vrot.slane %v21778_v12, 6  ;;  %v21781_v3 = vrot.slane %v21780_v48, 6  ;;  %v1677_v41 = vrot.slane %v18491_v47, 1 }
 0x36d   : > { %v5093_v11 = vsel %vm4952_vm5, %v21773_v58, %v5092_v63  ;;  %v5095_v40 = vsel %vm4952_vm5, %v5092_v63, %v21775_v5  ;;  %v5342_v36 = vadd.f32 %v21776_v59, %v4703_v18  ;;  %v5343_v51 = vadd.f32 %v21777_v2, %v4704_v10  ;;  %v18549_v5 = vld [vmem:[%s21275_s1] ss:$0 sm:$0xff]  ;;  %v21785_v2 = vld [vmem:[#allocation25_spill] sm:$0xff] }
 0x36e   : > { %v5338_v44 = vadd.f32 %v5093_v11, %v4699_v0  ;;  %v5339_v4 = vadd.f32 %v5095_v40, %v4700_v16  ;;  %v5731_v33 = vsel %vm2800_vm2, %v21779_v28, %v5730_v32  ;;  %v5733_v1 = vsel %vm2800_vm2, %v5730_v32, %v21781_v3 }
 0x36f   : > { %v5980_v0 = vadd.f32 %v21782_v55, %v5342_v36  ;;  %v5981_v16 = vadd.f32 %v18353_v62, %v5343_v51  ;;  %v5345_v21 = vadd.f32 %v5107_v26, %v4706_v23  ;;  %v1678_v20 = vsel %vm1507_vm0, %v1675_v24, %v1677_v41  ;;  %v18529_v62 = vld [vmem:[%s21275_s1 + $0x3] ss:$0 sm:$0xff] }
 0x370   : > { %v5976_v38 = vadd.f32 %v5731_v33, %v5338_v44  ;;  %v5977_v46 = vadd.f32 %v5733_v1, %v5339_v4  ;;  %v18524_v13 = vmul.f32 %v18520_v56, %v18475_v52  ;;  %v2670_v26 = vmul.f32 %v18529_v62, %v18475_v52  ;;  %v978_v4 = vpop.permute.xlu0 %977 }
 0x371   : > { %v6092_v32 = vadd.f32 %v18536_v30, %v5980_v0  ;;  %v6093_v18 = vadd.f32 %v18536_v30, %v5981_v16  ;;  %v5983_v61 = vadd.f32 %v18434_v7, %v5345_v21  ;;  %v1908_v10 = vadd.f32 %v1678_v20, %v18368_v25  ;;  %v18559_v7 = vld [vmem:[%s21275_s1 + $0x4] ss:$0 sm:$0xff] }
 0x372   : > { %v6088_v24 = vadd.f32 %v18536_v30, %v5976_v38  ;;  %v6089_v63 = vadd.f32 %v18536_v30, %v5977_v46  ;;  %v2316_v31 = vrot.slane %v18524_v13, 2  ;;  %v2964_v27 = vrot.slane %v2670_v26, 6  ;;  %v18600_v13 = vld [vmem:[%s21275_s1 + $0x5] ss:$0 sm:$0xff] }
 0x373   : > { %v6197_v58 = vmax.f32 %v6092_v32, 0.0  ;;  %v6198_v11 = vmax.f32 %v6093_v18, 0.0  ;;  %v6095_v29 = vadd.f32 %v18536_v30, %v5983_v61  ;;  %v1160_v40 = vmul.f32 %v18549_v5, %v18475_v52 }
 0x374   : > { %v6193_v49 = vmax.f32 %v6088_v24, 0.0  ;;  %v6194_v22 = vmax.f32 %v6089_v63, 0.0  ;;  %v2965_v25 = vsel %vm2800_vm2, %v2962_v39, %v2964_v27  ;;  %v3309_v44 = vmul.f32 %v18559_v7, %v18475_v52 }
 0x375   : > { %6302 = vst.msk [vmem:[#allocation4 + $0x248] sm:$0xff] %vm385_vm6, %v6197_v58  ;;  %6303 = vst.msk [vmem:[#allocation4 + $0x250] sm:$0xff] %vm385_vm6, %v6198_v11  ;;  %v4048_v59 = vadd.f32 %v21783_v8, %v3833_v57  ;;  %v21784_v39 = vrot.slane %v18371_v15, 2  ;;  %v3198_v51 = vadd.f32 %v2965_v25, %v21785_v2  ;;  %v4179_v23 = vmul.f32 %v18115_v54, %v18475_v52  ;;  %v18585_v15 = vld [vmem:[%s21275_s1 + $0x1] ss:$0 sm:$0xff] }
 0x376   : > { %6298 = vst.msk [vmem:[#allocation4 + $0x228] sm:$0xff] %vm385_vm6, %v6193_v49  ;;  %6299 = vst.msk [vmem:[#allocation4 + $0x230] sm:$0xff] %vm385_vm6, %v6194_v22  ;;  %v6200_v12 = vmax.f32 %v6095_v29, 0.0  ;;  %v3603_v28 = vrot.slane %v3309_v44, 7  ;;  %v4818_v33 = vmul.f32 %v18127_v43, %v18475_v52  ;;  %v18578_v48 = vmul.f32 %v18143_v9, %v18475_v52  ;;  %v983_v29 = vpop.permute.xlu1 %982 }
 0x377   : > { %v2317_v36 = vsel %vm2146_vm1, %v21784_v39, %v2316_v31  ;;  %v4469_v57 = vrot.slane %v4179_v23, 4  ;;  %v1381_v1 = vmul.f32 %v18585_v15, %v978_v4  ;;  %v18589_v38 = vmul.f32 %v18520_v56, %v978_v4 }
 0x378   : > { %v18580_v3 = vadd.f32 %v2317_v36, %v1908_v10  ;;  %6305 = vst.msk [vmem:[#allocation4 + $0x260] sm:$0xff] %vm385_vm6, %v6200_v12  ;;  %v21786_v46 = vrot.slane %v18383_v45, 7  ;;  %v5108_v0 = vrot.slane %v4818_v33, 5  ;;  %v5746_v16 = vrot.slane %v18578_v48, 6 }
 0x379   : > { %v2671_v21 = vmul.f32 %v18529_v62, %v978_v4  ;;  %v3947_v26 = vmul.f32 %v18600_v13, %v18475_v52  ;;  %v4470_v45 = vsel %vm4313_vm4, %v4467_v19, %v4469_v57  ;;  %v1679_v24 = vrot.slane %v1381_v1, 1 }
 0x37a   : > { %v3604_v55 = vsel %vm3439_vm3, %v21786_v46, %v3603_v28  ;;  %v4707_v63 = vadd.f32 %v4470_v45, %v4048_v59  ;;  %v1161_v32 = vmul.f32 %v18549_v5, %v978_v4  ;;  %v2318_v18 = vrot.slane %v18589_v38, 2 }
 0x37b   : > { %v3837_v20 = vadd.f32 %v3604_v55, %v3198_v51  ;;  %v2966_v61 = vrot.slane %v2671_v21, 6  ;;  %v5109_v10 = vsel %vm4952_vm5, %v5106_v37, %v5108_v0  ;;  %v5747_v49 = vsel %vm2800_vm2, %v5744_v14, %v5746_v16 }
 0x37c   : > { %v1680_v50 = vsel %vm1507_vm0, %v1677_v41, %v1679_v24  ;;  %v3310_v19 = vmul.f32 %v18559_v7, %v978_v4  ;;  %v5346_v22 = vadd.f32 %v5109_v10, %v4707_v63  ;;  %v4180_v53 = vmul.f32 %v18115_v54, %v978_v4  ;;  %v988_v10 = vpop.permute.xlu0 %987 }
 0x37d   : > { %v18619_v52 = vadd.f32 %v3947_v26, %v3837_v20  ;;  %v1909_v58 = vadd.f32 %v1680_v50, %v1160_v40  ;;  %v2967_v11 = vsel %vm2800_vm2, %v2964_v27, %v2966_v61  ;;  %v4819_v14 = vmul.f32 %v18127_v43, %v978_v4 }
 0x37e   : > { %v3199_v34 = vadd.f32 %v2967_v11, %v18373_v17  ;;  %v3605_v37 = vrot.slane %v3310_v19, 7  ;;  %v5984_v25 = vadd.f32 %v5747_v49, %v5346_v22  ;;  %v2319_v47 = vsel %vm2146_vm1, %v2316_v31, %v2318_v18  ;;  %v13875_v17 = vld [vmem:[%s21277_s3] sm:$0xff]  }
 0x37f   : > { %v3948_v41 = vmul.f32 %v18600_v13, %v978_v4  ;;  %v5458_v44 = vmul.f32 %v18143_v9, %v978_v4  ;;  %v4471_v40 = vrot.slane %v4180_v53, 4  ;;  %v5110_v59 = vrot.slane %v4819_v14, 5  ;;  %13095 = vmatprep.subr.bf16.mxu0 %v13875_v17 }
 0x380   : > { %v3606_v8 = vsel %vm3439_vm3, %v3603_v28, %v3605_v37  ;;  %v1382_v27 = vmul.f32 %v18585_v15, %v983_v29  ;;  %v6096_v39 = vadd.f32 %v18536_v30, %v5984_v25  ;;  %v18635_v31 = vmul.f32 %v18520_v56, %v983_v29  ;;  %13096 = vmatpush3.bf16.msra.mxu0 %v13875_v17 }
 0x381   : > { %v3838_v36 = vadd.f32 %v3606_v8, %v3199_v34  ;;  %v5748_v2 = vrot.slane %v5458_v44, 6  ;;  %v18637_v51 = vadd.f32 %v2319_v47, %v1909_v58  ;;  %v4472_v4 = vsel %vm4313_vm4, %v4469_v57, %v4471_v40 }
 0x382   : > { %v1681_v23 = vrot.slane %v1382_v27, 1  ;;  %v2672_v12 = vmul.f32 %v18529_v62, %v983_v29  ;;  %v6201_v28 = vmax.f32 %v6096_v39, 0.0  ;;  %v4708_v33 = vadd.f32 %v4472_v4, %v18358_v6 }
 0x383   : > { %v5111_v48 = vsel %vm4952_vm5, %v5108_v0, %v5110_v59  ;;  %v1162_v1 = vmul.f32 %v18549_v5, %v983_v29  ;;  %v2320_v46 = vrot.slane %v18635_v31, 2  ;;  %v3311_v21 = vmul.f32 %v18559_v7, %v983_v29 }
 0x384   : > { %v1682_v38 = vsel %vm1507_vm0, %v1679_v24, %v1681_v23  ;;  %v2968_v55 = vrot.slane %v2672_v12, 6  ;;  %6306 = vst.msk [vmem:[#allocation4 + $0x268] sm:$0xff] %vm385_vm6, %v6201_v28  ;;  %v18648_v57 = vadd.f32 %v3948_v41, %v3838_v36  ;;  %v5347_v20 = vadd.f32 %v5111_v48, %v4708_v33 }
 0x385   : > { %v5749_v26 = vsel %vm2800_vm2, %v5746_v16, %v5748_v2  ;;  %v4181_v6 = vmul.f32 %v18115_v54, %v983_v29  ;;  %v1910_v0 = vadd.f32 %v1682_v38, %v1161_v32  ;;  %v3607_v63 = vrot.slane %v3311_v21, 7 }
 0x386   : > { %v2969_v45 = vsel %vm2800_vm2, %v2966_v61, %v2968_v55  ;;  %v4820_v24 = vmul.f32 %v18127_v43, %v983_v29  ;;  %v5985_v49 = vadd.f32 %v5749_v26, %v5347_v20  ;;  %v3949_v19 = vmul.f32 %v18600_v13, %v983_v29  ;;  %v993_v20 = vpop.permute.xlu1 %992 }
 0x387   : > { %v3200_v50 = vadd.f32 %v2969_v45, %v18406_v35  ;;  %v4473_v22 = vrot.slane %v4181_v6, 4  ;;  %v2321_v58 = vsel %vm2146_vm1, %v2318_v18, %v2320_v46  ;;  %v3608_v11 = vsel %vm3439_vm3, %v3605_v37, %v3607_v63 }
 0x388   : > { %v5112_v16 = vrot.slane %v4820_v24, 5  ;;  %v5459_v34 = vmul.f32 %v18143_v9, %v983_v29  ;;  %v6097_v32 = vadd.f32 %v18536_v30, %v5985_v49  ;;  %v1383_v14 = vmul.f32 %v18585_v15, %v988_v10 }
 0x389   : > { %v3839_v61 = vadd.f32 %v3608_v11, %v3200_v50  ;;  %v4474_v53 = vsel %vm4313_vm4, %v4471_v40, %v4473_v22  ;;  %v18662_v25 = vadd.f32 %v2321_v58, %v1910_v0  ;;  %v18666_v41 = vmul.f32 %v18520_v56, %v988_v10 }
 0x38a   : > { %v4709_v35 = vadd.f32 %v4474_v53, %v18404_v60  ;;  %v5750_v47 = vrot.slane %v5459_v34, 6  ;;  %v6202_v18 = vmax.f32 %v6097_v32, 0.0  ;;  %v5113_v37 = vsel %vm4952_vm5, %v5110_v59, %v5112_v16 }
 0x38b   : > { %v1683_v44 = vrot.slane %v1383_v14, 1  ;;  %v2673_v29 = vmul.f32 %v18529_v62, %v988_v10  ;;  %v1163_v27 = vmul.f32 %v18549_v5, %v988_v10  ;;  %v2322_v40 = vrot.slane %v18666_v41, 2 }
 0x38c   : > { %v5348_v8 = vadd.f32 %v5113_v37, %v4709_v35  ;;  %v3312_v17 = vmul.f32 %v18559_v7, %v988_v10  ;;  %6307 = vst.msk [vmem:[#allocation4 + $0x270] sm:$0xff] %vm385_vm6, %v6202_v18  ;;  %v5751_v60 = vsel %vm2800_vm2, %v5748_v2, %v5750_v47  ;;  %v4182_v31 = vmul.f32 %v18115_v54, %v988_v10  ;;  %v6382_v18 = vld [vmem:[#allocation4 + $0x180] ss:$2 sm:$0xff]  ;;  %v6488_v37 = vld [vmem:[#allocation4 + $0x181] ss:$2 sm:$0xff] }
 0x38d   : > { %v1684_v39 = vsel %vm1507_vm0, %v1681_v23, %v1683_v44  ;;  %v2970_v36 = vrot.slane %v2673_v29, 6  ;;  %v18677_v59 = vadd.f32 %v3949_v19, %v3839_v61  ;;  %v4821_v38 = vmul.f32 %v18127_v43, %v988_v10 }
 0x38e   : > { %v5986_v4 = vadd.f32 %v5751_v60, %v5348_v8  ;;  %v1911_v12 = vadd.f32 %v1684_v39, %v1162_v1  ;;  %v3609_v28 = vrot.slane %v3312_v17, 7  ;;  %v4475_v48 = vrot.slane %v4182_v31, 4  ;;  %v6384_v17 = vld [vmem:[#allocation4 + $0x190] ss:$2 sm:$0xff]  ;;  %v6490_v60 = vld [vmem:[#allocation4 + $0x191] ss:$2 sm:$0xff] }
 0x38f   : > { %21787 = vst [vmem:[#allocation16_spill] sm:$0xff] %v18677_v59  ;;  %v2971_v33 = vsel %vm2800_vm2, %v2968_v55, %v2970_v36  ;;  %v18682_v21 = vmul.f32 %v18143_v9, %v988_v10  ;;  %v2323_v23 = vsel %vm2146_vm1, %v2320_v46, %v2322_v40  ;;  %v3950_v6 = vmul.f32 %v18600_v13, %v988_v10 }
 0x390   : > { %v6098_v2 = vadd.f32 %v18536_v30, %v5986_v4  ;;  %v3201_v26 = vadd.f32 %v2971_v33, %v18580_v3  ;;  %v18688_v0 = vadd.f32 %v2323_v23, %v1911_v12  ;;  %v4476_v1 = vsel %vm4313_vm4, %v4473_v22, %v4475_v48  ;;  %v6386_v4 = vld [vmem:[#allocation4 + $0x1a0] ss:$2 sm:$0xff]  ;;  %v6492_v12 = vld [vmem:[#allocation4 + $0x1a1] ss:$2 sm:$0xff] }
 0x391   : > { %v5114_v55 = vrot.slane %v4821_v38, 5  ;;  %v5752_v45 = vrot.slane %v18682_v21, 6  ;;  %v3610_v49 = vsel %vm3439_vm3, %v3607_v63, %v3609_v28  ;;  %v4710_v50 = vadd.f32 %v4476_v1, %v18486_v42  ;;  %v6380_v38 = vld [vmem:[#allocation4 + $0x170] ss:$2 sm:$0xff]  ;;  %v6486_v21 = vld [vmem:[#allocation4 + $0x171] ss:$2 sm:$0xff] }
 0x392   : > { %v6203_v24 = vmax.f32 %v6098_v2, 0.0  ;;  %v18695_v19 = vmul.f32 %v18585_v15, %v993_v20  ;;  %v3840_v46 = vadd.f32 %v3610_v49, %v3201_v26  ;;  %v18699_v10 = vmul.f32 %v18520_v56, %v993_v20  ;;  %v998_v2 = vpop.permute.xlu0 %997 }
 0x393   : > { %v5115_v3 = vsel %vm4952_vm5, %v5112_v16, %v5114_v55  ;;  %v18702_v58 = vmul.f32 %v18529_v62, %v993_v20  ;;  %v18706_v11 = vmul.f32 %v18549_v5, %v993_v20  ;;  %v18710_v63 = vmul.f32 %v18559_v7, %v993_v20 }
 0x394   : > { %6308 = vst.msk [vmem:[#allocation4 + $0x278] sm:$0xff] %vm385_vm6, %v6203_v24  ;;  %v5349_v22 = vadd.f32 %v5115_v3, %v4710_v50  ;;  %v1685_v42 = vrot.slane %v18695_v19, 1  ;;  %v5753_v34 = vsel %vm2800_vm2, %v5750_v47, %v5752_v45  ;;  %v2324_v16 = vrot.slane %v18699_v10, 2 }
 0x395   : > { %v2972_v32 = vrot.slane %v18702_v58, 6  ;;  %v18716_v61 = vmul.f32 %v18115_v54, %v993_v20  ;;  %v3611_v35 = vrot.slane %v18710_v63, 7  ;;  %v18721_v41 = vmul.f32 %v18127_v43, %v993_v20 }
 0x396   : > { %v5987_v53 = vadd.f32 %v5753_v34, %v5349_v22  ;;  %v1686_v14 = vsel %vm1507_vm0, %v1683_v44, %v1685_v42  ;;  %v18723_v29 = vadd.f32 %v3950_v6, %v3840_v46  ;;  %v3951_v43 = vmul.f32 %v18600_v13, %v993_v20 }
 0x397   : > { %v1912_v47 = vadd.f32 %v1686_v14, %v1163_v27  ;;  %v2973_v8 = vsel %vm2800_vm2, %v2970_v36, %v2972_v32  ;;  %v4477_v54 = vrot.slane %v18716_v61, 4  ;;  %v5116_v31 = vrot.slane %v18721_v41, 5  ;;  %v6388_v61 = vld [vmem:[#allocation4 + $0x1b0] ss:$2 sm:$0xff] }
 0x398   : > { %21788 = vst [vmem:[#allocation17_spill] sm:$0xff] %v18723_v29  ;;  %v6099_v44 = vadd.f32 %v18536_v30, %v5987_v53  ;;  %v3202_v39 = vadd.f32 %v2973_v8, %v18637_v51  ;;  %v2325_v27 = vsel %vm2146_vm1, %v2322_v40, %v2324_v16  ;;  %v3612_v36 = vsel %vm3439_vm3, %v3609_v28, %v3611_v35  ;;  %v6392_v41 = vld [vmem:[#allocation4 + $0x1d0] ss:$2 sm:$0xff] }
 0x399   : > { %v4478_v33 = vsel %vm4313_vm4, %v4475_v48, %v4477_v54  ;;  %v18743_v51 = vmul.f32 %v18143_v9, %v993_v20  ;;  %v18745_v26 = vadd.f32 %v2325_v27, %v1912_v47  ;;  %v5117_v40 = vsel %vm4952_vm5, %v5114_v55, %v5116_v31 }
 0x39a   : > { %v6204_v23 = vmax.f32 %v6099_v44, 0.0  ;;  %v4711_v6 = vadd.f32 %v4478_v33, %v18619_v52  ;;  %v6569_v1 = vmax.f32 %v6382_v18, %v6488_v37  ;;  %v6570_v24 = vmax.f32 %v6384_v17, %v6490_v60  ;;  %v21789_v37 = vld [vmem:[#allocation14_spill] sm:$0xff] }
 0x39b   : > { %v5754_v28 = vrot.slane %v18743_v51, 6  ;;  %v18752_v48 = vmax.f32 %v6386_v4, %v6492_v12  ;;  %v3841_v9 = vadd.f32 %v3612_v36, %v3202_v39  ;;  %v6568_v49 = vmax.f32 %v6380_v38, %v6486_v21  ;;  %v18797_v51 = vld [vmem:[%s21275_s1 + $0x7] ss:$0 sm:$0xff]  ;;  %v1008_v21 = vpop.permute.xlu1 %1007 }
 0x39c   : > { %6309 = vst.msk [vmem:[#allocation4 + $0x280] sm:$0xff] %vm385_vm6, %v6204_v23  ;;  %v5350_v20 = vadd.f32 %v5117_v40, %v4711_v6  ;;  %v18756_v50 = vmul.f32 %v18585_v15, %v998_v2  ;;  %v6697_v19 = vrot.slane %v6569_v1, 7  ;;  %v6698_v46 = vrot.slane %v6570_v24, 7  ;;  %v18814_v40 = vld [vmem:[%s21275_s1 + $0x8] ss:$0 sm:$0xff] }
 0x39d   : > { %v5755_v52 = vsel %vm2800_vm2, %v5752_v45, %v5754_v28  ;;  %v6700_v55 = vrot.slane %v18752_v48, 7  ;;  %v18762_v34 = vmul.f32 %v18520_v56, %v998_v2  ;;  %v18765_v53 = vmul.f32 %v18529_v62, %v998_v2 }
 0x39e   : > { %v5988_v3 = vadd.f32 %v5755_v52, %v5350_v20  ;;  %v21445_v22 = vrot.slane %v18756_v50, 1  ;;  %v6699_v14 = vsel %vm3439_vm3, %v6697_v19, %v6698_v46  ;;  %v6705_v47 = vmax.f32 %v21789_v37, %v6697_v19 }
 0x39f   : > { %v6701_v18 = vsel %vm3439_vm3, %v6698_v46, %v6700_v55  ;;  %v18771_v45 = vmul.f32 %v18559_v7, %v998_v2  ;;  %v6706_v17 = vmax.f32 %v6568_v49, %v6699_v14  ;;  %v18777_v39 = vadd.f32 %v3951_v43, %v3841_v9 }
 0x3a0   : > { %v6100_v8 = vadd.f32 %v18536_v30, %v5988_v3  ;;  %v6707_v60 = vmax.f32 %v6569_v1, %v6701_v18  ;;  %v1688_v44 = vsel %vm1507_vm0, %v1685_v42, %v21445_v22  ;;  %6708 = vst.msk [vmem:[#allocation2 + $0x6d] sm:$0xf0] %vm6646_vm10, %v6705_v47  ;;  %v21436_v4 = vrot.slane %v18762_v34, 2  ;;  %v18789_v42 = vld [vmem:[%s21275_s1 + $0x6] ss:$0 sm:$0xff] }
 0x3a1   : > { %v21435_v12 = vrot.slane %v18765_v53, 6  ;;  %v21434_v27 = vrot.slane %v18771_v45, 7  ;;  %6709 = vst.msk [vmem:[#allocation2 + $0x75] sm:$0xff] %vm385_vm6, %v6706_v17  ;;  %v1913_v33 = vadd.f32 %v1688_v44, %v18706_v11  ;;  %v18792_v43 = vmul.f32 %v18789_v42, %v998_v2  ;;  %v6390_v3 = vld [vmem:[#allocation4 + $0x1c0] ss:$2 sm:$0xff] }
 0x3a2   : > { %v6205_v36 = vmax.f32 %v6100_v8, 0.0  ;;  %6710 = vst.msk [vmem:[#allocation2 + $0x7d] sm:$0x3] %vm6649_vm11, %v6707_v60  ;;  %v18800_v38 = vmul.f32 %v18797_v51, %v998_v2  ;;  %v18803_v23 = vmul.f32 %v18549_v5, %v998_v2  ;;  %v3952_v6 = vmul.f32 %v18600_v13, %v998_v2 }
 0x3a3   : > { %21790 = vst [vmem:[#allocation12_spill] sm:$0xff] %v18792_v43  ;;  %v2975_v11 = vsel %vm2800_vm2, %v2972_v32, %v21435_v12  ;;  %v18817_v1 = vmul.f32 %v18814_v40, %v998_v2  ;;  %v2327_v58 = vsel %vm2146_vm1, %v2324_v16, %v21436_v4  ;;  %v21433_v24 = vrot.slane %v18792_v43, 4  ;;  %v1018_v12 = vpop.permute.xlu1 %1017 }
 0x3a4   : > { %21791 = vst [vmem:[#allocation27_spill] sm:$0xff] %v18800_v38  ;;  %6310 = vst.msk [vmem:[#allocation4 + $0x288] sm:$0xff] %vm385_vm6, %v6205_v36  ;;  %v3203_v32 = vadd.f32 %v2975_v11, %v18662_v25  ;;  %v21432_v9 = vrot.slane %v18800_v38, 5  ;;  %v3614_v2 = vsel %vm3439_vm3, %v3611_v35, %v21434_v27  ;;  %v18835_v49 = vmul.f32 %v18585_v15, %v1008_v21  ;;  %v6498_v36 = vld [vmem:[#allocation4 + $0x1d1] ss:$2 sm:$0xff] }
 0x3a5   : > { %21792 = vst [vmem:[#allocation24_spill] sm:$0xff] %v18817_v1  ;;  %v21431_v20 = vrot.slane %v18817_v1, 6  ;;  %v18838_v10 = vmul.f32 %v18520_v56, %v1008_v21  ;;  %v2552_v16 = vadd.f32 %v2327_v58, %v1913_v33  ;;  %v4480_v52 = vsel %vm4313_vm4, %v4477_v54, %v21433_v24  ;;  %v6496_v54 = vld [vmem:[#allocation4 + $0x1c1] ss:$2 sm:$0xff]  ;;  %v1013_v33 = vpop.permute.xlu0 %1012 }
 0x3a6   : > { %v3842_v25 = vadd.f32 %v3614_v2, %v3203_v32  ;;  %v18846_v63 = vmul.f32 %v18529_v62, %v1008_v21  ;;  %v4712_v35 = vadd.f32 %v4480_v52, %v18648_v57  ;;  %v5119_v19 = vsel %vm4952_vm5, %v5116_v31, %v21432_v9  ;;  %v6494_v31 = vld [vmem:[#allocation4 + $0x1b1] ss:$2 sm:$0xff] }
 0x3a7   : > { %v5757_v46 = vsel %vm2800_vm2, %v5754_v28, %v21431_v20  ;;  %v1167_v55 = vmul.f32 %v18549_v5, %v1008_v21  ;;  %v21442_v18 = vrot.slane %v18835_v49, 1  ;;  %v21440_v57 = vrot.slane %v18838_v10, 2 }
 0x3a8   : > { %v18858_v14 = vadd.f32 %v3952_v6, %v3842_v25  ;;  %v18863_v37 = vmul.f32 %v18559_v7, %v1008_v21  ;;  %v6872_v47 = vld [vmem:[#allocation2 + $0x71] sm:$0xff]  ;;  %v5351_v17 = vadd.f32 %v5119_v19, %v4712_v35  ;;  %v21437_v28 = vrot.slane %v18846_v63, 6 }
 0x3a9   : > { %v6873_v8 = vld [vmem:[#allocation2 + $0x79] sm:$0xff]  ;;  %v18867_v60 = vmul.f32 %v18789_v42, %v1008_v21  ;;  %v18870_v44 = vmul.f32 %v18797_v51, %v1008_v21  ;;  %v18873_v6 = vmul.f32 %v18600_v13, %v1008_v21  ;;  %v18876_v58 = vmul.f32 %v18814_v40, %v1008_v21 }
 0x3aa   : > { %v6893_v11 = vpack.c.bf16 %v6873_v8, %v6872_v47  ;;  %v6573_v32 = vmax.f32 %v6390_v3, %v6496_v54  ;;  %v5989_v2 = vadd.f32 %v5757_v46, %v5351_v17  ;;  %v21439_v25 = vrot.slane %v18863_v37, 7 }
 0x3ab   : > { %21793 = vst [vmem:[#allocation20_spill] sm:$0xff] %v18867_v60  ;;  %21794 = vst [vmem:[#allocation21_spill] sm:$0xff] %v18870_v44  ;;  %v21438_v52 = vrot.slane %v18867_v60, 4  ;;  %v6572_v35 = vmax.f32 %v6388_v61, %v6494_v31  ;;  %v21441_v19 = vrot.slane %v18870_v44, 5  ;;  %v6574_v20 = vmax.f32 %v6392_v41, %v6498_v36  ;;  %v6502_v44 = vld [vmem:[#allocation4 + $0x1f1] ss:$2 sm:$0xff] }
 0x3ac   : > { %21795 = vst [vmem:[#allocation23_spill] sm:$0xff] %v18873_v6  ;;  %21796 = vst [vmem:[#allocation11_spill] sm:$0xff] %v18876_v58  ;;  %13080 = vmatmul.mubr.msk.bf16.gmra.mrb[12].mxu0 %vm385_vm6, %v6893_v11  ;;  %v6713_v9 = vrot.slane %v6573_v32, 7  ;;  %v1388_v47 = vmul.f32 %v18585_v15, %v1013_v33  ;;  %v6101_v8 = vadd.f32 %v18536_v30, %v5989_v2  ;;  %v21443_v54 = vrot.slane %v18876_v58, 6 }
 0x3ad   : > { %v2027_v21 = vmul.f32 %v18520_v56, %v1013_v33  ;;  %v2678_v3 = vmul.f32 %v18529_v62, %v1013_v33  ;;  %v18887_v46 = vmul.f32 %v18559_v7, %v1013_v33  ;;  %v6714_v61 = vrot.slane %v6574_v20, 7 }
 0x3ae   : > { %v6718_v31 = vmax.f32 %v18752_v48, %v6713_v9  ;;  %v1693_v17 = vrot.slane %v1388_v47, 1  ;;  %v6206_v11 = vmax.f32 %v6101_v8, 0.0  ;;  %v4187_v27 = vmul.f32 %v18789_v42, %v1013_v33 }
 0x3af   : > { %v2332_v41 = vrot.slane %v2027_v21, 2  ;;  %v2980_v36 = vrot.slane %v2678_v3, 6  ;;  %v3619_v32 = vrot.slane %v18887_v46, 7  ;;  %v6715_v2 = vsel %vm3439_vm3, %v6713_v9, %v6714_v61 }
 0x3b0   : > { %6720 = vst.msk [vmem:[#allocation2 + $0x7f] sm:$0xfc] %vm6660_vm12, %v6718_v31  ;;  %v1694_v24 = vsel %vm1507_vm0, %v21442_v18, %v1693_v17  ;;  %v4826_v20 = vmul.f32 %v18797_v51, %v1013_v33  ;;  %v6719_v48 = vmax.f32 %v6572_v35, %v6715_v2  ;;  %v1168_v47 = vmul.f32 %v18549_v5, %v1013_v33 }
 0x3b1   : > { %6311 = vst.msk [vmem:[#allocation4 + $0x290] sm:$0xff] %vm385_vm6, %v6206_v11  ;;  %v1916_v8 = vadd.f32 %v1694_v24, %v1167_v55  ;;  %v2981_v9 = vsel %vm2800_vm2, %v21437_v28, %v2980_v36  ;;  %v3955_v3 = vmul.f32 %v18600_v13, %v1013_v33  ;;  %v4485_v61 = vrot.slane %v4187_v27, 4 }
 0x3b2   : > { %v3206_v21 = vadd.f32 %v2981_v9, %v2552_v16  ;;  %v5124_v31 = vrot.slane %v4826_v20, 5  ;;  %6721 = vst.msk [vmem:[#allocation2 + $0x87] sm:$0xff] %vm385_vm6, %v6719_v48  ;;  %v2333_v4 = vsel %vm2146_vm1, %v21440_v57, %v2332_v41  ;;  %v3620_v24 = vsel %vm3439_vm3, %v21439_v25, %v3619_v32 }
 0x3b3   : > { %v5465_v55 = vmul.f32 %v18814_v40, %v1013_v33  ;;  %v1389_v16 = vmul.f32 %v18585_v15, %v1018_v12  ;;  %v18916_v35 = vadd.f32 %v2333_v4, %v1916_v8  ;;  %v4486_v11 = vsel %vm4313_vm4, %v21438_v52, %v4485_v61 }
 0x3b4   : > { %v3845_v27 = vadd.f32 %v3620_v24, %v3206_v21  ;;  %v2028_v2 = vmul.f32 %v18520_v56, %v1018_v12  ;;  %v4715_v20 = vadd.f32 %v4486_v11, %v18777_v39  ;;  %v2679_v28 = vmul.f32 %v18529_v62, %v1018_v12 }
 0x3b5   : > { %v5762_v48 = vrot.slane %v5465_v55, 6  ;;  %v1695_v9 = vrot.slane %v1389_v16, 1  ;;  %v5125_v33 = vsel %vm4952_vm5, %v21441_v19, %v5124_v31  ;;  %v1169_v4 = vmul.f32 %v18549_v5, %v1018_v12 }
 0x3b6   : > { %v2334_v8 = vrot.slane %v2028_v2, 2  ;;  %v3318_v21 = vmul.f32 %v18559_v7, %v1018_v12  ;;  %v18929_v24 = vadd.f32 %v3955_v3, %v3845_v27  ;;  %v5354_v52 = vadd.f32 %v5125_v33, %v4715_v20  ;;  %v1023_v27 = vpop.permute.xlu0 %1022 }
 0x3b7   : > { %v1696_v25 = vsel %vm1507_vm0, %v1693_v17, %v1695_v9  ;;  %v2982_v57 = vrot.slane %v2679_v28, 6  ;;  %v5763_v39 = vsel %vm2800_vm2, %v21443_v54, %v5762_v48  ;;  %v18937_v11 = vmul.f32 %v18789_v42, %v1018_v12 }
 0x3b8   : > { %v1917_v55 = vadd.f32 %v1696_v25, %v1168_v47  ;;  %v2335_v16 = vsel %vm2146_vm1, %v2332_v41, %v2334_v8  ;;  %v5992_v19 = vadd.f32 %v5763_v39, %v5354_v52  ;;  %v3621_v2 = vrot.slane %v3318_v21, 7 }
 0x3b9   : > { %v4827_v18 = vmul.f32 %v18797_v51, %v1018_v12  ;;  %v18941_v3 = vmul.f32 %v18814_v40, %v1018_v12  ;;  %v6874_v17 = vld [vmem:[#allocation2 + $0x81] sm:$0xff]  ;;  %v6875_v28 = vld [vmem:[#allocation2 + $0x89] sm:$0xff]  ;;  %v18946_v33 = vsel %vm2800_vm2, %v2980_v36, %v2982_v57  ;;  %v18949_v25 = vmul.f32 %v18600_v13, %v1018_v12 }
 0x3ba   : > { %v18943_v20 = vadd.f32 %v2335_v16, %v1917_v55  ;;  %v21444_v41 = vrot.slane %v18937_v11, 4  ;;  %v6894_v52 = vpack.c.bf16 %v6875_v28, %v6874_v17  ;;  %v6104_v47 = vadd.f32 %v18536_v30, %v5992_v19 }
 0x3bb   : > { %21797 = vst [vmem:[#allocation15_spill] sm:$0xff] %v18949_v25  ;;  %v5126_v21 = vrot.slane %v4827_v18, 5  ;;  %v5764_v39 = vrot.slane %v18941_v3, 6  ;;  %v1390_v55 = vmul.f32 %v18585_v15, %v1023_v27  ;;  %v2029_v36 = vmul.f32 %v18520_v56, %v1023_v27 }
 0x3bc   : > { %v4488_v54 = vsel %vm4313_vm4, %v4485_v61, %v21444_v41  ;;  %v2680_v16 = vmul.f32 %v18529_v62, %v1023_v27  ;;  %13083 = vmatprep.mubr.msk.bf16.mxu0 %vm385_vm6, %v6894_v52  ;;  %v6209_v12 = vmax.f32 %v6104_v47, 0.0  ;;  %v18964_v19 = vsel %vm3439_vm3, %v3619_v32, %v3621_v2  ;;  %v1028_v32 = vpop.permute.xlu1 %1027 }
 0x3bd   : > { %21798 = vst [vmem:[#allocation19_spill] sm:$0xff] %v18964_v19  ;;  %v4716_v18 = vadd.f32 %v4488_v54, %v18858_v14  ;;  %v5127_v3 = vsel %vm4952_vm5, %v5124_v31, %v5126_v21  ;;  %v1697_v17 = vrot.slane %v1390_v55, 1  ;;  %v2336_v61 = vrot.slane %v2029_v36, 2 }
 0x3be   : > { %v2984_v28 = vrot.slane %v2680_v16, 6  ;;  %v3319_v41 = vmul.f32 %v18559_v7, %v1023_v27  ;;  %6314 = vst.msk [vmem:[#allocation4 + $0x2a8] sm:$0xff] %vm385_vm6, %v6209_v12  ;;  %v1170_v52 = vmul.f32 %v18549_v5, %v1023_v27  ;;  %v18972_v47 = vmul.f32 %v18789_v42, %v1023_v27 }
 0x3bf   : > { %v5355_v22 = vadd.f32 %v5127_v3, %v4716_v18  ;;  %v4828_v46 = vmul.f32 %v18797_v51, %v1023_v27  ;;  %v5765_v14 = vsel %vm2800_vm2, %v5762_v48, %v5764_v39  ;;  %v1698_v54 = vsel %vm1507_vm0, %v1695_v9, %v1697_v17  ;;  %v6396_v3 = vld [vmem:[#allocation4 + $0x1f0] ss:$2 sm:$0xff] }
 0x3c0   : > { %v3623_v31 = vrot.slane %v3319_v41, 7  ;;  %v18978_v55 = vmul.f32 %v18600_v13, %v1023_v27  ;;  %v1918_v16 = vadd.f32 %v1698_v54, %v1169_v4  ;;  %v2337_v12 = vsel %vm2146_vm1, %v2334_v8, %v2336_v61 }
 0x3c1   : > { %v5993_v36 = vadd.f32 %v5765_v14, %v5355_v22  ;;  %v18982_v18 = vsel %vm2800_vm2, %v2982_v57, %v2984_v28  ;;  %v5128_v58 = vrot.slane %v4828_v46, 5  ;;  %v5467_v1 = vmul.f32 %v18814_v40, %v1023_v27 }
 0x3c2   : > { %21799 = vst [vmem:[#allocation10_spill] sm:$0xff] %v18978_v55  ;;  %21800 = vst [vmem:[#allocation18_spill] sm:$0xff] %v18982_v18  ;;  %v18987_v48 = vmul.f32 %v18585_v15, %v1028_v32  ;;  %v18991_v41 = vsel %vm3439_vm3, %v3621_v2, %v3623_v31  ;;  %v18994_v22 = vmul.f32 %v18549_v5, %v1028_v32  ;;  %v6398_v55 = vld [vmem:[#allocation4 + $0x200] ss:$2 sm:$0xff] }
 0x3c3   : > { %v6105_v9 = vadd.f32 %v18536_v30, %v5993_v36  ;;  %21801 = vst [vmem:[#allocation26_spill] sm:$0xff] %v18991_v41  ;;  %v18997_v4 = vmul.f32 %v18520_v56, %v1028_v32  ;;  %v5766_v57 = vrot.slane %v5467_v1, 6  ;;  %v19001_v46 = vmul.f32 %v18529_v62, %v1028_v32  ;;  %v6504_v1 = vld [vmem:[#allocation4 + $0x201] ss:$2 sm:$0xff] }
 0x3c4   : > { %v1699_v8 = vrot.slane %v18987_v48, 1  ;;  %v19004_v27 = vmul.f32 %v18559_v7, %v1028_v32  ;;  %v19006_v54 = vadd.f32 %v2337_v12, %v1918_v16  ;;  %v19010_v36 = vmul.f32 %v18789_v42, %v1028_v32  ;;  %v6394_v16 = vld [vmem:[#allocation4 + $0x1e0] ss:$2 sm:$0xff]  ;;  %v6500_v12 = vld [vmem:[#allocation4 + $0x1e1] ss:$2 sm:$0xff] }
 0x3c5   : > { %v6210_v14 = vmax.f32 %v6105_v9, 0.0  ;;  %v19013_v48 = vsel %vm4952_vm5, %v5126_v21, %v5128_v58  ;;  %v2986_v25 = vrot.slane %v19001_v46, 6  ;;  %v3958_v29 = vmul.f32 %v18600_v13, %v1028_v32  ;;  %v6400_v21 = vld [vmem:[#allocation4 + $0x210] ss:$2 sm:$0xff] }
 0x3c6   : > { %21802 = vst [vmem:[#allocation13_spill] sm:$0xff] %v19013_v48  ;;  %v1700_v38 = vsel %vm1507_vm0, %v1697_v17, %v1699_v8  ;;  %v3625_v9 = vrot.slane %v19004_v27, 7  ;;  %v4491_v59 = vrot.slane %v19010_v36, 4  ;;  %v19022_v6 = vmul.f32 %v18797_v51, %v1028_v32  ;;  %v6506_v48 = vld [vmem:[#allocation4 + $0x211] ss:$2 sm:$0xff] }
 0x3c7   : > { %6315 = vst.msk [vmem:[#allocation4 + $0x2b0] sm:$0xff] %vm385_vm6, %v6210_v14  ;;  %v1919_v2 = vadd.f32 %v1700_v38, %v1170_v52  ;;  %v19025_v17 = vsel %vm2800_vm2, %v5764_v39, %v5766_v57  ;;  %v21804_v46 = vrot.slane %v18997_v4, 2  ;;  %v2987_v41 = vsel %vm2800_vm2, %v2984_v28, %v2986_v25  ;;  %v1033_v52 = vpop.permute.xlu0 %1032 }
 0x3c8   : > { %21803 = vst [vmem:[#allocation22_spill] sm:$0xff] %v19025_v17  ;;  %v19032_v38 = vmul.f32 %v18814_v40, %v1028_v32  ;;  %v3209_v14 = vadd.f32 %v2987_v41, %v18916_v35  ;;  %v3626_v36 = vsel %vm3439_vm3, %v3623_v31, %v3625_v9  ;;  %v5130_v19 = vrot.slane %v19022_v6, 5 }
 0x3c9   : > { %v2339_v27 = vsel %vm2146_vm1, %v2336_v61, %v21804_v46  ;;  %v6575_v60 = vmax.f32 %v6394_v16, %v6500_v12  ;;  %v6576_v17 = vmax.f32 %v6396_v3, %v6502_v44  ;;  %v6577_v43 = vmax.f32 %v6398_v55, %v6504_v1 }
 0x3ca   : > { %v5768_v39 = vrot.slane %v19032_v38, 6  ;;  %v19038_v18 = vmax.f32 %v6400_v21, %v6506_v48  ;;  %v19040_v61 = vadd.f32 %v2339_v27, %v1919_v2  ;;  %v3848_v28 = vadd.f32 %v3626_v36, %v3209_v14 }
 0x3cb   : > { %v21805_v32 = vrot.slane %v18972_v47, 4  ;;  %v1392_v35 = vmul.f32 %v18585_v15, %v1033_v52  ;;  %v19049_v31 = vsel %vm4952_vm5, %v5128_v58, %v5130_v19  ;;  %v6725_v6 = vrot.slane %v6576_v17, 7 }
 0x3cc   : > { %v6726_v41 = vrot.slane %v6577_v43, 7  ;;  %v6728_v44 = vrot.slane %v19038_v18, 7  ;;  %v1172_v55 = vmul.f32 %v18549_v5, %v1033_v52  ;;  %v19054_v2 = vmul.f32 %v18520_v56, %v1033_v52 }
 0x3cd   : > { %v19045_v46 = vsel %vm4313_vm4, %v21805_v32, %v4491_v59  ;;  %v1701_v3 = vrot.slane %v1392_v35, 1  ;;  %v2682_v1 = vmul.f32 %v18529_v62, %v1033_v52  ;;  %v19058_v48 = vsel %vm2800_vm2, %v5766_v57, %v5768_v39  ;;  %v1038_v57 = vpop.permute.xlu1 %1037 }
 0x3ce   : > { %v6727_v16 = vsel %vm3439_vm3, %v6725_v6, %v6726_v41  ;;  %v6729_v58 = vsel %vm3439_vm3, %v6726_v41, %v6728_v44  ;;  %v3321_v12 = vmul.f32 %v18559_v7, %v1033_v52  ;;  %v2340_v38 = vrot.slane %v19054_v2, 2 }
 0x3cf   : > { %v6732_v43 = vmax.f32 %v6575_v60, %v6727_v16  ;;  %v6733_v21 = vmax.f32 %v6576_v17, %v6729_v58  ;;  %v1702_v27 = vsel %vm1507_vm0, %v1699_v8, %v1701_v3  ;;  %v19065_v14 = vadd.f32 %v3958_v29, %v3848_v28 }
 0x3d0   : > { %v2988_v36 = vrot.slane %v2682_v1, 6  ;;  %v3627_v32 = vrot.slane %v3321_v12, 7  ;;  %v4191_v35 = vmul.f32 %v18789_v42, %v1033_v52  ;;  %v1920_v6 = vadd.f32 %v1702_v27, %v18994_v22 }
 0x3d1   : > { %6734 = vst.msk [vmem:[#allocation2 + $0x91] sm:$0xff] %vm385_vm6, %v6732_v43  ;;  %v3959_v60 = vmul.f32 %v18600_v13, %v1033_v52  ;;  %v19073_v17 = vmul.f32 %v18797_v51, %v1033_v52  ;;  %v19076_v8 = vmul.f32 %v18814_v40, %v1033_v52  ;;  %v21806_v29 = vrot.slane %v18997_v4, 2 }
 0x3d2   : > { %6735 = vst.msk [vmem:[#allocation2 + $0x99] sm:$0x3f] %vm6611_vm7, %v6733_v21  ;;  %v2989_v41 = vsel %vm2800_vm2, %v2986_v25, %v2988_v36  ;;  %v3628_v44 = vsel %vm3439_vm3, %v3625_v9, %v3627_v32  ;;  %v4493_v2 = vrot.slane %v4191_v35, 4  ;;  %v19087_v58 = vmul.f32 %v18585_v15, %v1038_v57 }
 0x3d3   : > { %v2341_v28 = vsel %vm2146_vm1, %v21806_v29, %v2340_v38  ;;  %v3210_v1 = vadd.f32 %v2989_v41, %v18943_v20  ;;  %v21453_v22 = vrot.slane %v19073_v17, 5  ;;  %v21452_v16 = vrot.slane %v19076_v8, 6 }
 0x3d4   : > { %v4494_v52 = vsel %vm4313_vm4, %v4491_v59, %v4493_v2  ;;  %v19091_v4 = vmul.f32 %v18520_v56, %v1038_v57  ;;  %v19094_v12 = vmul.f32 %v18529_v62, %v1038_v57  ;;  %v19097_v25 = vmul.f32 %v18559_v7, %v1038_v57 }
 0x3d5   : > { %v19099_v9 = vadd.f32 %v2341_v28, %v1920_v6  ;;  %v3849_v20 = vadd.f32 %v3628_v44, %v3210_v1  ;;  %v4719_v43 = vadd.f32 %v4494_v52, %v18929_v24  ;;  %v19103_v21 = vmul.f32 %v18549_v5, %v1038_v57 }
 0x3d6   : > { %v5133_v59 = vsel %vm4952_vm5, %v5130_v19, %v21453_v22  ;;  %v21454_v27 = vrot.slane %v19087_v58, 1  ;;  %v2990_v35 = vrot.slane %v19094_v12, 6  ;;  %v5771_v6 = vsel %vm2800_vm2, %v5768_v39, %v21452_v16  ;;  %v1003_v39 = vpop.permute.xlu0 %1002 }
 0x3d7   : > { %21807 = vst [vmem:[#allocation25_spill] sm:$0xff] %v19103_v21  ;;  %v5358_v41 = vadd.f32 %v5133_v59, %v4719_v43  ;;  %v19116_v28 = vmul.f32 %v18789_v42, %v1038_v57  ;;  %v19118_v52 = vadd.f32 %v3959_v60, %v3849_v20  ;;  %v3960_v59 = vmul.f32 %v18600_v13, %v1038_v57 }
 0x3d8   : > { %v6876_v44 = vld [vmem:[#allocation2 + $0x91] sm:$0xff]  ;;  %v1704_v19 = vsel %vm1507_vm0, %v1701_v3, %v21454_v27  ;;  %v2991_v43 = vsel %vm2800_vm2, %v2988_v36, %v2990_v35  ;;  %v21808_v21 = vrot.slane %v19097_v25, 7  ;;  %v19133_v3 = vmul.f32 %v18797_v51, %v1038_v57 }
 0x3d9   : > { %v6877_v1 = vld [vmem:[#allocation2 + $0x99] sm:$0xff]  ;;  %v5996_v22 = vadd.f32 %v5771_v6, %v5358_v41  ;;  %v1921_v24 = vadd.f32 %v1704_v19, %v1172_v55  ;;  %v3211_v29 = vadd.f32 %v2991_v43, %v19006_v54  ;;  %v4495_v20 = vrot.slane %v19116_v28, 4 }
 0x3da   : > { %v6895_v16 = vpack.c.bf16 %v6877_v1, %v6876_v44  ;;  %v3630_v60 = vsel %vm3439_vm3, %v3627_v32, %v21808_v21  ;;  %v19136_v27 = vmul.f32 %v18814_v40, %v1038_v57  ;;  %v21809_v55 = vrot.slane %v19091_v4, 2 }
 0x3db   : > { %v6108_v36 = vadd.f32 %v18536_v30, %v5996_v22  ;;  %v3850_v41 = vadd.f32 %v3630_v60, %v3211_v29  ;;  %v1386_v6 = vmul.f32 %v18585_v15, %v1003_v39  ;;  %v4496_v21 = vsel %vm4313_vm4, %v4493_v2, %v4495_v20 }
 0x3dc   : > { %13084 = vmatmul.mubr.msk.bf16.gmra.mrb[16].mxu0 %vm385_vm6, %v6895_v16  ;;  %v2343_v54 = vsel %vm2146_vm1, %v2340_v38, %v21809_v55  ;;  %v1166_v57 = vmul.f32 %v18549_v5, %v1003_v39  ;;  %v2025_v44 = vmul.f32 %v18520_v56, %v1003_v39  ;;  %v5134_v30 = vrot.slane %v19133_v3, 5 }
 0x3dd   : > { %v19144_v32 = vadd.f32 %v2343_v54, %v1921_v24  ;;  %v6213_v16 = vmax.f32 %v6108_v36, 0.0  ;;  %v1689_v22 = vrot.slane %v1386_v6, 1  ;;  %v2676_v1 = vmul.f32 %v18529_v62, %v1003_v39 }
 0x3de   : > { %v19153_v38 = vadd.f32 %v3960_v59, %v3850_v41  ;;  %v5772_v15 = vrot.slane %v19136_v27, 6  ;;  %v2328_v29 = vrot.slane %v2025_v44, 2  ;;  %v3315_v24 = vmul.f32 %v18559_v7, %v1003_v39 }
 0x3df   : > { %6318 = vst.msk [vmem:[#allocation4 + $0x2c8] sm:$0xff] %vm385_vm6, %v6213_v16  ;;  %v21810_v2 = vrot.slane %v18756_v50, 1  ;;  %v21811_v56 = vrot.slane %v18835_v49, 1  ;;  %v2976_v43 = vrot.slane %v2676_v1, 6  ;;  %v3953_v62 = vmul.f32 %v18600_v13, %v1003_v39 }
 0x3e0   : > { %v21812_v36 = vrot.slane %v18762_v34, 2  ;;  %v21813_v55 = vrot.slane %v18838_v10, 2  ;;  %v21814_v54 = vrot.slane %v18765_v53, 6  ;;  %v21815_v41 = vrot.slane %v18846_v63, 6  ;;  %v13876_v34 = vld [vmem:[%s21277_s3 + $0x8] sm:$0xff]  }
 0x3e1   : > { %v1690_v5 = vsel %vm1507_vm0, %v21810_v2, %v1689_v22  ;;  %v1692_v19 = vsel %vm1507_vm0, %v1689_v22, %v21811_v56  ;;  %v3615_v13 = vrot.slane %v3315_v24, 7  ;;  %v21816_v53 = vrot.slane %v18771_v45, 7  ;;  %13097 = vmatprep.subr.bf16.mxu0 %v13876_v34  ;;  %v21820_v45 = vld [vmem:[#allocation18_spill] sm:$0xff] }
 0x3e2   : > { %v1914_v59 = vadd.f32 %v1690_v5, %v18803_v23  ;;  %v1915_v60 = vadd.f32 %v1692_v19, %v1166_v57  ;;  %v2329_v7 = vsel %vm2146_vm1, %v21812_v36, %v2328_v29  ;;  %v2331_v50 = vsel %vm2146_vm1, %v2328_v29, %v21813_v55  ;;  %13098 = vmatpush3.bf16.msra.mxu0 %v13876_v34 }
 0x3e3   : > { %v2977_v49 = vsel %vm2800_vm2, %v21814_v54, %v2976_v43  ;;  %v2979_v6 = vsel %vm2800_vm2, %v2976_v43, %v21815_v41  ;;  %v4185_v23 = vmul.f32 %v18789_v42, %v1003_v39  ;;  %v3616_v22 = vsel %vm3439_vm3, %v21816_v53, %v3615_v13  ;;  %v21821_v43 = vld [vmem:[#allocation12_spill] sm:$0xff]  ;;  %v21826_v54 = vld [vmem:[#allocation26_spill] sm:$0xff] }
 0x3e4   : > { %v2553_v57 = vadd.f32 %v2329_v7, %v1914_v59  ;;  %v2554_v44 = vadd.f32 %v2331_v50, %v1915_v60  ;;  %v3204_v10 = vadd.f32 %v2977_v49, %v18688_v0  ;;  %v3205_v16 = vadd.f32 %v2979_v6, %v18745_v26  ;;  %v13877_v0 = vld [vmem:[%s21277_s3 + $0x20] sm:$0xff]   ;;  %v21823_v60 = vld [vmem:[#allocation20_spill] sm:$0xff] }
 0x3e5   : > { %v21817_v63 = vrot.slane %v18863_v37, 7  ;;  %v4481_v29 = vrot.slane %v4185_v23, 4  ;;  %v21818_v24 = vrot.slane %v18972_v47, 4  ;;  %v21819_v2 = vrot.slane %v18937_v11, 4  ;;  %13127 = vmatprep.subr.bf16.mxu0 %v13877_v0  ;;  %v21825_v50 = vld [vmem:[#allocation19_spill] sm:$0xff]  ;;  %v21828_v23 = vld [vmem:[#allocation16_spill] sm:$0xff] }
 0x3e6   : > { %v3207_v26 = vadd.f32 %v18946_v33, %v2553_v57  ;;  %v3208_v56 = vadd.f32 %v21820_v45, %v2554_v44  ;;  %v3843_v19 = vadd.f32 %v3616_v22, %v3204_v10  ;;  %v21822_v59 = vrot.slane %v21821_v43, 4  ;;  %v21827_v6 = vld [vmem:[#allocation23_spill] sm:$0xff]  ;;  %v21829_v57 = vld [vmem:[#allocation17_spill] sm:$0xff] }
 0x3e7   : > { %v3618_v1 = vsel %vm3439_vm3, %v3615_v13, %v21817_v63  ;;  %v4490_v5 = vsel %vm4313_vm4, %v21819_v2, %v21818_v24  ;;  %v21824_v11 = vrot.slane %v21823_v60, 4  ;;  %v4824_v7 = vmul.f32 %v18797_v51, %v1003_v39  ;;  %v21831_v22 = vld [vmem:[#allocation15_spill] sm:$0xff] }
 0x3e8   : > { %v3844_v37 = vadd.f32 %v3618_v1, %v3205_v16  ;;  %v4482_v47 = vsel %vm4313_vm4, %v21822_v59, %v4481_v29  ;;  %v5463_v55 = vmul.f32 %v18814_v40, %v1003_v39  ;;  %v3846_v33 = vadd.f32 %v21825_v50, %v3207_v26  ;;  %v21833_v0 = vld [vmem:[#allocation27_spill] sm:$0xff] }
 0x3e9   : > { %v4484_v36 = vsel %vm4313_vm4, %v4481_v29, %v21824_v11  ;;  %v3847_v49 = vadd.f32 %v21826_v54, %v3208_v56  ;;  %v4058_v41 = vadd.f32 %v3953_v62, %v3843_v19  ;;  %v4713_v34 = vadd.f32 %v4482_v47, %v21828_v23  ;;  %v1043_v62 = vpop.permute.xlu1 %1042  ;;  %v21835_v56 = vld [vmem:[#allocation21_spill] sm:$0xff]  ;;  %v21839_v11 = vld [vmem:[#allocation24_spill] sm:$0xff]  ;;  %v19245_v54 = vld [vmem:[%s21275_s1 + $0x1] ss:$0 sm:$0xff] }
 0x3ea   : > { %v4059_v13 = vadd.f32 %v21827_v6, %v3844_v37  ;;  %v4714_v44 = vadd.f32 %v4484_v36, %v21829_v57  ;;  %v5120_v10 = vrot.slane %v4824_v7, 5  ;;  %v5758_v16 = vrot.slane %v5463_v55, 6  ;;  %v21837_v37 = vld [vmem:[#allocation10_spill] sm:$0xff]  ;;  %v21838_v47 = vld [vmem:[#allocation13_spill] sm:$0xff]  ;;  %v21841_v55 = vld [vmem:[#allocation11_spill] sm:$0xff]  ;;  %21843 = vst [vmem:[#allocation14_spill] sm:$0xff] %v19245_v54 }
 0x3eb   : > { %v21830_v53 = vrot.slane %v19073_v17, 5  ;;  %v4061_v63 = vadd.f32 %v21831_v22, %v3846_v33  ;;  %v4717_v1 = vadd.f32 %v4490_v5, %v4058_v41  ;;  %v21832_v24 = vrot.slane %v19076_v8, 6 }
 0x3ec   : > { %v4718_v29 = vadd.f32 %v19045_v46, %v4059_v13  ;;  %v21834_v26 = vrot.slane %v21833_v0, 5  ;;  %v21836_v17 = vrot.slane %v21835_v56, 5  ;;  %v19232_v43 = vadd.f32 %v21837_v37, %v3847_v49  ;;  %v1048_v37 = vpop.permute.xlu0 %1047 }
 0x3ed   : > { %v5135_v39 = vsel %vm4952_vm5, %v21830_v53, %v5134_v30  ;;  %v5773_v2 = vsel %vm2800_vm2, %v21832_v24, %v5772_v15  ;;  %v4720_v5 = vadd.f32 %v4496_v21, %v4061_v63  ;;  %v5356_v60 = vadd.f32 %v21838_v47, %v4717_v1 }
 0x3ee   : > { %v5121_v45 = vsel %vm4952_vm5, %v21834_v26, %v5120_v10  ;;  %v5123_v19 = vsel %vm4952_vm5, %v5120_v10, %v21836_v17  ;;  %v5357_v8 = vadd.f32 %v19049_v31, %v4718_v29  ;;  %v21840_v36 = vrot.slane %v21839_v11, 6  ;;  %v21844_v31 = vld [vmem:[#allocation22_spill] sm:$0xff] }
 0x3ef   : > { %v5352_v46 = vadd.f32 %v5121_v45, %v4713_v34  ;;  %v5353_v59 = vadd.f32 %v5123_v19, %v4714_v44  ;;  %v21842_v50 = vrot.slane %v21841_v55, 6  ;;  %v19248_v21 = vmul.f32 %v19245_v54, %v1043_v62  ;;  %v19255_v34 = vld [vmem:[%s21275_s1] ss:$0 sm:$0xff]  ;;  %v19263_v44 = vld [vmem:[%s21275_s1 + $0x2] ss:$0 sm:$0xff] }
 0x3f0   : > { %v5759_v7 = vsel %vm2800_vm2, %v21840_v36, %v5758_v16  ;;  %v5359_v49 = vadd.f32 %v5135_v39, %v4720_v5  ;;  %v5994_v13 = vadd.f32 %v21844_v31, %v5356_v60  ;;  %v5995_v23 = vadd.f32 %v19058_v48, %v5357_v8  ;;  %v19271_v48 = vld [vmem:[%s21275_s1 + $0x3] ss:$0 sm:$0xff]  ;;  %v19277_v39 = vld [vmem:[%s21276_s2] ss:$0 sm:$0xff] }
 0x3f1   : > { %v5761_v33 = vsel %vm2800_vm2, %v5758_v16, %v21842_v50  ;;  %v5990_v41 = vadd.f32 %v5759_v7, %v5352_v46  ;;  %v19258_v57 = vmul.f32 %v19255_v34, %v1043_v62  ;;  %v19266_v10 = vmul.f32 %v19263_v44, %v1043_v62  ;;  %21845 = vst [vmem:[#allocation18_spill] sm:$0xff] %v19271_v48 }
 0x3f2   : > { %v5991_v6 = vadd.f32 %v5761_v33, %v5353_v59  ;;  %v2684_v16 = vmul.f32 %v19271_v48, %v1043_v62  ;;  %v5997_v53 = vadd.f32 %v5773_v2, %v5359_v49  ;;  %v6106_v1 = vadd.f32 %v19277_v39, %v5994_v13  ;;  %v19287_v2 = vld [vmem:[%s21275_s1 + $0x4] ss:$0 sm:$0xff] }
 0x3f3   : > { %v6102_v22 = vadd.f32 %v19277_v39, %v5990_v41  ;;  %v6107_v29 = vadd.f32 %v19277_v39, %v5995_v23  ;;  %v3323_v26 = vmul.f32 %v19287_v2, %v1043_v62  ;;  %v4193_v47 = vmul.f32 %v18789_v42, %v1043_v62 }
 0x3f4   : > { %v6103_v63 = vadd.f32 %v19277_v39, %v5991_v6  ;;  %v2992_v0 = vrot.slane %v2684_v16, 6  ;;  %v6109_v45 = vadd.f32 %v19277_v39, %v5997_v53  ;;  %v6211_v19 = vmax.f32 %v6106_v1, 0.0 }
 0x3f5   : > { %v6207_v56 = vmax.f32 %v6102_v22, 0.0  ;;  %v6212_v5 = vmax.f32 %v6107_v29, 0.0  ;;  %v3631_v59 = vrot.slane %v3323_v26, 7  ;;  %v4832_v11 = vmul.f32 %v18797_v51, %v1043_v62 }
 0x3f6   : > { %v6208_v17 = vmax.f32 %v6103_v63, 0.0  ;;  %v2993_v46 = vsel %vm2800_vm2, %v2990_v35, %v2992_v0  ;;  %v6214_v60 = vmax.f32 %v6109_v45, 0.0  ;;  %6316 = vst.msk [vmem:[#allocation4 + $0x2b8] sm:$0xff] %vm385_vm6, %v6211_v19  ;;  %v5471_v36 = vmul.f32 %v18814_v40, %v1043_v62  ;;  %v19331_v63 = vpop.permute.xlu1 %1052 }
 0x3f7   : > { %6312 = vst.msk [vmem:[#allocation4 + $0x298] sm:$0xff] %vm385_vm6, %v6207_v56  ;;  %v3212_v8 = vadd.f32 %v2993_v46, %v19040_v61  ;;  %6317 = vst.msk [vmem:[#allocation4 + $0x2c0] sm:$0xff] %vm385_vm6, %v6212_v5  ;;  %v21846_v35 = vrot.slane %v19097_v25, 7  ;;  %v4497_v55 = vrot.slane %v4193_v47, 4  ;;  %v19307_v50 = vmul.f32 %v19245_v54, %v1048_v37  ;;  %v19313_v61 = vld [vmem:[%s21275_s1 + $0x5] ss:$0 sm:$0xff] }
 0x3f8   : > { %6313 = vst.msk [vmem:[#allocation4 + $0x2a0] sm:$0xff] %vm385_vm6, %v6208_v17  ;;  %6319 = vst.msk [vmem:[#allocation4 + $0x2d0] sm:$0xff] %vm385_vm6, %v6214_v60  ;;  %v3961_v49 = vmul.f32 %v19313_v61, %v1043_v62  ;;  %v5136_v41 = vrot.slane %v4832_v11, 5  ;;  %v5774_v6 = vrot.slane %v5471_v36, 6  ;;  %v19320_v31 = vmul.f32 %v19263_v44, %v1048_v37 }
 0x3f9   : > { %v3632_v7 = vsel %vm3439_vm3, %v21846_v35, %v3631_v59  ;;  %v4498_v25 = vsel %vm4313_vm4, %v4495_v20, %v4497_v55  ;;  %v2685_v13 = vmul.f32 %v19271_v48, %v1048_v37  ;;  %v3324_v23 = vmul.f32 %v19287_v2, %v1048_v37 }
 0x3fa   : > { %v3851_v33 = vadd.f32 %v3632_v7, %v3212_v8  ;;  %v4721_v53 = vadd.f32 %v4498_v25, %v19232_v43  ;;  %v19328_v22 = vmul.f32 %v19255_v34, %v1048_v37  ;;  %v21461_v62 = vrot.slane %v19307_v50, 1 }
 0x3fb   : > { %v5137_v28 = vsel %vm4952_vm5, %v5134_v30, %v5136_v41  ;;  %v5775_v20 = vsel %vm2800_vm2, %v5772_v15, %v5774_v6  ;;  %v2994_v1 = vrot.slane %v2685_v13, 6  ;;  %v3633_v29 = vrot.slane %v3324_v23, 7  ;;  %v19373_v23 = vpop.permute.xlu0 %1057 }
 0x3fc   : > { %v19324_v16 = vadd.f32 %v3961_v49, %v3851_v33  ;;  %v5360_v26 = vadd.f32 %v5137_v28, %v4721_v53  ;;  %v4194_v43 = vmul.f32 %v18789_v42, %v1048_v37  ;;  %v4833_v45 = vmul.f32 %v18797_v51, %v1048_v37 }
 0x3fd   : > { %v5472_v56 = vmul.f32 %v18814_v40, %v1048_v37  ;;  %v2995_v19 = vsel %vm2800_vm2, %v2992_v0, %v2994_v1  ;;  %v19346_v3 = vmul.f32 %v19245_v54, %v19331_v63  ;;  %v19350_v27 = vmul.f32 %v19263_v44, %v19331_v63 }
 0x3fe   : > { %v5998_v30 = vadd.f32 %v5775_v20, %v5360_v26  ;;  %v3213_v15 = vadd.f32 %v2995_v19, %v19099_v9  ;;  %v4499_v5 = vrot.slane %v4194_v43, 4  ;;  %v5138_v46 = vrot.slane %v4833_v45, 5 }
 0x3ff   : > { %v3634_v47 = vsel %vm3439_vm3, %v3631_v59, %v3633_v29  ;;  %v3962_v60 = vmul.f32 %v19313_v61, %v1048_v37  ;;  %v5776_v8 = vrot.slane %v5472_v56, 6  ;;  %v19357_v0 = vmul.f32 %v19271_v48, %v19331_v63 }
 0x400   : > { %v6110_v11 = vadd.f32 %v19277_v39, %v5998_v30  ;;  %v4500_v36 = vsel %vm4313_vm4, %v4497_v55, %v4499_v5  ;;  %v21462_v35 = vrot.slane %v19346_v3, 1  ;;  %v3852_v9 = vadd.f32 %v3634_v47, %v3213_v15 }
 0x401   : > { %v4722_v33 = vadd.f32 %v4500_v36, %v19065_v14  ;;  %v21456_v59 = vrot.slane %v19357_v0, 6  ;;  %v19367_v37 = vmul.f32 %v19287_v2, %v19331_v63  ;;  %v5139_v25 = vsel %vm4952_vm5, %v5136_v41, %v5138_v46 }
 0x402   : > { %v6215_v49 = vmax.f32 %v6110_v11, 0.0  ;;  %v5777_v13 = vsel %vm2800_vm2, %v5774_v6, %v5776_v8  ;;  %v4195_v55 = vmul.f32 %v18789_v42, %v19331_v63  ;;  %v4834_v20 = vmul.f32 %v18797_v51, %v19331_v63 }
 0x403   : > { %v5361_v53 = vadd.f32 %v5139_v25, %v4722_v33  ;;  %v2997_v14 = vsel %vm2800_vm2, %v2994_v1, %v21456_v59  ;;  %v21455_v28 = vrot.slane %v19367_v37, 7  ;;  %v3963_v6 = vmul.f32 %v19313_v61, %v19331_v63 }
 0x404   : > { %6320 = vst.msk [vmem:[#allocation4 + $0x2d8] sm:$0xff] %vm385_vm6, %v6215_v49  ;;  %v3214_v41 = vadd.f32 %v2997_v14, %v19144_v32  ;;  %v4501_v26 = vrot.slane %v4195_v55, 4  ;;  %v5473_v43 = vmul.f32 %v18814_v40, %v19331_v63  ;;  %v5140_v56 = vrot.slane %v4834_v20, 5  ;;  %v19405_v49 = vpop.permute.xlu1 %1062 }
 0x405   : > { %v5999_v45 = vadd.f32 %v5777_v13, %v5361_v53  ;;  %v3636_v1 = vsel %vm3439_vm3, %v3633_v29, %v21455_v28  ;;  %v19392_v19 = vmul.f32 %v19271_v48, %v19373_v23  ;;  %v19397_v47 = vmul.f32 %v19287_v2, %v19373_v23  ;;  %21847 = vst [vmem:[#allocation12_spill] sm:$0xff] %v19405_v49 }
 0x406   : > { %v3853_v30 = vadd.f32 %v3636_v1, %v3214_v41  ;;  %v4502_v32 = vsel %vm4313_vm4, %v4499_v5, %v4501_v26  ;;  %v5778_v15 = vrot.slane %v5473_v43, 6  ;;  %v4067_v11 = vadd.f32 %v3962_v60, %v3852_v9 }
 0x407   : > { %v6111_v36 = vadd.f32 %v19277_v39, %v5999_v45  ;;  %v4723_v33 = vadd.f32 %v4502_v32, %v19118_v52  ;;  %v19403_v29 = vmul.f32 %v19245_v54, %v19373_v23  ;;  %v5141_v5 = vsel %vm4952_vm5, %v5138_v46, %v5140_v56 }
 0x408   : > { %v19407_v25 = vadd.f32 %v3963_v6, %v3853_v30  ;;  %v4196_v55 = vmul.f32 %v18789_v42, %v19373_v23  ;;  %v4835_v52 = vmul.f32 %v18797_v51, %v19373_v23  ;;  %v5474_v53 = vmul.f32 %v18814_v40, %v19373_v23  ;;  %v19430_v30 = vpop.permute.xlu0 %1067 }
 0x409   : > { %v6216_v60 = vmax.f32 %v6111_v36, 0.0  ;;  %v5362_v9 = vadd.f32 %v5141_v5, %v4723_v33  ;;  %v5779_v14 = vsel %vm2800_vm2, %v5776_v8, %v5778_v15  ;;  %v19421_v46 = vmul.f32 %v19271_v48, %v19405_v49  ;;  %21849 = vst [vmem:[#allocation19_spill] sm:$0xff] %v19430_v30 }
 0x40a   : > { %v4503_v41 = vrot.slane %v4196_v55, 4  ;;  %v5142_v43 = vrot.slane %v4835_v52, 5  ;;  %v19426_v45 = vmul.f32 %v19245_v54, %v19405_v49  ;;  %v4197_v1 = vmul.f32 %v18789_v42, %v19405_v49 }
 0x40b   : > { %6321 = vst.msk [vmem:[#allocation4 + $0x2e0] sm:$0xff] %vm385_vm6, %v6216_v60  ;;  %v6000_v6 = vadd.f32 %v5779_v14, %v5362_v9  ;;  %v5780_v32 = vrot.slane %v5474_v53, 6  ;;  %v19435_v36 = vmul.f32 %v19287_v2, %v19405_v49  ;;  %v4836_v33 = vmul.f32 %v18797_v51, %v19405_v49 }
 0x40c   : > { %21848 = vst [vmem:[#allocation20_spill] sm:$0xff] %v19426_v45  ;;  %v4504_v8 = vsel %vm4313_vm4, %v4501_v26, %v4503_v41  ;;  %v5143_v60 = vsel %vm4952_vm5, %v5140_v56, %v5142_v43  ;;  %v4505_v52 = vrot.slane %v4197_v1, 4  ;;  %v5475_v26 = vmul.f32 %v18814_v40, %v19405_v49  ;;  %v19455_v56 = vpop.permute.xlu1 %1287  ;;  %v19481_v7 = vpop.permute.xlu0 %2575 }
 0x40d   : > { %v6112_v5 = vadd.f32 %v19277_v39, %v6000_v6  ;;  %v4724_v55 = vadd.f32 %v4504_v8, %v19153_v38  ;;  %v5144_v14 = vrot.slane %v4836_v33, 5  ;;  %v19447_v53 = vmul.f32 %v19271_v48, %v19430_v30  ;;  %21852 = vst [vmem:[#allocation16_spill] sm:$0xff] %v19481_v7 }
 0x40e   : > { %v19451_v6 = vmul.f32 %v19287_v2, %v19430_v30  ;;  %v4198_v38 = vmul.f32 %v18789_v42, %v19430_v30  ;;  %v5781_v1 = vsel %vm2800_vm2, %v5778_v15, %v5780_v32  ;;  %v4506_v33 = vsel %vm4313_vm4, %v4503_v41, %v4505_v52 }
 0x40f   : > { %v6217_v28 = vmax.f32 %v6112_v5, 0.0  ;;  %v5363_v20 = vadd.f32 %v5143_v60, %v4724_v55  ;;  %v5782_v59 = vrot.slane %v5475_v26, 6  ;;  %v4725_v55 = vadd.f32 %v4506_v33, %v19324_v16 }
 0x410   : > { %v5145_v60 = vsel %vm4952_vm5, %v5142_v43, %v5144_v14  ;;  %v4507_v13 = vrot.slane %v4198_v38, 4  ;;  %v4837_v24 = vmul.f32 %v18797_v51, %v19430_v30  ;;  %v5476_v15 = vmul.f32 %v18814_v40, %v19430_v30 }
 0x411   : > { %6322 = vst.msk [vmem:[#allocation4 + $0x2e8] sm:$0xff] %vm385_vm6, %v6217_v28  ;;  %v6001_v5 = vadd.f32 %v5781_v1, %v5363_v20  ;;  %v19470_v41 = vmul.f32 %v19245_v54, %v19455_v56  ;;  %v5364_v20 = vadd.f32 %v5145_v60, %v4725_v55  ;;  %v5783_v26 = vsel %vm2800_vm2, %v5780_v32, %v5782_v59 }
 0x412   : > { %v4508_v43 = vsel %vm4313_vm4, %v4505_v52, %v4507_v13  ;;  %v5146_v1 = vrot.slane %v4837_v24, 5  ;;  %v5784_v33 = vrot.slane %v5476_v15, 6  ;;  %v19479_v17 = vmul.f32 %v19263_v44, %v19455_v56 }
 0x413   : > { %21850 = vst [vmem:[#allocation26_spill] sm:$0xff] %v19470_v41  ;;  %v6113_v28 = vadd.f32 %v19277_v39, %v6001_v5  ;;  %v4726_v38 = vadd.f32 %v4508_v43, %v4067_v11  ;;  %v6002_v9 = vadd.f32 %v5783_v26, %v5364_v20  ;;  %v19486_v52 = vmul.f32 %v19271_v48, %v19455_v56  ;;  %v6406_v41 = vld [vmem:[#allocation4 + $0x240] ss:$2 sm:$0xff] }
 0x414   : > { %21851 = vst [vmem:[#allocation23_spill] sm:$0xff] %v19479_v17  ;;  %v5147_v5 = vsel %vm4952_vm5, %v5144_v14, %v5146_v1  ;;  %v19490_v24 = vmul.f32 %v18789_v42, %v19455_v56  ;;  %v19494_v11 = vmul.f32 %v18797_v51, %v19455_v56  ;;  %v5785_v60 = vsel %vm2800_vm2, %v5782_v59, %v5784_v33 }
 0x415   : > { %v6218_v8 = vmax.f32 %v6113_v28, 0.0  ;;  %v6114_v32 = vadd.f32 %v19277_v39, %v6002_v9  ;;  %v5365_v55 = vadd.f32 %v5147_v5, %v4726_v38  ;;  %v19501_v14 = vmul.f32 %v18814_v40, %v19455_v56  ;;  %v19517_v40 = vld [vmem:[%s21275_s1 + $0x6] ss:$0 sm:$0xff] }
 0x416   : > { %21853 = vst [vmem:[#allocation17_spill] sm:$0xff] %v19490_v24  ;;  %21854 = vst [vmem:[#allocation15_spill] sm:$0xff] %v19494_v11  ;;  %v21459_v15 = vrot.slane %v19490_v24, 4  ;;  %v21458_v42 = vrot.slane %v19494_v11, 5  ;;  %v19507_v28 = vmul.f32 %v19271_v48, %v19481_v7  ;;  %v19511_v51 = vmul.f32 %v19287_v2, %v19481_v7 }
 0x417   : > { %6323 = vst.msk [vmem:[#allocation4 + $0x2f0] sm:$0xff] %vm385_vm6, %v6218_v8  ;;  %21855 = vst [vmem:[#allocation27_spill] sm:$0xff] %v19501_v14  ;;  %v6219_v9 = vmax.f32 %v6114_v32, 0.0  ;;  %v6003_v8 = vadd.f32 %v5785_v60, %v5365_v55  ;;  %v21457_v59 = vrot.slane %v19501_v14, 6  ;;  %v19521_v20 = vmul.f32 %v19517_v40, %v19481_v7 }
 0x418   : > { %21856 = vst [vmem:[#allocation21_spill] sm:$0xff] %v19507_v28  ;;  %21857 = vst [vmem:[#allocation10_spill] sm:$0xff] %v19511_v51  ;;  %v4510_v38 = vsel %vm4313_vm4, %v4507_v13, %v21459_v15  ;;  %v5149_v5 = vsel %vm4952_vm5, %v5146_v1, %v21458_v42  ;;  %v19542_v13 = vld [vmem:[%s21275_s1 + $0x7] ss:$0 sm:$0xff]  ;;  %v21858_v26 = vrot.slane %v19350_v27, 2  ;;  %v21859_v16 = vrot.slane %v19320_v31, 2 }
 0x419   : > { %6324 = vst.msk [vmem:[#allocation4 + $0x2f8] sm:$0xff] %vm385_vm6, %v6219_v9  ;;  %v6115_v32 = vadd.f32 %v19277_v39, %v6003_v8  ;;  %v4727_v55 = vadd.f32 %v4510_v38, %v19407_v25  ;;  %v5787_v12 = vsel %vm2800_vm2, %v5784_v33, %v21457_v59  ;;  %v19546_v1 = vmul.f32 %v19542_v13, %v19481_v7  ;;  %v19551_v25 = vld [vmem:[%s21275_s1 + $0x8] ss:$0 sm:$0xff]  ;;  %v19564_v59 = vpop.permute.xlu1 %2580 }
 0x41a   : > { %v19555_v9 = vmul.f32 %v19551_v25, %v19481_v7  ;;  %v1710_v33 = vsel %vm1507_vm0, %v21461_v62, %v21462_v35  ;;  %v2349_v17 = vsel %vm2146_vm1, %v21859_v16, %v21858_v26  ;;  %v21860_v62 = vrot.slane %v19447_v53, 6  ;;  %v6404_v26 = vld [vmem:[#allocation4 + $0x230] ss:$2 sm:$0xff]  ;;  %v6510_v7 = vld [vmem:[#allocation4 + $0x231] ss:$2 sm:$0xff] }
 0x41b   : > { %v6220_v8 = vmax.f32 %v6115_v32, 0.0  ;;  %v5366_v38 = vadd.f32 %v5149_v5, %v4727_v55  ;;  %v1924_v60 = vadd.f32 %v1710_v33, %v19328_v22  ;;  %v21861_v5 = vrot.slane %v19421_v46, 6  ;;  %v6402_v55 = vld [vmem:[#allocation4 + $0x220] ss:$2 sm:$0xff]  ;;  %v6508_v22 = vld [vmem:[#allocation4 + $0x221] ss:$2 sm:$0xff] }
 0x41c   : > { %v21862_v15 = vrot.slane %v19451_v6, 7  ;;  %v21863_v42 = vrot.slane %v19435_v36, 7  ;;  %v3966_v16 = vmul.f32 %v19313_v61, %v19430_v30  ;;  %v19605_v51 = vmul.f32 %v19287_v2, %v19564_v59 }
 0x41d   : > { %v3003_v32 = vsel %vm2800_vm2, %v21861_v5, %v21860_v62  ;;  %6325 = vst.msk [vmem:[#allocation4 + $0x300] sm:$0xff] %vm385_vm6, %v6220_v8  ;;  %v6004_v33 = vadd.f32 %v5787_v12, %v5366_v38  ;;  %v2563_v35 = vadd.f32 %v2349_v17, %v1924_v60  ;;  %v19588_v62 = vmul.f32 %v19271_v48, %v19564_v59  ;;  %v6512_v60 = vld [vmem:[#allocation4 + $0x241] ss:$2 sm:$0xff]  ;;  %v6514_v8 = vld [vmem:[#allocation4 + $0x251] ss:$2 sm:$0xff] }
 0x41e   : > { %v3642_v43 = vsel %vm3439_vm3, %v21863_v42, %v21862_v15  ;;  %v19592_v12 = vmul.f32 %v19517_v40, %v19564_v59  ;;  %v19596_v17 = vmul.f32 %v19542_v13, %v19564_v59  ;;  %v19600_v15 = vmul.f32 %v19551_v25, %v19564_v59  ;;  %v6408_v42 = vld [vmem:[#allocation4 + $0x250] ss:$2 sm:$0xff] }
 0x41f   : > { %v6116_v38 = vadd.f32 %v19277_v39, %v6004_v33  ;;  %v3217_v5 = vadd.f32 %v3003_v32, %v2563_v35  ;;  %v6579_v28 = vmax.f32 %v6402_v55, %v6508_v22  ;;  %v6580_v11 = vmax.f32 %v6404_v26, %v6510_v7 }
 0x420   : > { %v4515_v54 = vrot.slane %v19592_v12, 4  ;;  %v5154_v30 = vrot.slane %v19596_v17, 5  ;;  %v21478_v14 = vrot.slane %v19600_v15, 6  ;;  %v6581_v49 = vmax.f32 %v6406_v41, %v6512_v60 }
 0x421   : > { %v6221_v24 = vmax.f32 %v6116_v38, 0.0  ;;  %v3856_v45 = vadd.f32 %v3642_v43, %v3217_v5  ;;  %v19610_v48 = vmax.f32 %v6408_v42, %v6514_v8  ;;  %v21864_v35 = vrot.slane %v19521_v20, 4  ;;  %v4079_v38 = vpop.permute.xlu0 %4078 }
 0x422   : > { %v21865_v55 = vrot.slane %v19546_v1, 5  ;;  %v6739_v12 = vrot.slane %v6580_v11, 7  ;;  %v6740_v7 = vrot.slane %v6581_v49, 7  ;;  %v1711_v41 = vrot.slane %v19403_v29, 1 }
 0x423   : > { %v4516_v32 = vsel %vm4313_vm4, %v21864_v35, %v4515_v54  ;;  %6326 = vst.msk [vmem:[#allocation4 + $0x308] sm:$0xff] %vm385_vm6, %v6221_v24  ;;  %v4071_v17 = vadd.f32 %v3966_v16, %v3856_v45  ;;  %v6742_v43 = vrot.slane %v19610_v48, 7  ;;  %v21866_v26 = vrot.slane %v19555_v9, 6 }
 0x424   : > { %v5155_v22 = vsel %vm4952_vm5, %v21865_v55, %v5154_v30  ;;  %v6747_v60 = vmax.f32 %v19038_v18, %v6739_v12  ;;  %v19630_v8 = vmul.f32 %v19263_v44, %v19373_v23  ;;  %v1176_v49 = vmul.f32 %v19255_v34, %v19331_v63 }
 0x425   : > { %v5793_v42 = vsel %vm2800_vm2, %v21866_v26, %v21478_v14  ;;  %v4730_v45 = vadd.f32 %v4516_v32, %v4071_v17  ;;  %v6741_v24 = vsel %vm3439_vm3, %v6739_v12, %v6740_v7  ;;  %v6743_v16 = vsel %vm3439_vm3, %v6740_v7, %v6742_v43 }
 0x426   : > { %v21867_v5 = vrot.slane %v19346_v3, 1  ;;  %v6748_v18 = vmax.f32 %v6579_v28, %v6741_v24  ;;  %v6749_v55 = vmax.f32 %v6580_v11, %v6743_v16  ;;  %6750 = vst.msk [vmem:[#allocation2 + $0x9b] sm:$0xc0] %vm6627_vm8, %v6747_v60  ;;  %v2350_v26 = vrot.slane %v19630_v8, 2 }
 0x427   : > { %v5369_v14 = vadd.f32 %v5155_v22, %v4730_v45  ;;  %v21868_v63 = vrot.slane %v19486_v52, 6  ;;  %v21869_v32 = vrot.slane %v19447_v53, 6  ;;  %v19650_v17 = vmul.f32 %v19287_v2, %v19455_v56 }
 0x428   : > { %v1712_v35 = vsel %vm1507_vm0, %v21867_v5, %v1711_v41  ;;  %v19653_v3 = vmul.f32 %v19517_v40, %v4079_v38  ;;  %6751 = vst.msk [vmem:[#allocation2 + $0xa3] sm:$0xff] %vm385_vm6, %v6748_v18  ;;  %v21870_v11 = vrot.slane %v19350_v27, 2  ;;  %v19663_v53 = vmul.f32 %v19542_v13, %v4079_v38 }
 0x429   : > { %v1925_v33 = vadd.f32 %v1712_v35, %v1176_v49  ;;  %v3005_v12 = vsel %vm2800_vm2, %v21869_v32, %v21868_v63  ;;  %6752 = vst.msk [vmem:[#allocation2 + $0xab] sm:$0xf] %vm6630_vm9, %v6749_v55  ;;  %v19666_v22 = vmul.f32 %v19551_v25, %v4079_v38  ;;  %v21871_v7 = vrot.slane %v19248_v21, 1  ;;  %v21875_v55 = vld [vmem:[#allocation25_spill] sm:$0xff] }
 0x42a   : > { %v2351_v28 = vsel %vm2146_vm1, %v21870_v11, %v2350_v26  ;;  %v21872_v43 = vrot.slane %v19087_v58, 1  ;;  %v6007_v49 = vadd.f32 %v5793_v42, %v5369_v14  ;;  %v3643_v24 = vrot.slane %v19650_v17, 7 }
 0x42b   : > { %v2564_v45 = vadd.f32 %v2351_v28, %v1925_v33  ;;  %v4517_v27 = vrot.slane %v19653_v3, 4  ;;  %v3649_v16 = vrot.slane %v19605_v51, 7  ;;  %v5156_v5 = vrot.slane %v19663_v53, 5  ;;  %v21905_v3 = vld [vmem:[#allocation21_spill] sm:$0xff] }
 0x42c   : > { %v1706_v60 = vsel %vm1507_vm0, %v21872_v43, %v21871_v7  ;;  %v21873_v35 = vrot.slane %v19307_v50, 1  ;;  %v21874_v38 = vmov %v21871_v7  ;;  %v6119_v63 = vadd.f32 %v19277_v39, %v6007_v49 }
 0x42d   : > { %v1922_v58 = vadd.f32 %v1706_v60, %v21875_v55  ;;  %v3218_v14 = vadd.f32 %v3005_v12, %v2564_v45  ;;  %v3967_v33 = vmul.f32 %v19313_v61, %v19455_v56  ;;  %v5794_v42 = vrot.slane %v19666_v22, 6  ;;  %v21907_v22 = vld [vmem:[#allocation10_spill] sm:$0xff] }
 0x42e   : > { %v1708_v18 = vsel %vm1507_vm0, %v21874_v38, %v21873_v35  ;;  %v21876_v32 = vrot.slane %v19451_v6, 7  ;;  %v4518_v21 = vsel %vm4313_vm4, %v4515_v54, %v4517_v27  ;;  %v21877_v28 = vrot.slane %v19266_v10, 2  ;;  %v19706_v35 = vpop.permute.xlu1 %2570 }
 0x42f   : > { %v1923_v11 = vadd.f32 %v1708_v18, %v19258_v57  ;;  %v21878_v12 = vrot.slane %v19091_v4, 2  ;;  %v6224_v7 = vmax.f32 %v6119_v63, 0.0  ;;  %v21879_v60 = vrot.slane %v19320_v31, 2 }
 0x430   : > { %v3644_v50 = vsel %vm3439_vm3, %v21876_v32, %v3643_v24  ;;  %v21880_v6 = vmov %v21877_v28  ;;  %v5157_v54 = vsel %vm4952_vm5, %v5154_v30, %v5156_v5  ;;  %v21881_v4 = vrot.slane %v19392_v19, 6  ;;  %v6879_v63 = vld [vmem:[#allocation2 + $0xa9] sm:$0xff] }
 0x431   : > { %v2345_v56 = vsel %vm2146_vm1, %v21878_v12, %v21877_v28  ;;  %v3857_v43 = vadd.f32 %v3644_v50, %v3218_v14  ;;  %v2347_v49 = vsel %vm2146_vm1, %v21880_v6, %v21879_v60  ;;  %v21882_v38 = vrot.slane %v19357_v0, 6  ;;  %6329 = vst.msk [vmem:[#allocation4 + $0x320] sm:$0xff] %vm385_vm6, %v6224_v7  ;;  %v21890_v7 = vld [vmem:[#allocation18_spill] sm:$0xff] }
 0x432   : > { %v2561_v45 = vadd.f32 %v2345_v56, %v1922_v58  ;;  %v2562_v57 = vadd.f32 %v2347_v49, %v1923_v11  ;;  %v21883_v31 = vrot.slane %v19421_v46, 6  ;;  %v21884_v10 = vmov %v21881_v4  ;;  %v6878_v58 = vld [vmem:[#allocation2 + $0xa1] sm:$0xff]  ;;  %v21891_v49 = vld [vmem:[#allocation12_spill] sm:$0xff] }
 0x433   : > { %v2999_v18 = vsel %vm2800_vm2, %v21882_v38, %v21881_v4  ;;  %v4072_v14 = vadd.f32 %v3967_v33, %v3857_v43  ;;  %v21885_v30 = vrot.slane %v19600_v15, 6  ;;  %v21886_v50 = vrot.slane %v19397_v47, 7 }
 0x434   : > { %v3001_v55 = vsel %vm2800_vm2, %v21884_v10, %v21883_v31  ;;  %v3215_v0 = vadd.f32 %v2999_v18, %v2561_v45  ;;  %v21887_v46 = vrot.slane %v19367_v37, 7  ;;  %v6896_v11 = vpack.c.bf16 %v6879_v63, %v6878_v58 }
 0x435   : > { %v5795_v32 = vsel %vm2800_vm2, %v21885_v30, %v5794_v42  ;;  %v3216_v28 = vadd.f32 %v3001_v55, %v2562_v57  ;;  %v21888_v12 = vrot.slane %v19435_v36, 7  ;;  %v21889_v56 = vmov %v21886_v50 }
 0x436   : > { %v3638_v19 = vsel %vm3439_vm3, %v21887_v46, %v21886_v50  ;;  %v19739_v15 = vmul.f32 %v21890_v7, %v19706_v35  ;;  %v4731_v43 = vadd.f32 %v4518_v21, %v4072_v14  ;;  %v3964_v6 = vmul.f32 %v19313_v61, %v19373_v23  ;;  %13087 = vmatprep.mubr.msk.bf16.mxu0 %vm385_vm6, %v6896_v11  ;;  %v21892_v14 = vld [vmem:[#allocation20_spill] sm:$0xff]  ;;  %v21893_v50 = vld [vmem:[#allocation17_spill] sm:$0xff] }
 0x437   : > { %v3640_v33 = vsel %vm3439_vm3, %v21889_v56, %v21888_v12  ;;  %v3854_v60 = vadd.f32 %v3638_v19, %v3215_v0  ;;  %v19745_v37 = vmul.f32 %v19287_v2, %v19706_v35  ;;  %v3965_v47 = vmul.f32 %v19313_v61, %v21891_v49 }
 0x438   : > { %v3855_v36 = vadd.f32 %v3640_v33, %v3216_v28  ;;  %v4200_v45 = vmul.f32 %v19517_v40, %v19706_v35  ;;  %v4839_v21 = vmul.f32 %v19542_v13, %v19706_v35  ;;  %v5370_v57 = vadd.f32 %v5157_v54, %v4731_v43  ;;  %v21896_v28 = vld [vmem:[#allocation15_spill] sm:$0xff] }
 0x439   : > { %v4069_v4 = vadd.f32 %v3964_v6, %v3854_v60  ;;  %v3006_v38 = vrot.slane %v19739_v15, 6  ;;  %v5478_v2 = vmul.f32 %v19551_v25, %v19706_v35  ;;  %v3645_v31 = vrot.slane %v19745_v37, 7  ;;  %v4084_v6 = vpop.permute.xlu0 %4083  ;;  %v21899_v37 = vld [vmem:[#allocation27_spill] sm:$0xff] }
 0x43a   : > { %v4070_v18 = vadd.f32 %v3965_v47, %v3855_v36  ;;  %v4511_v10 = vrot.slane %v4200_v45, 4  ;;  %v5150_v55 = vrot.slane %v4839_v21, 5  ;;  %v6008_v58 = vadd.f32 %v5795_v32, %v5370_v57 }
 0x43b   : > { %v5788_v63 = vrot.slane %v5478_v2, 6  ;;  %v1713_v30 = vrot.slane %v21892_v14, 1  ;;  %v2037_v0 = vmul.f32 %v19263_v44, %v21891_v49  ;;  %v21894_v54 = vrot.slane %v21893_v50, 4  ;;  %v21903_v50 = vld [vmem:[#allocation19_spill] sm:$0xff] }
 0x43c   : > { %v21895_v19 = vrot.slane %v19521_v20, 4  ;;  %v21897_v12 = vrot.slane %v21896_v28, 5  ;;  %v1177_v32 = vmul.f32 %v19255_v34, %v19373_v23  ;;  %v6120_v33 = vadd.f32 %v19277_v39, %v6008_v58 }
 0x43d   : > { %v4512_v46 = vsel %vm4313_vm4, %v21894_v54, %v4511_v10  ;;  %v21898_v43 = vrot.slane %v19546_v1, 5  ;;  %v21900_v20 = vrot.slane %v21899_v37, 6  ;;  %v21901_v47 = vrot.slane %v19555_v9, 6 }
 0x43e   : > { %v4514_v11 = vsel %vm4313_vm4, %v4511_v10, %v21895_v19  ;;  %v5151_v56 = vsel %vm4952_vm5, %v21897_v12, %v5150_v55  ;;  %v4728_v7 = vadd.f32 %v4512_v46, %v4069_v4  ;;  %v1714_v23 = vsel %vm1507_vm0, %v1711_v41, %v1713_v30 }
 0x43f   : > { %v4729_v15 = vadd.f32 %v4514_v11, %v4070_v18  ;;  %v5153_v60 = vsel %vm4952_vm5, %v5150_v55, %v21898_v43  ;;  %v5789_v36 = vsel %vm2800_vm2, %v21900_v20, %v5788_v63  ;;  %v5791_v45 = vsel %vm2800_vm2, %v5788_v63, %v21901_v47 }
 0x440   : > { %v2352_v21 = vrot.slane %v2037_v0, 2  ;;  %v6225_v57 = vmax.f32 %v6120_v33, 0.0  ;;  %v5367_v4 = vadd.f32 %v5151_v56, %v4728_v7  ;;  %v1926_v1 = vadd.f32 %v1714_v23, %v1177_v32  ;;  %v4089_v33 = vpop.permute.xlu1 %4088 }
 0x441   : > { %v5368_v2 = vadd.f32 %v5153_v60, %v4729_v15  ;;  %v21902_v10 = vrot.slane %v19486_v52, 6  ;;  %v4204_v9 = vmul.f32 %v19517_v40, %v4084_v6  ;;  %v4843_v58 = vmul.f32 %v19542_v13, %v4084_v6  ;;  %v21904_v52 = vld [vmem:[#allocation14_spill] sm:$0xff] }
 0x442   : > { %v2353_v18 = vsel %vm2146_vm1, %v2350_v26, %v2352_v21  ;;  %6330 = vst.msk [vmem:[#allocation4 + $0x328] sm:$0xff] %vm385_vm6, %v6225_v57  ;;  %v6005_v29 = vadd.f32 %v5789_v36, %v5367_v4  ;;  %v5482_v14 = vmul.f32 %v19551_v25, %v4084_v6  ;;  %v3968_v8 = vmul.f32 %v19313_v61, %v19706_v35 }
 0x443   : > { %v3007_v55 = vsel %vm2800_vm2, %v21902_v10, %v3006_v38  ;;  %v6006_v41 = vadd.f32 %v5791_v45, %v5368_v2  ;;  %v2565_v63 = vadd.f32 %v2353_v18, %v1926_v1  ;;  %v4519_v0 = vrot.slane %v4204_v9, 4  ;;  %v21910_v18 = vld [vmem:[#allocation26_spill] sm:$0xff] }
 0x444   : > { %v5158_v26 = vrot.slane %v4843_v58, 5  ;;  %v1399_v54 = vmul.f32 %v21904_v52, %v21903_v50  ;;  %v6117_v46 = vadd.f32 %v19277_v39, %v6005_v29  ;;  %v5796_v28 = vrot.slane %v5482_v14, 6  ;;  %v4094_v58 = vpop.permute.xlu0 %4093 }
 0x445   : > { %v6118_v19 = vadd.f32 %v19277_v39, %v6006_v41  ;;  %v3219_v11 = vadd.f32 %v3007_v55, %v2565_v63  ;;  %v3646_v12 = vsel %vm3439_vm3, %v3643_v24, %v3645_v31  ;;  %v1178_v56 = vmul.f32 %v19255_v34, %v21891_v49  ;;  %v21912_v41 = vld [vmem:[#allocation23_spill] sm:$0xff] }
 0x446   : > { %v1715_v32 = vrot.slane %v1399_v54, 1  ;;  %v2038_v35 = vmul.f32 %v19263_v44, %v21903_v50  ;;  %v6222_v7 = vmax.f32 %v6117_v46, 0.0  ;;  %v4520_v60 = vsel %vm4313_vm4, %v4517_v27, %v4519_v0 }
 0x447   : > { %v6223_v15 = vmax.f32 %v6118_v19, 0.0  ;;  %v3858_v43 = vadd.f32 %v3646_v12, %v3219_v11  ;;  %v5159_v17 = vsel %vm4952_vm5, %v5156_v5, %v5158_v26  ;;  %v5797_v24 = vsel %vm2800_vm2, %v5794_v42, %v5796_v28  ;;  %v6412_v19 = vld [vmem:[#allocation4 + $0x270] ss:$2 sm:$0xff]  ;;  %v6518_v11 = vld [vmem:[#allocation4 + $0x271] ss:$2 sm:$0xff] }
 0x448   : > { %v1716_v49 = vsel %vm1507_vm0, %v1713_v30, %v1715_v32  ;;  %v2354_v6 = vrot.slane %v2038_v35, 2  ;;  %6327 = vst.msk [vmem:[#allocation4 + $0x310] sm:$0xff] %vm385_vm6, %v6222_v7  ;;  %v21906_v20 = vrot.slane %v21905_v3, 6  ;;  %v4205_v53 = vmul.f32 %v19517_v40, %v4089_v33 }
 0x449   : > { %6328 = vst.msk [vmem:[#allocation4 + $0x318] sm:$0xff] %vm385_vm6, %v6223_v15  ;;  %v4073_v44 = vadd.f32 %v3968_v8, %v3858_v43  ;;  %v1927_v37 = vadd.f32 %v1716_v49, %v1178_v56  ;;  %v21908_v36 = vrot.slane %v21907_v22, 7  ;;  %v4844_v30 = vmul.f32 %v19542_v13, %v4089_v33  ;;  %v6416_v43 = vld [vmem:[#allocation4 + $0x290] ss:$2 sm:$0xff]  ;;  %v6410_v49 = vld [vmem:[#allocation4 + $0x260] ss:$2 sm:$0xff] }
 0x44a   : > { %v3009_v27 = vsel %vm2800_vm2, %v3006_v38, %v21906_v20  ;;  %v2355_v5 = vsel %vm2146_vm1, %v2352_v21, %v2354_v6  ;;  %v19830_v47 = vmul.f32 %v19551_v25, %v4089_v33  ;;  %v4521_v57 = vrot.slane %v4205_v53, 4  ;;  %v21909_v38 = vld [vmem:[#allocation16_spill] sm:$0xff] }
 0x44b   : > { %v3648_v42 = vsel %vm3439_vm3, %v3645_v31, %v21908_v36  ;;  %v4732_v45 = vadd.f32 %v4520_v60, %v4073_v44  ;;  %v2566_v23 = vadd.f32 %v2355_v5, %v1927_v37  ;;  %v1179_v4 = vmul.f32 %v19255_v34, %v21903_v50  ;;  %v6520_v33 = vld [vmem:[#allocation4 + $0x281] ss:$2 sm:$0xff]  ;;  %v6522_v60 = vld [vmem:[#allocation4 + $0x291] ss:$2 sm:$0xff]  ;;  %v6420_v44 = vld [vmem:[#allocation4 + $0x2b0] ss:$2 sm:$0xff] }
 0x44c   : > { %v3969_v2 = vmul.f32 %v19313_v61, %v21909_v38  ;;  %v5160_v1 = vrot.slane %v4844_v30, 5  ;;  %v5798_v21 = vrot.slane %v19830_v47, 6  ;;  %v21911_v10 = vrot.slane %v21910_v18, 1  ;;  %v6528_v5 = vld [vmem:[#allocation4 + $0x2c1] ss:$2 sm:$0xff] }
 0x44d   : > { %v5371_v55 = vadd.f32 %v5159_v17, %v4732_v45  ;;  %v3220_v9 = vadd.f32 %v3009_v27, %v2566_v23  ;;  %v21913_v63 = vrot.slane %v21912_v41, 2  ;;  %v4522_v34 = vsel %vm4313_vm4, %v4519_v0, %v4521_v57  ;;  %v6418_v38 = vld [vmem:[#allocation4 + $0x2a0] ss:$2 sm:$0xff] }
 0x44e   : > { %v1718_v31 = vsel %vm1507_vm0, %v1715_v32, %v21911_v10  ;;  %v5161_v8 = vsel %vm4952_vm5, %v5158_v26, %v5160_v1  ;;  %v5799_v50 = vsel %vm2800_vm2, %v5796_v28, %v5798_v21  ;;  %v21914_v52 = vrot.slane %v19588_v62, 6  ;;  %v6414_v26 = vld [vmem:[#allocation4 + $0x280] ss:$2 sm:$0xff] }
 0x44f   : > { %v1928_v29 = vadd.f32 %v1718_v31, %v1179_v4  ;;  %v2357_v14 = vsel %vm2146_vm1, %v2354_v6, %v21913_v63  ;;  %v21915_v54 = vmov %v21906_v20  ;;  %v6009_v12 = vadd.f32 %v5797_v24, %v5371_v55  ;;  %v6516_v6 = vld [vmem:[#allocation4 + $0x261] ss:$2 sm:$0xff] }
 0x450   : > { %v3011_v46 = vsel %vm2800_vm2, %v21915_v54, %v21914_v52  ;;  %v3859_v56 = vadd.f32 %v3648_v42, %v3220_v9  ;;  %v21916_v35 = vmov %v21908_v36  ;;  %v3970_v62 = vmul.f32 %v19313_v61, %v19564_v59  ;;  %v6422_v59 = vld [vmem:[#allocation4 + $0x2c0] ss:$2 sm:$0xff] }
 0x451   : > { %v2567_v32 = vadd.f32 %v2357_v14, %v1928_v29  ;;  %v3650_v0 = vsel %vm3439_vm3, %v21916_v35, %v3649_v16  ;;  %v4206_v28 = vmul.f32 %v19517_v40, %v4094_v58  ;;  %v4845_v7 = vmul.f32 %v19542_v13, %v4094_v58  ;;  %v6426_v9 = vld [vmem:[#allocation4 + $0x2e0] ss:$2 sm:$0xff] }
 0x452   : > { %v5484_v15 = vmul.f32 %v19551_v25, %v4094_v58  ;;  %v6121_v17 = vadd.f32 %v19277_v39, %v6009_v12  ;;  %v4074_v51 = vadd.f32 %v3969_v2, %v3859_v56  ;;  %v6584_v16 = vmax.f32 %v6412_v19, %v6518_v11  ;;  %v6526_v25 = vld [vmem:[#allocation4 + $0x2b1] ss:$2 sm:$0xff]  ;;  %v6524_v2 = vld [vmem:[#allocation4 + $0x2a1] ss:$2 sm:$0xff]  ;;  %v6430_v14 = vld [vmem:[#allocation4 + $0x300] ss:$2 sm:$0xff] }
 0x453   : > { %v3221_v24 = vadd.f32 %v3011_v46, %v2567_v32  ;;  %v4523_v37 = vrot.slane %v4206_v28, 4  ;;  %v5162_v3 = vrot.slane %v4845_v7, 5  ;;  %v6585_v61 = vmax.f32 %v6414_v26, %v6520_v33  ;;  %v6532_v58 = vld [vmem:[#allocation4 + $0x2e1] ss:$2 sm:$0xff]  ;;  %v6424_v46 = vld [vmem:[#allocation4 + $0x2d0] ss:$2 sm:$0xff] }
 0x454   : > { %v5800_v20 = vrot.slane %v5484_v15, 6  ;;  %v6226_v40 = vmax.f32 %v6121_v17, 0.0  ;;  %v4733_v27 = vadd.f32 %v4522_v34, %v4074_v51  ;;  %v6586_v53 = vmax.f32 %v6416_v43, %v6522_v60  ;;  %v6534_v34 = vld [vmem:[#allocation4 + $0x2f1] ss:$2 sm:$0xff]  ;;  %v6434_v17 = vld [vmem:[#allocation4 + $0x320] ss:$2 sm:$0xff] }
 0x455   : > { %v3860_v13 = vadd.f32 %v3650_v0, %v3221_v24  ;;  %v4524_v22 = vsel %vm4313_vm4, %v4521_v57, %v4523_v37  ;;  %v5163_v36 = vsel %vm4952_vm5, %v5160_v1, %v5162_v3  ;;  %v6583_v42 = vmax.f32 %v6410_v49, %v6516_v6  ;;  %v6428_v57 = vld [vmem:[#allocation4 + $0x2f0] ss:$2 sm:$0xff]  ;;  %v6530_v19 = vld [vmem:[#allocation4 + $0x2d1] ss:$2 sm:$0xff]  ;;  %v6540_v51 = vld [vmem:[#allocation4 + $0x321] ss:$2 sm:$0xff] }
 0x456   : > { %v6756_v30 = vrot.slane %v6584_v16, 7  ;;  %6331 = vst.msk [vmem:[#allocation4 + $0x330] sm:$0xff] %vm385_vm6, %v6226_v40  ;;  %v5372_v47 = vadd.f32 %v5161_v8, %v4733_v27  ;;  %v6757_v23 = vrot.slane %v6585_v61, 7  ;;  %v6759_v4 = vrot.slane %v6586_v53, 7  ;;  %v6536_v8 = vld [vmem:[#allocation4 + $0x301] ss:$2 sm:$0xff] }
 0x457   : > { %v4075_v45 = vadd.f32 %v3970_v62, %v3860_v13  ;;  %v5801_v18 = vsel %vm2800_vm2, %v5798_v21, %v5800_v20  ;;  %v6588_v31 = vmax.f32 %v6420_v44, %v6526_v25  ;;  %v6589_v55 = vmax.f32 %v6422_v59, %v6528_v5  ;;  %v6813_v25 = vld [vmem:[#allocation2 + $0x8] sm:$0xff] }
 0x458   : > { %v6764_v10 = vmax.f32 %v19610_v48, %v6756_v30  ;;  %v6010_v1 = vadd.f32 %v5799_v50, %v5372_v47  ;;  %v6758_v41 = vsel %vm3439_vm3, %v6756_v30, %v6757_v23  ;;  %v6760_v63 = vsel %vm3439_vm3, %v6757_v23, %v6759_v4  ;;  %v6815_v47 = vld [vmem:[#allocation2 + $0x18] sm:$0xff]  ;;  %v6817_v23 = vld [vmem:[#allocation2 + $0x28] sm:$0xff]  ;;  %v6814_v4 = vld [vmem:[#allocation2 + $0x10] sm:$0xff] }
 0x459   : > { %v4734_v29 = vadd.f32 %v4524_v22, %v4075_v45  ;;  %v6765_v52 = vmax.f32 %v6583_v42, %v6758_v41  ;;  %v6766_v54 = vmax.f32 %v6584_v16, %v6760_v63  ;;  %v6772_v21 = vrot.slane %v6588_v31, 7  ;;  %v6816_v45 = vld [vmem:[#allocation2 + $0x20] sm:$0xff]  ;;  %v19919_v31 = vld [vmem:[%s21277_s3 + $0x30] sm:$0xff]   ;;  %v6823_v41 = vld [vmem:[#allocation2 + $0x58] sm:$0xff] }
 0x45a   : > { %6767 = vst.msk [vmem:[#allocation2 + $0xad] sm:$0xf0] %vm6646_vm10, %v6764_v10  ;;  %v6773_v48 = vrot.slane %v6589_v55, 7  ;;  %v6122_v11 = vadd.f32 %v19277_v39, %v6010_v1  ;;  %v6587_v50 = vmax.f32 %v6418_v38, %v6524_v2  ;;  %v6591_v56 = vmax.f32 %v6426_v9, %v6532_v58  ;;  %v13878_v2 = vld [vmem:[%s21277_s3 + $0x28] sm:$0xff]   ;;  %v14230_v10 = vld [vmem:[%s21277_s3 + $0x20] sm:$0xff]   ;;  %v6819_v55 = vld [vmem:[#allocation2 + $0x38] sm:$0xff] }
 0x45b   : > { %v5373_v12 = vadd.f32 %v5163_v36, %v4734_v29  ;;  %6768 = vst.msk [vmem:[#allocation2 + $0xb5] sm:$0xff] %vm385_vm6, %v6765_v52  ;;  %v6777_v35 = vmax.f32 %v6586_v53, %v6772_v21  ;;  %v6592_v0 = vmax.f32 %v6428_v57, %v6534_v34  ;;  %v6593_v26 = vmax.f32 %v6430_v14, %v6536_v8  ;;  %v6812_v53 = vld [vmem:[#allocation2] sm:$0xff]  ;;  %v6821_v57 = vld [vmem:[#allocation2 + $0x48] sm:$0xff]  ;;  %v6818_v58 = vld [vmem:[#allocation2 + $0x30] sm:$0xff] }
 0x45c   : > { %6769 = vst.msk [vmem:[#allocation2 + $0xbd] sm:$0x3] %vm6649_vm11, %v6766_v54  ;;  %v6774_v32 = vsel %vm3439_vm3, %v6772_v21, %v6773_v48  ;;  %v6227_v33 = vmax.f32 %v6122_v11, 0.0  ;;  %v6590_v7 = vmax.f32 %v6424_v46, %v6530_v19  ;;  %v6784_v15 = vrot.slane %v6591_v56, 7  ;;  %v6820_v9 = vld [vmem:[#allocation2 + $0x40] sm:$0xff]  ;;  %v6825_v14 = vld [vmem:[#allocation2 + $0x68] sm:$0xff] }
 0x45d   : > { %v6011_v62 = vadd.f32 %v5801_v18, %v5373_v12  ;;  %v6778_v28 = vmax.f32 %v6587_v50, %v6774_v32  ;;  %6779 = vst.msk [vmem:[#allocation2 + $0xbf] sm:$0xfc] %vm6660_vm12, %v6777_v35  ;;  %v6785_v43 = vrot.slane %v6592_v0, 7  ;;  %v6787_v60 = vrot.slane %v6593_v26, 7  ;;  %v6824_v63 = vld [vmem:[#allocation2 + $0x60] sm:$0xff]  ;;  %v6822_v52 = vld [vmem:[#allocation2 + $0x50] sm:$0xff] }
 0x45e   : > { %6332 = vst.msk [vmem:[#allocation4 + $0x338] sm:$0xff] %vm385_vm6, %v6227_v33  ;;  %v19880_v3 = vmax.f32 %v6434_v17, %v6540_v51  ;;  %v6840_v42 = vpack.c.bf16 %v6813_v25, %v6812_v53  ;;  %v19902_v38 = vpack.c.bf16 %v6815_v47, %v6814_v4  ;;  %v19907_v18 = vpack.c.bf16 %v6817_v23, %v6816_v45  ;;  %v6827_v12 = vld [vmem:[#allocation2 + $0x78] sm:$0xff]  ;;  %v6828_v50 = vld [vmem:[#allocation2 + $0x80] sm:$0xff]  ;;  %v6826_v0 = vld [vmem:[#allocation2 + $0x70] sm:$0xff] }
 0x45f   : > { %v6123_v24 = vadd.f32 %v19277_v39, %v6011_v62  ;;  %6780 = vst.msk [vmem:[#allocation2 + $0xc7] sm:$0xff] %vm385_vm6, %v6778_v28  ;;  %v6786_v49 = vsel %vm3439_vm3, %v6784_v15, %v6785_v43  ;;  %v6788_v6 = vsel %vm3439_vm3, %v6785_v43, %v6787_v60  ;;  %v19921_v1 = vpack.c.bf16 %v6819_v55, %v6818_v58  ;;  %v6432_v62 = vld [vmem:[#allocation4 + $0x310] ss:$2 sm:$0xff]  ;;  %v6538_v28 = vld [vmem:[#allocation4 + $0x311] ss:$2 sm:$0xff]  ;;  %v7303_v25 = vld [vmem:[#allocation2 + $0xa] sm:$0xff] }
 0x460   : > { %v6791_v44 = vmax.f32 %v6590_v7, %v6786_v49  ;;  %v6792_v37 = vmax.f32 %v6591_v56, %v6788_v6  ;;  %v6798_v40 = vrot.slane %v19880_v3, 7  ;;  %v19924_v29 = vpack.c.bf16 %v6821_v57, %v6820_v9  ;;  %v6829_v56 = vld [vmem:[#allocation2 + $0x88] sm:$0xff]  ;;  %v6831_v17 = vld [vmem:[#allocation2 + $0x98] sm:$0xff]  ;;  %v6832_v51 = vld [vmem:[#allocation2 + $0xa0] sm:$0xff] }
 0x461   : > { %v6228_v16 = vmax.f32 %v6123_v24, 0.0  ;;  %v19930_v48 = vpack.c.bf16 %v6823_v41, %v6822_v52  ;;  %v19932_v46 = vpack.c.bf16 %v6825_v14, %v6824_v63  ;;  %v19940_v33 = vpack.c.bf16 %v6829_v56, %v6828_v50  ;;  %v6833_v24 = vld [vmem:[#allocation2 + $0xa8] sm:$0xff]  ;;  %v6830_v6 = vld [vmem:[#allocation2 + $0x90] sm:$0xff]  ;;  %v13881_v55 = vld [vmem:[%s21277_s3 + $0x40] sm:$0xff]  }
 0x462   : > { %v6880_v20 = vld [vmem:[#allocation2 + $0xb1] sm:$0xff]  ;;  %6793 = vst.msk [vmem:[#allocation2 + $0xd1] sm:$0xff] %vm385_vm6, %v6791_v44  ;;  %v6806_v5 = vmax.f32 %v6593_v26, %v6798_v40  ;;  %v19938_v26 = vpack.c.bf16 %v6827_v12, %v6826_v0  ;;  %v6594_v43 = vmax.f32 %v6432_v62, %v6538_v28  ;;  %v19955_v44 = vpack.c.bf16 %v6833_v24, %v6832_v51  ;;  %v7302_v53 = vld [vmem:[#allocation2 + $0x2] sm:$0xff]  ;;  %v7309_v9 = vld [vmem:[#allocation2 + $0x3a] sm:$0xff] }
 0x463   : > { %6333 = vst.msk [vmem:[#allocation4 + $0x340] sm:$0xff] %vm385_vm6, %v6228_v16  ;;  %v6881_v61 = vld [vmem:[#allocation2 + $0xb9] sm:$0xff]  ;;  %v19952_v16 = vpack.c.bf16 %v6831_v17, %v6830_v6  ;;  %v7306_v47 = vld [vmem:[#allocation2 + $0x22] sm:$0xff]  ;;  %v7307_v45 = vld [vmem:[#allocation2 + $0x2a] sm:$0xff] }
 0x464   : > { %6794 = vst.msk [vmem:[#allocation2 + $0xd9] sm:$0x3f] %vm6611_vm7, %v6792_v37  ;;  %v19885_v39 = vpack.c.bf16 %v6881_v61, %v6880_v20  ;;  %v6835_v37 = vld [vmem:[#allocation2 + $0xb8] sm:$0xff]  ;;  %v6834_v61 = vld [vmem:[#allocation2 + $0xb0] sm:$0xff]  ;;  %v7310_v63 = vld [vmem:[#allocation2 + $0x42] sm:$0xff] }
 0x465   : > { %6809 = vst.msk [vmem:[#allocation2 + $0xdb] sm:$0xc0] %vm6627_vm8, %v6806_v5  ;;  %v6436_v34 = vld [vmem:[#allocation4 + $0x330] ss:$2 sm:$0xff]  ;;  %v6542_v8 = vld [vmem:[#allocation4 + $0x331] ss:$2 sm:$0xff] }
 0x466   : > { %13088 = vmatmul.mubr.msk.bf16.gmra.mrb[20].mxu0 %vm385_vm6, %v19885_v39  ;;  %v6882_v59 = vld [vmem:[#allocation2 + $0xc1] sm:$0xff]  ;;  %v6883_v27 = vld [vmem:[#allocation2 + $0xc9] sm:$0xff]  ;;  %v6596_v19 = vmax.f32 %v6436_v34, %v6542_v8  ;;  %v7304_v23 = vld [vmem:[#allocation2 + $0x12] sm:$0xff] }
 0x467   : > { %v19890_v13 = vpack.c.bf16 %v6883_v27, %v6882_v59  ;;  %v6837_v20 = vld [vmem:[#allocation2 + $0xc8] sm:$0xff]  ;;  %v19961_v59 = vpack.c.bf16 %v6835_v37, %v6834_v61  ;;  %v7308_v58 = vld [vmem:[#allocation2 + $0x32] sm:$0xff] }
 0x468   : > { %v6799_v32 = vrot.slane %v6596_v19, 7  ;;  %v7311_v57 = vld [vmem:[#allocation2 + $0x4a] sm:$0xff]  ;;  %v19989_v41 = vpack.c.bf16 %v7309_v9, %v7308_v58  ;;  %v7314_v34 = vld [vmem:[#allocation2 + $0x62] sm:$0xff]  ;;  %v7312_v52 = vld [vmem:[#allocation2 + $0x52] sm:$0xff] }
 0x469   : > { %13091 = vmatprep.mubr.msk.bf16.mxu0 %vm385_vm6, %v19890_v13  ;;  %v6884_v22 = vld [vmem:[#allocation2 + $0xd1] sm:$0xff]  ;;  %v19991_v14 = vpack.c.bf16 %v7311_v57, %v7310_v63  ;;  %v7317_v19 = vld [vmem:[#allocation2 + $0x7a] sm:$0xff]  ;;  %v7318_v56 = vld [vmem:[#allocation2 + $0x82] sm:$0xff] }
 0x46a   : > { %v6438_v54 = vld [vmem:[#allocation4 + $0x340] ss:$2 sm:$0xf]  ;;  %v6544_v21 = vld [vmem:[#allocation4 + $0x341] ss:$2 sm:$0xf]  ;;  %v6800_v7 = vsel %vm3439_vm3, %v6798_v40, %v6799_v32 }
 0x46b   : > { %v6885_v36 = vld [vmem:[#allocation2 + $0xd9] sm:$0xff]  ;;  %v6597_v11 = vmax.f32 %v6438_v54, %v6544_v21  ;;  %v6807_v49 = vmax.f32 %v6594_v43, %v6800_v7  ;;  %v6838_v5 = vld [vmem:[#allocation2 + $0xd0] sm:$0xff]  ;;  %v7322_v0 = vld [vmem:[#allocation2 + $0xa2] sm:$0xff] }
 0x46c   : > { %v19897_v30 = vpack.c.bf16 %v6885_v36, %v6884_v22  ;;  %v6839_v27 = vld [vmem:[#allocation2 + $0xd8] sm:$0xff]  ;;  %v7330_v36 = vpack.c.bf16 %v7303_v25, %v7302_v53  ;;  %v7315_v8 = vld [vmem:[#allocation2 + $0x6a] sm:$0xff]  ;;  %v7326_v24 = vld [vmem:[#allocation2 + $0xc2] sm:$0xff] }
 0x46d   : > { %v6801_v35 = vrot.slane %v6597_v11, 7  ;;  %6810 = vst.msk [vmem:[#allocation2 + $0xe3] sm:$0xff] %vm385_vm6, %v6807_v49  ;;  %v19969_v22 = vpack.c.bf16 %v6839_v27, %v6838_v5  ;;  %v19999_v21 = vpack.c.bf16 %v7315_v8, %v7314_v34  ;;  %v7319_v11 = vld [vmem:[#allocation2 + $0x8a] sm:$0xff]  ;;  %v7316_v12 = vld [vmem:[#allocation2 + $0x72] sm:$0xff]  ;;  %v7325_v43 = vld [vmem:[#allocation2 + $0xba] sm:$0xff] }
 0x46e   : > { %13092 = vmatmul.mubr.msk.bf16.gmra.mrb[24].mxu0 %vm385_vm6, %v19897_v30  ;;  %v20005_v50 = vpack.c.bf16 %v7317_v19, %v7316_v12  ;;  %v7323_v62 = vld [vmem:[#allocation2 + $0xaa] sm:$0xff]  ;;  %v7320_v28 = vld [vmem:[#allocation2 + $0x92] sm:$0xff]  ;;  %v7329_v6 = vld [vmem:[#allocation2 + $0xda] sm:$0xff] }
 0x46f   : > { %13099 = vmatprep.mubr.msk.bf16.mxu0 %vm385_vm6, %v6840_v42  ;;  %v6802_v15 = vsel %vm3439_vm3, %v6799_v32, %v6801_v35  ;;  %v7305_v42 = vld [vmem:[#allocation2 + $0x1a] sm:$0xff]  ;;  %v20007_v32 = vpack.c.bf16 %v7319_v11, %v7318_v56  ;;  %v7324_v17 = vld [vmem:[#allocation2 + $0xb2] sm:$0xff]  ;;  %v7855_v63 = vld [vmem:[#allocation2 + $0x49] sm:$0xff] }
 0x470   : > { %v6808_v60 = vmax.f32 %v19880_v3, %v6802_v15  ;;  %v6836_v3 = vld [vmem:[#allocation2 + $0xc0] sm:$0xff]  ;;  %v19974_v4 = vpack.c.bf16 %v7305_v42, %v7304_v23  ;;  %v20015_v15 = vpack.c.bf16 %v7323_v62, %v7322_v0  ;;  %v20021_v51 = vpack.c.bf16 %v7325_v43, %v7324_v17  ;;  %v7328_v37 = vld [vmem:[#allocation2 + $0xd2] sm:$0xff]  ;;  %v7859_v11 = vld [vmem:[#allocation2 + $0x69] sm:$0xff] }
 0x471   : > { %v19963_v40 = vpack.c.bf16 %v6837_v20, %v6836_v3  ;;  %v7321_v35 = vld [vmem:[#allocation2 + $0x9a] sm:$0xff]  ;;  %v20029_v3 = vpack.c.bf16 %v7329_v6, %v7328_v37  ;;  %v13882_v20 = vld [vmem:[%s21277_s3 + $0x48] sm:$0xff]   ;;  %v13883_v61 = vld [vmem:[%s21277_s3 + $0x50] sm:$0xff]  }
 0x472   : > { %6811 = vst.msk [vmem:[#allocation2 + $0xeb] sm:$0xf] %vm6630_vm9, %v6808_v60  ;;  %v20013_v7 = vpack.c.bf16 %v7321_v35, %v7320_v28  ;;  %v7327_v60 = vld [vmem:[#allocation2 + $0xca] sm:$0xff]  ;;  %v7849_v27 = vld [vmem:[#allocation2 + $0x19] sm:$0xff]  ;;  %v7850_v42 = vld [vmem:[#allocation2 + $0x21] sm:$0xff] }
 0x473   : > { %v20023_v49 = vpack.c.bf16 %v7327_v60, %v7326_v24  ;;  %v7848_v5 = vld [vmem:[#allocation2 + $0x11] sm:$0xff]  ;;  %v13885_v57 = vld [vmem:[%s21277_s3 + $0x60] sm:$0xff]   ;;  %v7863_v28 = vld [vmem:[#allocation2 + $0x89] sm:$0xff] }
 0x474   : > { %v7601_v53 = vld [vmem:[#allocation2 + $0xe0] sm:$0xff]  ;;  %v7856_v8 = vld [vmem:[#allocation2 + $0x51] sm:$0xff]  ;;  %v7867_v37 = vld [vmem:[#allocation2 + $0xa9] sm:$0xff] }
 0x475   : > { %v7854_v58 = vld [vmem:[#allocation2 + $0x41] sm:$0xff]  ;;  %v7861_v12 = vld [vmem:[#allocation2 + $0x79] sm:$0xff]  ;;  %v7860_v35 = vld [vmem:[#allocation2 + $0x71] sm:$0xff] }
 0x476   : > { %13100 = vmatmul.mubr.msk.bf16.vlgmr.msra.gmra.mrb[0].mxu0 %vm385_vm6, %v19902_v38  ;;  %v20084_v34 = vpack.c.bf16 %v7855_v63, %v7854_v58  ;;  %v7858_v19 = vld [vmem:[#allocation2 + $0x61] sm:$0xff]  ;;  %v20094_v0 = vpack.c.bf16 %v7861_v12, %v7860_v35  ;;  %v7865_v43 = vld [vmem:[#allocation2 + $0x99] sm:$0xff]  ;;  %v7864_v17 = vld [vmem:[#allocation2 + $0x91] sm:$0xff] }
 0x477   : > { %13128 = vmatpush3.bf16.msra.mxu0 %v14230_v10  ;;  %13103 = vmatprep.mubr.msk.bf16.mxu0 %vm385_vm6, %v19907_v18  ;;  %v19979_v10 = vpack.c.bf16 %v7307_v45, %v7306_v47  ;;  %v7851_v47 = vld [vmem:[#allocation2 + $0x29] sm:$0xff]  ;;  %v7853_v45 = vld [vmem:[#allocation2 + $0x39] sm:$0xff]  ;;  %v20092_v56 = vpack.c.bf16 %v7859_v11, %v7858_v19  ;;  %v7862_v62 = vld [vmem:[#allocation2 + $0x81] sm:$0xff]  ;;  %v20102_v24 = vpack.c.bf16 %v7865_v43, %v7864_v17 }
 0x478   : > { %13129 = vmatprep.subr.bf16.mxu0 %v13878_v2  ;;  %v20070_v23 = vpack.c.bf16 %v7851_v47, %v7850_v42  ;;  %v20100_v60 = vpack.c.bf16 %v7863_v28, %v7862_v62  ;;  %v7866_v6 = vld [vmem:[#allocation2 + $0xa1] sm:$0xff]  ;;  %v13888_v47 = vld [vmem:[%s21277_s3 + $0x78] sm:$0xff]  }
 0x47b   : > { %13130 = vmatpush3.bf16.msra.mxu0 %v13878_v2  ;;  %v13880_v2 = vld [vmem:[%s21277_s3 + $0x38] sm:$0xff]  }
 0x47c   : > { %13159 = vmatprep.subr.bf16.mxu0 %v19919_v31 }
 0x47e   : > { %13104 = vmatmul.mubr.msk.bf16.gmra.mrb[4].mxu0 %vm385_vm6, %v19921_v1 }
 0x47f   : > { %13107 = vmatprep.mubr.msk.bf16.mxu0 %vm385_vm6, %v19924_v29 }
 0x486   : > { %13108 = vmatmul.mubr.msk.bf16.gmra.mrb[8].mxu0 %vm385_vm6, %v19930_v48 }
 0x487   : > { %13111 = vmatprep.mubr.msk.bf16.mxu0 %vm385_vm6, %v19932_v46 }
 0x48e   : > { %13112 = vmatmul.mubr.msk.bf16.gmra.mrb[12].mxu0 %vm385_vm6, %v19938_v26 }
 0x48f   : > { %13115 = vmatprep.mubr.msk.bf16.mxu0 %vm385_vm6, %v19940_v33 }
 0x496   : > { %13116 = vmatmul.mubr.msk.bf16.gmra.mrb[16].mxu0 %vm385_vm6, %v19952_v16 }
 0x497   : > { %13119 = vmatprep.mubr.msk.bf16.mxu0 %vm385_vm6, %v19955_v44 }
 0x49e   : > { %13120 = vmatmul.mubr.msk.bf16.gmra.mrb[20].mxu0 %vm385_vm6, %v19961_v59 }
 0x49f   : > { %13123 = vmatprep.mubr.msk.bf16.mxu0 %vm385_vm6, %v19963_v40 }
 0x4a6   : > { %13124 = vmatmul.mubr.msk.bf16.gmra.mrb[24].mxu0 %vm385_vm6, %v19969_v22 }
 0x4a7   : > { %13131 = vmatprep.mubr.msk.bf16.mxu0 %vm385_vm6, %v7330_v36  ;;  %v7876_v36 = vpack.c.bf16 %v7849_v27, %v7848_v5  ;;  %v13887_v5 = vld [vmem:[%s21277_s3 + $0x70] sm:$0xff]  }
 0x4ae   : > { %13132 = vmatmul.mubr.msk.bf16.vlgmr.msra.gmra.mrb[0].mxu0 %vm385_vm6, %v19974_v4 }
 0x4af   : > { %13160 = vmatpush3.bf16.msra.mxu0 %v19919_v31  ;;  %13135 = vmatprep.mubr.msk.bf16.mxu0 %vm385_vm6, %v19979_v10  ;;  %v7313_v31 = vld [vmem:[#allocation2 + $0x5a] sm:$0xff] }
 0x4b0   : > { %13161 = vmatprep.subr.bf16.mxu0 %v13880_v2  ;;  %v19997_v54 = vpack.c.bf16 %v7313_v31, %v7312_v52  ;;  %v7857_v31 = vld [vmem:[#allocation2 + $0x59] sm:$0xff] }
 0x4b1   : > { %v20086_v52 = vpack.c.bf16 %v7857_v31, %v7856_v8 }
 0x4b3   : > { %13162 = vmatpush3.bf16.msra.mxu0 %v13880_v2  ;;  %v7852_v2 = vld [vmem:[#allocation2 + $0x31] sm:$0xff] }
 0x4b4   : > { %13191 = vmatprep.subr.bf16.mxu0 %v13881_v55  ;;  %v20075_v9 = vpack.c.bf16 %v7853_v45, %v7852_v2  ;;  %v13889_v45 = vld [vmem:[%s21277_s3 + $0x80] sm:$0xff]  }
 0x4b6   : > { %13136 = vmatmul.mubr.msk.bf16.gmra.mrb[4].mxu0 %vm385_vm6, %v19989_v41 }
 0x4b7   : > { %13139 = vmatprep.mubr.msk.bf16.mxu0 %vm385_vm6, %v19991_v14 }
 0x4be   : > { %13140 = vmatmul.mubr.msk.bf16.gmra.mrb[8].mxu0 %vm385_vm6, %v19997_v54 }
 0x4bf   : > { %13143 = vmatprep.mubr.msk.bf16.mxu0 %vm385_vm6, %v19999_v21 }
 0x4c6   : > { %13144 = vmatmul.mubr.msk.bf16.gmra.mrb[12].mxu0 %vm385_vm6, %v20005_v50 }
 0x4c7   : > { %13147 = vmatprep.mubr.msk.bf16.mxu0 %vm385_vm6, %v20007_v32 }
 0x4ce   : > { %13148 = vmatmul.mubr.msk.bf16.gmra.mrb[16].mxu0 %vm385_vm6, %v20013_v7 }
 0x4cf   : > { %13151 = vmatprep.mubr.msk.bf16.mxu0 %vm385_vm6, %v20015_v15 }
 0x4d6   : > { %13152 = vmatmul.mubr.msk.bf16.gmra.mrb[20].mxu0 %vm385_vm6, %v20021_v51 }
 0x4d7   : > { %13155 = vmatprep.mubr.msk.bf16.mxu0 %vm385_vm6, %v20023_v49 }
 0x4de   : > { %13156 = vmatmul.mubr.msk.bf16.gmra.mrb[24].mxu0 %vm385_vm6, %v20029_v3 }
 0x4df   : > { %13163 = vmatprep.mubr.msk.bf16.mxu0 %vm385_vm6, %v19902_v38  ;;  %v7602_v38 = vld [vmem:[#allocation2 + $0xe8] sm:$0xff] }
 0x4e0   : > { %v20065_v25 = vpack.c.bf16 %v7602_v38, %v7601_v53  ;;  %v7874_v38 = vld [vmem:[#allocation2 + $0xe1] sm:$0xff] }
 0x4e1   : > { %v13886_v53 = vld [vmem:[%s21277_s3 + $0x68] sm:$0xff]  }
 0x4e6   : > { %13164 = vmatmul.mubr.msk.bf16.vlgmr.msra.gmra.mrb[0].mxu0 %vm385_vm6, %v19907_v18 }
 0x4e7   : > { %13192 = vmatpush3.bf16.msra.mxu0 %v13881_v55  ;;  %13167 = vmatprep.mubr.msk.bf16.mxu0 %vm385_vm6, %v19921_v1  ;;  %v13884_v55 = vld [vmem:[%s21277_s3 + $0x58] sm:$0xff]  }
 0x4e8   : > { %13193 = vmatprep.subr.bf16.mxu0 %v13882_v20 }
 0x4eb   : > { %13194 = vmatpush3.bf16.msra.mxu0 %v13882_v20  ;;  %v20108_v20 = vpack.c.bf16 %v7867_v37, %v7866_v6 }
 0x4ec   : > { %13223 = vmatprep.subr.bf16.mxu0 %v13883_v61 }
 0x4ee   : > { %13168 = vmatmul.mubr.msk.bf16.gmra.mrb[4].mxu0 %vm385_vm6, %v19924_v29 }
 0x4ef   : > { %13171 = vmatprep.mubr.msk.bf16.mxu0 %vm385_vm6, %v19930_v48 }
 0x4f6   : > { %13172 = vmatmul.mubr.msk.bf16.gmra.mrb[8].mxu0 %vm385_vm6, %v19932_v46 }
 0x4f7   : > { %13175 = vmatprep.mubr.msk.bf16.mxu0 %vm385_vm6, %v19938_v26 }
 0x4fe   : > { %13176 = vmatmul.mubr.msk.bf16.gmra.mrb[12].mxu0 %vm385_vm6, %v19940_v33 }
 0x4ff   : > { %13179 = vmatprep.mubr.msk.bf16.mxu0 %vm385_vm6, %v19952_v16 }
 0x506   : > { %13180 = vmatmul.mubr.msk.bf16.gmra.mrb[16].mxu0 %vm385_vm6, %v19955_v44 }
 0x507   : > { %13183 = vmatprep.mubr.msk.bf16.mxu0 %vm385_vm6, %v19961_v59 }
 0x50e   : > { %13184 = vmatmul.mubr.msk.bf16.gmra.mrb[20].mxu0 %vm385_vm6, %v19963_v40 }
 0x50f   : > { %13187 = vmatprep.mubr.msk.bf16.mxu0 %vm385_vm6, %v19969_v22 }
 0x516   : > { %13188 = vmatmul.mubr.msk.bf16.gmra.mrb[24].mxu0 %vm385_vm6, %v20065_v25 }
 0x517   : > { %13195 = vmatprep.mubr.msk.bf16.mxu0 %vm385_vm6, %v7876_v36  ;;  %v8147_v36 = vld [vmem:[#allocation2 + $0xe2] sm:$0xff] }
 0x51e   : > { %13196 = vmatmul.mubr.msk.bf16.vlgmr.msra.gmra.mrb[0].mxu0 %vm385_vm6, %v20070_v23 }
 0x51f   : > { %13224 = vmatpush3.bf16.msra.mxu0 %v13883_v61  ;;  %13199 = vmatprep.mubr.msk.bf16.mxu0 %vm385_vm6, %v20075_v9  ;;  %v7875_v61 = vld [vmem:[#allocation2 + $0xe9] sm:$0xff] }
 0x520   : > { %13225 = vmatprep.subr.bf16.mxu0 %v13884_v55  ;;  %v20118_v27 = vpack.c.bf16 %v7875_v61, %v7874_v38 }
 0x523   : > { %13226 = vmatpush3.bf16.msra.mxu0 %v13884_v55 }
 0x524   : > { %13255 = vmatprep.subr.bf16.mxu0 %v13885_v57 }
 0x526   : > { %13200 = vmatmul.mubr.msk.bf16.gmra.mrb[4].mxu0 %vm385_vm6, %v20084_v34 }
 0x527   : > { %13203 = vmatprep.mubr.msk.bf16.mxu0 %vm385_vm6, %v20086_v52 }
 0x52e   : > { %13204 = vmatmul.mubr.msk.bf16.gmra.mrb[8].mxu0 %vm385_vm6, %v20092_v56 }
 0x52f   : > { %13207 = vmatprep.mubr.msk.bf16.mxu0 %vm385_vm6, %v20094_v0 }
 0x536   : > { %13208 = vmatmul.mubr.msk.bf16.gmra.mrb[12].mxu0 %vm385_vm6, %v20100_v60 }
 0x537   : > { %13211 = vmatprep.mubr.msk.bf16.mxu0 %vm385_vm6, %v20102_v24 }
 0x53e   : > { %13212 = vmatmul.mubr.msk.bf16.gmra.mrb[16].mxu0 %vm385_vm6, %v20108_v20 }
 0x53f   : > { %13215 = vmatprep.mubr.msk.bf16.mxu0 %vm385_vm6, %v19885_v39 }
 0x546   : > { %13216 = vmatmul.mubr.msk.bf16.gmra.mrb[20].mxu0 %vm385_vm6, %v19890_v13 }
 0x547   : > { %13219 = vmatprep.mubr.msk.bf16.mxu0 %vm385_vm6, %v19897_v30 }
 0x54e   : > { %13220 = vmatmul.mubr.msk.bf16.gmra.mrb[24].mxu0 %vm385_vm6, %v20118_v27 }
 0x54f   : > { %13227 = vmatprep.mubr.msk.bf16.mxu0 %vm385_vm6, %v19974_v4  ;;  %v8148_v4 = vld [vmem:[#allocation2 + $0xea] sm:$0xff] }
 0x550   : > { %v20154_v42 = vpack.c.bf16 %v8148_v4, %v8147_v36 }
 0x556   : > { %13228 = vmatmul.mubr.msk.bf16.vlgmr.msra.gmra.mrb[0].mxu0 %vm385_vm6, %v19979_v10 }
 0x557   : > { %13256 = vmatpush3.bf16.msra.mxu0 %v13885_v57  ;;  %13231 = vmatprep.mubr.msk.bf16.mxu0 %vm385_vm6, %v19989_v41 }
 0x558   : > { %13257 = vmatprep.subr.bf16.mxu0 %v13886_v53 }
 0x55b   : > { %13258 = vmatpush3.bf16.msra.mxu0 %v13886_v53 }
 0x55c   : > { %13287 = vmatprep.subr.bf16.mxu0 %v13887_v5 }
 0x55e   : > { %13232 = vmatmul.mubr.msk.bf16.gmra.mrb[4].mxu0 %vm385_vm6, %v19991_v14 }
 0x55f   : > { %13235 = vmatprep.mubr.msk.bf16.mxu0 %vm385_vm6, %v19997_v54 }
 0x566   : > { %13236 = vmatmul.mubr.msk.bf16.gmra.mrb[8].mxu0 %vm385_vm6, %v19999_v21 }
 0x567   : > { %13239 = vmatprep.mubr.msk.bf16.mxu0 %vm385_vm6, %v20005_v50 }
 0x56e   : > { %13240 = vmatmul.mubr.msk.bf16.gmra.mrb[12].mxu0 %vm385_vm6, %v20007_v32 }
 0x56f   : > { %13243 = vmatprep.mubr.msk.bf16.mxu0 %vm385_vm6, %v20013_v7 }
 0x576   : > { %13244 = vmatmul.mubr.msk.bf16.gmra.mrb[16].mxu0 %vm385_vm6, %v20015_v15 }
 0x577   : > { %13247 = vmatprep.mubr.msk.bf16.mxu0 %vm385_vm6, %v20021_v51 }
 0x57e   : > { %13248 = vmatmul.mubr.msk.bf16.gmra.mrb[20].mxu0 %vm385_vm6, %v20023_v49 }
 0x57f   : > { %13251 = vmatprep.mubr.msk.bf16.mxu0 %vm385_vm6, %v20029_v3 }
 0x586   : > { %13252 = vmatmul.mubr.msk.bf16.gmra.mrb[24].mxu0 %vm385_vm6, %v20154_v42 }
 0x587   : > { %13259 = vmatprep.mubr.msk.bf16.mxu0 %vm385_vm6, %v19907_v18  ;;  %v21917_v18 = vmov 0.0  }
 0x588   : > { %420 = vst.msk [vmem:[#allocation3] sm:$0xff] %vm419_vm13, %v21917_v18  ;;  %421 = vst.msk [vmem:[#allocation3 + $0x8] sm:$0xff] %vm419_vm13, %v21917_v18  ;;  %13359 = vmatprep.mubr.msk.bf16.mxu1 %vm14297_vm14, %v21917_v18 }
 0x589   : > { %422 = vst.msk [vmem:[#allocation3 + $0x10] sm:$0xff] %vm419_vm13, %v21917_v18  ;;  %423 = vst.msk [vmem:[#allocation3 + $0x18] sm:$0xff] %vm419_vm13, %v21917_v18 }
 0x58a   : > { %424 = vst.msk [vmem:[#allocation3 + $0x20] sm:$0xff] %vm419_vm13, %v21917_v18  ;;  %425 = vst.msk [vmem:[#allocation3 + $0x28] sm:$0xff] %vm419_vm13, %v21917_v18 }
 0x58b   : > { %426 = vst.msk [vmem:[#allocation3 + $0x30] sm:$0xff] %vm419_vm13, %v21917_v18  ;;  %427 = vst.msk [vmem:[#allocation3 + $0x38] sm:$0xff] %vm419_vm13, %v21917_v18 }
 0x58c   : > { %428 = vst.msk [vmem:[#allocation3 + $0x40] sm:$0xff] %vm419_vm13, %v21917_v18  ;;  %429 = vst.msk [vmem:[#allocation3 + $0x48] sm:$0xff] %vm419_vm13, %v21917_v18 }
 0x58d   : > { %430 = vst.msk [vmem:[#allocation3 + $0x50] sm:$0xff] %vm419_vm13, %v21917_v18  ;;  %431 = vst.msk [vmem:[#allocation3 + $0x58] sm:$0xff] %vm419_vm13, %v21917_v18 }
 0x58e   : > { %13260 = vmatmul.mubr.msk.bf16.vlgmr.msra.gmra.mrb[0].mxu0 %vm385_vm6, %v19921_v1  ;;  %v8420_v1 = vld [vmem:[#allocation2 + $0xf0] sm:$0xff] }
 0x58f   : > { %13288 = vmatpush3.bf16.msra.mxu0 %v13887_v5  ;;  %13263 = vmatprep.mubr.msk.bf16.mxu0 %vm385_vm6, %v19924_v29  ;;  %v8421_v29 = vld [vmem:[#allocation2 + $0xf8] sm:$0xff] }
 0x590   : > { %13289 = vmatprep.subr.bf16.mxu0 %v13888_v47 }
 0x593   : > { %13290 = vmatpush3.bf16.msra.mxu0 %v13888_v47 }
 0x594   : > { %13319 = vmatprep.subr.bf16.mxu0 %v13889_v45 }
 0x596   : > { %13264 = vmatmul.mubr.msk.bf16.gmra.mrb[4].mxu0 %vm385_vm6, %v19930_v48  ;;  %v8435_v48 = vpack.c.bf16 %v8421_v29, %v8420_v1 }
 0x597   : > { %13267 = vmatprep.mubr.msk.bf16.mxu0 %vm385_vm6, %v19932_v46  ;;  %v13890_v46 = vld [vmem:[%s21277_s3 + $0x88] sm:$0xff]  }
 0x59e   : > { %13268 = vmatmul.mubr.msk.bf16.gmra.mrb[8].mxu0 %vm385_vm6, %v19938_v26  ;;  %v8693_v26 = vld [vmem:[#allocation2 + $0xf1] sm:$0xff] }
 0x59f   : > { %13271 = vmatprep.mubr.msk.bf16.mxu0 %vm385_vm6, %v19940_v33  ;;  %v8694_v33 = vld [vmem:[#allocation2 + $0xf9] sm:$0xff] }
 0x5a6   : > { %13272 = vmatmul.mubr.msk.bf16.gmra.mrb[12].mxu0 %vm385_vm6, %v19952_v16  ;;  %v8708_v16 = vpack.c.bf16 %v8694_v33, %v8693_v26  ;;  %v9410_v33 = vld [vmem:[#allocation3 + $0x1] sm:$0xff] }
 0x5a7   : > { %13275 = vmatprep.mubr.msk.bf16.mxu0 %vm385_vm6, %v19955_v44  ;;  %v21918_v44 = vmov 0  }
 0x5ae   : > { %13276 = vmatmul.mubr.msk.bf16.gmra.mrb[16].mxu0 %vm385_vm6, %v19961_v59  ;;  %v13891_v59 = vld [vmem:[%s21279_s5 + $0x20] sm:$0xff]  }
 0x5af   : > { %13279 = vmatprep.mubr.msk.bf16.mxu0 %vm385_vm6, %v19963_v40  ;;  %13352 = vmatpush3.bf16.msra.mxu1 %v13891_v59  ;;  %v13892_v40 = vld [vmem:[%s21279_s5 + $0x28] sm:$0xff]  }
 0x5b0   : > { %13353 = vmatprep.subr.bf16.mxu1 %v21917_v18 }
 0x5b3   : > { %13354 = vmatpush3.bf16.msra.mxu1 %v13892_v40 }
 0x5b4   : > { %13355 = vmatprep.subr.bf16.mxu1 %v21917_v18 }
 0x5b6   : > { %13280 = vmatmul.mubr.msk.bf16.gmra.mrb[20].mxu0 %vm385_vm6, %v19969_v22  ;;  %v13893_v22 = vld [vmem:[%s21279_s5 + $0x30] sm:$0xff]  }
 0x5b7   : > { %13283 = vmatprep.mubr.msk.bf16.mxu0 %vm385_vm6, %v20065_v25  ;;  %13356 = vmatpush3.bf16.msra.mxu1 %v13893_v22 }
 0x5b8   : > { %13357 = vmatprep.subr.bf16.mxu1 %v21917_v18 }
 0x5be   : > { %13284 = vmatmul.mubr.msk.bf16.gmra.mrb[24].mxu0 %vm385_vm6, %v8435_v48 }
 0x5bf   : > { %13291 = vmatprep.mubr.msk.bf16.mxu0 %vm385_vm6, %v20070_v23 }
 0x5c6   : > { %13292 = vmatmul.mubr.msk.bf16.vlgmr.msra.gmra.mrb[0].mxu0 %vm385_vm6, %v20075_v9 }
 0x5c7   : > { %13320 = vmatpush3.bf16.msra.mxu0 %v13889_v45  ;;  %13295 = vmatprep.mubr.msk.bf16.mxu0 %vm385_vm6, %v20084_v34 }
 0x5c8   : > { %13321 = vmatprep.subr.bf16.mxu0 %v13890_v46 }
 0x5cb   : > { %13322 = vmatpush3.bf16.msra.mxu0 %v13890_v46 }
 0x5ce   : > { %13296 = vmatmul.mubr.msk.bf16.gmra.mrb[4].mxu0 %vm385_vm6, %v20086_v52 }
 0x5cf   : > { %13299 = vmatprep.mubr.msk.bf16.mxu0 %vm385_vm6, %v20092_v56 }
 0x5d6   : > { %13300 = vmatmul.mubr.msk.bf16.gmra.mrb[8].mxu0 %vm385_vm6, %v20094_v0 }
 0x5d7   : > { %13303 = vmatprep.mubr.msk.bf16.mxu0 %vm385_vm6, %v20100_v60 }
 0x5de   : > { %13304 = vmatmul.mubr.msk.bf16.gmra.mrb[12].mxu0 %vm385_vm6, %v20102_v24 }
 0x5df   : > { %13307 = vmatprep.mubr.msk.bf16.mxu0 %vm385_vm6, %v20108_v20 }
 0x5e6   : > { %13308 = vmatmul.mubr.msk.bf16.gmra.mrb[16].mxu0 %vm385_vm6, %v19885_v39  ;;  %v8966_v39 = vld [vmem:[#allocation2 + $0xf2] sm:$0xff] }
 0x5e7   : > { %13311 = vmatprep.mubr.msk.bf16.mxu0 %vm385_vm6, %v19890_v13  ;;  %v8967_v13 = vld [vmem:[#allocation2 + $0xfa] sm:$0xff] }
 0x5ee   : > { %13312 = vmatmul.mubr.msk.bf16.gmra.mrb[20].mxu0 %vm385_vm6, %v19897_v30  ;;  %v8981_v30 = vpack.c.bf16 %v8967_v13, %v8966_v39 }
 0x5ef   : > { %13315 = vmatprep.mubr.msk.bf16.mxu0 %vm385_vm6, %v20118_v27 }
 0x5f6   : > { %13316 = vmatmul.mubr.msk.bf16.gmra.mrb[24].mxu0 %vm385_vm6, %v8708_v16 }
 0x5f7   : > { %13323 = vmatprep.mubr.msk.bf16.mxu0 %vm385_vm6, %v19979_v10  ;;  %v13894_v10 = vld [vmem:[%s21279_s5 + $0x38] sm:$0xff]  }
 0x5f8   : > { %13358 = vmatpush3.bf16.msra.mxu1 %v13894_v10  ;;  %v13895_v10 = vld [vmem:[%s21279_s5] sm:$0xff]  }
 0x5f9   : > { %13379 = vmatprep.subr.bf16.mxu1 %v21917_v18 }
 0x5fe   : > { %13324 = vmatmul.mubr.msk.bf16.vlgmr.msra.gmra.mrb[0].mxu0 %vm385_vm6, %v19989_v41  ;;  %v20294_v41 = vld [vmem:[%s21278_s4] ss:$0 sm:$0xff] }
 0x5ff   : > { %13327 = vmatprep.mubr.msk.bf16.mxu0 %vm385_vm6, %v19991_v14 }
 0x606   : > { %13328 = vmatmul.mubr.msk.bf16.gmra.mrb[4].mxu0 %vm385_vm6, %v19997_v54 }
 0x607   : > { %13331 = vmatprep.mubr.msk.bf16.mxu0 %vm385_vm6, %v19999_v21 }
 0x60e   : > { %13332 = vmatmul.mubr.msk.bf16.gmra.mrb[8].mxu0 %vm385_vm6, %v20005_v50 }
 0x60f   : > { %13335 = vmatprep.mubr.msk.bf16.mxu0 %vm385_vm6, %v20007_v32 }
 0x616   : > { %13336 = vmatmul.mubr.msk.bf16.gmra.mrb[12].mxu0 %vm385_vm6, %v20013_v7 }
 0x617   : > { %13339 = vmatprep.mubr.msk.bf16.mxu0 %vm385_vm6, %v20015_v15 }
 0x61e   : > { %13340 = vmatmul.mubr.msk.bf16.gmra.mrb[16].mxu0 %vm385_vm6, %v20021_v51 }
 0x61f   : > { %13343 = vmatprep.mubr.msk.bf16.mxu0 %vm385_vm6, %v20023_v49 }
 0x626   : > { %13344 = vmatmul.mubr.msk.bf16.gmra.mrb[20].mxu0 %vm385_vm6, %v20029_v3 }
 0x627   : > { %13347 = vmatprep.mubr.msk.bf16.mxu0 %vm385_vm6, %v20154_v42 }
 0x62e   : > { %13348 = vmatmul.mubr.msk.bf16.gmra.mrb[24].mxu0 %vm385_vm6, %v8981_v30 }
 0x62f   : > { %11640 = vmatprep.mubr.bf16.mxu0 %v21918_v44 }
 0x6d1   : > { %v13325_v14 = vpop.f32.mrb[0].mxu0 }
 0x6d2   : > { %v9222_v54 = vadd.f32 %v13325_v14, %v20294_v41  ;;  %v9074_v21 = vpop.f32.mrb[1].mxu0 }
 0x6d3   : > { %v9220_v50 = vadd.f32 %v20294_v41, %v9074_v21  ;;  %v13326_v32 = vpop.f32.mrb[2].mxu0 }
 0x6d4   : > { %v9250_v7 = vmax.f32 %v9222_v54, 0.0  ;;  %v9223_v15 = vadd.f32 %v13326_v32, %v20294_v41  ;;  %v9077_v51 = vpop.f32.mrb[3].mxu0 }
 0x6d5   : > { %v9248_v49 = vmax.f32 %v9220_v50, 0.0  ;;  %v9221_v3 = vadd.f32 %v20294_v41, %v9077_v51 }
 0x6d6   : > { %9278 = vst.msk [vmem:[#allocation5 + $0x10] sm:$0xff] %vm419_vm13, %v9250_v7  ;;  %v9251_v25 = vmax.f32 %v9223_v15, 0.0 }
 0x6d7   : > { %9276 = vst.msk [vmem:[#allocation5] sm:$0xff] %vm419_vm13, %v9248_v49  ;;  %v9249_v23 = vmax.f32 %v9221_v3, 0.0 }
 0x6d8   : > { %9279 = vst.msk [vmem:[#allocation5 + $0x18] sm:$0xff] %vm419_vm13, %v9251_v25  ;;  %v13896_v25 = vld [vmem:[%s21279_s5 + $0x8] sm:$0xff]  }
 0x6d9   : > { %9277 = vst.msk [vmem:[#allocation5 + $0x8] sm:$0xff] %vm419_vm13, %v9249_v23  ;;  %v13329_v2 = vpop.f32.mrb[4].mxu0 }
 0x6da   : > { %v9226_v55 = vadd.f32 %v13329_v2, %v20294_v41  ;;  %v9090_v9 = vpop.f32.mrb[5].mxu0 }
 0x6db   : > { %v9224_v57 = vadd.f32 %v20294_v41, %v9090_v9  ;;  %v13330_v58 = vpop.f32.mrb[6].mxu0 }
 0x6dc   : > { %v9254_v63 = vmax.f32 %v9226_v55, 0.0  ;;  %v9227_v31 = vadd.f32 %v13330_v58, %v20294_v41  ;;  %v9093_v34 = vpop.f32.mrb[7].mxu0 }
 0x6dd   : > { %v9252_v8 = vmax.f32 %v9224_v57, 0.0  ;;  %v9225_v52 = vadd.f32 %v20294_v41, %v9093_v34 }
 0x6de   : > { %9282 = vst.msk [vmem:[#allocation5 + $0x30] sm:$0xff] %vm419_vm13, %v9254_v63  ;;  %v9255_v19 = vmax.f32 %v9227_v31, 0.0 }
 0x6df   : > { %v9306_v11 = vld [vmem:[#allocation5 + $0x10] ss:$2 sm:$0xff]  ;;  %v9334_v12 = vld [vmem:[#allocation5 + $0x11] ss:$2 sm:$0xff]  ;;  %9280 = vst.msk [vmem:[#allocation5 + $0x20] sm:$0xff] %vm419_vm13, %v9252_v8  ;;  %v9253_v56 = vmax.f32 %v9225_v52, 0.0 }
 0x6e0   : > { %v9360_v35 = vmax.f32 %v9306_v11, %v9334_v12  ;;  %v9304_v0 = vld [vmem:[#allocation5] ss:$2 sm:$0xff]  ;;  %v9332_v62 = vld [vmem:[#allocation5 + $0x1] ss:$2 sm:$0xff]  ;;  %9283 = vst.msk [vmem:[#allocation5 + $0x38] sm:$0xff] %vm419_vm13, %v9255_v19 }
 0x6e1   : > { %v9359_v28 = vmax.f32 %v9304_v0, %v9332_v62  ;;  %9281 = vst.msk [vmem:[#allocation5 + $0x28] sm:$0xff] %vm419_vm13, %v9253_v56  ;;  %v13333_v43 = vpop.f32.mrb[8].mxu0  ;;  %v13897_v52 = vld [vmem:[%s21279_s5 + $0x10] sm:$0xff]  }
 0x6e2   : > { %v9230_v60 = vadd.f32 %v13333_v43, %v20294_v41  ;;  %v9106_v17 = vpop.f32.mrb[9].mxu0 }
 0x6e3   : > { %v9373_v24 = vmax.f32 %v9359_v28, %v9360_v35  ;;  %v9228_v6 = vadd.f32 %v20294_v41, %v9106_v17  ;;  %v13334_v37 = vpop.f32.mrb[10].mxu0 }
 0x6e4   : > { %v9258_v20 = vmax.f32 %v9230_v60, 0.0  ;;  %v9231_v61 = vadd.f32 %v13334_v37, %v20294_v41  ;;  %v9109_v38 = vpop.f32.mrb[11].mxu0  ;;  %v13898_v60 = vld [vmem:[%s21279_s5 + $0x18] sm:$0xff]  }
 0x6e5   : > { %v9256_v27 = vmax.f32 %v9228_v6, 0.0  ;;  %v9229_v53 = vadd.f32 %v20294_v41, %v9109_v38  ;;  %9375 = vst.msk [vmem:[#allocation3 + $0xb] sm:$0x7f] %vm9374_vm15, %v9373_v24 }
 0x6e6   : > { %9286 = vst.msk [vmem:[#allocation5 + $0x50] sm:$0xff] %vm419_vm13, %v9258_v20  ;;  %v9259_v5 = vmax.f32 %v9231_v61, 0.0 }
 0x6e7   : > { %v9310_v4 = vld [vmem:[#allocation5 + $0x30] ss:$2 sm:$0xff]  ;;  %v9338_v36 = vld [vmem:[#allocation5 + $0x31] ss:$2 sm:$0xff]  ;;  %9284 = vst.msk [vmem:[#allocation5 + $0x40] sm:$0xff] %vm419_vm13, %v9256_v27  ;;  %v9257_v42 = vmax.f32 %v9229_v53, 0.0 }
 0x6e8   : > { %v9362_v47 = vmax.f32 %v9310_v4, %v9338_v36  ;;  %v9308_v45 = vld [vmem:[#allocation5 + $0x20] ss:$2 sm:$0xff]  ;;  %v9336_v1 = vld [vmem:[#allocation5 + $0x21] ss:$2 sm:$0xff]  ;;  %9287 = vst.msk [vmem:[#allocation5 + $0x58] sm:$0xff] %vm419_vm13, %v9259_v5 }
 0x6e9   : > { %v9361_v29 = vmax.f32 %v9308_v45, %v9336_v1  ;;  %9285 = vst.msk [vmem:[#allocation5 + $0x48] sm:$0xff] %vm419_vm13, %v9257_v42  ;;  %v13337_v48 = vpop.f32.mrb[12].mxu0 }
 0x6ea   : > { %v9234_v46 = vadd.f32 %v13337_v48, %v20294_v41  ;;  %v9122_v26 = vpop.f32.mrb[13].mxu0 }
 0x6eb   : > { %v9376_v16 = vmax.f32 %v9361_v29, %v9362_v47  ;;  %v9232_v39 = vadd.f32 %v20294_v41, %v9122_v26  ;;  %v13338_v13 = vpop.f32.mrb[14].mxu0 }
 0x6ec   : > { %v9262_v30 = vmax.f32 %v9234_v46, 0.0  ;;  %v9235_v59 = vadd.f32 %v13338_v13, %v20294_v41  ;;  %v9125_v40 = vpop.f32.mrb[15].mxu0  ;;  %v9411_v22 = vld [vmem:[#allocation3 + $0x9] sm:$0xff] }
 0x6ed   : > { %v9260_v14 = vmax.f32 %v9232_v39, 0.0  ;;  %v9233_v54 = vadd.f32 %v20294_v41, %v9125_v40  ;;  %v9419_v21 = vpack.c.bf16 %v9411_v22, %v9410_v33  ;;  %9377 = vst.msk [vmem:[#allocation3 + $0x15] sm:$0x7f] %vm9374_vm15, %v9376_v16 }
 0x6ee   : > { %9290 = vst.msk [vmem:[#allocation5 + $0x70] sm:$0xff] %vm419_vm13, %v9262_v30  ;;  %v9263_v50 = vmax.f32 %v9235_v59, 0.0 }
 0x6ef   : > { %v9314_v32 = vld [vmem:[#allocation5 + $0x50] ss:$2 sm:$0xff]  ;;  %v9342_v7 = vld [vmem:[#allocation5 + $0x51] ss:$2 sm:$0xff]  ;;  %9288 = vst.msk [vmem:[#allocation5 + $0x60] sm:$0xff] %vm419_vm13, %v9260_v14  ;;  %v9261_v15 = vmax.f32 %v9233_v54, 0.0  ;;  %13360 = vmatmul.mubr.msk.bf16.vlgmr.msra.gmra.mrb[0].mxu1 %vm419_vm13, %v9419_v21 }
 0x6f0   : > { %v9364_v51 = vmax.f32 %v9314_v32, %v9342_v7  ;;  %v9312_v49 = vld [vmem:[#allocation5 + $0x40] ss:$2 sm:$0xff]  ;;  %v9340_v3 = vld [vmem:[#allocation5 + $0x41] ss:$2 sm:$0xff]  ;;  %9291 = vst.msk [vmem:[#allocation5 + $0x78] sm:$0xff] %vm419_vm13, %v9263_v50  ;;  %13363 = vmatprep.mubr.msk.bf16.mxu1 %vm14297_vm14, %v21917_v18  ;;  %13380 = vmatpush3.bf16.msra.mxu1 %v13895_v10 }
 0x6f1   : > { %v9363_v23 = vmax.f32 %v9312_v49, %v9340_v3  ;;  %9289 = vst.msk [vmem:[#allocation5 + $0x68] sm:$0xff] %vm419_vm13, %v9261_v15  ;;  %v13341_v2 = vpop.f32.mrb[16].mxu0  ;;  %13381 = vmatprep.subr.bf16.mxu1 %v21917_v18 }
 0x6f2   : > { %v9238_v55 = vadd.f32 %v13341_v2, %v20294_v41  ;;  %v9138_v9 = vpop.f32.mrb[17].mxu0 }
 0x6f3   : > { %v9378_v57 = vmax.f32 %v9363_v23, %v9364_v51  ;;  %v9236_v58 = vadd.f32 %v20294_v41, %v9138_v9  ;;  %v13342_v63 = vpop.f32.mrb[18].mxu0 }
 0x6f4   : > { %v9266_v31 = vmax.f32 %v9238_v55, 0.0  ;;  %v9239_v34 = vadd.f32 %v13342_v63, %v20294_v41  ;;  %v9141_v8 = vpop.f32.mrb[19].mxu0  ;;  %13382 = vmatpush3.bf16.msra.mxu1 %v13896_v25  ;;  %v9412_v4 = vld [vmem:[#allocation3 + $0x11] sm:$0xff] }
 0x6f5   : > { %9379 = vst.msk [vmem:[#allocation3 + $0x1f] sm:$0x7f] %vm9374_vm15, %v9378_v57  ;;  %v9264_v19 = vmax.f32 %v9236_v58, 0.0  ;;  %v9237_v11 = vadd.f32 %v20294_v41, %v9141_v8  ;;  %13383 = vmatprep.subr.bf16.mxu1 %v21917_v18 }
 0x6f6   : > { %9294 = vst.msk [vmem:[#allocation5 + $0x90] sm:$0xff] %vm419_vm13, %v9266_v31  ;;  %v9267_v12 = vmax.f32 %v9239_v34, 0.0 }
 0x6f7   : > { %v9318_v56 = vld [vmem:[#allocation5 + $0x70] ss:$2 sm:$0xff]  ;;  %v9346_v35 = vld [vmem:[#allocation5 + $0x71] ss:$2 sm:$0xff]  ;;  %9292 = vst.msk [vmem:[#allocation5 + $0x80] sm:$0xff] %vm419_vm13, %v9264_v19  ;;  %v9265_v0 = vmax.f32 %v9237_v11, 0.0 }
 0x6f8   : > { %v9366_v62 = vmax.f32 %v9318_v56, %v9346_v35  ;;  %v9316_v28 = vld [vmem:[#allocation5 + $0x60] ss:$2 sm:$0xff]  ;;  %v9344_v43 = vld [vmem:[#allocation5 + $0x61] ss:$2 sm:$0xff]  ;;  %9295 = vst.msk [vmem:[#allocation5 + $0x98] sm:$0xff] %vm419_vm13, %v9267_v12  ;;  %13384 = vmatpush3.bf16.msra.mxu1 %v13897_v52 }
 0x6f9   : > { %v9365_v17 = vmax.f32 %v9316_v28, %v9344_v43  ;;  %9293 = vst.msk [vmem:[#allocation5 + $0x88] sm:$0xff] %vm419_vm13, %v9265_v0  ;;  %v13345_v24 = vpop.f32.mrb[20].mxu0  ;;  %13385 = vmatprep.subr.bf16.mxu1 %v21917_v18  ;;  %v9389_v28 = vld [vmem:[#allocation3 + $0x8] sm:$0xff]  ;;  %v13899_v43 = vld [vmem:[%s21279_s5 + $0x40] sm:$0xff]  }
 0x6fa   : > { %v9242_v6 = vadd.f32 %v13345_v24, %v20294_v41  ;;  %v9154_v37 = vpop.f32.mrb[21].mxu0 }
 0x6fb   : > { %v9380_v20 = vmax.f32 %v9365_v17, %v9366_v62  ;;  %v9240_v61 = vadd.f32 %v20294_v41, %v9154_v37  ;;  %v13346_v38 = vpop.f32.mrb[22].mxu0  ;;  %v9388_v62 = vld [vmem:[#allocation3] sm:$0xff]  ;;  %v13901_v37 = vld [vmem:[%s21279_s5 + $0x50] sm:$0xff]  }
 0x6fc   : > { %v9270_v27 = vmax.f32 %v9242_v6, 0.0  ;;  %v9243_v53 = vadd.f32 %v13346_v38, %v20294_v41  ;;  %v9157_v5 = vpop.f32.mrb[23].mxu0  ;;  %v9413_v36 = vld [vmem:[#allocation3 + $0x19] sm:$0xff]  ;;  %13386 = vmatpush3.bf16.msra.mxu1 %v13898_v60  ;;  %v9414_v50 = vld [vmem:[#allocation3 + $0x21] sm:$0xff]  ;;  %v9397_v60 = vpack.c.bf16 %v9389_v28, %v9388_v62  ;;  %v9390_v6 = vld [vmem:[#allocation3 + $0x10] sm:$0xff] }
 0x6fd   : > { %9381 = vst.msk [vmem:[#allocation3 + $0x29] sm:$0x7f] %vm9374_vm15, %v9380_v20  ;;  %v9268_v42 = vmax.f32 %v9240_v61, 0.0  ;;  %v9241_v47 = vadd.f32 %v20294_v41, %v9157_v5  ;;  %v9420_v45 = vpack.c.bf16 %v9413_v36, %v9412_v4  ;;  %13407 = vmatprep.subr.bf16.mxu1 %v21917_v18  ;;  %v13900_v17 = vld [vmem:[%s21279_s5 + $0x48] sm:$0xff]   ;;  %v9391_v24 = vld [vmem:[#allocation3 + $0x18] sm:$0xff]  ;;  %v13902_v61 = vld [vmem:[%s21279_s5 + $0x58] sm:$0xff]  }
 0x6fe   : > { %9298 = vst.msk [vmem:[#allocation5 + $0xb0] sm:$0xff] %vm419_vm13, %v9270_v27  ;;  %v9271_v1 = vmax.f32 %v9243_v53, 0.0  ;;  %v9398_v20 = vpack.c.bf16 %v9391_v24, %v9390_v6  ;;  %v9392_v27 = vld [vmem:[#allocation3 + $0x20] sm:$0xff] }
 0x6ff   : > { %v9322_v29 = vld [vmem:[#allocation5 + $0x90] ss:$2 sm:$0xff]  ;;  %v9350_v48 = vld [vmem:[#allocation5 + $0x91] ss:$2 sm:$0xff]  ;;  %9296 = vst.msk [vmem:[#allocation5 + $0xa0] sm:$0xff] %vm419_vm13, %v9268_v42  ;;  %v9269_v46 = vmax.f32 %v9241_v47, 0.0  ;;  %13364 = vmatmul.mubr.msk.bf16.gmra.mrb[4].mxu1 %vm419_vm13, %v9420_v45 }
 0x700   : > { %v9368_v26 = vmax.f32 %v9322_v29, %v9350_v48  ;;  %v9320_v33 = vld [vmem:[#allocation5 + $0x80] ss:$2 sm:$0xff]  ;;  %v9348_v16 = vld [vmem:[#allocation5 + $0x81] ss:$2 sm:$0xff]  ;;  %9299 = vst.msk [vmem:[#allocation5 + $0xb8] sm:$0xff] %vm419_vm13, %v9271_v1  ;;  %13367 = vmatprep.mubr.msk.bf16.mxu1 %vm14297_vm14, %v21917_v18  ;;  %v13903_v29 = vld [vmem:[%s21279_s5 + $0x60] sm:$0xff]  }
 0x701   : > { %v9367_v39 = vmax.f32 %v9320_v33, %v9348_v16  ;;  %9297 = vst.msk [vmem:[#allocation5 + $0xa8] sm:$0xff] %vm419_vm13, %v9269_v46  ;;  %v13349_v13 = vpop.f32.mrb[24].mxu0  ;;  %v9654_v45 = vld [vmem:[#allocation3 + $0x2] sm:$0xff]  ;;  %v9655_v1 = vld [vmem:[#allocation3 + $0xa] sm:$0xff]  ;;  %v9656_v33 = vld [vmem:[#allocation3 + $0x12] sm:$0xff] }
 0x702   : > { %v9246_v30 = vadd.f32 %v13349_v13, %v20294_v41  ;;  %v9170_v59 = vpop.f32.mrb[25].mxu0  ;;  %v9663_v48 = vpack.c.bf16 %v9655_v1, %v9654_v45  ;;  %v13904_v46 = vld [vmem:[%s21279_s5 + $0x68] sm:$0xff]   ;;  %v13905_v16 = vld [vmem:[%s21279_s5 + $0x70] sm:$0xff]   ;;  %v13906_v13 = vld [vmem:[%s21279_s5 + $0x78] sm:$0xff]  }
 0x703   : > { %v9382_v40 = vmax.f32 %v9367_v39, %v9368_v26  ;;  %v9244_v22 = vadd.f32 %v20294_v41, %v9170_v59  ;;  %v13350_v10 = vpop.f32.mrb[26].mxu0  ;;  %v9657_v26 = vld [vmem:[#allocation3 + $0x1a] sm:$0xff] }
 0x704   : > { %v9274_v14 = vmax.f32 %v9246_v30, 0.0  ;;  %v9247_v54 = vadd.f32 %v13350_v10, %v20294_v41  ;;  %v9173_v21 = vpop.f32.mrb[27].mxu0  ;;  %v9415_v32 = vld [vmem:[#allocation3 + $0x29] sm:$0xff]  ;;  %v9664_v39 = vpack.c.bf16 %v9657_v26, %v9656_v33 }
 0x705   : > { %9383 = vst.msk [vmem:[#allocation3 + $0x33] sm:$0x7f] %vm9374_vm15, %v9382_v40  ;;  %v9272_v7 = vmax.f32 %v9244_v22, 0.0  ;;  %v9245_v15 = vadd.f32 %v20294_v41, %v9173_v21  ;;  %v9421_v51 = vpack.c.bf16 %v9415_v32, %v9414_v50  ;;  %v9393_v38 = vld [vmem:[#allocation3 + $0x28] sm:$0xff]  ;;  %v13907_v50 = vld [vmem:[%s21279_s5 + $0x80] sm:$0xff]   ;;  %v9805_v32 = vpack.c.bf16 %v9656_v33, %v9655_v1 }
 0x706   : > { %9302 = vst.msk [vmem:[#allocation5 + $0xd0] sm:$0xff] %vm419_vm13, %v9274_v14  ;;  %v9275_v49 = vmax.f32 %v9247_v54, 0.0  ;;  %v9399_v53 = vpack.c.bf16 %v9393_v38, %v9392_v27  ;;  %v9658_v30 = vld [vmem:[#allocation3 + $0x22] sm:$0xff]  ;;  %v9659_v59 = vld [vmem:[#allocation3 + $0x2a] sm:$0xff] }
 0x707   : > { %v9326_v3 = vld [vmem:[#allocation5 + $0xb0] ss:$2 sm:$0xff]  ;;  %v9354_v25 = vld [vmem:[#allocation5 + $0xb1] ss:$2 sm:$0xff]  ;;  %9300 = vst.msk [vmem:[#allocation5 + $0xc0] sm:$0xff] %vm419_vm13, %v9272_v7  ;;  %v9273_v23 = vmax.f32 %v9245_v15, 0.0  ;;  %13368 = vmatmul.mubr.msk.bf16.gmra.mrb[8].mxu1 %vm419_vm13, %v9421_v51  ;;  %v9665_v40 = vpack.c.bf16 %v9659_v59, %v9658_v30  ;;  %v9806_v51 = vpack.c.bf16 %v9658_v30, %v9657_v26 }
 0x708   : > { %v9370_v2 = vmax.f32 %v9326_v3, %v9354_v25  ;;  %v9324_v55 = vld [vmem:[#allocation5 + $0xa0] ss:$2 sm:$0xff]  ;;  %v9352_v9 = vld [vmem:[#allocation5 + $0xa1] ss:$2 sm:$0xff]  ;;  %9303 = vst.msk [vmem:[#allocation5 + $0xd8] sm:$0xff] %vm419_vm13, %v9275_v49  ;;  %13371 = vmatprep.mubr.msk.bf16.mxu1 %vm14297_vm14, %v21917_v18  ;;  %v13908_v7 = vld [vmem:[%s21279_s5 + $0x88] sm:$0xff]  }
 0x709   : > { %v9369_v41 = vmax.f32 %v9324_v55, %v9352_v9  ;;  %9301 = vst.msk [vmem:[#allocation5 + $0xc8] sm:$0xff] %vm419_vm13, %v9273_v23  ;;  %v13909_v15 = vld [vmem:[%s21279_s5 + $0x90] sm:$0xff]   ;;  %v13910_v49 = vld [vmem:[%s21279_s5 + $0x98] sm:$0xff]   ;;  %v13916_v27 = vld [vmem:[%s21279_s5 + $0xc8] sm:$0xff]  }
 0x70a   : > { %v9939_v9 = vld [vmem:[#allocation3 + $0x13] sm:$0xff] }
 0x70b   : > { %v9384_v57 = vmax.f32 %v9369_v41, %v9370_v2  ;;  %v9938_v41 = vld [vmem:[#allocation3 + $0xb] sm:$0xff] }
 0x70c   : > { %v9416_v11 = vld [vmem:[#allocation3 + $0x31] sm:$0xff] }
 0x70d   : > { %9385 = vst.msk [vmem:[#allocation3 + $0x3d] sm:$0x7f] %vm9374_vm15, %v9384_v57  ;;  %v9394_v4 = vld [vmem:[#allocation3 + $0x30] sm:$0xff]  ;;  %v13911_v57 = vld [vmem:[%s21279_s5 + $0xa0] sm:$0xff]  }
 0x70e   : > { %v9660_v10 = vld [vmem:[#allocation3 + $0x32] sm:$0xff] }
 0x70f   : > { %v9330_v58 = vld [vmem:[#allocation5 + $0xd0] ss:$2 sm:$0xff]  ;;  %v9358_v63 = vld [vmem:[#allocation5 + $0xd1] ss:$2 sm:$0xff]  ;;  %v9807_v3 = vpack.c.bf16 %v9660_v10, %v9659_v59  ;;  %v10084_v45 = vld [vmem:[#allocation3 + $0x2c] sm:$0xff] }
 0x710   : > { %v9372_v31 = vmax.f32 %v9330_v58, %v9358_v63  ;;  %v9328_v34 = vld [vmem:[#allocation5 + $0xc0] ss:$2 sm:$0xff]  ;;  %v9356_v8 = vld [vmem:[#allocation5 + $0xc1] ss:$2 sm:$0xff]  ;;  %v9947_v58 = vpack.c.bf16 %v9939_v9, %v9938_v41  ;;  %v13912_v63 = vld [vmem:[%s21279_s5 + $0xa8] sm:$0xff]  }
 0x711   : > { %v9371_v52 = vmax.f32 %v9328_v34, %v9356_v8  ;;  %v9940_v34 = vld [vmem:[#allocation3 + $0x1b] sm:$0xff]  ;;  %v13913_v8 = vld [vmem:[%s21279_s5 + $0xb0] sm:$0xff]  }
 0x712   : > { %v10085_v1 = vld [vmem:[#allocation3 + $0x34] sm:$0xff] }
 0x713   : > { %v9386_v19 = vmax.f32 %v9371_v52, %v9372_v31  ;;  %v9941_v31 = vld [vmem:[#allocation3 + $0x23] sm:$0xff]  ;;  %v10091_v26 = vpack.c.bf16 %v10085_v1, %v10084_v45 }
 0x714   : > { %v9417_v12 = vld [vmem:[#allocation3 + $0x39] sm:$0xff]  ;;  %v9418_v35 = vld [vmem:[#allocation3 + $0x41] sm:$0x3f]  ;;  %v9948_v52 = vpack.c.bf16 %v9941_v31, %v9940_v34 }
 0x715   : > { %9387 = vst.msk [vmem:[#allocation3 + $0x47] sm:$0x7f] %vm9374_vm15, %v9386_v19  ;;  %v9422_v56 = vpack.c.bf16 %v9417_v12, %v9416_v11  ;;  %v9423_v0 = vpack.c.bf16 %v9418_v35, %v9418_v35  ;;  %v9395_v5 = vld [vmem:[#allocation3 + $0x38] sm:$0xff]  ;;  %v9396_v42 = vld [vmem:[#allocation3 + $0x40] sm:$0x3f]  ;;  %v13914_v19 = vld [vmem:[%s21279_s5 + $0xb8] sm:$0xff]  }
 0x716   : > { %v9400_v36 = vpack.c.bf16 %v9395_v5, %v9394_v4  ;;  %v9401_v47 = vpack.c.bf16 %v9396_v42, %v9396_v42  ;;  %v9661_v22 = vld [vmem:[#allocation3 + $0x3a] sm:$0xff]  ;;  %v9942_v12 = vld [vmem:[#allocation3 + $0x2b] sm:$0xff] }
 0x717   : > { %13372 = vmatmul.mubr.msk.bf16.gmra.mrb[12].mxu1 %vm419_vm13, %v9422_v56  ;;  %v9666_v14 = vpack.c.bf16 %v9661_v22, %v9660_v10  ;;  %v9943_v11 = vld [vmem:[#allocation3 + $0x33] sm:$0xff]  ;;  %v10082_v5 = vld [vmem:[#allocation3 + $0x1c] sm:$0xff]  ;;  %v13917_v4 = vld [vmem:[%s21279_s5 + $0xd0] sm:$0xff]  }
 0x718   : > { %13375 = vmatprep.mubr.msk.bf16.mxu1 %vm14297_vm14, %v21917_v18  ;;  %v9949_v56 = vpack.c.bf16 %v9943_v11, %v9942_v12  ;;  %v13918_v42 = vld [vmem:[%s21279_s5 + $0xd8] sm:$0xff]   ;;  %v10086_v30 = vld [vmem:[#allocation3 + $0x3c] sm:$0xff] }
 0x719   : > { %v10233_v34 = vpack.c.bf16 %v10086_v30, %v10085_v1 }
 0x71c   : > { %v9662_v54 = vld [vmem:[#allocation3 + $0x42] sm:$0x3f]  ;;  %v9804_v2 = vld [vmem:[#allocation3 + $0x4a] sm:$0x3f] }
 0x71d   : > { %v9667_v21 = vpack.c.bf16 %v9662_v54, %v9662_v54  ;;  %v9803_v25 = vld [vmem:[#allocation3 + $0x42] sm:$0xff]  ;;  %v9809_v55 = vpack.c.bf16 %v9804_v2, %v9804_v2  ;;  %v9946_v28 = vld [vmem:[#allocation3 + $0x4b] sm:$0x3f] }
 0x71e   : > { %v9808_v23 = vpack.c.bf16 %v9803_v25, %v9661_v22  ;;  %v9945_v35 = vld [vmem:[#allocation3 + $0x43] sm:$0xff]  ;;  %v10088_v22 = vld [vmem:[#allocation3 + $0x4c] sm:$0x3f] }
 0x71f   : > { %13376 = vmatmul.mubr.msk.bf16.gmra.mrb[16].mxu1 %vm419_vm13, %v9423_v0  ;;  %v9944_v0 = vld [vmem:[#allocation3 + $0x3b] sm:$0xff]  ;;  %v10093_v10 = vpack.c.bf16 %v10088_v22, %v10088_v22  ;;  %v13921_v25 = vld [vmem:[%s21279_s5 + $0xf0] sm:$0xff]  }
 0x720   : > { %13387 = vmatprep.mubr.msk.bf16.mxu1 %vm14297_vm14, %v21917_v18  ;;  %v9950_v62 = vpack.c.bf16 %v9945_v35, %v9944_v0 }
 0x727   : > { %13388 = vmatmul.mubr.msk.bf16.vlgmr.msra.gmra.mrb[20].mxu1 %vm419_vm13, %v9397_v60 }
 0x728   : > { %13408 = vmatpush3.bf16.msra.mxu1 %v13899_v43  ;;  %13391 = vmatprep.mubr.msk.bf16.mxu1 %vm14297_vm14, %v21917_v18  ;;  %v9951_v43 = vpack.c.bf16 %v9946_v28, %v9946_v28 }
 0x729   : > { %13409 = vmatprep.subr.bf16.mxu1 %v21917_v18 }
 0x72c   : > { %13410 = vmatpush3.bf16.msra.mxu1 %v13900_v17  ;;  %v10081_v17 = vld [vmem:[#allocation3 + $0x14] sm:$0xff] }
 0x72d   : > { %13411 = vmatprep.subr.bf16.mxu1 %v21917_v18 }
 0x72f   : > { %13392 = vmatmul.mubr.msk.bf16.gmra.mrb[24].mxu1 %vm419_vm13, %v9398_v20  ;;  %v13915_v20 = vld [vmem:[%s21279_s5 + $0xc0] sm:$0xff]  }
 0x730   : > { %13395 = vmatprep.mubr.msk.bf16.mxu1 %vm14297_vm14, %v21917_v18  ;;  %13412 = vmatpush3.bf16.msra.mxu1 %v13901_v37  ;;  %v10080_v37 = vld [vmem:[#allocation3 + $0xc] sm:$0xff] }
 0x731   : > { %13413 = vmatprep.subr.bf16.mxu1 %v21917_v18  ;;  %v10089_v38 = vpack.c.bf16 %v10081_v17, %v10080_v37 }
 0x734   : > { %13414 = vmatpush3.bf16.msra.mxu1 %v13902_v61 }
 0x735   : > { %13435 = vmatprep.subr.bf16.mxu1 %v21917_v18 }
 0x737   : > { %13396 = vmatmul.mubr.msk.bf16.gmra.mrb[28].mxu1 %vm419_vm13, %v9399_v53  ;;  %v10083_v53 = vld [vmem:[#allocation3 + $0x24] sm:$0xff] }
 0x738   : > { %13399 = vmatprep.mubr.msk.bf16.mxu1 %vm14297_vm14, %v21917_v18  ;;  %v10232_v2 = vpack.c.bf16 %v10084_v45, %v10083_v53  ;;  %v13924_v45 = vld [vmem:[%s21279_s5 + $0x108] sm:$0xff]  }
 0x73f   : > { %13400 = vmatmul.mubr.msk.bf16.gmra.mrb[32].mxu1 %vm419_vm13, %v9400_v36  ;;  %v10090_v36 = vpack.c.bf16 %v10083_v53, %v10082_v5 }
 0x740   : > { %13403 = vmatprep.mubr.msk.bf16.mxu1 %vm14297_vm14, %v21917_v18 }
 0x747   : > { %13404 = vmatmul.mubr.msk.bf16.gmra.mrb[36].mxu1 %vm419_vm13, %v9401_v47 }
 0x748   : > { %13415 = vmatprep.mubr.msk.bf16.mxu1 %vm14297_vm14, %v21917_v18 }
 0x74f   : > { %13416 = vmatmul.mubr.msk.bf16.vlgmr.msra.gmra.mrb[40].mxu1 %vm419_vm13, %v9663_v48 }
 0x750   : > { %13436 = vmatpush3.bf16.msra.mxu1 %v13903_v29  ;;  %13419 = vmatprep.mubr.msk.bf16.mxu1 %vm14297_vm14, %v21917_v18 }
 0x751   : > { %13437 = vmatprep.subr.bf16.mxu1 %v21917_v18 }
 0x754   : > { %13438 = vmatpush3.bf16.msra.mxu1 %v13904_v46 }
 0x755   : > { %13439 = vmatprep.subr.bf16.mxu1 %v21917_v18 }
 0x757   : > { %13420 = vmatmul.mubr.msk.bf16.gmra.mrb[44].mxu1 %vm419_vm13, %v9664_v39 }
 0x758   : > { %13423 = vmatprep.mubr.msk.bf16.mxu1 %vm14297_vm14, %v21917_v18  ;;  %13440 = vmatpush3.bf16.msra.mxu1 %v13905_v16  ;;  %v10087_v16 = vld [vmem:[#allocation3 + $0x44] sm:$0xff] }
 0x759   : > { %13441 = vmatprep.subr.bf16.mxu1 %v21917_v18 }
 0x75c   : > { %13442 = vmatpush3.bf16.msra.mxu1 %v13906_v13 }
 0x75d   : > { %13463 = vmatprep.subr.bf16.mxu1 %v21917_v18 }
 0x75f   : > { %13424 = vmatmul.mubr.msk.bf16.gmra.mrb[48].mxu1 %vm419_vm13, %v9665_v40  ;;  %v10092_v40 = vpack.c.bf16 %v10087_v16, %v10086_v30 }
 0x760   : > { %13427 = vmatprep.mubr.msk.bf16.mxu1 %vm14297_vm14, %v21917_v18 }
 0x767   : > { %13428 = vmatmul.mubr.msk.bf16.gmra.mrb[52].mxu1 %vm419_vm13, %v9666_v14 }
 0x768   : > { %13431 = vmatprep.mubr.msk.bf16.mxu1 %vm14297_vm14, %v21917_v18 }
 0x76f   : > { %13432 = vmatmul.mubr.msk.bf16.gmra.mrb[56].mxu1 %vm419_vm13, %v9667_v21 }
 0x770   : > { %13443 = vmatprep.mubr.msk.bf16.mxu1 %vm14297_vm14, %v21917_v18 }
 0x777   : > { %13444 = vmatmul.mubr.msk.bf16.vlgmr.msra.gmra.mrb[60].mxu1 %vm419_vm13, %v9805_v32 }
 0x778   : > { %13464 = vmatpush3.bf16.msra.mxu1 %v13907_v50  ;;  %13447 = vmatprep.mubr.msk.bf16.mxu1 %vm14297_vm14, %v21917_v18  ;;  %v13919_v50 = vld [vmem:[%s21279_s5 + $0xe0] sm:$0xff]  }
 0x779   : > { %13465 = vmatprep.subr.bf16.mxu1 %v21917_v18 }
 0x77c   : > { %13466 = vmatpush3.bf16.msra.mxu1 %v13908_v7  ;;  %v10231_v7 = vpack.c.bf16 %v10082_v5, %v10081_v17  ;;  %v10364_v5 = vld [vmem:[#allocation3 + $0x15] sm:$0xff] }
 0x77d   : > { %13467 = vmatprep.subr.bf16.mxu1 %v21917_v18 }
 0x77f   : > { %13448 = vmatmul.mubr.msk.bf16.gmra.mrb[64].mxu1 %vm419_vm13, %v9806_v51 }
 0x780   : > { %13451 = vmatprep.mubr.msk.bf16.mxu1 %vm14297_vm14, %v21917_v18  ;;  %13468 = vmatpush3.bf16.msra.mxu1 %v13909_v15  ;;  %v13920_v15 = vld [vmem:[%s21279_s5 + $0xe8] sm:$0xff]  }
 0x781   : > { %13469 = vmatprep.subr.bf16.mxu1 %v21917_v18 }
 0x784   : > { %13470 = vmatpush3.bf16.msra.mxu1 %v13910_v49 }
 0x785   : > { %13491 = vmatprep.subr.bf16.mxu1 %v21917_v18 }
 0x787   : > { %13452 = vmatmul.mubr.msk.bf16.gmra.mrb[68].mxu1 %vm419_vm13, %v9807_v3 }
 0x788   : > { %13455 = vmatprep.mubr.msk.bf16.mxu1 %vm14297_vm14, %v21917_v18 }
 0x78f   : > { %13456 = vmatmul.mubr.msk.bf16.gmra.mrb[72].mxu1 %vm419_vm13, %v9808_v23 }
 0x790   : > { %13459 = vmatprep.mubr.msk.bf16.mxu1 %vm14297_vm14, %v21917_v18 }
 0x797   : > { %13460 = vmatmul.mubr.msk.bf16.gmra.mrb[76].mxu1 %vm419_vm13, %v9809_v55  ;;  %v13922_v55 = vld [vmem:[%s21279_s5 + $0xf8] sm:$0xff]  }
 0x798   : > { %13471 = vmatprep.mubr.msk.bf16.mxu1 %vm14297_vm14, %v21917_v18 }
 0x79f   : > { %13472 = vmatmul.mubr.msk.bf16.vlgmr.msra.gmra.mrb[80].mxu1 %vm419_vm13, %v9947_v58 }
 0x7a0   : > { %13492 = vmatpush3.bf16.msra.mxu1 %v13911_v57  ;;  %13475 = vmatprep.mubr.msk.bf16.mxu1 %vm14297_vm14, %v21917_v18 }
 0x7a1   : > { %13493 = vmatprep.subr.bf16.mxu1 %v21917_v18 }
 0x7a4   : > { %13494 = vmatpush3.bf16.msra.mxu1 %v13912_v63 }
 0x7a5   : > { %13495 = vmatprep.subr.bf16.mxu1 %v21917_v18 }
 0x7a7   : > { %13476 = vmatmul.mubr.msk.bf16.gmra.mrb[84].mxu1 %vm419_vm13, %v9948_v52  ;;  %v10229_v52 = vld [vmem:[#allocation3 + $0x4c] sm:$0xff] }
 0x7a8   : > { %13479 = vmatprep.mubr.msk.bf16.mxu1 %vm14297_vm14, %v21917_v18  ;;  %13496 = vmatpush3.bf16.msra.mxu1 %v13913_v8  ;;  %v10234_v0 = vpack.c.bf16 %v10229_v52, %v10087_v16  ;;  %v10507_v52 = vld [vmem:[#allocation3 + $0x1e] sm:$0xff] }
 0x7a9   : > { %13497 = vmatprep.subr.bf16.mxu1 %v21917_v18 }
 0x7ac   : > { %13498 = vmatpush3.bf16.msra.mxu1 %v13914_v19 }
 0x7ad   : > { %13519 = vmatprep.subr.bf16.mxu1 %v21917_v18 }
 0x7af   : > { %13480 = vmatmul.mubr.msk.bf16.gmra.mrb[88].mxu1 %vm419_vm13, %v9949_v56 }
 0x7b0   : > { %13483 = vmatprep.mubr.msk.bf16.mxu1 %vm14297_vm14, %v21917_v18 }
 0x7b7   : > { %13484 = vmatmul.mubr.msk.bf16.gmra.mrb[92].mxu1 %vm419_vm13, %v9950_v62  ;;  %v10230_v62 = vld [vmem:[#allocation3 + $0x54] sm:$0x3f] }
 0x7b8   : > { %13487 = vmatprep.mubr.msk.bf16.mxu1 %vm14297_vm14, %v21917_v18  ;;  %v10235_v17 = vpack.c.bf16 %v10230_v62, %v10230_v62 }
 0x7bf   : > { %13488 = vmatmul.mubr.msk.bf16.gmra.mrb[96].mxu1 %vm419_vm13, %v9951_v43 }
 0x7c0   : > { %13499 = vmatprep.mubr.msk.bf16.mxu1 %vm14297_vm14, %v21917_v18 }
 0x7c2   : > { %v20514_v60 = vpop.f32.mrb[0].mxu1 }
 0x7c3   : > { %v13361_v24 = vpop.f32.mrb[1].mxu1 }
 0x7c4   : > { %v20516_v6 = vpop.f32.mrb[2].mxu1 }
 0x7c5   : > { %v13362_v61 = vpop.f32.mrb[3].mxu1 }
 0x7c6   : > { %v10365_v61 = vld [vmem:[#allocation3 + $0x1d] sm:$0xff] }
 0x7c7   : > { %13500 = vmatmul.mubr.msk.bf16.vlgmr.msra.gmra.mrb[100].mxu1 %vm419_vm13, %v10089_v38 }
 0x7c8   : > { %13520 = vmatpush3.bf16.msra.mxu1 %v13915_v20  ;;  %13503 = vmatprep.mubr.msk.bf16.mxu1 %vm14297_vm14, %v21917_v18 }
 0x7c9   : > { %13521 = vmatprep.subr.bf16.mxu1 %v21917_v18 }
 0x7cc   : > { %13522 = vmatpush3.bf16.msra.mxu1 %v13916_v27 }
 0x7cd   : > { %13523 = vmatprep.subr.bf16.mxu1 %v21917_v18 }
 0x7cf   : > { %13504 = vmatmul.mubr.msk.bf16.gmra.mrb[104].mxu1 %vm419_vm13, %v10090_v36 }
 0x7d0   : > { %13507 = vmatprep.mubr.msk.bf16.mxu1 %vm14297_vm14, %v21917_v18  ;;  %13524 = vmatpush3.bf16.msra.mxu1 %v13917_v4  ;;  %v13923_v4 = vld [vmem:[%s21279_s5 + $0x100] sm:$0xff]  }
 0x7d1   : > { %13525 = vmatprep.subr.bf16.mxu1 %v21917_v18 }
 0x7d2   : > { %v9513_v47 = vpop.f32.mrb[4].mxu1 }
 0x7d3   : > { %v13365_v29 = vpop.f32.mrb[5].mxu1 }
 0x7d4   : > { %v9516_v48 = vpop.f32.mrb[6].mxu1  ;;  %13526 = vmatpush3.bf16.msra.mxu1 %v13918_v42  ;;  %v10367_v29 = vld [vmem:[#allocation3 + $0x2d] sm:$0xff] }
 0x7d5   : > { %v13366_v46 = vpop.f32.mrb[7].mxu1  ;;  %13547 = vmatprep.subr.bf16.mxu1 %v21917_v18 }
 0x7d7   : > { %13508 = vmatmul.mubr.msk.bf16.gmra.mrb[108].mxu1 %vm419_vm13, %v10091_v26  ;;  %v10366_v26 = vld [vmem:[#allocation3 + $0x25] sm:$0xff] }
 0x7d8   : > { %13511 = vmatprep.mubr.msk.bf16.mxu1 %vm14297_vm14, %v21917_v18 }
 0x7da   : > { %v9521_v33 = vpop.f32.mrb[8].mxu1 }
 0x7db   : > { %v13369_v39 = vpop.f32.mrb[9].mxu1 }
 0x7dc   : > { %v9524_v13 = vpop.f32.mrb[10].mxu1  ;;  %v10374_v39 = vpack.c.bf16 %v10367_v29, %v10366_v26 }
 0x7dd   : > { %v13370_v59 = vpop.f32.mrb[11].mxu1 }
 0x7de   : > { %v10369_v59 = vld [vmem:[#allocation3 + $0x3d] sm:$0xff] }
 0x7df   : > { %13512 = vmatmul.mubr.msk.bf16.gmra.mrb[112].mxu1 %vm419_vm13, %v10092_v40 }
 0x7e0   : > { %13515 = vmatprep.mubr.msk.bf16.mxu1 %vm14297_vm14, %v21917_v18 }
 0x7e7   : > { %13516 = vmatmul.mubr.msk.bf16.gmra.mrb[116].mxu1 %vm419_vm13, %v10093_v10 }
 0x7e8   : > { %13527 = vmatprep.mubr.msk.bf16.mxu1 %vm14297_vm14, %v21917_v18 }
 0x7ea   : > { %v9529_v14 = vpop.f32.mrb[12].mxu1 }
 0x7eb   : > { %v13373_v54 = vpop.f32.mrb[13].mxu1 }
 0x7ec   : > { %v9532_v21 = vpop.f32.mrb[14].mxu1 }
 0x7ed   : > { %v13374_v32 = vpop.f32.mrb[15].mxu1 }
 0x7ef   : > { %13528 = vmatmul.mubr.msk.bf16.vlgmr.msra.gmra.mrb[120].mxu1 %vm419_vm13, %v10231_v7  ;;  %v10370_v7 = vld [vmem:[#allocation3 + $0x45] sm:$0xff] }
 0x7f0   : > { %13548 = vmatpush3.bf16.msra.mxu1 %v13919_v50  ;;  %13531 = vmatprep.mubr.msk.bf16.mxu1 %vm14297_vm14, %v21917_v18 }
 0x7f1   : > { %13549 = vmatprep.subr.bf16.mxu1 %v21917_v18 }
 0x7f2   : > { %v9537_v51 = vpop.f32.mrb[16].mxu1 }
 0x7f3   : > { %v13377_v49 = vpop.f32.mrb[17].mxu1 }
 0x7f4   : > { %v9540_v3 = vpop.f32.mrb[18].mxu1  ;;  %13550 = vmatpush3.bf16.msra.mxu1 %v13920_v15  ;;  %v10371_v15 = vld [vmem:[#allocation3 + $0x4d] sm:$0xff] }
 0x7f5   : > { %v13378_v23 = vpop.f32.mrb[19].mxu1  ;;  %13551 = vmatprep.subr.bf16.mxu1 %v21917_v18 }
 0x7f7   : > { %13532 = vmatmul.mubr.msk.bf16.gmra.mrb[124].mxu1 %vm419_vm13, %v10232_v2  ;;  %v10376_v2 = vpack.c.bf16 %v10371_v15, %v10370_v7 }
 0x7f8   : > { %13535 = vmatprep.mubr.msk.bf16.mxu1 %vm14297_vm14, %v21917_v18  ;;  %13552 = vmatpush3.bf16.msra.mxu1 %v13921_v25 }
 0x7f9   : > { %13553 = vmatprep.subr.bf16.mxu1 %v21917_v18 }
 0x7fa   : > { %v9616_v9 = vpop.f32.mrb[20].mxu1 }
 0x7fb   : > { %v9617_v41 = vadd.f32 %v9616_v9, %v20514_v60  ;;  %v13389_v57 = vpop.f32.mrb[21].mxu1 }
 0x7fc   : > { %v9619_v58 = vpop.f32.mrb[22].mxu1  ;;  %13554 = vmatpush3.bf16.msra.mxu1 %v13922_v55  ;;  %v10372_v55 = vld [vmem:[#allocation3 + $0x55] sm:$0x3f] }
 0x7fd   : > { %v20572_v63 = vadd.f32 %v9619_v58, %v20516_v6  ;;  %v13390_v31 = vpop.f32.mrb[23].mxu1  ;;  %13575 = vmatprep.subr.bf16.mxu1 %v21917_v18  ;;  %v10377_v58 = vpack.c.bf16 %v10372_v55, %v10372_v55 }
 0x7ff   : > { %13536 = vmatmul.mubr.msk.bf16.gmra.mrb[128].mxu1 %vm419_vm13, %v10233_v34 }
 0x800   : > { %13539 = vmatprep.mubr.msk.bf16.mxu1 %vm14297_vm14, %v21917_v18 }
 0x802   : > { %v9624_v8 = vpop.f32.mrb[24].mxu1 }
 0x803   : > { %v20578_v19 = vadd.f32 %v9624_v8, %v9513_v47  ;;  %v13393_v11 = vpop.f32.mrb[25].mxu1  ;;  %v10373_v47 = vpack.c.bf16 %v10365_v61, %v10364_v5  ;;  %v10510_v61 = vld [vmem:[#allocation3 + $0x36] sm:$0xff] }
 0x804   : > { %v9627_v12 = vpop.f32.mrb[26].mxu1 }
 0x805   : > { %v20580_v56 = vadd.f32 %v9627_v12, %v9516_v48  ;;  %v13394_v35 = vpop.f32.mrb[27].mxu1 }
 0x807   : > { %13540 = vmatmul.mubr.msk.bf16.gmra.mrb[132].mxu1 %vm419_vm13, %v10234_v0 }
 0x808   : > { %13543 = vmatprep.mubr.msk.bf16.mxu1 %vm14297_vm14, %v21917_v18 }
 0x80a   : > { %v9632_v28 = vpop.f32.mrb[28].mxu1 }
 0x80b   : > { %v20585_v43 = vadd.f32 %v9632_v28, %v9521_v33  ;;  %v13397_v60 = vpop.f32.mrb[29].mxu1  ;;  %v13925_v33 = vld [vmem:[%s21279_s5 + $0x110] sm:$0xff]  }
 0x80c   : > { %v9635_v24 = vpop.f32.mrb[30].mxu1 }
 0x80d   : > { %v20587_v6 = vadd.f32 %v9635_v24, %v9524_v13  ;;  %v13398_v37 = vpop.f32.mrb[31].mxu1  ;;  %v13926_v13 = vld [vmem:[%s21279_s5 + $0x118] sm:$0xff]   ;;  %v10508_v24 = vld [vmem:[#allocation3 + $0x26] sm:$0xff] }
 0x80f   : > { %13544 = vmatmul.mubr.msk.bf16.gmra.mrb[136].mxu1 %vm419_vm13, %v10235_v17 }
 0x810   : > { %13555 = vmatprep.mubr.msk.bf16.mxu1 %vm14297_vm14, %v21917_v18 }
 0x812   : > { %v9640_v20 = vpop.f32.mrb[32].mxu1 }
 0x813   : > { %v20592_v38 = vadd.f32 %v9640_v20, %v9529_v14  ;;  %v13401_v27 = vpop.f32.mrb[33].mxu1  ;;  %v10368_v14 = vld [vmem:[#allocation3 + $0x35] sm:$0xff] }
 0x814   : > { %v9643_v53 = vpop.f32.mrb[34].mxu1  ;;  %v10375_v50 = vpack.c.bf16 %v10369_v59, %v10368_v14 }
 0x815   : > { %v9644_v36 = vadd.f32 %v9643_v53, %v9532_v21  ;;  %v13402_v42 = vpop.f32.mrb[35].mxu1 }
 0x817   : > { %13556 = vmatmul.mubr.msk.bf16.vlgmr.msra.gmra.mrb[140].mxu1 %vm419_vm13, %v10373_v47 }
 0x818   : > { %13576 = vmatpush3.bf16.msra.mxu1 %v13923_v4  ;;  %13559 = vmatprep.mubr.msk.bf16.mxu1 %vm14297_vm14, %v21917_v18 }
 0x819   : > { %13577 = vmatprep.subr.bf16.mxu1 %v21917_v18 }
 0x81a   : > { %v9648_v1 = vpop.f32.mrb[36].mxu1 }
 0x81b   : > { %v13405_v48 = vpop.f32.mrb[37].mxu1  ;;  %v10513_v1 = vld [vmem:[#allocation3 + $0x4e] sm:$0xff] }
 0x81c   : > { %v9651_v46 = vpop.f32.mrb[38].mxu1  ;;  %13578 = vmatpush3.bf16.msra.mxu1 %v13924_v45  ;;  %v10512_v45 = vld [vmem:[#allocation3 + $0x46] sm:$0xff] }
 0x81d   : > { %v13406_v16 = vpop.f32.mrb[39].mxu1  ;;  %13579 = vmatprep.subr.bf16.mxu1 %v21917_v18 }
 0x81e   : > { %v10518_v16 = vpack.c.bf16 %v10513_v1, %v10512_v45 }
 0x81f   : > { %13560 = vmatmul.mubr.msk.bf16.gmra.mrb[144].mxu1 %vm419_vm13, %v10374_v39  ;;  %v10514_v39 = vld [vmem:[#allocation3 + $0x56] sm:$0x3f] }
 0x820   : > { %13563 = vmatprep.mubr.msk.bf16.mxu1 %vm14297_vm14, %v21917_v18  ;;  %13580 = vmatpush3.bf16.msra.mxu1 %v13925_v33 }
 0x821   : > { %13581 = vmatprep.subr.bf16.mxu1 %v21917_v18 }
 0x822   : > { %v9749_v30 = vpop.f32.mrb[40].mxu1 }
 0x823   : > { %v9787_v40 = vadd.f32 %v9749_v30, %v9617_v41  ;;  %v13417_v22 = vpop.f32.mrb[41].mxu1 }
 0x824   : > { %v9752_v10 = vpop.f32.mrb[42].mxu1  ;;  %13582 = vmatpush3.bf16.msra.mxu1 %v13926_v13 }
 0x825   : > { %v9788_v54 = vadd.f32 %v9752_v10, %v20572_v63  ;;  %v13418_v21 = vpop.f32.mrb[43].mxu1 }
 0x827   : > { %13564 = vmatmul.mubr.msk.bf16.gmra.mrb[148].mxu1 %vm419_vm13, %v10375_v50 }
 0x828   : > { %13567 = vmatprep.mubr.msk.bf16.mxu1 %vm14297_vm14, %v21917_v18 }
 0x82a   : > { %v9757_v32 = vpop.f32.mrb[44].mxu1 }
 0x82b   : > { %v9789_v51 = vadd.f32 %v9757_v32, %v20578_v19  ;;  %v13421_v49 = vpop.f32.mrb[45].mxu1 }
 0x82c   : > { %v9760_v3 = vpop.f32.mrb[46].mxu1 }
 0x82d   : > { %v9790_v25 = vadd.f32 %v9760_v3, %v20580_v56  ;;  %v13422_v23 = vpop.f32.mrb[47].mxu1  ;;  %v10506_v56 = vld [vmem:[#allocation3 + $0x16] sm:$0xff] }
 0x82e   : > { %v10515_v62 = vpack.c.bf16 %v10507_v52, %v10506_v56  ;;  %v13929_v56 = vld [vmem:[%s21281_s7 + $0x4] ss:$8 sps:$4 sm:$0xff]  }
 0x82f   : > { %13568 = vmatmul.mubr.msk.bf16.gmra.mrb[152].mxu1 %vm419_vm13, %v10376_v2  ;;  %10803 = vmatprep.subr.bf16.mxu1 %v13929_v56  ;;  %v13974_v56 = vld [vmem:[%s21281_s7 + $0x2d4] ss:$8 sps:$4 sm:$0xff]  }
 0x830   : > { %13571 = vmatprep.mubr.msk.bf16.mxu1 %vm14297_vm14, %v21917_v18 }
 0x832   : > { %v9765_v9 = vpop.f32.mrb[48].mxu1 }
 0x833   : > { %v9791_v41 = vadd.f32 %v9765_v9, %v20585_v43  ;;  %v13425_v57 = vpop.f32.mrb[49].mxu1  ;;  %v10509_v43 = vld [vmem:[#allocation3 + $0x2e] sm:$0xff] }
 0x834   : > { %v9768_v63 = vpop.f32.mrb[50].mxu1  ;;  %v10516_v37 = vpack.c.bf16 %v10509_v43, %v10508_v24  ;;  %v13930_v43 = vld [vmem:[%s21281_s7 + $0x10] ss:$8 sps:$4 sm:$0xff]  }
 0x835   : > { %v9792_v31 = vadd.f32 %v9768_v63, %v20587_v6  ;;  %v13426_v34 = vpop.f32.mrb[51].mxu1 }
 0x837   : > { %13572 = vmatmul.mubr.msk.bf16.gmra.mrb[156].mxu1 %vm419_vm13, %v10377_v58 }
 0x838   : > { %13583 = vmatprep.mubr.msk.bf16.mxu1 %vm14297_vm14, %v21917_v18 }
 0x83a   : > { %v9773_v8 = vpop.f32.mrb[52].mxu1 }
 0x83b   : > { %v9793_v19 = vadd.f32 %v9773_v8, %v20592_v38  ;;  %v13429_v11 = vpop.f32.mrb[53].mxu1  ;;  %v10511_v38 = vld [vmem:[#allocation3 + $0x3e] sm:$0xff] }
 0x83c   : > { %v9776_v12 = vpop.f32.mrb[54].mxu1  ;;  %v10517_v42 = vpack.c.bf16 %v10511_v38, %v10510_v61 }
 0x83d   : > { %v9794_v35 = vadd.f32 %v9776_v12, %v9644_v36  ;;  %v13430_v0 = vpop.f32.mrb[55].mxu1  ;;  %v13927_v12 = vld [vmem:[%s21281_s7] ss:$8 sps:$4 sm:$0xff]  }
 0x83f   : > { %13584 = vmatmul.mubr.msk.bf16.vlgmr.msra.gmra.mrb[160].mxu1 %vm419_vm13, %v10515_v62 }
 0x840   : > { %13587 = vmatprep.mubr.msk.bf16.mxu1 %vm14297_vm14, %v21917_v18  ;;  %10804 = vmatpush1.bf16.msra.mxu1 %v13927_v12 }
 0x842   : > { %v9781_v28 = vpop.f32.mrb[56].mxu1 }
 0x843   : > { %v13433_v60 = vpop.f32.mrb[57].mxu1  ;;  %v13932_v28 = vld [vmem:[%s21281_s7 + $0x14] ss:$8 sps:$4 sm:$0xff]  }
 0x844   : > { %v9784_v17 = vpop.f32.mrb[58].mxu1  ;;  %10805 = vmatprep.subr.bf16.mxu1 %v13932_v28 }
 0x845   : > { %v13434_v6 = vpop.f32.mrb[59].mxu1  ;;  %10806 = vmatpush1.bf16.msra.mxu1 %v13930_v43  ;;  %v13978_v43 = vld [vmem:[%s21281_s7 + $0x2e0] ss:$8 sps:$4 sm:$0xff]  }
 0x847   : > { %13588 = vmatmul.mubr.msk.bf16.gmra.mrb[164].mxu1 %vm419_vm13, %v10516_v37  ;;  %v13933_v37 = vld [vmem:[%s21281_s7 + $0x20] ss:$8 sps:$4 sm:$0xff]  }
 0x848   : > { %13591 = vmatprep.mubr.msk.bf16.mxu1 %vm14297_vm14, %v21917_v18 }
 0x84a   : > { %v9891_v20 = vpop.f32.mrb[60].mxu1 }
 0x84b   : > { %v9929_v27 = vadd.f32 %v9891_v20, %v9787_v40  ;;  %v13445_v53 = vpop.f32.mrb[61].mxu1  ;;  %v10519_v40 = vpack.c.bf16 %v10514_v39, %v10514_v39  ;;  %v13935_v20 = vld [vmem:[%s21281_s7 + $0x24] ss:$8 sps:$4 sm:$0xff]   ;;  %v13944_v39 = vld [vmem:[%s21281_s7 + $0x54] ss:$8 sps:$4 sm:$0xff]  }
 0x84c   : > { %v9894_v5 = vpop.f32.mrb[62].mxu1  ;;  %10807 = vmatprep.subr.bf16.mxu1 %v13935_v20  ;;  %v13936_v53 = vld [vmem:[%s21281_s7 + $0x30] ss:$8 sps:$4 sm:$0xff]  }
 0x84d   : > { %v9930_v4 = vadd.f32 %v9894_v5, %v9788_v54  ;;  %v13446_v36 = vpop.f32.mrb[63].mxu1  ;;  %10808 = vmatpush1.bf16.msra.mxu1 %v13933_v37  ;;  %v13992_v37 = vld [vmem:[%s21281_s7 + $0x384] ss:$8 sps:$4 sm:$0xff]  }
 0x84f   : > { %13592 = vmatmul.mubr.msk.bf16.gmra.mrb[168].mxu1 %vm419_vm13, %v10517_v42 }
 0x850   : > { %13595 = vmatprep.mubr.msk.bf16.mxu1 %vm14297_vm14, %v21917_v18 }
 0x852   : > { %v9899_v47 = vpop.f32.mrb[64].mxu1 }
 0x853   : > { %v9931_v29 = vadd.f32 %v9899_v47, %v9789_v51  ;;  %v13449_v48 = vpop.f32.mrb[65].mxu1 }
 0x854   : > { %v9902_v46 = vpop.f32.mrb[66].mxu1  ;;  %v13941_v48 = vld [vmem:[%s21281_s7 + $0x44] ss:$8 sps:$4 sm:$0xff]  }
 0x855   : > { %v9932_v26 = vadd.f32 %v9902_v46, %v9790_v25  ;;  %v13450_v33 = vpop.f32.mrb[67].mxu1 }
 0x857   : > { %13596 = vmatmul.mubr.msk.bf16.gmra.mrb[172].mxu1 %vm419_vm13, %v10518_v16  ;;  %v13942_v16 = vld [vmem:[%s21281_s7 + $0x50] ss:$8 sps:$4 sm:$0xff]  }
 0x858   : > { %13599 = vmatprep.mubr.msk.bf16.mxu1 %vm14297_vm14, %v21917_v18 }
 0x85a   : > { %v9907_v13 = vpop.f32.mrb[68].mxu1 }
 0x85b   : > { %v9933_v30 = vadd.f32 %v9907_v13, %v9791_v41  ;;  %v13453_v59 = vpop.f32.mrb[69].mxu1 }
 0x85c   : > { %v9910_v22 = vpop.f32.mrb[70].mxu1 }
 0x85d   : > { %v9934_v10 = vadd.f32 %v9910_v22, %v9792_v31  ;;  %v13454_v14 = vpop.f32.mrb[71].mxu1  ;;  %v13947_v22 = vld [vmem:[%s21281_s7 + $0x284] ss:$8 sps:$4 sm:$0xff]  }
 0x85e   : > { %v13948_v14 = vld [vmem:[%s21281_s7 + $0x60] ss:$8 sps:$4 sm:$0xff]   ;;  %11608 = vmatprep.subr.bf16.mxu0 %v13947_v22 }
 0x85f   : > { %13600 = vmatmul.mubr.msk.bf16.gmra.mrb[176].mxu1 %vm419_vm13, %v10519_v40  ;;  %v13945_v40 = vld [vmem:[%s21281_s7 + $0x280] ss:$8 sps:$4 sm:$0xff]  }
 0x860   : > { %10835 = vmatprep.mubr.bf16.mxu1 %v21918_v44  ;;  %11609 = vmatpush1.bf16.msra.mxu0 %v13945_v40 }
 0x862   : > { %v9915_v54 = vpop.f32.mrb[72].mxu1 }
 0x863   : > { %v9935_v21 = vadd.f32 %v9915_v54, %v9793_v19  ;;  %v13457_v50 = vpop.f32.mrb[73].mxu1  ;;  %v13950_v54 = vld [vmem:[%s21281_s7 + $0x64] ss:$8 sps:$4 sm:$0xff]  }
 0x864   : > { %v9918_v32 = vpop.f32.mrb[74].mxu1 }
 0x865   : > { %v9936_v7 = vadd.f32 %v9918_v32, %v9794_v35  ;;  %v13458_v15 = vpop.f32.mrb[75].mxu1  ;;  %v13953_v32 = vld [vmem:[%s21281_s7 + $0x294] ss:$8 sps:$4 sm:$0xff]  }
 0x866   : > { %11610 = vmatprep.subr.bf16.mxu0 %v13953_v32 }
 0x86a   : > { %v9923_v51 = vpop.f32.mrb[76].mxu1 }
 0x86b   : > { %v13461_v18 = vpop.f32.mrb[77].mxu1 }
 0x86c   : > { %v9926_v49 = vpop.f32.mrb[78].mxu1 }
 0x86d   : > { %v13462_v3 = vpop.f32.mrb[79].mxu1  ;;  %v13954_v49 = vld [vmem:[%s21281_s7 + $0x70] ss:$8 sps:$4 sm:$0xff]  }
 0x86e   : > { %v13956_v3 = vld [vmem:[%s21281_s7 + $0x74] ss:$8 sps:$4 sm:$0xff]  }
 0x872   : > { %v10033_v25 = vpop.f32.mrb[80].mxu1 }
 0x873   : > { %v10071_v23 = vadd.f32 %v10033_v25, %v9929_v27  ;;  %v13473_v2 = vpop.f32.mrb[81].mxu1  ;;  %v13938_v27 = vld [vmem:[%s21281_s7 + $0x34] ss:$8 sps:$4 sm:$0xff]  }
 0x874   : > { %v10036_v55 = vpop.f32.mrb[82].mxu1  ;;  %10809 = vmatprep.subr.bf16.mxu1 %v13938_v27  ;;  %v13959_v2 = vld [vmem:[%s21281_s7 + $0x2a4] ss:$8 sps:$4 sm:$0xff]  }
 0x875   : > { %v10072_v9 = vadd.f32 %v10036_v55, %v9930_v4  ;;  %v13474_v41 = vpop.f32.mrb[83].mxu1  ;;  %10810 = vmatpush1.bf16.msra.mxu1 %v13936_v53 }
 0x876   : > { %10811 = vmatprep.subr.bf16.mxu1 %v13941_v48  ;;  %v13962_v41 = vld [vmem:[%s21281_s7 + $0x2b4] ss:$8 sps:$4 sm:$0xff]  }
 0x87a   : > { %v10041_v57 = vpop.f32.mrb[84].mxu1 }
 0x87b   : > { %v10073_v58 = vadd.f32 %v10041_v57, %v9931_v29  ;;  %v13477_v63 = vpop.f32.mrb[85].mxu1  ;;  %v13939_v29 = vld [vmem:[%s21281_s7 + $0x40] ss:$8 sps:$4 sm:$0xff]   ;;  %v13960_v57 = vld [vmem:[%s21281_s7 + $0x2b0] ss:$8 sps:$4 sm:$0xff]  }
 0x87c   : > { %v10044_v31 = vpop.f32.mrb[86].mxu1  ;;  %10812 = vmatpush1.bf16.msra.mxu1 %v13939_v29 }
 0x87d   : > { %v10074_v34 = vadd.f32 %v10044_v31, %v9932_v26  ;;  %v13478_v8 = vpop.f32.mrb[87].mxu1  ;;  %10813 = vmatprep.subr.bf16.mxu1 %v13944_v39 }
 0x87e   : > { %v13966_v8 = vld [vmem:[%s21281_s7 + $0x2c0] ss:$8 sps:$4 sm:$0xff]  }
 0x880   : > { %10814 = vmatpush1.bf16.msra.mxu1 %v13942_v16 }
 0x881   : > { %10815 = vmatprep.subr.bf16.mxu1 %v13950_v54 }
 0x882   : > { %v10049_v52 = vpop.f32.mrb[88].mxu1 }
 0x883   : > { %v20644_v19 = vadd.f32 %v10049_v52, %v9933_v30  ;;  %v13481_v11 = vpop.f32.mrb[89].mxu1  ;;  %v13968_v52 = vld [vmem:[%s21281_s7 + $0x2c4] ss:$8 sps:$4 sm:$0xff]  }
 0x884   : > { %v10052_v35 = vpop.f32.mrb[90].mxu1  ;;  %10816 = vmatpush1.bf16.msra.mxu1 %v13948_v14 }
 0x885   : > { %v20652_v0 = vadd.f32 %v10052_v35, %v9934_v10  ;;  %v13482_v62 = vpop.f32.mrb[91].mxu1  ;;  %10817 = vmatprep.subr.bf16.mxu1 %v13956_v3  ;;  %v13972_v35 = vld [vmem:[%s21281_s7 + $0x2d0] ss:$8 sps:$4 sm:$0xff]  }
 0x886   : > { %v13980_v62 = vld [vmem:[%s21281_s7 + $0x2e4] ss:$8 sps:$4 sm:$0xff]  }
 0x888   : > { %10818 = vmatpush1.bf16.msra.mxu1 %v13954_v49 }
 0x88a   : > { %v10057_v60 = vpop.f32.mrb[92].mxu1 }
 0x88b   : > { %v20660_v17 = vadd.f32 %v10057_v60, %v9935_v21  ;;  %v13485_v24 = vpop.f32.mrb[93].mxu1 }
 0x88c   : > { %v10060_v6 = vpop.f32.mrb[94].mxu1 }
 0x88d   : > { %v20668_v61 = vadd.f32 %v10060_v6, %v9936_v7  ;;  %v13486_v38 = vpop.f32.mrb[95].mxu1  ;;  %v13951_v7 = vld [vmem:[%s21281_s7 + $0x290] ss:$8 sps:$4 sm:$0xff]  }
 0x88e   : > { %11611 = vmatpush1.bf16.msra.mxu0 %v13951_v7  ;;  %v13984_v6 = vld [vmem:[%s21281_s7 + $0x2f0] ss:$8 sps:$4 sm:$0xff]  }
 0x88f   : > { %11612 = vmatprep.subr.bf16.mxu0 %v13959_v2 }
 0x892   : > { %v10065_v5 = vpop.f32.mrb[96].mxu1 }
 0x893   : > { %v13489_v4 = vpop.f32.mrb[97].mxu1 }
 0x894   : > { %v10068_v36 = vpop.f32.mrb[98].mxu1 }
 0x895   : > { %v13490_v42 = vpop.f32.mrb[99].mxu1 }
 0x89a   : > { %v10175_v47 = vpop.f32.mrb[100].mxu1 }
 0x89b   : > { %v20676_v45 = vadd.f32 %v10175_v47, %v10071_v23  ;;  %v13501_v1 = vpop.f32.mrb[101].mxu1  ;;  %v13957_v23 = vld [vmem:[%s21281_s7 + $0x2a0] ss:$8 sps:$4 sm:$0xff]  }
 0x89c   : > { %v10178_v46 = vpop.f32.mrb[102].mxu1  ;;  %11613 = vmatpush1.bf16.msra.mxu0 %v13957_v23 }
 0x89d   : > { %v20684_v26 = vadd.f32 %v10178_v46, %v10072_v9  ;;  %v13502_v33 = vpop.f32.mrb[103].mxu1  ;;  %11614 = vmatprep.subr.bf16.mxu0 %v13962_v41 }
 0x8a0   : > { %11615 = vmatpush1.bf16.msra.mxu0 %v13960_v57 }
 0x8a1   : > { %11616 = vmatprep.subr.bf16.mxu0 %v13968_v52 }
 0x8a2   : > { %v10183_v13 = vpop.f32.mrb[104].mxu1 }
 0x8a3   : > { %v20692_v30 = vadd.f32 %v10183_v13, %v10073_v58  ;;  %v13505_v59 = vpop.f32.mrb[105].mxu1  ;;  %v13965_v58 = vld [vmem:[%s21281_s7 + $0x84] ss:$8 sps:$4 sm:$0xff]  }
 0x8a4   : > { %v10186_v10 = vpop.f32.mrb[106].mxu1  ;;  %10963 = vmatprep.subr.bf16.mxu1 %v13965_v58  ;;  %11617 = vmatpush1.bf16.msra.mxu0 %v13966_v8 }
 0x8a5   : > { %v20706_v21 = vadd.f32 %v10186_v10, %v10074_v34  ;;  %v13506_v50 = vpop.f32.mrb[107].mxu1  ;;  %11618 = vmatprep.subr.bf16.mxu0 %v13974_v56 }
 0x8a8   : > { %11619 = vmatpush1.bf16.msra.mxu0 %v13972_v35 }
 0x8a9   : > { %11620 = vmatprep.subr.bf16.mxu0 %v13980_v62 }
 0x8aa   : > { %v10191_v15 = vpop.f32.mrb[108].mxu1 }
 0x8ab   : > { %v10217_v51 = vadd.f32 %v10191_v15, %v20644_v19  ;;  %v13509_v18 = vpop.f32.mrb[109].mxu1 }
 0x8ac   : > { %v10194_v25 = vpop.f32.mrb[110].mxu1  ;;  %11621 = vmatpush1.bf16.msra.mxu0 %v13978_v43  ;;  %v12652_v43 = vld [vmem:[%s21280_s6] ss:$0 sm:$0xff] }
 0x8ad   : > { %v10218_v55 = vadd.f32 %v10194_v25, %v20652_v0  ;;  %v13510_v9 = vpop.f32.mrb[111].mxu1 }
 0x8b2   : > { %v10199_v63 = vpop.f32.mrb[112].mxu1 }
 0x8b3   : > { %v10219_v31 = vadd.f32 %v10199_v63, %v20660_v17  ;;  %v13513_v34 = vpop.f32.mrb[113].mxu1  ;;  %v13986_v17 = vld [vmem:[%s21281_s7 + $0x2f4] ss:$8 sps:$4 sm:$0xff]  }
 0x8b4   : > { %v10202_v19 = vpop.f32.mrb[114].mxu1  ;;  %11622 = vmatprep.subr.bf16.mxu0 %v13986_v17 }
 0x8b5   : > { %v10220_v11 = vadd.f32 %v10202_v19, %v20668_v61  ;;  %v13514_v12 = vpop.f32.mrb[115].mxu1  ;;  %11623 = vmatpush1.bf16.msra.mxu0 %v13984_v6 }
 0x8b6   : > { %11933 = vmatprep.subr.bf16.mxu0 %v13992_v37 }
 0x8ba   : > { %v10207_v0 = vpop.f32.mrb[116].mxu1 }
 0x8bb   : > { %v13517_v28 = vpop.f32.mrb[117].mxu1 }
 0x8bc   : > { %v10210_v60 = vpop.f32.mrb[118].mxu1 }
 0x8bd   : > { %v13518_v24 = vpop.f32.mrb[119].mxu1 }
 0x8c2   : > { %v10317_v20 = vpop.f32.mrb[120].mxu1 }
 0x8c3   : > { %v10355_v61 = vadd.f32 %v10317_v20, %v20676_v45  ;;  %v13529_v38 = vpop.f32.mrb[121].mxu1 }
 0x8c4   : > { %v10320_v27 = vpop.f32.mrb[122].mxu1 }
 0x8c5   : > { %v10356_v53 = vadd.f32 %v10320_v27, %v20684_v26  ;;  %v13530_v5 = vpop.f32.mrb[123].mxu1 }
 0x8ca   : > { %v10325_v4 = vpop.f32.mrb[124].mxu1 }
 0x8cb   : > { %v10357_v36 = vadd.f32 %v10325_v4, %v20692_v30  ;;  %v13533_v42 = vpop.f32.mrb[125].mxu1 }
 0x8cc   : > { %v10328_v47 = vpop.f32.mrb[126].mxu1 }
 0x8cd   : > { %v10358_v1 = vadd.f32 %v10328_v47, %v20706_v21  ;;  %v13534_v29 = vpop.f32.mrb[127].mxu1 }
 0x8d2   : > { %v10333_v48 = vpop.f32.mrb[128].mxu1 }
 0x8d3   : > { %v10359_v46 = vadd.f32 %v10333_v48, %v10217_v51  ;;  %v13537_v33 = vpop.f32.mrb[129].mxu1 }
 0x8d4   : > { %v10336_v16 = vpop.f32.mrb[130].mxu1 }
 0x8d5   : > { %v10360_v45 = vadd.f32 %v10336_v16, %v10218_v55  ;;  %v13538_v39 = vpop.f32.mrb[131].mxu1 }
 0x8da   : > { %v10341_v13 = vpop.f32.mrb[132].mxu1 }
 0x8db   : > { %v10361_v59 = vadd.f32 %v10341_v13, %v10219_v31  ;;  %v13541_v40 = vpop.f32.mrb[133].mxu1 }
 0x8dc   : > { %v10344_v22 = vpop.f32.mrb[134].mxu1 }
 0x8dd   : > { %v10362_v26 = vadd.f32 %v10344_v22, %v10220_v11  ;;  %v13542_v10 = vpop.f32.mrb[135].mxu1 }
 0x8e2   : > { %v10349_v14 = vpop.f32.mrb[136].mxu1 }
 0x8e3   : > { %v13545_v54 = vpop.f32.mrb[137].mxu1 }
 0x8e4   : > { %v10352_v30 = vpop.f32.mrb[138].mxu1 }
 0x8e5   : > { %v13546_v50 = vpop.f32.mrb[139].mxu1 }
 0x8ea   : > { %v10459_v32 = vpop.f32.mrb[140].mxu1 }
 0x8eb   : > { %v10497_v7 = vadd.f32 %v10459_v32, %v10355_v61  ;;  %v13557_v21 = vpop.f32.mrb[141].mxu1  ;;  %v13963_v32 = vld [vmem:[%s21281_s7 + $0x80] ss:$8 sps:$4 sm:$0xff]  }
 0x8ec   : > { %v10462_v15 = vpop.f32.mrb[142].mxu1 }
 0x8ed   : > { %v10498_v18 = vadd.f32 %v10462_v15, %v10356_v53  ;;  %v13558_v51 = vpop.f32.mrb[143].mxu1  ;;  %v13971_v15 = vld [vmem:[%s21281_s7 + $0x94] ss:$8 sps:$4 sm:$0xff]  }
 0x8f2   : > { %v10467_v49 = vpop.f32.mrb[144].mxu1 }
 0x8f3   : > { %v10499_v3 = vadd.f32 %v10467_v49, %v10357_v36  ;;  %v13561_v25 = vpop.f32.mrb[145].mxu1 }
 0x8f4   : > { %v10470_v23 = vpop.f32.mrb[146].mxu1  ;;  %v13969_v25 = vld [vmem:[%s21281_s7 + $0x90] ss:$8 sps:$4 sm:$0xff]  }
 0x8f5   : > { %v10500_v2 = vadd.f32 %v10470_v23, %v10358_v1  ;;  %v13562_v55 = vpop.f32.mrb[147].mxu1 }
 0x8fa   : > { %v10475_v9 = vpop.f32.mrb[148].mxu1 }
 0x8fb   : > { %v10501_v41 = vadd.f32 %v10475_v9, %v10359_v46  ;;  %v13565_v57 = vpop.f32.mrb[149].mxu1  ;;  %v13977_v9 = vld [vmem:[%s21281_s7 + $0xa4] ss:$8 sps:$4 sm:$0xff]  }
 0x8fc   : > { %v10478_v58 = vpop.f32.mrb[150].mxu1 }
 0x8fd   : > { %v10502_v63 = vadd.f32 %v10478_v58, %v10360_v45  ;;  %v13566_v31 = vpop.f32.mrb[151].mxu1 }
 0x8fe   : > { %v13975_v31 = vld [vmem:[%s21281_s7 + $0xa0] ss:$8 sps:$4 sm:$0xff]  }
 0x902   : > { %v10483_v34 = vpop.f32.mrb[152].mxu1 }
 0x903   : > { %v10503_v8 = vadd.f32 %v10483_v34, %v10361_v59  ;;  %v13569_v52 = vpop.f32.mrb[153].mxu1 }
 0x904   : > { %v10486_v19 = vpop.f32.mrb[154].mxu1 }
 0x905   : > { %v10504_v11 = vadd.f32 %v10486_v19, %v10362_v26  ;;  %v13570_v12 = vpop.f32.mrb[155].mxu1 }
 0x90a   : > { %v10491_v56 = vpop.f32.mrb[156].mxu1 }
 0x90b   : > { %v13573_v35 = vpop.f32.mrb[157].mxu1 }
 0x90c   : > { %v10494_v0 = vpop.f32.mrb[158].mxu1 }
 0x90d   : > { %v13574_v62 = vpop.f32.mrb[159].mxu1  ;;  %v13981_v0 = vld [vmem:[%s21281_s7 + $0xb0] ss:$8 sps:$4 sm:$0xff]  }
 0x912   : > { %v10601_v28 = vpop.f32.mrb[160].mxu1 }
 0x913   : > { %v10639_v60 = vadd.f32 %v10601_v28, %v10497_v7  ;;  %v13585_v17 = vpop.f32.mrb[161].mxu1  ;;  %v13989_v28 = vld [vmem:[%s21281_s7 + $0xc4] ss:$8 sps:$4 sm:$0xff]  }
 0x914   : > { %v10604_v24 = vpop.f32.mrb[162].mxu1 }
 0x915   : > { %v10655_v6 = vadd.f32 %v12652_v43, %v10639_v60  ;;  %v10640_v37 = vadd.f32 %v10604_v24, %v10498_v18  ;;  %v13586_v20 = vpop.f32.mrb[163].mxu1 }
 0x916   : > { %v13995_v20 = vld [vmem:[%s21281_s7 + $0xd4] ss:$8 sps:$4 sm:$0xff]  }
 0x917   : > { %v10664_v61 = vmax.f32 %v10655_v6, 0.0  ;;  %v10656_v38 = vadd.f32 %v12652_v43, %v10640_v37  ;;  %v13987_v6 = vld [vmem:[%s21281_s7 + $0xc0] ss:$8 sps:$4 sm:$0xff]  }
 0x919   : > { %10673 = vst [vmem:[#allocation6] sm:$0xff] %v10664_v61  ;;  %v10665_v27 = vmax.f32 %v10656_v38, 0.0  ;;  %v13990_v38 = vld [vmem:[%s21281_s7 + $0x380] ss:$8 sps:$4 sm:$0xff]  }
 0x91a   : > { %v10609_v53 = vpop.f32.mrb[164].mxu1 }
 0x91b   : > { %10674 = vst [vmem:[#allocation6 + $0x8] sm:$0xff] %v10665_v27  ;;  %v10641_v5 = vadd.f32 %v10609_v53, %v10499_v3  ;;  %v13589_v4 = vpop.f32.mrb[165].mxu1  ;;  %v13993_v27 = vld [vmem:[%s21281_s7 + $0xd0] ss:$8 sps:$4 sm:$0xff]  }
 0x91c   : > { %v10612_v36 = vpop.f32.mrb[166].mxu1  ;;  %v14001_v4 = vld [vmem:[%s21281_s7 + $0xe4] ss:$8 sps:$4 sm:$0xff]  }
 0x91d   : > { %v10657_v42 = vadd.f32 %v12652_v43, %v10641_v5  ;;  %v10642_v47 = vadd.f32 %v10612_v36, %v10500_v2  ;;  %v13590_v1 = vpop.f32.mrb[167].mxu1  ;;  %v13998_v5 = vld [vmem:[%s21281_s7 + $0x394] ss:$8 sps:$4 sm:$0xff]   ;;  %v13996_v36 = vld [vmem:[%s21281_s7 + $0x390] ss:$8 sps:$4 sm:$0xff]  }
 0x91e   : > { %v14007_v1 = vld [vmem:[%s21281_s7 + $0xf4] ss:$8 sps:$4 sm:$0xff]  }
 0x91f   : > { %v10666_v29 = vmax.f32 %v10657_v42, 0.0  ;;  %v10658_v48 = vadd.f32 %v12652_v43, %v10642_v47  ;;  %v13999_v42 = vld [vmem:[%s21281_s7 + $0xe0] ss:$8 sps:$4 sm:$0xff]   ;;  %v14004_v47 = vld [vmem:[%s21281_s7 + $0x3a4] ss:$8 sps:$4 sm:$0xff]  }
 0x921   : > { %10675 = vst [vmem:[#allocation6 + $0x10] sm:$0xff] %v10666_v29  ;;  %v10667_v46 = vmax.f32 %v10658_v48, 0.0  ;;  %v14002_v29 = vld [vmem:[%s21281_s7 + $0x3a0] ss:$8 sps:$4 sm:$0xff]   ;;  %v14005_v48 = vld [vmem:[%s21281_s7 + $0xf0] ss:$8 sps:$4 sm:$0xff]  }
 0x922   : > { %v10617_v33 = vpop.f32.mrb[168].mxu1  ;;  %v10682_v16 = vld [vmem:[#allocation6] ss:$2 sm:$0xff]  ;;  %v10690_v45 = vld [vmem:[#allocation6 + $0x1] ss:$2 sm:$0xff] }
 0x923   : > { %10676 = vst [vmem:[#allocation6 + $0x18] sm:$0xff] %v10667_v46  ;;  %v10643_v39 = vadd.f32 %v10617_v33, %v10501_v41  ;;  %v13593_v13 = vpop.f32.mrb[169].mxu1  ;;  %v10697_v59 = vmax.f32 %v10682_v16, %v10690_v45  ;;  %v14010_v46 = vld [vmem:[%s21281_s7 + $0x3b4] ss:$8 sps:$4 sm:$0xff]   ;;  %v14013_v33 = vld [vmem:[%s21281_s7 + $0x104] ss:$8 sps:$4 sm:$0xff]  }
 0x924   : > { %v10620_v40 = vpop.f32.mrb[170].mxu1  ;;  %v14011_v13 = vld [vmem:[%s21281_s7 + $0x100] ss:$8 sps:$4 sm:$0xff]  }
 0x925   : > { %v10659_v22 = vadd.f32 %v12652_v43, %v10643_v39  ;;  %v10644_v26 = vadd.f32 %v10620_v40, %v10502_v63  ;;  %v13594_v10 = vpop.f32.mrb[171].mxu1  ;;  %v10703_v14 = vrot.slane %v10697_v59, 5  ;;  %v14008_v39 = vld [vmem:[%s21281_s7 + $0x3b0] ss:$8 sps:$4 sm:$0xff]  }
 0x926   : > { %v14014_v10 = vld [vmem:[%s21281_s7 + $0x3c0] ss:$8 sps:$4 sm:$0xff]  }
 0x927   : > { %v10668_v54 = vmax.f32 %v10659_v22, 0.0  ;;  %v10660_v30 = vadd.f32 %v12652_v43, %v10644_v26  ;;  %v10705_v50 = vmax.f32 %v10697_v59, %v10703_v14  ;;  %v14016_v59 = vld [vmem:[%s21281_s7 + $0x3c4] ss:$8 sps:$4 sm:$0xff]   ;;  %v14019_v26 = vld [vmem:[%s21281_s7 + $0x114] ss:$8 sps:$4 sm:$0xff]  }
 0x928   : > { %v14017_v14 = vld [vmem:[%s21281_s7 + $0x110] ss:$8 sps:$4 sm:$0xff]  }
 0x929   : > { %10677 = vst [vmem:[#allocation6 + $0x20] sm:$0xff] %v10668_v54  ;;  %v10669_v7 = vmax.f32 %v10660_v30, 0.0  ;;  %v20776_v21 = vpack.c.bf16 %v10705_v50, %v10705_v50  ;;  %v14022_v54 = vld [vmem:[%s21281_s7 + $0x3d4] ss:$8 sps:$4 sm:$0xff]   ;;  %v14025_v50 = vld [vmem:[%s21281_s7 + $0x124] ss:$8 sps:$4 sm:$0xff]  }
 0x92a   : > { %v10625_v18 = vpop.f32.mrb[172].mxu1  ;;  %v10684_v41 = vld [vmem:[#allocation6 + $0x10] ss:$2 sm:$0xff]  ;;  %v10692_v57 = vld [vmem:[#allocation6 + $0x11] ss:$2 sm:$0xff] }
 0x92b   : > { %10678 = vst [vmem:[#allocation6 + $0x28] sm:$0xff] %v10669_v7  ;;  %v10645_v51 = vadd.f32 %v10625_v18, %v10503_v8  ;;  %v13597_v49 = vpop.f32.mrb[173].mxu1  ;;  %10836 = vmatmul.mubr.bf16.vlgmr.msra.gmra.mrb[180].mxu1 %v20776_v21  ;;  %v13983_v8 = vld [vmem:[%s21281_s7 + $0xb4] ss:$8 sps:$4 sm:$0xff]   ;;  %v10698_v52 = vmax.f32 %v10684_v41, %v10692_v57  ;;  %v10880_v22 = vshrl.u32 %v20776_v21, 16 }
 0x92c   : > { %10964 = vmatpush1.bf16.msra.mxu1 %v13963_v32  ;;  %v10628_v3 = vpop.f32.mrb[174].mxu1  ;;  %10995 = vmatprep.mubr.bf16.mxu1 %v21918_v44  ;;  %v14020_v32 = vld [vmem:[%s21281_s7 + $0x3d0] ss:$8 sps:$4 sm:$0xff]   ;;  %v14023_v7 = vld [vmem:[%s21281_s7 + $0x120] ss:$8 sps:$4 sm:$0xff]  }
 0x92d   : > { %v10661_v23 = vadd.f32 %v12652_v43, %v10645_v51  ;;  %v10646_v2 = vadd.f32 %v10628_v3, %v10504_v11  ;;  %v13598_v55 = vpop.f32.mrb[175].mxu1  ;;  %10965 = vmatprep.subr.bf16.mxu1 %v13971_v15  ;;  %v14028_v15 = vld [vmem:[%s21281_s7 + $0x3e4] ss:$8 sps:$4 sm:$0xff]   ;;  %v14031_v51 = vld [vmem:[%s21281_s7 + $0x134] ss:$8 sps:$4 sm:$0xff]  }
 0x92e   : > { %v14026_v49 = vld [vmem:[%s21281_s7 + $0x3e0] ss:$8 sps:$4 sm:$0xff]   ;;  %v14029_v3 = vld [vmem:[%s21281_s7 + $0x130] ss:$8 sps:$4 sm:$0xff]   ;;  %v14040_v57 = vld [vmem:[%s21281_s7 + $0x154] ss:$8 sps:$4 sm:$0xff]  }
 0x92f   : > { %v10670_v58 = vmax.f32 %v10661_v23, 0.0  ;;  %v10662_v63 = vadd.f32 %v12652_v43, %v10646_v2  ;;  %v11184_v43 = vrot.slane %v10698_v52, 5  ;;  %v14037_v2 = vld [vmem:[%s21281_s7 + $0x144] ss:$8 sps:$4 sm:$0xff]   ;;  %v14032_v55 = vld [vmem:[%s21281_s7 + $0x3f0] ss:$8 sps:$4 sm:$0xff]  }
 0x930   : > { %10966 = vmatpush1.bf16.msra.mxu1 %v13969_v25  ;;  %v14034_v25 = vld [vmem:[%s21281_s7 + $0x3f4] ss:$8 sps:$4 sm:$0xff]  }
 0x931   : > { %10679 = vst [vmem:[#allocation6 + $0x30] sm:$0xff] %v10670_v58  ;;  %v10671_v34 = vmax.f32 %v10662_v63, 0.0  ;;  %10967 = vmatprep.subr.bf16.mxu1 %v13977_v9  ;;  %v14035_v9 = vld [vmem:[%s21281_s7 + $0x140] ss:$8 sps:$4 sm:$0xff]   ;;  %v14038_v63 = vld [vmem:[%s21281_s7 + $0x150] ss:$8 sps:$4 sm:$0xff]  }
 0x932   : > { %v10633_v19 = vpop.f32.mrb[176].mxu1  ;;  %v10686_v11 = vld [vmem:[#allocation6 + $0x20] ss:$2 sm:$0xff]  ;;  %v10694_v12 = vld [vmem:[#allocation6 + $0x21] ss:$2 sm:$0xff] }
 0x933   : > { %10680 = vst [vmem:[#allocation6 + $0x38] sm:$0xff] %v10671_v34  ;;  %v20795_v56 = vmax.f32 %v10686_v11, %v10694_v12  ;;  %v13601_v35 = vpop.f32.mrb[177].mxu1  ;;  %v14041_v34 = vld [vmem:[%s21281_s7 + $0x160] ss:$8 sps:$4 sm:$0xff]   ;;  %v14049_v19 = vld [vmem:[%s21281_s7 + $0x184] ss:$8 sps:$4 sm:$0xff]  }
 0x934   : > { %10968 = vmatpush1.bf16.msra.mxu1 %v13975_v31  ;;  %v10636_v62 = vpop.f32.mrb[178].mxu1  ;;  %v14043_v31 = vld [vmem:[%s21281_s7 + $0x164] ss:$8 sps:$4 sm:$0xff]   ;;  %v14047_v11 = vld [vmem:[%s21281_s7 + $0x180] ss:$8 sps:$4 sm:$0xff]   ;;  %v11040_v12 = vrot.slane %v20776_v21, 1 }
 0x935   : > { %10969 = vmatprep.subr.bf16.mxu1 %v13983_v8  ;;  %v11185_v60 = vrot.slane %v20795_v56, 5  ;;  %v13602_v17 = vpop.f32.mrb[179].mxu1  ;;  %v14046_v8 = vld [vmem:[%s21281_s7 + $0x174] ss:$8 sps:$4 sm:$0xff]   ;;  %v14050_v35 = vld [vmem:[%s21281_s7 + $0x190] ss:$8 sps:$4 sm:$0xff]  }
 0x936   : > { %v14053_v21 = vld [vmem:[%s21281_s7 + $0x1a0] ss:$8 sps:$4 sm:$0xff]   ;;  %v14058_v62 = vld [vmem:[%s21281_s7 + $0x1b4] ss:$8 sps:$4 sm:$0xff]  }
 0x937   : > { %v11186_v24 = vsel %vm4952_vm5, %v11184_v43, %v11185_v60  ;;  %v14061_v43 = vld [vmem:[%s21281_s7 + $0x1c4] ss:$8 sps:$4 sm:$0xff]   ;;  %v14059_v60 = vld [vmem:[%s21281_s7 + $0x1c0] ss:$8 sps:$4 sm:$0xff]   ;;  %v14064_v17 = vld [vmem:[%s21281_s7 + $0x1d4] ss:$8 sps:$4 sm:$0xff]  }
 0x938   : > { %10970 = vmatpush1.bf16.msra.mxu1 %v13981_v0  ;;  %v11188_v37 = vmax.f32 %v10698_v52, %v11186_v24  ;;  %v14044_v52 = vld [vmem:[%s21281_s7 + $0x170] ss:$8 sps:$4 sm:$0xff]   ;;  %v14055_v0 = vld [vmem:[%s21281_s7 + $0x1a4] ss:$8 sps:$4 sm:$0xff]  }
 0x939   : > { %10971 = vmatprep.subr.bf16.mxu1 %v13989_v28  ;;  %v14056_v28 = vld [vmem:[%s21281_s7 + $0x1b0] ss:$8 sps:$4 sm:$0xff]  }
 0x93a   : > { %v20811_v61 = vpack.c.bf16 %v11188_v37, %v11188_v37  ;;  %v10688_v16 = vld [vmem:[#allocation6 + $0x30] ss:$2 sm:$0xff]  ;;  %v10696_v45 = vld [vmem:[#allocation6 + $0x31] ss:$2 sm:$0xff]  ;;  %v14062_v24 = vld [vmem:[%s21281_s7 + $0x1d0] ss:$8 sps:$4 sm:$0xff]  }
 0x93b   : > { %v10700_v40 = vmax.f32 %v10688_v16, %v10696_v45  ;;  %v14065_v37 = vld [vmem:[%s21281_s7 + $0x1e0] ss:$8 sps:$4 sm:$0xff]   ;;  %v14086_v16 = vld [vmem:[%s21281_s7 + $0x250] ss:$8 sps:$4 sm:$0xff]   ;;  %v14091_v45 = vld [vmem:[%s21281_s7 + $0x264] ss:$8 sps:$4 sm:$0xff]  }
 0x93c   : > { %10972 = vmatpush1.bf16.msra.mxu1 %v13987_v6  ;;  %v11526_v53 = vrot.slane %v20811_v61, 2  ;;  %v14067_v6 = vld [vmem:[%s21281_s7 + $0x1e4] ss:$8 sps:$4 sm:$0xff]  }
 0x93d   : > { %10973 = vmatprep.subr.bf16.mxu1 %v13995_v20  ;;  %v11669_v30 = vrot.slane %v10700_v40, 5  ;;  %v14070_v20 = vld [vmem:[%s21281_s7 + $0x1f4] ss:$8 sps:$4 sm:$0xff]   ;;  %v11366_v40 = vshrl.u32 %v20811_v61, 16 }
 0x93e   : > { %11641 = vmatmul.mubr.bf16.vlgmr.msra.gmra.mrb[28].mxu0 %v11526_v53  ;;  %v14071_v53 = vld [vmem:[%s21281_s7 + $0x200] ss:$8 sps:$4 sm:$0xff]  }
 0x93f   : > { %11934 = vmatpush1.bf16.msra.mxu0 %v13990_v38  ;;  %11965 = vmatprep.mubr.bf16.mxu0 %v21918_v44  ;;  %v11671_v18 = vmax.f32 %v20795_v56, %v11669_v30  ;;  %v14052_v56 = vld [vmem:[%s21281_s7 + $0x194] ss:$8 sps:$4 sm:$0xff]   ;;  %v14068_v38 = vld [vmem:[%s21281_s7 + $0x1f0] ss:$8 sps:$4 sm:$0xff]   ;;  %v14101_v30 = vld [vmem:[%s21281_s7 + $0x320] ss:$8 sps:$4 sm:$0xff]  }
 0x940   : > { %10974 = vmatpush1.bf16.msra.mxu1 %v13993_v27  ;;  %11935 = vmatprep.subr.bf16.mxu0 %v13998_v5  ;;  %v14073_v27 = vld [vmem:[%s21281_s7 + $0x204] ss:$8 sps:$4 sm:$0xff]   ;;  %v11207_v5 = vrot.slane %v20811_v61, 1  ;;  %v14098_v61 = vld [vmem:[%s21281_s7 + $0x310] ss:$8 sps:$4 sm:$0xff]  }
 0x941   : > { %10975 = vmatprep.subr.bf16.mxu1 %v14001_v4  ;;  %v20899_v23 = vpack.c.bf16 %v11671_v18, %v11671_v18  ;;  %v14076_v4 = vld [vmem:[%s21281_s7 + $0x214] ss:$8 sps:$4 sm:$0xff]  }
 0x942   : > { %v14112_v18 = vld [vmem:[%s21281_s7 + $0x354] ss:$8 sps:$4 sm:$0xff]  }
 0x943   : > { %11936 = vmatpush1.bf16.msra.mxu0 %v13996_v36  ;;  %v11849_v41 = vshrl.u32 %v20899_v23, 16  ;;  %v14074_v36 = vld [vmem:[%s21281_s7 + $0x210] ss:$8 sps:$4 sm:$0xff]  }
 0x944   : > { %10976 = vmatpush1.bf16.msra.mxu1 %v13999_v42  ;;  %11937 = vmatprep.subr.bf16.mxu0 %v14004_v47  ;;  %v14079_v42 = vld [vmem:[%s21281_s7 + $0x224] ss:$8 sps:$4 sm:$0xff]   ;;  %v14077_v47 = vld [vmem:[%s21281_s7 + $0x220] ss:$8 sps:$4 sm:$0xff]  }
 0x945   : > { %10977 = vmatprep.subr.bf16.mxu1 %v14007_v1  ;;  %v11851_v58 = vrot.slane %v11849_v41, 2  ;;  %v14082_v1 = vld [vmem:[%s21281_s7 + $0x234] ss:$8 sps:$4 sm:$0xff]   ;;  %v11690_v41 = vrot.slane %v20899_v23, 2 }
 0x947   : > { %11938 = vmatpush1.bf16.msra.mxu0 %v14002_v29  ;;  %v14080_v29 = vld [vmem:[%s21281_s7 + $0x230] ss:$8 sps:$4 sm:$0xff]  }
 0x948   : > { %10978 = vmatpush1.bf16.msra.mxu1 %v14005_v48  ;;  %11939 = vmatprep.subr.bf16.mxu0 %v14010_v46  ;;  %v14085_v48 = vld [vmem:[%s21281_s7 + $0x244] ss:$8 sps:$4 sm:$0xff]   ;;  %v14083_v46 = vld [vmem:[%s21281_s7 + $0x240] ss:$8 sps:$4 sm:$0xff]  }
 0x949   : > { %11122 = vmatprep.subr.bf16.mxu1 %v14013_v33  ;;  %v14088_v33 = vld [vmem:[%s21281_s7 + $0x254] ss:$8 sps:$4 sm:$0xff]  }
 0x94b   : > { %10996 = vmatmul.mubr.bf16.vlgmr.msra.gmra.mrb[184].mxu1 %v10880_v22  ;;  %11940 = vmatpush1.bf16.msra.mxu0 %v14008_v39  ;;  %v14089_v39 = vld [vmem:[%s21281_s7 + $0x260] ss:$8 sps:$4 sm:$0xff]   ;;  %v14097_v22 = vld [vmem:[%s21281_s7 + $0x304] ss:$8 sps:$4 sm:$0xff]  }
 0x94c   : > { %11123 = vmatpush1.bf16.msra.mxu1 %v14011_v13  ;;  %11941 = vmatprep.subr.bf16.mxu0 %v14016_v59  ;;  %v14094_v13 = vld [vmem:[%s21281_s7 + $0x274] ss:$8 sps:$4 sm:$0xff]   ;;  %v14092_v59 = vld [vmem:[%s21281_s7 + $0x270] ss:$8 sps:$4 sm:$0xff]  }
 0x94d   : > { %11124 = vmatprep.subr.bf16.mxu1 %v14019_v26  ;;  %11154 = vmatprep.mubr.bf16.mxu1 %v21918_v44  ;;  %v14095_v26 = vld [vmem:[%s21281_s7 + $0x300] ss:$8 sps:$4 sm:$0xff]  }
 0x94f   : > { %11942 = vmatpush1.bf16.msra.mxu0 %v14014_v10  ;;  %v11368_v10 = vrot.slane %v11366_v40, 1 }
 0x950   : > { %11125 = vmatpush1.bf16.msra.mxu1 %v14017_v14  ;;  %11943 = vmatprep.subr.bf16.mxu0 %v14022_v54  ;;  %v14100_v14 = vld [vmem:[%s21281_s7 + $0x314] ss:$8 sps:$4 sm:$0xff]   ;;  %v14103_v54 = vld [vmem:[%s21281_s7 + $0x324] ss:$8 sps:$4 sm:$0xff]  }
 0x951   : > { %11126 = vmatprep.subr.bf16.mxu1 %v14025_v50  ;;  %v14106_v50 = vld [vmem:[%s21281_s7 + $0x334] ss:$8 sps:$4 sm:$0xff]  }
 0x953   : > { %11944 = vmatpush1.bf16.msra.mxu0 %v14020_v32  ;;  %v14104_v32 = vld [vmem:[%s21281_s7 + $0x330] ss:$8 sps:$4 sm:$0xff]  }
 0x954   : > { %11127 = vmatpush1.bf16.msra.mxu1 %v14023_v7  ;;  %11945 = vmatprep.subr.bf16.mxu0 %v14028_v15  ;;  %v14109_v7 = vld [vmem:[%s21281_s7 + $0x344] ss:$8 sps:$4 sm:$0xff]   ;;  %v14107_v15 = vld [vmem:[%s21281_s7 + $0x340] ss:$8 sps:$4 sm:$0xff]  }
 0x955   : > { %11128 = vmatprep.subr.bf16.mxu1 %v14031_v51  ;;  %v14110_v51 = vld [vmem:[%s21281_s7 + $0x350] ss:$8 sps:$4 sm:$0xff]  }
 0x957   : > { %11946 = vmatpush1.bf16.msra.mxu0 %v14026_v49  ;;  %v14115_v49 = vld [vmem:[%s21281_s7 + $0x364] ss:$8 sps:$4 sm:$0xff]  }
 0x958   : > { %11129 = vmatpush1.bf16.msra.mxu1 %v14029_v3  ;;  %11947 = vmatprep.subr.bf16.mxu0 %v14034_v25  ;;  %v14113_v3 = vld [vmem:[%s21281_s7 + $0x360] ss:$8 sps:$4 sm:$0xff]   ;;  %v14118_v25 = vld [vmem:[%s21281_s7 + $0x374] ss:$8 sps:$4 sm:$0xff]  }
 0x959   : > { %11130 = vmatprep.subr.bf16.mxu1 %v14037_v2  ;;  %v14116_v2 = vld [vmem:[%s21281_s7 + $0x370] ss:$8 sps:$4 sm:$0xff]  }
 0x95b   : > { %11948 = vmatpush1.bf16.msra.mxu0 %v14032_v55  ;;  %v14121_v55 = vld [vmem:[%s21281_s7 + $0x404] ss:$8 sps:$4 sm:$0xff]  }
 0x95c   : > { %11131 = vmatpush1.bf16.msra.mxu1 %v14035_v9  ;;  %v14119_v9 = vld [vmem:[%s21281_s7 + $0x400] ss:$8 sps:$4 sm:$0xff]  }
 0x95d   : > { %11132 = vmatprep.subr.bf16.mxu1 %v14040_v57  ;;  %v14124_v57 = vld [vmem:[%s21281_s7 + $0x414] ss:$8 sps:$4 sm:$0xff]  }
 0x95e   : > { %11966 = vmatmul.mubr.bf16.vlgmr.msra.gmra.mrb[32].mxu0 %v11851_v58  ;;  %v14122_v58 = vld [vmem:[%s21281_s7 + $0x410] ss:$8 sps:$4 sm:$0xff]  }
 0x960   : > { %11133 = vmatpush1.bf16.msra.mxu1 %v14038_v63  ;;  %v14127_v63 = vld [vmem:[%s21281_s7 + $0x424] ss:$8 sps:$4 sm:$0xff]  }
 0x961   : > { %11134 = vmatprep.subr.bf16.mxu1 %v14043_v31  ;;  %v14125_v31 = vld [vmem:[%s21281_s7 + $0x420] ss:$8 sps:$4 sm:$0xff]  }
 0x964   : > { %11135 = vmatpush1.bf16.msra.mxu1 %v14041_v34  ;;  %v14130_v34 = vld [vmem:[%s21281_s7 + $0x434] ss:$8 sps:$4 sm:$0xff]  }
 0x965   : > { %11136 = vmatprep.subr.bf16.mxu1 %v14046_v8  ;;  %v14133_v8 = vld [vmem:[%s21281_s7 + $0x444] ss:$8 sps:$4 sm:$0xff]  }
 0x968   : > { %11137 = vmatpush1.bf16.msra.mxu1 %v14044_v52  ;;  %v14131_v52 = vld [vmem:[%s21281_s7 + $0x440] ss:$8 sps:$4 sm:$0xff]  }
 0x969   : > { %11289 = vmatprep.subr.bf16.mxu1 %v14049_v19  ;;  %v14136_v19 = vld [vmem:[%s21281_s7 + $0x454] ss:$8 sps:$4 sm:$0xff]  }
 0x96b   : > { %11155 = vmatmul.mubr.bf16.vlgmr.msra.gmra.mrb[188].mxu1 %v11040_v12  ;;  %v14139_v12 = vld [vmem:[%s21281_s7 + $0x464] ss:$8 sps:$4 sm:$0xff]  }
 0x96c   : > { %11290 = vmatpush1.bf16.msra.mxu1 %v14047_v11  ;;  %11321 = vmatprep.mubr.bf16.mxu1 %v21918_v44  ;;  %v14134_v11 = vld [vmem:[%s21281_s7 + $0x450] ss:$8 sps:$4 sm:$0xff]  }
 0x96d   : > { %11291 = vmatprep.subr.bf16.mxu1 %v14052_v56  ;;  %v14137_v56 = vld [vmem:[%s21281_s7 + $0x460] ss:$8 sps:$4 sm:$0xff]  }
 0x970   : > { %11292 = vmatpush1.bf16.msra.mxu1 %v14050_v35  ;;  %v14142_v35 = vld [vmem:[%s21281_s7 + $0x474] ss:$8 sps:$4 sm:$0xff]  }
 0x971   : > { %11293 = vmatprep.subr.bf16.mxu1 %v14055_v0  ;;  %v14140_v0 = vld [vmem:[%s21281_s7 + $0x470] ss:$8 sps:$4 sm:$0xff]  }
 0x974   : > { %11294 = vmatpush1.bf16.msra.mxu1 %v14053_v21  ;;  %v12009_v21 = vrot.slane %v20899_v23, 3 }
 0x975   : > { %11295 = vmatprep.subr.bf16.mxu1 %v14058_v62 }
 0x978   : > { %11296 = vmatpush1.bf16.msra.mxu1 %v14056_v28 }
 0x979   : > { %11297 = vmatprep.subr.bf16.mxu1 %v14061_v43 }
 0x97c   : > { %11298 = vmatpush1.bf16.msra.mxu1 %v14059_v60 }
 0x97d   : > { %11299 = vmatprep.subr.bf16.mxu1 %v14064_v17 }
 0x980   : > { %11300 = vmatpush1.bf16.msra.mxu1 %v14062_v24  ;;  %v14298_v24 = vmov 1966171168  }
 0x981   : > { %11301 = vmatprep.subr.bf16.mxu1 %v14067_v6  ;;  %v10848_v6 = vunpack.c.l.s4 %v14298_v24 }
 0x984   : > { %11302 = vmatpush1.bf16.msra.mxu1 %v14065_v37  ;;  %v10850_v37 = vlaneseq }
 0x985   : > { %11303 = vmatprep.subr.bf16.mxu1 %v14070_v20 }
 0x988   : > { %11304 = vmatpush1.bf16.msra.mxu1 %v14068_v38 }
 0x989   : > { %11450 = vmatprep.subr.bf16.mxu1 %v14073_v27 }
 0x98b   : > { %11322 = vmatmul.mubr.bf16.vlgmr.msra.gmra.mrb[192].mxu1 %v11207_v5  ;;  %v10849_v5 = vunpack.c.0.s8 %v10848_v6 }
 0x98c   : > { %11451 = vmatpush1.bf16.msra.mxu1 %v14071_v53  ;;  %11482 = vmatprep.mubr.bf16.mxu1 %v21918_v44 }
 0x98d   : > { %11452 = vmatprep.subr.bf16.mxu1 %v14076_v4  ;;  %v21136_v4 = vshrl.u32 %v10850_v37, 7 }
 0x990   : > { %11453 = vmatpush1.bf16.msra.mxu1 %v14074_v36  ;;  %v21139_v36 = vsub.s32 %v10849_v5, %v21136_v4 }
 0x991   : > { %11454 = vmatprep.subr.bf16.mxu1 %v14079_v42 }
 0x994   : > { %11455 = vmatpush1.bf16.msra.mxu1 %v14077_v47 }
 0x995   : > { %11456 = vmatprep.subr.bf16.mxu1 %v14082_v1 }
 0x998   : > { %11457 = vmatpush1.bf16.msra.mxu1 %v14080_v29 }
 0x999   : > { %11458 = vmatprep.subr.bf16.mxu1 %v14085_v48 }
 0x99c   : > { %11459 = vmatpush1.bf16.msra.mxu1 %v14083_v46 }
 0x99d   : > { %11460 = vmatprep.subr.bf16.mxu1 %v14088_v33  ;;  %v10701_v33 = vld [vmem:[%s21282_s8] sm:$0x3] }
 0x9a0   : > { %11461 = vmatpush1.bf16.msra.mxu1 %v14086_v16 }
 0x9a1   : > { %11462 = vmatprep.subr.bf16.mxu1 %v14091_v45 }
 0x9a4   : > { %11463 = vmatpush1.bf16.msra.mxu1 %v14089_v39 }
 0x9a5   : > { %11464 = vmatprep.subr.bf16.mxu1 %v14094_v13 }
 0x9a8   : > { %11465 = vmatpush1.bf16.msra.mxu1 %v14092_v59 }
 0x9a9   : > { %11772 = vmatprep.subr.bf16.mxu1 %v14097_v22 }
 0x9ab   : > { %11483 = vmatmul.mubr.bf16.vlgmr.msra.gmra.mrb[196].mxu1 %v11368_v10 }
 0x9ac   : > { %11773 = vmatpush1.bf16.msra.mxu1 %v14095_v26  ;;  %11804 = vmatprep.mubr.bf16.mxu1 %v21918_v44 }
 0x9ad   : > { %11774 = vmatprep.subr.bf16.mxu1 %v14100_v14 }
 0x9b0   : > { %11775 = vmatpush1.bf16.msra.mxu1 %v14098_v61 }
 0x9b1   : > { %11776 = vmatprep.subr.bf16.mxu1 %v14103_v54 }
 0x9b4   : > { %11777 = vmatpush1.bf16.msra.mxu1 %v14101_v30 }
 0x9b5   : > { %11778 = vmatprep.subr.bf16.mxu1 %v14106_v50 }
 0x9b8   : > { %11779 = vmatpush1.bf16.msra.mxu1 %v14104_v32 }
 0x9b9   : > { %11780 = vmatprep.subr.bf16.mxu1 %v14109_v7 }
 0x9bc   : > { %11781 = vmatpush1.bf16.msra.mxu1 %v14107_v15 }
 0x9bd   : > { %11782 = vmatprep.subr.bf16.mxu1 %v14112_v18 }
 0x9c0   : > { %11783 = vmatpush1.bf16.msra.mxu1 %v14110_v51  ;;  %v14143_v51 = vld [vmem:[%s21283_s9 + $0x40] sm:$0xff]  }
 0x9c1   : > { %11784 = vmatprep.subr.bf16.mxu1 %v14115_v49  ;;  %v14144_v49 = vld [vmem:[%s21283_s9] sm:$0xff]   ;;  %13041 = vmatprep.subr.bf16.mxu0 %v14143_v51  ;;  %v12167_v51 = vsub.s32 1, %v21136_v4 }
 0x9c2   : > { %13042 = vmatpush3.bf16.msra.mxu0 %v14144_v49  ;;  %v12163_v49 = vsub.s32 0, %v21136_v4 }
 0x9c4   : > { %11785 = vmatpush1.bf16.msra.mxu1 %v14113_v3  ;;  %v14145_v3 = vld [vmem:[%s21283_s9 + $0x48] sm:$0xff]  }
 0x9c5   : > { %11786 = vmatprep.subr.bf16.mxu1 %v14118_v25  ;;  %v14146_v25 = vld [vmem:[%s21283_s9 + $0x8] sm:$0xff]   ;;  %13043 = vmatprep.subr.bf16.mxu0 %v14145_v3 }
 0x9c6   : > { %13044 = vmatpush3.bf16.msra.mxu0 %v14146_v25 }
 0x9c8   : > { %11787 = vmatpush1.bf16.msra.mxu1 %v14116_v2  ;;  %v14147_v2 = vld [vmem:[%s21283_s9 + $0x50] sm:$0xff]  }
 0x9c9   : > { %12091 = vmatprep.subr.bf16.mxu1 %v14121_v55  ;;  %v14148_v55 = vld [vmem:[%s21283_s9 + $0x10] sm:$0xff]   ;;  %13045 = vmatprep.subr.bf16.mxu0 %v14147_v2 }
 0x9ca   : > { %13046 = vmatpush3.bf16.msra.mxu0 %v14148_v55 }
 0x9cb   : > { %11805 = vmatmul.mubr.bf16.vlgmr.msra.gmra.mrb[200].mxu1 %v11690_v41  ;;  %v14150_v41 = vld [vmem:[%s21283_s9 + $0x18] sm:$0xff]  }
 0x9cc   : > { %12092 = vmatpush1.bf16.msra.mxu1 %v14119_v9  ;;  %12123 = vmatprep.mubr.bf16.mxu1 %v21918_v44  ;;  %v14128_v44 = vld [vmem:[%s21281_s7 + $0x430] ss:$8 sps:$4 sm:$0xff]  }
 0x9cd   : > { %12093 = vmatprep.subr.bf16.mxu1 %v14124_v57  ;;  %v14149_v9 = vld [vmem:[%s21283_s9 + $0x58] sm:$0xff]   ;;  %v14151_v57 = vld [vmem:[%s21283_s9 + $0x60] sm:$0xff]  }
 0x9ce   : > { %13047 = vmatprep.subr.bf16.mxu0 %v14149_v9 }
 0x9cf   : > { %13048 = vmatpush3.bf16.msra.mxu0 %v14150_v41  ;;  %v12205_v41 = vld [vmem:[%s21284_s10] sm:$0x1] }
 0x9d0   : > { %12094 = vmatpush1.bf16.msra.mxu1 %v14122_v58  ;;  %v14152_v58 = vld [vmem:[%s21283_s9 + $0x20] sm:$0xff]   ;;  %13049 = vmatprep.subr.bf16.mxu0 %v14151_v57 }
 0x9d1   : > { %12095 = vmatprep.subr.bf16.mxu1 %v14127_v63  ;;  %v14153_v63 = vld [vmem:[%s21283_s9 + $0x68] sm:$0xff]  }
 0x9d3   : > { %13050 = vmatpush3.bf16.msra.mxu0 %v14152_v58 }
 0x9d4   : > { %12096 = vmatpush1.bf16.msra.mxu1 %v14125_v31  ;;  %v14154_v31 = vld [vmem:[%s21283_s9 + $0x28] sm:$0xff]   ;;  %13051 = vmatprep.subr.bf16.mxu0 %v14153_v63 }
 0x9d5   : > { %12097 = vmatprep.subr.bf16.mxu1 %v14130_v34  ;;  %v14155_v34 = vld [vmem:[%s21283_s9 + $0x70] sm:$0xff]  }
 0x9d7   : > { %13052 = vmatpush3.bf16.msra.mxu0 %v14154_v31 }
 0x9d8   : > { %12098 = vmatpush1.bf16.msra.mxu1 %v14128_v44  ;;  %v14156_v44 = vld [vmem:[%s21283_s9 + $0x30] sm:$0xff]   ;;  %13053 = vmatprep.subr.bf16.mxu0 %v14155_v34 }
 0x9d9   : > { %12099 = vmatprep.subr.bf16.mxu1 %v14133_v8 }
 0x9db   : > { %13054 = vmatpush3.bf16.msra.mxu0 %v14156_v44 }
 0x9dc   : > { %12100 = vmatpush1.bf16.msra.mxu1 %v14131_v52  ;;  %v14157_v52 = vld [vmem:[%s21283_s9 + $0x78] sm:$0xff]  }
 0x9dd   : > { %12101 = vmatprep.subr.bf16.mxu1 %v14136_v19  ;;  %13055 = vmatprep.subr.bf16.mxu0 %v14157_v52 }
 0x9e0   : > { %12102 = vmatpush1.bf16.msra.mxu1 %v14134_v11 }
 0x9e1   : > { %12103 = vmatprep.subr.bf16.mxu1 %v14139_v12 }
 0x9e4   : > { %12104 = vmatpush1.bf16.msra.mxu1 %v14137_v56 }
 0x9e5   : > { %12105 = vmatprep.subr.bf16.mxu1 %v14142_v35  ;;  %v14158_v35 = vld [vmem:[%s21283_s9 + $0x38] sm:$0xff]  }
 0x9e6   : > { %13056 = vmatpush3.bf16.msra.mxu0 %v14158_v35 }
 0x9e8   : > { %12106 = vmatpush1.bf16.msra.mxu1 %v14140_v0 }
 0x9eb   : > { %12124 = vmatmul.mubr.bf16.vlgmr.msra.gmra.mrb[204].mxu1 %v12009_v21 }
 0x9fe   : > { %v10837_v62 = vpop.f32.mrb[180].mxu1 }
 0x9ff   : > { %v10839_v28 = vpop.f32.mrb[181].mxu1 }
 0xa00   : > { %v10846_v43 = vcombine.low %v10837_v62, %v10839_v28  ;;  %v10841_v60 = vpop.f32.mrb[182].mxu1 }
 0xa01   : > { %v10842_v17 = vpop.f32.mrb[183].mxu1 }
 0xa02   : > { %v10853_v42 = vrot.slane %v10846_v43, %v21139_v36 }
 0xa04   : > { %v10860_v29 = vrot.slane %v10853_v42, %v21139_v36 }
 0xa06   : > { %v10862_v39 = vadd.f32 %v10860_v29, %v10701_v33 }
 0xa11   : > { %v21130_v20 = vpop.f32.mrb[28].mxu0 }
 0xa12   : > { %v21132_v38 = vpop.f32.mrb[29].mxu0 }
 0xa13   : > { %v11651_v27 = vcombine.low %v21130_v20, %v21132_v38  ;;  %v11646_v53 = vpop.f32.mrb[30].mxu0 }
 0xa14   : > { %v11647_v23 = vpop.f32.mrb[31].mxu0 }
 0xa15   : > { %v11658_v6 = vrot.slane %v11651_v27, %v21139_v36 }
 0xa17   : > { %v11665_v5 = vrot.slane %v11658_v6, %v21139_v36 }
 0xa1e   : > { %v10997_v47 = vpop.f32.mrb[184].mxu1 }
 0xa1f   : > { %v10999_v1 = vpop.f32.mrb[185].mxu1 }
 0xa20   : > { %v11006_v48 = vcombine.low %v10997_v47, %v10999_v1  ;;  %v11001_v46 = vpop.f32.mrb[186].mxu1 }
 0xa21   : > { %v11002_v16 = vpop.f32.mrb[187].mxu1 }
 0xa22   : > { %v11013_v45 = vrot.slane %v11006_v48, %v21139_v36 }
 0xa24   : > { %v11020_v13 = vrot.slane %v11013_v45, %v21139_v36 }
 0xa26   : > { %v11022_v59 = vadd.f32 %v11020_v13, %v10862_v39 }
 0xa31   : > { %v21148_v40 = vpop.f32.mrb[32].mxu0 }
 0xa32   : > { %v21150_v22 = vpop.f32.mrb[33].mxu0 }
 0xa33   : > { %v11976_v26 = vcombine.low %v21148_v40, %v21150_v22  ;;  %v11971_v10 = vpop.f32.mrb[34].mxu0 }
 0xa34   : > { %v11972_v14 = vpop.f32.mrb[35].mxu0 }
 0xa35   : > { %v11983_v33 = vrot.slane %v11976_v26, %v21139_v36 }
 0xa37   : > { %v11990_v27 = vrot.slane %v11983_v33, %v21139_v36 }
 0xa3e   : > { %v11156_v61 = vpop.f32.mrb[188].mxu1 }
 0xa3f   : > { %v11158_v54 = vpop.f32.mrb[189].mxu1 }
 0xa40   : > { %v11165_v30 = vcombine.low %v11156_v61, %v11158_v54  ;;  %v11160_v50 = vpop.f32.mrb[190].mxu1 }
 0xa41   : > { %v11161_v32 = vpop.f32.mrb[191].mxu1 }
 0xa42   : > { %v11172_v7 = vrot.slane %v11165_v30, %v21139_v36 }
 0xa44   : > { %v11179_v15 = vrot.slane %v11172_v7, %v21139_v36 }
 0xa46   : > { %v11181_v18 = vadd.f32 %v11179_v15, %v11022_v59 }
 0xa5e   : > { %v11323_v8 = vpop.f32.mrb[192].mxu1 }
 0xa5f   : > { %v11325_v19 = vpop.f32.mrb[193].mxu1 }
 0xa60   : > { %v11332_v11 = vcombine.low %v11323_v8, %v11325_v19  ;;  %v11327_v12 = vpop.f32.mrb[194].mxu1 }
 0xa61   : > { %v11328_v56 = vpop.f32.mrb[195].mxu1 }
 0xa62   : > { %v11339_v0 = vrot.slane %v11332_v11, %v21139_v36 }
 0xa64   : > { %v11346_v21 = vrot.slane %v11339_v0, %v21139_v36 }
 0xa66   : > { %v11348_v62 = vadd.f32 %v11346_v21, %v11181_v18 }
 0xa7e   : > { %v11484_v28 = vpop.f32.mrb[196].mxu1 }
 0xa7f   : > { %v11486_v43 = vpop.f32.mrb[197].mxu1 }
 0xa80   : > { %v11493_v60 = vcombine.low %v11484_v28, %v11486_v43  ;;  %v11488_v17 = vpop.f32.mrb[198].mxu1 }
 0xa81   : > { %v11489_v24 = vpop.f32.mrb[199].mxu1 }
 0xa82   : > { %v11500_v37 = vrot.slane %v11493_v60, %v21139_v36 }
 0xa84   : > { %v11507_v53 = vrot.slane %v11500_v37, %v21139_v36 }
 0xa86   : > { %v11509_v23 = vadd.f32 %v11507_v53, %v11348_v62 }
 0xa88   : > { %v11667_v42 = vadd.f32 %v11665_v5, %v11509_v23 }
 0xa9e   : > { %v11806_v47 = vpop.f32.mrb[200].mxu1 }
 0xa9f   : > { %v11808_v1 = vpop.f32.mrb[201].mxu1 }
 0xaa0   : > { %v11815_v29 = vcombine.low %v11806_v47, %v11808_v1  ;;  %v11810_v48 = vpop.f32.mrb[202].mxu1 }
 0xaa1   : > { %v11811_v46 = vpop.f32.mrb[203].mxu1 }
 0xaa2   : > { %v11822_v20 = vrot.slane %v11815_v29, %v21139_v36 }
 0xaa4   : > { %v11829_v38 = vrot.slane %v11822_v20, %v21139_v36 }
 0xaa6   : > { %v11831_v16 = vadd.f32 %v11829_v38, %v11667_v42 }
 0xaa8   : > { %v11992_v45 = vadd.f32 %v11990_v27, %v11831_v16 }
 0xabe   : > { %v12125_v39 = vpop.f32.mrb[204].mxu1 }
 0xabf   : > { %v12127_v13 = vpop.f32.mrb[205].mxu1 }
 0xac0   : > { %v12134_v59 = vcombine.low %v12125_v39, %v12127_v13  ;;  %v12129_v10 = vpop.f32.mrb[206].mxu1 }
 0xac1   : > { %v12130_v14 = vpop.f32.mrb[207].mxu1 }
 0xac2   : > { %v12141_v61 = vrot.slane %v12134_v59, %v21139_v36 }
 0xac4   : > { %v12148_v54 = vrot.slane %v12141_v61, %v21139_v36 }
 0xac6   : > { %v12150_v30 = vadd.f32 %v12148_v54, %v11992_v45 }
 0xac8   : > { %v12152_v40 = vmul.f32 0.044715, %v12150_v30  ;;  %v12151_v15 = vmul.f32 0.5, %v12150_v30 }
 0xaca   : > { %v12153_v22 = vmul.f32 %v12152_v40, %v12150_v30 }
 0xacc   : > { %v12154_v26 = vmul.f32 %v12153_v22, %v12150_v30 }
 0xace   : > { %v12155_v50 = vadd.f32 %v12154_v26, %v12150_v30 }
 0xad0   : > { %v12156_v32 = vmul.f32 0.7978846, %v12155_v50 }
 0xad2   : > { %14159 = vtanh.f32 %v12156_v32 }
 0xadc   : > { %v14160_v7 = vpop.eup %14159 }
 0xadd   : > { %v12158_v18 = vadd.f32 1.0, %v14160_v7 }
 0xadf   : > { %v12159_v3 = vmul.f32 %v12158_v18, %v12151_v15 }
 0xae1   : > { %v12168_v25 = vrot.slane %v12159_v3, %v12167_v51  ;;  %v12164_v2 = vrot.slane %v12159_v3, %v12163_v49 }
 0xae3   : > { %v12172_v36 = vpack.c.bf16 %v12168_v25, %v12168_v25  ;;  %v12171_v55 = vpack.c.bf16 %v12164_v2, %v12164_v2 }
 0xae5   : > { %12334 = vmatprep.mubr.bf16.mxu0 %v12172_v36 }
 0xae6   : > { %12335 = vmatmul.mubr.bf16.vlgmr.msra.gmra.mrb[36].mxu0 %v12171_v55 }
 0xbb9   : > { %v13057_v9 = vpop.f32.mrb[36].mxu0 }
 0xbba   : > { %v13058_v57 = vpop.f32.mrb[37].mxu0 }
 0xbbb   : > { %v13059_v58 = vadd.f32 %v13058_v57, %v13057_v9  ;;  %v13060_v4 = vpop.f32.mrb[38].mxu0 }
 0xbbc   : > { %v13061_v63 = vpop.f32.mrb[39].mxu0 }
 0xbbd   : > { %v12337_v31 = vadd.f32 %v13059_v58, %v12205_v41 }
 0xbbf   : > { %12342 = vst [vmem:[%s378_s25] sm:$0x1] %v12337_v31 }
 0xbc0   : > { %14244 = shalt.err (!%p14241_p3)
}
 0xbc1   : > { %s14245_s15 = scalar_lea.hbm %s21232_s14, 16  ;;  %s14249_s30 = scalar_lea.hbm %s21285_s11, 32 }
 0xbc2   : > { %p14246_p4 = scmp.ne.s32.totalorder %s21232_s14, %s14245_s15  ;;  %p14250_p9 = scmp.lt.u32.totalorder %s21232_s14, %s21285_s11 }
 0xbc3   : > { %p14251_p10 = scmp.lt.u32.totalorder %s14249_s30, %s14245_s15  ;;  %p14253_p12 = scmp.lt.u32.totalorder %s14245_s15, %s21232_s14 }
 0xbc4   : > { %p14247_p7 = pnand %p14246_p4, %p14398_p5 }
 0xbc5   : > { %p14252_p11 = por %p14251_p10, %p14250_p9 }
 0xbc6   : > { %p14248_p8 = pneg %p14247_p7 }
 0xbc7   : > { %p14254_p13 = por %p14253_p12, %p14252_p11 }
 0xbc9   : > { %p14255_p0 = pnand %p14254_p13, %p14248_p8 }
 0xbcb   : > { %14258 = shalt.err (!%p14255_p0)
}
 0xbcc   : > { %13828 = dma.vmem_to_hbm [thread:$0]  (%p14398_p5), %s21234_s29, 16, %s21232_s14, %s12344_s13  }
 0xbcd PF: > { %p13834_p1 = scmp.ge.s32.totalorder %s14293_s20, 2  ;;  %s12368_s0 = sand.u32 1, %s14281_s17  }
 0xbce   : > { %s12369_s16 = scalar_lea.sflag [#allocation8], %s12368_s0 }
 0xbcf   : > { %p13831_p2 = pnand %p13834_p1, %p14402_p6 }
 0xbd1   : > { %14276 = dma.done.wait (!%p13831_p2), %s12369_s16, 16  }
 0xbd2   : > { %14278 = vsyncadd (!%p13831_p2), %s12369_s16, 4294967280  ;;  %p21_p3 = scmp.ge.s32.totalorder %s14385_s23, 4   ;;  %s21919_s17 = smov %s14285_s18 }
 0xbd3   : > { %s21920_s18 = smov %s14289_s19  ;;  %s21921_s19 = smov %s14396_s26 }
 0xbd4   : > { %s21922_s20 = smov %s14385_s23  ;;  %23 = sbr.rel (!%p21_p3) target bundleno = 5 (0x5), region = 238 }
 0xbdb   :  { %12373 = vsyncpa [#allocation8], 1 }
 0xbdc   :  { %12375 = vsyncpa [#allocation8 + $0x1], 1 }

</bundles_post_ra>
